<compile_context>
chip_gen: v6e
topology: v6e:2x2x1
jax: 0.10.0
libtpu: 0.0.40
codegen_flags: <defaults>
</compile_context>

<pallas_src>
import functools

import jax
import jax.numpy as jnp
from jax.experimental import pallas as pl
from jax.experimental.pallas import tpu as pltpu

D_IN, D_H1, D_H2, D_OUT = 8292, 512, 128, 1
MAX_BLOCK_B = 256   # safe on v5e/v6e/v7x; v6e callers may pass block_b=512 explicitly


def _round_up(n, m):
    return (n + m - 1) // m * m


def _cdiv(a, b):
    return -(-a // b)


def _choose_block_b(B, max_block_b):
    """Pick a batch tile that (a) yields >=2 grid steps when B allows it (v7x /
    megacore sharding) and (b) divides the padded batch tightly (minimal waste)."""
    B8 = _round_up(max(B, 1), 8)
    num_tiles = _cdiv(B8, max_block_b)
    if B8 >= 16:
        num_tiles = max(num_tiles, 2)
    return _round_up(_cdiv(B8, num_tiles), 8)


def _mlp_kernel(x_ref, w1_ref, b1_ref, w2_ref, b2_ref, w3_ref, b3_ref, o_ref):
    # x arrives as f32 straight from HBM; cast to bf16 in-kernel (no host copy).
    xb = x_ref[...].astype(jnp.bfloat16)
    # fc1: bf16 x bf16 -> f32 accumulation on the MXU, then bias + ReLU.
    h1 = jnp.dot(xb, w1_ref[...], preferred_element_type=jnp.float32)
    h1 = jnp.maximum(h1 + b1_ref[...], 0.0)
    # dropout(p=0.5): identity at inference time.
    # fc2: cast activations back to bf16 so the MXU stays in its native dtype.
    h2 = jnp.dot(h1.astype(jnp.bfloat16), w2_ref[...],
                 preferred_element_type=jnp.float32)
    h2 = jnp.maximum(h2 + b2_ref[...], 0.0)
    # score head (128 -> 1): VPU multiply + XLU lane reduction instead of an
    # N=1 MXU push; w3 is a (1, 128) f32 row in VMEM, b3 is an SMEM scalar.
    out = jnp.sum(h2 * w3_ref[...], axis=-1, keepdims=True) + b3_ref[0]
    o_ref[...] = out.astype(o_ref.dtype)


def _resident_spec(shape):
    """Grid-invariant operand: constant index map, single-buffered if supported."""
    try:
        return pl.BlockSpec(shape, lambda i: (0, 0), pipeline_mode=pl.Buffered(1))
    except (TypeError, AttributeError):  # older JAX without pipeline_mode
        return pl.BlockSpec(shape, lambda i: (0, 0))


@functools.partial(jax.jit, static_argnames=("block_b",))
def net_forward(x, w1, b1, w2, b2, w3, b3, *, block_b=None):
    """x: (B, 8292) float32 -> (B, 1) float32.  Params from prepare_params()."""
    B = x.shape[0]
    if block_b is None:
        block_b = _choose_block_b(B, MAX_BLOCK_B)
    B_pad = _round_up(B, block_b)
    xp = x.astype(jnp.float32)
    if B_pad != B:  # only the remainder rows are padded; no K pad, no dtype churn
        xp = jnp.pad(xp, ((0, B_pad - B), (0, 0)))

    flops = 2 * B_pad * (D_IN * D_H1 + D_H1 * D_H2 + D_H2)
    bytes_accessed = (B_pad * D_IN * 4            # x stream (f32)
                      + D_IN * D_H1 * 2           # w1 (bf16)
                      + D_H1 * D_H2 * 2           # w2 (bf16)
                      + (D_H1 + 2 * D_H2 + 1) * 4 # biases + w3 row
                      + B_pad * D_OUT * 4)        # output

    out = pl.pallas_call(
        _mlp_kernel,
        out_shape=jax.ShapeDtypeStruct((B_pad, D_OUT), jnp.float32),
        grid_spec=pltpu.PrefetchScalarGridSpec(
            num_scalar_prefetch=0,
            grid=(B_pad // block_b,),
            in_specs=[
                # x tile: f32, full (unpadded) K — cast to bf16 inside the kernel.
                pl.BlockSpec((block_b, D_IN), lambda i: (i, 0)),
                _resident_spec((D_IN, D_H1)),   # w1 (bf16, ~8.1 MiB, resident)
                _resident_spec((1, D_H1)),      # b1 (f32)
                _resident_spec((D_H1, D_H2)),   # w2 (bf16)
                _resident_spec((1, D_H2)),      # b2 (f32)
                _resident_spec((1, D_H2)),      # w3 row (f32)
                pl.BlockSpec(memory_space=pltpu.MemorySpace.SMEM),  # b3 scalar
            ],
            out_specs=pl.BlockSpec((block_b, D_OUT), lambda i: (i, 0)),
        ),
        compiler_params=pltpu.CompilerParams(
            dimension_semantics=("parallel",),
            # Budget at block_b=256: x f32 double-buffer 2 x 8.1 MiB + resident
            # w1 8.1 MiB + in-kernel bf16 x copy ~4 MiB + small intermediates
            # ~= 30 MiB << 48 MiB, which also fits v7x's 64 MiB-per-TC VMEM.
            vmem_limit_bytes=48 << 20,
        ),
        cost_estimate=pl.CostEstimate(flops=flops, transcendentals=0,
                                      bytes_accessed=bytes_accessed),
    )(xp, w1, b1, w2, b2, w3, b3)
    return out[:B]


def prepare_params(fc1_w, fc1_b, fc2_w, fc2_b, score_w, score_b):
    """PyTorch-layout (out, in) f32 params -> kernel layout:
    (in, out) weights, matmul weights cast to bf16 (one-time host prep)."""
    w1 = jnp.asarray(fc1_w, jnp.float32).T.astype(jnp.bfloat16)    # (8292, 512)
    b1 = jnp.asarray(fc1_b, jnp.float32).reshape(1, D_H1)
    w2 = jnp.asarray(fc2_w, jnp.float32).T.astype(jnp.bfloat16)    # (512, 128)
    b2 = jnp.asarray(fc2_b, jnp.float32).reshape(1, D_H2)
    w3 = jnp.asarray(score_w, jnp.float32).reshape(1, D_H2)        # (1, 128) row
    b3 = jnp.asarray(score_b, jnp.float32).reshape(1)              # SMEM scalar
    return w1, b1, w2, b2, w3, b3


def _init_torch_like_params(key):
    """Deterministic init mirroring nn.Linear: (out, in) weights, U(-1/sqrt(fan_in))."""
    def lin(k, fan_in, fan_out):
        kw, kb = jax.random.split(k)
        bound = 1.0 / float(fan_in) ** 0.5
        w = jax.random.uniform(kw, (fan_out, fan_in), jnp.float32, -bound, bound)
        b = jax.random.uniform(kb, (fan_out,), jnp.float32, -bound, bound)
        return w, b
    k1, k2, k3 = jax.random.split(key, 3)
    w1, b1 = lin(k1, D_IN, D_H1)
    w2, b2 = lin(k2, D_H1, D_H2)
    w3, b3 = lin(k3, D_H2, D_OUT)
    return w1, b1, w2, b2, w3, b3


def _reference_f32(x, fc1_w, fc1_b, fc2_w, fc2_b, score_w, score_b):
    """Full-f32 reference with the original PyTorch semantics (eval mode)."""
    h1 = jnp.maximum(x @ fc1_w.T + fc1_b, 0.0)
    h2 = jnp.maximum(h1 @ fc2_w.T + fc2_b, 0.0)
    return h2 @ score_w.T + score_b


if __name__ == "__main__":
    key = jax.random.PRNGKey(0)
    kx, kp = jax.random.split(key)

    # B=20 exercises both the multi-tile (grid=2, megacore-shardable) path and
    # the batch-padding path (20 -> 2 tiles of 16 rows).
    B = 20
    x = jax.random.normal(kx, (B, D_IN), dtype=jnp.float32)

    torch_like = _init_torch_like_params(kp)
    params = prepare_params(*torch_like)

    out = net_forward(x, *params)
    out = jax.block_until_ready(out)
    assert out.shape == (B, D_OUT)

    # Validate against the f32 PyTorch-semantics reference (bf16 weight/activation
    # drift on K~8300 is ~1e-2 relative; tolerance has ~10x margin).
    ref = _reference_f32(x, *torch_like)
    assert jnp.allclose(out, ref, atol=2e-2, rtol=2e-2), (
        "mismatch vs f32 reference: max abs err = "
        f"{float(jnp.max(jnp.abs(out - ref)))}")

    print("KERNEL_OK")
</pallas_src>

<mosaic_0001>
module attributes {stable_mosaic.version = 11 : i64} {
  func.func @_mlp_kernel(%arg0: i32, %arg1: memref<16x8292xf32, #tpu.memory_space<vmem>>, %arg2: memref<8292x512xbf16, #tpu.memory_space<vmem>>, %arg3: memref<1x512xf32, #tpu.memory_space<vmem>>, %arg4: memref<512x128xbf16, #tpu.memory_space<vmem>>, %arg5: memref<1x128xf32, #tpu.memory_space<vmem>>, %arg6: memref<1x128xf32, #tpu.memory_space<vmem>>, %arg7: memref<1xf32, #tpu.memory_space<smem>>, %arg8: memref<16x1xf32, #tpu.memory_space<vmem>>) attributes {dimension_semantics = [#tpu.dimension_semantics<parallel>], iteration_bounds = array<i64: 2>, scalar_prefetch = 0 : i64, scratch_operands = 0 : i64, tpu.core_type = #tpu.core_type<tc>, window_params = [{transform_indices = @transform_0, window_bounds = array<i64: 16, 8292>}, {pipeline_mode = #tpu.pipeline_mode<synchronous>, transform_indices = @transform_1, window_bounds = array<i64: 8292, 512>}, {pipeline_mode = #tpu.pipeline_mode<synchronous>, transform_indices = @transform_2, window_bounds = array<i64: 1, 512>}, {pipeline_mode = #tpu.pipeline_mode<synchronous>, transform_indices = @transform_3, window_bounds = array<i64: 512, 128>}, {pipeline_mode = #tpu.pipeline_mode<synchronous>, transform_indices = @transform_4, window_bounds = array<i64: 1, 128>}, {pipeline_mode = #tpu.pipeline_mode<synchronous>, transform_indices = @transform_5, window_bounds = array<i64: 1, 128>}, {transform_indices = @transform_6, window_bounds = array<i64: 1>}, {transform_indices = @transform_7, window_bounds = array<i64: 16, 1>}]} {
    %c0 = arith.constant 0 : index
    %c0_0 = arith.constant 0 : index
    %0 = vector.load %arg1[%c0, %c0_0] : memref<16x8292xf32, #tpu.memory_space<vmem>>, vector<16x8292xf32>
    %1 = arith.truncf %0 : vector<16x8292xf32> to vector<16x8292xbf16>
    %c0_1 = arith.constant 0 : index
    %c0_2 = arith.constant 0 : index
    %2 = vector.load %arg2[%c0_1, %c0_2] : memref<8292x512xbf16, #tpu.memory_space<vmem>>, vector<8292x512xbf16>
    %cst = arith.constant dense<0.000000e+00> : vector<16x512xf32>
    %3 = tpu.matmul %1, %2, %cst {dimension_numbers = #tpu.dot_dimension_numbers<[1], [0], [0], [1], [0, 0, 1, 1], [], []>} : vector<16x8292xbf16>, vector<8292x512xbf16>, vector<16x512xf32> -> vector<16x512xf32>
    %c0_3 = arith.constant 0 : index
    %c0_4 = arith.constant 0 : index
    %4 = vector.load %arg3[%c0_3, %c0_4] : memref<1x512xf32, #tpu.memory_space<vmem>>, vector<1x512xf32>
    %5 = vector.broadcast %4 : vector<1x512xf32> to vector<16x512xf32>
    %6 = arith.addf %3, %5 : vector<16x512xf32>
    %cst_5 = arith.constant 0.000000e+00 : f32
    %7 = vector.broadcast %cst_5 : f32 to vector<16x512xf32>
    %8 = arith.maximumf %6, %7 : vector<16x512xf32>
    %9 = arith.truncf %8 : vector<16x512xf32> to vector<16x512xbf16>
    %c0_6 = arith.constant 0 : index
    %c0_7 = arith.constant 0 : index
    %10 = vector.load %arg4[%c0_6, %c0_7] : memref<512x128xbf16, #tpu.memory_space<vmem>>, vector<512x128xbf16>
    %cst_8 = arith.constant dense<0.000000e+00> : vector<16x128xf32>
    %11 = tpu.matmul %9, %10, %cst_8 {dimension_numbers = #tpu.dot_dimension_numbers<[1], [0], [0], [1], [0, 0, 1, 1], [], []>} : vector<16x512xbf16>, vector<512x128xbf16>, vector<16x128xf32> -> vector<16x128xf32>
    %c0_9 = arith.constant 0 : index
    %c0_10 = arith.constant 0 : index
    %12 = vector.load %arg5[%c0_9, %c0_10] : memref<1x128xf32, #tpu.memory_space<vmem>>, vector<1x128xf32>
    %13 = vector.broadcast %12 : vector<1x128xf32> to vector<16x128xf32>
    %14 = arith.addf %11, %13 : vector<16x128xf32>
    %cst_11 = arith.constant 0.000000e+00 : f32
    %15 = vector.broadcast %cst_11 : f32 to vector<16x128xf32>
    %16 = arith.maximumf %14, %15 : vector<16x128xf32>
    %c0_12 = arith.constant 0 : index
    %c0_13 = arith.constant 0 : index
    %17 = vector.load %arg6[%c0_12, %c0_13] : memref<1x128xf32, #tpu.memory_space<vmem>>, vector<1x128xf32>
    %18 = vector.broadcast %17 : vector<1x128xf32> to vector<16x128xf32>
    %19 = arith.mulf %16, %18 : vector<16x128xf32>
    %cst_14 = arith.constant dense<0.000000e+00> : vector<16xf32>
    %20 = vector.multi_reduction <add>, %19, %cst_14 [1] : vector<16x128xf32> to vector<16xf32>
    %21 = vector.shape_cast %20 : vector<16xf32> to vector<16x1xf32>
    %c0_15 = arith.constant 0 : index
    %22 = memref.load %arg7[%c0_15] : memref<1xf32, #tpu.memory_space<smem>>
    %23 = vector.broadcast %22 : f32 to vector<16x1xf32>
    %24 = arith.addf %21, %23 : vector<16x1xf32>
    %c0_16 = arith.constant 0 : index
    %c0_17 = arith.constant 0 : index
    %25 = vector.load %arg8[%c0_16, %c0_17] : memref<16x1xf32, #tpu.memory_space<vmem>>, vector<16x1xf32>
    tpu.vector_store %arg8[%c0_16, %c0_17], %24 {strides = array<i32>} : memref<16x1xf32, #tpu.memory_space<vmem>>, vector<16x1xf32>,
    return
  }
  func.func @transform_0(%arg0: i32) -> (i32, i32) {
    %c0_i32 = arith.constant 0 : i32
    %c0_i32_0 = arith.constant 0 : i32
    return %arg0, %c0_i32 : i32, i32
  }
  func.func @transform_1(%arg0: i32) -> (i32, i32) {
    %c0_i32 = arith.constant 0 : i32
    %c0_i32_0 = arith.constant 0 : i32
    %c0_i32_1 = arith.constant 0 : i32
    return %c0_i32, %c0_i32_0 : i32, i32
  }
  func.func @transform_2(%arg0: i32) -> (i32, i32) {
    %c0_i32 = arith.constant 0 : i32
    %c0_i32_0 = arith.constant 0 : i32
    %c0_i32_1 = arith.constant 0 : i32
    return %c0_i32, %c0_i32_0 : i32, i32
  }
  func.func @transform_3(%arg0: i32) -> (i32, i32) {
    %c0_i32 = arith.constant 0 : i32
    %c0_i32_0 = arith.constant 0 : i32
    %c0_i32_1 = arith.constant 0 : i32
    return %c0_i32, %c0_i32_0 : i32, i32
  }
  func.func @transform_4(%arg0: i32) -> (i32, i32) {
    %c0_i32 = arith.constant 0 : i32
    %c0_i32_0 = arith.constant 0 : i32
    %c0_i32_1 = arith.constant 0 : i32
    return %c0_i32, %c0_i32_0 : i32, i32
  }
  func.func @transform_5(%arg0: i32) -> (i32, i32) {
    %c0_i32 = arith.constant 0 : i32
    %c0_i32_0 = arith.constant 0 : i32
    %c0_i32_1 = arith.constant 0 : i32
    return %c0_i32, %c0_i32_0 : i32, i32
  }
  func.func @transform_6(%arg0: i32) -> i32 {
    %c0_i32 = arith.constant 0 : i32
    %c0_i32_0 = arith.constant 0 : i32
    return %c0_i32 : i32
  }
  func.func @transform_7(%arg0: i32) -> (i32, i32) {
    %c0_i32 = arith.constant 0 : i32
    %c0_i32_0 = arith.constant 0 : i32
    return %arg0, %c0_i32 : i32, i32
  }
}

</mosaic_0001>

<bundles_post_ra>
// kernel: net_forward.1
= control target key start
LH: loop header
LB: loop body
LE: loop exit
PB: predicated region body
PF: predicated region fallthrough
CT: control target
= control target key end

     0   :  { %s23101_s0 = inlined_call_operand.vmem [shape: f32[32,8292], index: 0, kind: input, shape index: {}]   ;;  %s23102_s1 = inlined_call_operand.hbm [shape: bf16[8292,512], index: 1, kind: input, shape index: {}]   ;;  %s23103_s2 = inlined_call_operand.hbm [shape: f32[1,512], index: 2, kind: input, shape index: {}]   ;;  %s23104_s3 = inlined_call_operand.hbm [shape: bf16[512,128], index: 3, kind: input, shape index: {}]   ;;  %s23105_s4 = inlined_call_operand.hbm [shape: f32[1,128], index: 4, kind: input, shape index: {}]   ;;  %s23106_s5 = inlined_call_operand.hbm [shape: f32[1,128], index: 5, kind: input, shape index: {}]   ;;  %s23107_s6 = inlined_call_operand.<no memory space> [shape: f32[1], index: 6, kind: input, shape index: {}]   ;;  %s23108_s7 = inlined_call_operand.vmem [shape: f32[32,1], index: 7, kind: output, shape index: {}]  }
   0x1   :  { %12 = sst [smem:[#allocation2]] %s23107_s6 }
   0x2   :  { %13 = vsyncpa [#allocation4], 0 }
   0x3   :  { %14 = vsyncpa [#allocation6], 0 }
   0x4   :  { %15 = vsyncpa [#allocation9], 0  ;;  %s21947_s26 = smov 0  }
   0x5 LB: > { %s21894_s27 = smov [#allocation5]   ;;  %s16355_s29 = sadd.s32 4294967295, %s21892_s26   ;;  %s21892_s26 = sphi %s21947_s26, %s21_s26  }
   0x6   : > { %s230_s28 = sshll.u32 %s21894_s27, 4  ;;  %p16357_p0 = scmp.ge.s32.totalorder %s21892_s26, 1  ;;  %s231_s28 = int_to_ptr.vmem [resolvable:$true] %s230_s28 }
   0x7   : > { %p204_p1 = scmp.lt.s32.totalorder %s21892_s26, 3  ;;  %p21957_p2 = scmp.eq.s32.totalorder %s16355_s29, 0 }
   0x8   : > { %s21895_s8 = smov [#allocation8]   ;;  %s21896_s10 = smov [#allocation3]  }
   0x9   : > { %s23139_s6 = scalar_select %p21957_p2, 1, 0 }
   0xa   : > { %p21961_p3 = pnand %p16357_p0, %p204_p1  ;;  %s254_s9 = sshll.u32 %s21895_s8, 4  ;;  %s255_s9 = int_to_ptr.vmem [resolvable:$true] %s254_s9 }
   0xb   : > { %s216_s11 = sshll.u32 %s21896_s10, 4  ;;  %s21897_s13 = smov [#allocation7]   ;;  %s21973_s11 = int_to_ptr.vmem [resolvable:$true] %s216_s11 }
   0xc   : > { %s23140_s30 = scalar_select %p21961_p3, 1, 0 }
   0xd   : > { %p18555_p4 = pneg %p21961_p3  ;;  %s21975_s14 = sshll.u32 %s21897_s13, 4  ;;  %s241_s14 = int_to_ptr.vmem [resolvable:$true] %s21975_s14 }
   0xe   : > { %s21755_s16 = scalar_lea.vmem %s231_s28, 64  ;;  %p21763_p10 = scmp.lt.s32.totalorder %s231_s28, %s231_s28 }
   0xf   : > { %p21969_p5 = pnand %p21957_p2, %p18555_p4  ;;  %p21756_p7 = scmp.ne.s32.totalorder %s231_s28, %s21755_s16 }
  0x10   : > { %p21764_p11 = scmp.lt.s32.totalorder %s21755_s16, %s21755_s16 }
  0x11   : > { %p21979_p6 = pneg %p21969_p5 }
  0x12   : > { %p21765_p12 = por %p21764_p11, %p21763_p10 }
  0x13   : > { %p21758_p8 = pnand %p21756_p7, %p21979_p6 }
  0x15   : > { %p21759_p9 = pneg %p21758_p8 }
  0x17   : > { %p21766_p13 = pnand %p21765_p12, %p21759_p9 }
  0x19   : > { %21769 = shalt.err (!%p21766_p13)
}
  0x1a   : > { %18561 = dma.hbm_to_vmem [thread:$0]  (!%p21969_p5), %s23103_s2, 64, %s231_s28, [#allocation6]  }
  0x1b   : > { %s21781_s19 = scalar_lea.vmem %s255_s9, 16  ;;  %s21788_s20 = scalar_lea.vmem %s255_s9, 32 }
  0x1c   : > { %p21782_p0 = scmp.ne.s32.totalorder %s255_s9, %s21781_s19  ;;  %p21789_p7 = scmp.lt.s32.totalorder %s255_s9, %s255_s9 }
  0x1d   : > { %p21790_p8 = scmp.lt.s32.totalorder %s21788_s20, %s21781_s19 }
  0x1e   : > { %p21784_p1 = pnand %p21782_p0, %p21979_p6 }
  0x1f   : > { %p21791_p2 = por %p21790_p8, %p21789_p7 }
  0x20   : > { %p21785_p4 = pneg %p21784_p1 }
  0x22   : > { %p21792_p3 = pnand %p21791_p2, %p21785_p4 }
  0x24   : > { %21795 = shalt.err (!%p21792_p3)
}
  0x25   : > { %18567 = dma.hbm_to_vmem [thread:$0]  (!%p21969_p5), %s23105_s4, 16, %s255_s9, [#allocation9]  }
  0x26   : > { %s21807_s23 = scalar_lea.vmem %s21973_s11, 265472  ;;  %p21815_p12 = scmp.lt.s32.totalorder %s21973_s11, %s21973_s11 }
  0x27   : > { %p21808_p9 = scmp.ne.s32.totalorder %s21973_s11, %s21807_s23  ;;  %p21816_p13 = scmp.lt.s32.totalorder %s21807_s23, %s21807_s23 }
  0x29   : > { %p21810_p10 = pnand %p21808_p9, %p21979_p6  ;;  %p21817_p2 = por %p21816_p13, %p21815_p12 }
  0x2b   : > { %p21811_p11 = pneg %p21810_p10 }
  0x2d   : > { %p21818_p3 = pnand %p21817_p2, %p21811_p11 }
  0x2f   : > { %21821 = shalt.err (!%p21818_p3)
}
  0x30   : > { %s21898_s24 = smov 256   ;;  %s21899_s25 = smov 16  }
  0x31   : > { %18558 = dma.hbm_to_vmem [thread:$0]  (!%p21969_p5), %s23102_s1, 265472, %s21973_s11, [#allocation4], %s21898_s24, %s21898_s24, %s21899_s25  }
  0x32   : > { %s21833_s8 = scalar_lea.vmem %s241_s14, 4096  ;;  %p21841_p7 = scmp.lt.s32.totalorder %s241_s14, %s241_s14 }
  0x33   : > { %p21834_p0 = scmp.ne.s32.totalorder %s241_s14, %s21833_s8  ;;  %p21842_p8 = scmp.lt.s32.totalorder %s21833_s8, %s21833_s8 }
  0x35   : > { %p21836_p1 = pnand %p21834_p0, %p21979_p6  ;;  %p21843_p9 = por %p21842_p8, %p21841_p7 }
  0x37   : > { %p21837_p4 = pneg %p21836_p1 }
  0x39   : > { %p21844_p10 = pnand %p21843_p9, %p21837_p4 }
  0x3b   : > { %21847 = shalt.err (!%p21844_p10)
}
  0x3c   : > { %s21900_s9 = smov 64   ;;  %s21901_s10 = smov 4  }
  0x3d   : > { %18564 = dma.hbm_to_vmem [thread:$0]  (!%p21969_p5), %s23104_s3, 4096, %s241_s14, [#allocation6], %s21900_s9, %s21900_s9, %s21901_s10  }
  0x3e   : > { %s21902_s11 = smov [#allocation10]  }
  0x3f   : > { %s265_s17 = sshll.u32 %s21902_s11, 4  ;;  %s266_s17 = int_to_ptr.vmem [resolvable:$true] %s265_s17 }
  0x40   : > { %s21859_s18 = scalar_lea.vmem %s266_s17, 16  ;;  %s21866_s19 = scalar_lea.vmem %s266_s17, 32 }
  0x41   : > { %p21860_p11 = scmp.ne.s32.totalorder %s266_s17, %s21859_s18  ;;  %p21867_p2 = scmp.lt.s32.totalorder %s266_s17, %s266_s17 }
  0x42   : > { %p21868_p3 = scmp.lt.s32.totalorder %s21866_s19, %s21859_s18 }
  0x43   : > { %p21862_p12 = pnand %p21860_p11, %p21979_p6 }
  0x44   : > { %p21869_p0 = por %p21868_p3, %p21867_p2 }
  0x45   : > { %p21863_p13 = pneg %p21862_p12 }
  0x47   : > { %p21870_p1 = pnand %p21869_p0, %p21863_p13 }
  0x49   : > { %21873 = shalt.err (!%p21870_p1)
}
  0x4a   : > { %18570 = dma.hbm_to_vmem [thread:$0]  (!%p21969_p5), %s23106_s5, 16, %s266_s17, [#allocation9]  }
  0x4b   : > { %p23143_p4 = scmp.ne.s32.totalorder %s23140_s30, 0 }
  0x4d   : > { %291 = sbr.rel (%p23143_p4) target bundleno = 2722 (0xaa2), region = 48 }
  0x52   : > { %p23144_p7 = scmp.ne.s32.totalorder %s23139_s6, 0 }
  0x54   : > { %21879 = dma.done.wait (%p23144_p7), [#allocation4], 265472  }
  0x55   : > { %21881 = vsyncadd (%p23144_p7), [#allocation4], 4294701824 }
  0x56   : > { %21883 = dma.done.wait (%p23144_p7), [#allocation6], 4160  }
  0x57   : > { %21885 = vsyncadd (%p23144_p7), [#allocation6], 4294963136 }
  0x58   : > { %21887 = dma.done.wait (%p23144_p7), [#allocation9], 32  }
  0x59   : > { %21889 = vsyncadd (%p23144_p7), [#allocation9], 4294967264  ;;  %v18599_v0 = vld [vmem:[#allocation3 + $0xe4] ss:$16 sps:$4 sm:$0xff]   ;;  %v18603_v2 = vld [vmem:[#allocation3 + $0xe0] ss:$16 sps:$4 sm:$0xff]  }
  0x5a   : > { %v18601_v1 = vld [vmem:[#allocation3 + $0x2e4] ss:$16 sps:$4 sm:$0xff]   ;;  %13032 = vmatprep.subr.bf16.mxu0 %v18599_v0  ;;  %v18604_v3 = vld [vmem:[#allocation3 + $0x2e0] ss:$16 sps:$4 sm:$0xff]   ;;  %s16370_s6 = sshll.u32 %s16355_s29, 1  ;;  %vm13019_vm0 = vcmask 1041408  }
  0x5b   : > { %13075 = vmatprep.subr.bf16.mxu1 %v18601_v1  ;;  %v18605_v4 = vld [vmem:[#allocation3 + $0xc4] ss:$16 sps:$4 sm:$0xff]   ;;  %13033 = vmatpush1.bf16.msra.mxu0 %v18603_v2  ;;  %v18609_v6 = vld [vmem:[#allocation3 + $0xc0] ss:$16 sps:$4 sm:$0xff]   ;;  %p341_p5 = scmp.lt.s32.totalorder %s16370_s6, 3  ;;  %vm13015_vm1 = vcmask 818176  }
  0x5c   : > { %13076 = vmatpush1.bf16.msra.mxu1 %v18604_v3  ;;  %v18607_v5 = vld [vmem:[#allocation3 + $0x2c4] ss:$16 sps:$4 sm:$0xff]   ;;  %13034 = vmatprep.subr.bf16.mxu0 %v18605_v4  ;;  %v18610_v7 = vld [vmem:[#allocation3 + $0x2c0] ss:$16 sps:$4 sm:$0xff]   ;;  %s16242_s15 = sld [smem:[#allocation2]]  ;;  %vm16246_vm2 = vcmask 7168  }
  0x5d   : > { %13077 = vmatprep.subr.bf16.mxu1 %v18607_v5  ;;  %v18611_v8 = vld [vmem:[#allocation3 + $0xa4] ss:$16 sps:$4 sm:$0xff]   ;;  %v18615_v10 = vld [vmem:[#allocation3 + $0xa0] ss:$16 sps:$4 sm:$0xff]   ;;  %s23369_s6 = smov (!%p341_p5, %s16370_s6), 3 }
  0x5e   : > { %v18613_v9 = vld [vmem:[#allocation3 + $0x2a4] ss:$16 sps:$4 sm:$0xff]   ;;  %v18616_v11 = vld [vmem:[#allocation3 + $0x2a0] ss:$16 sps:$4 sm:$0xff]   ;;  %s18534_s29 = smul.u32 520, %s23369_s6  ;;  %s16373_s22 = sshll.u32 %s23369_s6, 3 }
  0x5f   : > { %13035 = vmatpush1.bf16.msra.mxu0 %v18609_v6  ;;  %v18617_v12 = vld [vmem:[#allocation3 + $0x84] ss:$16 sps:$4 sm:$0xff]   ;;  %v18621_v14 = vld [vmem:[#allocation3 + $0x80] ss:$16 sps:$4 sm:$0xff]   ;;  %s351_s25 = scalar_lea.vmem %s23108_s7, %s16373_s22 }
  0x60   : > { %13078 = vmatpush1.bf16.msra.mxu1 %v18610_v7  ;;  %13036 = vmatprep.subr.bf16.mxu0 %v18611_v8  ;;  %v18619_v13 = vld [vmem:[#allocation3 + $0x284] ss:$16 sps:$4 sm:$0xff]   ;;  %v18622_v15 = vld [vmem:[#allocation3 + $0x280] ss:$16 sps:$4 sm:$0xff]   ;;  %s22046_s14 = scalar_lea.vmem %s23101_s0, %s18534_s29 }
  0x61   : > { %13079 = vmatprep.subr.bf16.mxu1 %v18613_v9  ;;  %v18623_v16 = vld [vmem:[#allocation3 + $0x64] ss:$16 sps:$4 sm:$0xff]   ;;  %v18627_v18 = vld [vmem:[#allocation3 + $0x60] ss:$16 sps:$4 sm:$0xff]   ;;  %v355_v46 = vld [vmem:[%s22046_s14 + $0x8] sm:$0xff] }
  0x62   : > { %v18625_v17 = vld [vmem:[#allocation3 + $0x264] ss:$16 sps:$4 sm:$0xff]   ;;  %v18628_v19 = vld [vmem:[#allocation3 + $0x260] ss:$16 sps:$4 sm:$0xff]   ;;  %v357_v48 = vld [vmem:[%s22046_s14 + $0x18] sm:$0xff] }
  0x63   : > { %13037 = vmatpush1.bf16.msra.mxu0 %v18615_v10  ;;  %v18629_v20 = vld [vmem:[#allocation3 + $0x44] ss:$16 sps:$4 sm:$0xff]   ;;  %v18633_v22 = vld [vmem:[#allocation3 + $0x40] ss:$16 sps:$4 sm:$0xff]   ;;  %v419_v7 = vld [vmem:[%s22046_s14 + $0x208] sm:$0xff] }
  0x64   : > { %13080 = vmatpush1.bf16.msra.mxu1 %v18616_v11  ;;  %13038 = vmatprep.subr.bf16.mxu0 %v18617_v12  ;;  %v18631_v21 = vld [vmem:[#allocation3 + $0x244] ss:$16 sps:$4 sm:$0xff]   ;;  %v18634_v23 = vld [vmem:[#allocation3 + $0x240] ss:$16 sps:$4 sm:$0xff]   ;;  %v421_v9 = vld [vmem:[%s22046_s14 + $0x218] sm:$0xff] }
  0x65   : > { %13081 = vmatprep.subr.bf16.mxu1 %v18619_v13  ;;  %v18635_v24 = vld [vmem:[#allocation3 + $0x24] ss:$16 sps:$4 sm:$0xff]   ;;  %v18639_v26 = vld [vmem:[#allocation3 + $0x20] ss:$16 sps:$4 sm:$0xff]  }
  0x66   : > { %v18637_v25 = vld [vmem:[#allocation3 + $0x224] ss:$16 sps:$4 sm:$0xff]   ;;  %v18640_v27 = vld [vmem:[#allocation3 + $0x220] ss:$16 sps:$4 sm:$0xff]  }
  0x67   : > { %13039 = vmatpush1.bf16.msra.mxu0 %v18621_v14  ;;  %v18641_v28 = vld [vmem:[#allocation3 + $0x4] ss:$16 sps:$4 sm:$0xff]   ;;  %v18645_v30 = vld [vmem:[#allocation3] ss:$16 sps:$4 sm:$0xff]  }
  0x68   : > { %13082 = vmatpush1.bf16.msra.mxu1 %v18622_v15  ;;  %13040 = vmatprep.subr.bf16.mxu0 %v18623_v16  ;;  %v18643_v29 = vld [vmem:[#allocation3 + $0x204] ss:$16 sps:$4 sm:$0xff]   ;;  %v18646_v31 = vld [vmem:[#allocation3 + $0x200] ss:$16 sps:$4 sm:$0xff]  }
  0x69   : > { %13083 = vmatprep.subr.bf16.mxu1 %v18625_v17  ;;  %v18647_v32 = vld [vmem:[#allocation3 + $0x1e4] ss:$16 sps:$4 sm:$0xff]   ;;  %v18651_v34 = vld [vmem:[#allocation3 + $0x1e0] ss:$16 sps:$4 sm:$0xff]  }
  0x6a   : > { %v18649_v33 = vld [vmem:[#allocation3 + $0x3e4] ss:$16 sps:$4 sm:$0xff]   ;;  %v18652_v35 = vld [vmem:[#allocation3 + $0x3e0] ss:$16 sps:$4 sm:$0xff]  }
  0x6b   : > { %13041 = vmatpush1.bf16.msra.mxu0 %v18627_v18  ;;  %v18653_v36 = vld [vmem:[#allocation3 + $0x1c4] ss:$16 sps:$4 sm:$0xff]   ;;  %v18657_v38 = vld [vmem:[#allocation3 + $0x1c0] ss:$16 sps:$4 sm:$0xff]  }
  0x6c   : > { %13084 = vmatpush1.bf16.msra.mxu1 %v18628_v19  ;;  %13042 = vmatprep.subr.bf16.mxu0 %v18629_v20  ;;  %v18655_v37 = vld [vmem:[#allocation3 + $0x3c4] ss:$16 sps:$4 sm:$0xff]   ;;  %v18658_v39 = vld [vmem:[#allocation3 + $0x3c0] ss:$16 sps:$4 sm:$0xff]  }
  0x6d   : > { %13085 = vmatprep.subr.bf16.mxu1 %v18631_v21  ;;  %v18659_v40 = vld [vmem:[#allocation3 + $0x1a4] ss:$16 sps:$4 sm:$0xff]   ;;  %v18663_v42 = vld [vmem:[#allocation3 + $0x1a0] ss:$16 sps:$4 sm:$0xff]  }
  0x6e   : > { %v18661_v41 = vld [vmem:[#allocation3 + $0x3a4] ss:$16 sps:$4 sm:$0xff]   ;;  %v18664_v43 = vld [vmem:[#allocation3 + $0x3a0] ss:$16 sps:$4 sm:$0xff]  }
  0x6f   : > { %13043 = vmatpush1.bf16.msra.mxu0 %v18633_v22  ;;  %v18665_v44 = vld [vmem:[#allocation3 + $0x184] ss:$16 sps:$4 sm:$0xff]   ;;  %v18669_v50 = vld [vmem:[#allocation3 + $0x180] ss:$16 sps:$4 sm:$0xff]  }
  0x70   : > { %13086 = vmatpush1.bf16.msra.mxu1 %v18634_v23  ;;  %13044 = vmatprep.subr.bf16.mxu0 %v18635_v24  ;;  %v18667_v45 = vld [vmem:[#allocation3 + $0x384] ss:$16 sps:$4 sm:$0xff]   ;;  %v18670_v51 = vld [vmem:[#allocation3 + $0x380] ss:$16 sps:$4 sm:$0xff]  }
  0x71   : > { %13087 = vmatprep.subr.bf16.mxu1 %v18637_v25  ;;  %v420_v47 = vld [vmem:[%s22046_s14 + $0x210] sm:$0xff]  ;;  %v422_v49 = vld [vmem:[%s22046_s14 + $0x220] sm:$0xff] }
  0x72   : > { %v18671_v52 = vld [vmem:[#allocation3 + $0x164] ss:$16 sps:$4 sm:$0xff]   ;;  %v22052_v53 = vpack.c.bf16 %v420_v47, %v355_v46  ;;  %v22054_v54 = vpack.c.bf16 %v422_v49, %v357_v48  ;;  %v18675_v56 = vld [vmem:[#allocation3 + $0x160] ss:$16 sps:$4 sm:$0xff]  }
  0x73   : > { %13045 = vmatpush1.bf16.msra.mxu0 %v18639_v26  ;;  %v18673_v55 = vld [vmem:[#allocation3 + $0x364] ss:$16 sps:$4 sm:$0xff]   ;;  %v18676_v57 = vld [vmem:[#allocation3 + $0x360] ss:$16 sps:$4 sm:$0xff]  }
  0x74   : > { %13088 = vmatpush1.bf16.msra.mxu1 %v18640_v27  ;;  %13046 = vmatprep.subr.bf16.mxu0 %v18641_v28  ;;  %v18677_v58 = vld [vmem:[#allocation3 + $0x144] ss:$16 sps:$4 sm:$0xff]   ;;  %v18681_v60 = vld [vmem:[#allocation3 + $0x140] ss:$16 sps:$4 sm:$0xff]  }
  0x75   : > { %13089 = vmatprep.subr.bf16.mxu1 %v18643_v29  ;;  %13064 = vmatprep.mubr.bf16.mxu0 %v22052_v53  ;;  %v18679_v59 = vld [vmem:[#allocation3 + $0x344] ss:$16 sps:$4 sm:$0xff]   ;;  %v18682_v61 = vld [vmem:[#allocation3 + $0x340] ss:$16 sps:$4 sm:$0xff]  }
  0x76   : > { %13107 = vmatprep.mubr.bf16.mxu1 %v22054_v54  ;;  %v18683_v62 = vld [vmem:[#allocation3 + $0x124] ss:$16 sps:$4 sm:$0xff]   ;;  %v18687_v0 = vld [vmem:[#allocation3 + $0x120] ss:$16 sps:$4 sm:$0xff]  }
  0x77   : > { %13047 = vmatpush1.bf16.msra.mxu0 %v18645_v30  ;;  %v18685_v63 = vld [vmem:[#allocation3 + $0x324] ss:$16 sps:$4 sm:$0xff]   ;;  %v18688_v1 = vld [vmem:[#allocation3 + $0x320] ss:$16 sps:$4 sm:$0xff]  }
  0x78   : > { %13090 = vmatpush1.bf16.msra.mxu1 %v18646_v31  ;;  %13048 = vmatprep.subr.bf16.mxu0 %v18647_v32  ;;  %v18689_v2 = vld [vmem:[#allocation3 + $0x104] ss:$16 sps:$4 sm:$0xff]   ;;  %v18693_v4 = vld [vmem:[#allocation3 + $0x100] ss:$16 sps:$4 sm:$0xff]  }
  0x79   : > { %13091 = vmatprep.subr.bf16.mxu1 %v18649_v33  ;;  %v18691_v3 = vld [vmem:[#allocation3 + $0x304] ss:$16 sps:$4 sm:$0xff]   ;;  %v18694_v5 = vld [vmem:[#allocation3 + $0x300] ss:$16 sps:$4 sm:$0xff]  }
  0x7a   : > { %v354_v6 = vld [vmem:[%s22046_s14] sm:$0xff]  ;;  %v356_v8 = vld [vmem:[%s22046_s14 + $0x10] sm:$0xff] }
  0x7b   : > { %13049 = vmatpush2.bf16.msra.mxu0 %v18651_v34  ;;  %v18697_v10 = vld [vmem:[#allocation3 + $0x4e4] ss:$16 sps:$4 sm:$0xff]   ;;  %v22062_v12 = vpack.c.bf16 %v419_v7, %v354_v6  ;;  %v22064_v13 = vpack.c.bf16 %v421_v9, %v356_v8  ;;  %v18695_v14 = vld [vmem:[#allocation3 + $0x4e0] ss:$16 sps:$4 sm:$0xff]  }
  0x7c   : > { %13092 = vmatpush2.bf16.msra.mxu1 %v18652_v35  ;;  %13050 = vmatprep.subr.bf16.mxu0 %v18653_v36  ;;  %v18700_v11 = vld [vmem:[#allocation3 + $0x6e4] ss:$16 sps:$4 sm:$0xff]   ;;  %v18698_v15 = vld [vmem:[#allocation3 + $0x6e0] ss:$16 sps:$4 sm:$0xff]  }
  0x7d   : > { %13093 = vmatprep.subr.bf16.mxu1 %v18655_v37  ;;  %v18703_v16 = vld [vmem:[#allocation3 + $0x4c4] ss:$16 sps:$4 sm:$0xff]   ;;  %v18701_v18 = vld [vmem:[#allocation3 + $0x4c0] ss:$16 sps:$4 sm:$0xff]  }
  0x7e   : > { %v18706_v17 = vld [vmem:[#allocation3 + $0x6c4] ss:$16 sps:$4 sm:$0xff]   ;;  %v18704_v19 = vld [vmem:[#allocation3 + $0x6c0] ss:$16 sps:$4 sm:$0xff]  }
  0x7f   : > { %13051 = vmatpush2.bf16.msra.mxu0 %v18657_v38  ;;  %v18709_v20 = vld [vmem:[#allocation3 + $0x4a4] ss:$16 sps:$4 sm:$0xff]   ;;  %v18707_v22 = vld [vmem:[#allocation3 + $0x4a0] ss:$16 sps:$4 sm:$0xff]  }
  0x80   : > { %13094 = vmatpush2.bf16.msra.mxu1 %v18658_v39  ;;  %13052 = vmatprep.subr.bf16.mxu0 %v18659_v40  ;;  %v18712_v21 = vld [vmem:[#allocation3 + $0x6a4] ss:$16 sps:$4 sm:$0xff]   ;;  %v18710_v23 = vld [vmem:[#allocation3 + $0x6a0] ss:$16 sps:$4 sm:$0xff]   ;;  %v359_v40 = vld [vmem:[%s22046_s14 + $0x28] sm:$0xff] }
  0x81   : > { %13095 = vmatprep.subr.bf16.mxu1 %v18661_v41  ;;  %v18715_v24 = vld [vmem:[#allocation3 + $0x484] ss:$16 sps:$4 sm:$0xff]   ;;  %v18713_v26 = vld [vmem:[#allocation3 + $0x480] ss:$16 sps:$4 sm:$0xff]  }
  0x82   : > { %v18718_v25 = vld [vmem:[#allocation3 + $0x684] ss:$16 sps:$4 sm:$0xff]   ;;  %v18716_v27 = vld [vmem:[#allocation3 + $0x680] ss:$16 sps:$4 sm:$0xff]  }
  0x83   : > { %13053 = vmatpush2.bf16.msra.mxu0 %v18663_v42  ;;  %v18721_v28 = vld [vmem:[#allocation3 + $0x464] ss:$16 sps:$4 sm:$0xff]   ;;  %v18719_v30 = vld [vmem:[#allocation3 + $0x460] ss:$16 sps:$4 sm:$0xff]   ;;  %v361_v42 = vld [vmem:[%s22046_s14 + $0x38] sm:$0xff] }
  0x84   : > { %13096 = vmatpush2.bf16.msra.mxu1 %v18664_v43  ;;  %13054 = vmatprep.subr.bf16.mxu0 %v18665_v44  ;;  %v18724_v29 = vld [vmem:[#allocation3 + $0x664] ss:$16 sps:$4 sm:$0xff]   ;;  %v18722_v31 = vld [vmem:[#allocation3 + $0x660] ss:$16 sps:$4 sm:$0xff]  }
  0x85   : > { %13097 = vmatprep.subr.bf16.mxu1 %v18667_v45  ;;  %v18727_v32 = vld [vmem:[#allocation3 + $0x444] ss:$16 sps:$4 sm:$0xff]   ;;  %v18725_v34 = vld [vmem:[#allocation3 + $0x440] ss:$16 sps:$4 sm:$0xff]  }
  0x86   : > { %v18730_v33 = vld [vmem:[#allocation3 + $0x644] ss:$16 sps:$4 sm:$0xff]   ;;  %v18728_v35 = vld [vmem:[#allocation3 + $0x640] ss:$16 sps:$4 sm:$0xff]  }
  0x87   : > { %13055 = vmatpush2.bf16.msra.mxu0 %v18669_v50  ;;  %v18733_v36 = vld [vmem:[#allocation3 + $0x424] ss:$16 sps:$4 sm:$0xff]   ;;  %v18731_v38 = vld [vmem:[#allocation3 + $0x420] ss:$16 sps:$4 sm:$0xff]  }
  0x88   : > { %13098 = vmatpush2.bf16.msra.mxu1 %v18670_v51  ;;  %13056 = vmatprep.subr.bf16.mxu0 %v18671_v52  ;;  %v18736_v37 = vld [vmem:[#allocation3 + $0x624] ss:$16 sps:$4 sm:$0xff]   ;;  %v18734_v39 = vld [vmem:[#allocation3 + $0x620] ss:$16 sps:$4 sm:$0xff]  }
  0x89   : > { %13099 = vmatprep.subr.bf16.mxu1 %v18673_v55  ;;  %v424_v41 = vld [vmem:[%s22046_s14 + $0x230] sm:$0xff]  ;;  %v426_v46 = vld [vmem:[%s22046_s14 + $0x240] sm:$0xff] }
  0x8a   : > { %v18739_v43 = vld [vmem:[#allocation3 + $0x404] ss:$16 sps:$4 sm:$0xff]   ;;  %v22071_v45 = vpack.c.bf16 %v424_v41, %v359_v40  ;;  %v22074_v47 = vpack.c.bf16 %v426_v46, %v361_v42  ;;  %v18737_v48 = vld [vmem:[#allocation3 + $0x400] ss:$16 sps:$4 sm:$0xff]   ;;  %v365_v41 = vld [vmem:[%s22046_s14 + $0x58] sm:$0xff] }
  0x8b   : > { %13057 = vmatpush2.bf16.msra.mxu0 %v18675_v56  ;;  %v18742_v44 = vld [vmem:[#allocation3 + $0x604] ss:$16 sps:$4 sm:$0xff]   ;;  %v18740_v49 = vld [vmem:[#allocation3 + $0x600] ss:$16 sps:$4 sm:$0xff]  }
  0x8c   : > { %13100 = vmatpush2.bf16.msra.mxu1 %v18676_v57  ;;  %13058 = vmatprep.subr.bf16.mxu0 %v18677_v58  ;;  %v18745_v50 = vld [vmem:[#allocation3 + $0x5e4] ss:$16 sps:$4 sm:$0xff]   ;;  %v18743_v52 = vld [vmem:[#allocation3 + $0x5e0] ss:$16 sps:$4 sm:$0xff]  }
  0x8d   : > { %13101 = vmatprep.subr.bf16.mxu1 %v18679_v59  ;;  %v18748_v51 = vld [vmem:[#allocation3 + $0x7e4] ss:$16 sps:$4 sm:$0xff]   ;;  %v18746_v55 = vld [vmem:[#allocation3 + $0x7e0] ss:$16 sps:$4 sm:$0xff]  }
  0x8e   : > { %v18751_v56 = vld [vmem:[#allocation3 + $0x5c4] ss:$16 sps:$4 sm:$0xff]   ;;  %v18749_v58 = vld [vmem:[#allocation3 + $0x5c0] ss:$16 sps:$4 sm:$0xff]  }
  0x8f   : > { %13059 = vmatpush2.bf16.msra.mxu0 %v18681_v60  ;;  %v18754_v57 = vld [vmem:[#allocation3 + $0x7c4] ss:$16 sps:$4 sm:$0xff]   ;;  %v18752_v59 = vld [vmem:[#allocation3 + $0x7c0] ss:$16 sps:$4 sm:$0xff]  }
  0x90   : > { %13102 = vmatpush2.bf16.msra.mxu1 %v18682_v61  ;;  %13060 = vmatprep.subr.bf16.mxu0 %v18683_v62  ;;  %v18757_v60 = vld [vmem:[#allocation3 + $0x5a4] ss:$16 sps:$4 sm:$0xff]   ;;  %v18755_v62 = vld [vmem:[#allocation3 + $0x5a0] ss:$16 sps:$4 sm:$0xff]  }
  0x91   : > { %13103 = vmatprep.subr.bf16.mxu1 %v18685_v63  ;;  %v18760_v61 = vld [vmem:[#allocation3 + $0x7a4] ss:$16 sps:$4 sm:$0xff]   ;;  %v18758_v63 = vld [vmem:[#allocation3 + $0x7a0] ss:$16 sps:$4 sm:$0xff]  }
  0x92   : > { %v18767_v6 = vld [vmem:[#allocation3 + $0x560] ss:$16 sps:$4 sm:$0xff]   ;;  %v18775_v8 = vld [vmem:[#allocation3 + $0x544] ss:$16 sps:$4 sm:$0xff]  }
  0x93   : > { %13061 = vmatpush2.bf16.msra.mxu0 %v18687_v0  ;;  %v18763_v0 = vld [vmem:[#allocation3 + $0x584] ss:$16 sps:$4 sm:$0xff]   ;;  %v18770_v7 = vld [vmem:[#allocation3 + $0x760] ss:$16 sps:$4 sm:$0xff]  }
  0x94   : > { %13104 = vmatpush2.bf16.msra.mxu1 %v18688_v1  ;;  %13062 = vmatprep.subr.bf16.mxu0 %v18689_v2  ;;  %v18766_v1 = vld [vmem:[#allocation3 + $0x784] ss:$16 sps:$4 sm:$0xff]   ;;  %v18761_v2 = vld [vmem:[#allocation3 + $0x580] ss:$16 sps:$4 sm:$0xff]  }
  0x95   : > { %13105 = vmatprep.subr.bf16.mxu1 %v18691_v3  ;;  %v18764_v3 = vld [vmem:[#allocation3 + $0x780] ss:$16 sps:$4 sm:$0xff]   ;;  %v18778_v9 = vld [vmem:[#allocation3 + $0x744] ss:$16 sps:$4 sm:$0xff]  }
  0x96   : > { %v430_v42 = vld [vmem:[%s22046_s14 + $0x260] sm:$0xff] }
  0x97   : > { %13063 = vmatpush2.bf16.msra.mxu0 %v18693_v4  ;;  %v18769_v4 = vld [vmem:[#allocation3 + $0x564] ss:$16 sps:$4 sm:$0xff]   ;;  %v22094_v46 = vpack.c.bf16 %v430_v42, %v365_v41  ;;  %v18881_v41 = vld [vmem:[#allocation3 + $0x900] ss:$16 sps:$4 sm:$0xff]  }
  0x98   : > { %13106 = vmatpush2.bf16.msra.mxu1 %v18694_v5  ;;  %13118 = vmatprep.subr.bf16.mxu0 %v18697_v10  ;;  %v18772_v5 = vld [vmem:[#allocation3 + $0x764] ss:$16 sps:$4 sm:$0xff]   ;;  %v18773_v10 = vld [vmem:[#allocation3 + $0x540] ss:$16 sps:$4 sm:$0xff]  }
  0x99   : > { %13161 = vmatprep.subr.bf16.mxu1 %v18700_v11  ;;  %v18776_v11 = vld [vmem:[#allocation3 + $0x740] ss:$16 sps:$4 sm:$0xff]  }
  0x9a   : > { %13065 = vmatmul.mubr.bf16.vlgmr.msra.gmra.mxu0 %v22062_v12  ;;  %v18884_v42 = vld [vmem:[#allocation3 + $0xb00] ss:$16 sps:$4 sm:$0xff]  }
  0x9b   : > { %13108 = vmatmul.mubr.bf16.vlgmr.msra.gmra.mxu1 %v22064_v13  ;;  %13119 = vmatpush1.bf16.msra.mxu0 %v18695_v14  ;;  %v18781_v14 = vld [vmem:[#allocation3 + $0x524] ss:$16 sps:$4 sm:$0xff]  }
  0x9c   : > { %13162 = vmatpush1.bf16.msra.mxu1 %v18698_v15  ;;  %13120 = vmatprep.subr.bf16.mxu0 %v18703_v16  ;;  %v18784_v15 = vld [vmem:[#allocation3 + $0x724] ss:$16 sps:$4 sm:$0xff]   ;;  %v18779_v16 = vld [vmem:[#allocation3 + $0x520] ss:$16 sps:$4 sm:$0xff]  }
  0x9d   : > { %13163 = vmatprep.subr.bf16.mxu1 %v18706_v17  ;;  %13150 = vmatprep.mubr.bf16.mxu0 %v22071_v45  ;;  %v18782_v17 = vld [vmem:[#allocation3 + $0x720] ss:$16 sps:$4 sm:$0xff]  }
  0x9e   : > { %13193 = vmatprep.mubr.bf16.mxu1 %v22074_v47 }
  0x9f   : > { %13121 = vmatpush1.bf16.msra.mxu0 %v18701_v18  ;;  %v18787_v18 = vld [vmem:[#allocation3 + $0x504] ss:$16 sps:$4 sm:$0xff]  }
  0xa0   : > { %13164 = vmatpush1.bf16.msra.mxu1 %v18704_v19  ;;  %13122 = vmatprep.subr.bf16.mxu0 %v18709_v20  ;;  %v18790_v19 = vld [vmem:[#allocation3 + $0x704] ss:$16 sps:$4 sm:$0xff]   ;;  %v18785_v20 = vld [vmem:[#allocation3 + $0x500] ss:$16 sps:$4 sm:$0xff]  }
  0xa1   : > { %13165 = vmatprep.subr.bf16.mxu1 %v18712_v21  ;;  %v18788_v21 = vld [vmem:[#allocation3 + $0x700] ss:$16 sps:$4 sm:$0xff]  }
  0xa3   : > { %13123 = vmatpush1.bf16.msra.mxu0 %v18707_v22  ;;  %v358_v22 = vld [vmem:[%s22046_s14 + $0x20] sm:$0xff] }
  0xa4   : > { %13166 = vmatpush1.bf16.msra.mxu1 %v18710_v23  ;;  %13124 = vmatprep.subr.bf16.mxu0 %v18715_v24  ;;  %v423_v23 = vld [vmem:[%s22046_s14 + $0x228] sm:$0xff]  ;;  %v360_v24 = vld [vmem:[%s22046_s14 + $0x30] sm:$0xff] }
  0xa5   : > { %13167 = vmatprep.subr.bf16.mxu1 %v18718_v25  ;;  %v425_v25 = vld [vmem:[%s22046_s14 + $0x238] sm:$0xff] }
  0xa7   : > { %13125 = vmatpush1.bf16.msra.mxu0 %v18713_v26  ;;  %v18793_v26 = vld [vmem:[#allocation3 + $0x8e4] ss:$16 sps:$4 sm:$0xff]  }
  0xa8   : > { %13168 = vmatpush1.bf16.msra.mxu1 %v18716_v27  ;;  %13126 = vmatprep.subr.bf16.mxu0 %v18721_v28  ;;  %v18796_v27 = vld [vmem:[#allocation3 + $0xae4] ss:$16 sps:$4 sm:$0xff]   ;;  %v22082_v28 = vpack.c.bf16 %v423_v23, %v358_v22  ;;  %v18857_v22 = vld [vmem:[#allocation3 + $0x980] ss:$16 sps:$4 sm:$0xff]  }
  0xa9   : > { %13169 = vmatprep.subr.bf16.mxu1 %v18724_v29  ;;  %v22084_v29 = vpack.c.bf16 %v425_v25, %v360_v24  ;;  %v18860_v23 = vld [vmem:[#allocation3 + $0xb80] ss:$16 sps:$4 sm:$0xff]   ;;  %v18865_v24 = vld [vmem:[#allocation3 + $0x964] ss:$16 sps:$4 sm:$0xff]  }
  0xaa   : > { %v18868_v25 = vld [vmem:[#allocation3 + $0xb64] ss:$16 sps:$4 sm:$0xff]  }
  0xab   : > { %13127 = vmatpush1.bf16.msra.mxu0 %v18719_v30  ;;  %v18791_v30 = vld [vmem:[#allocation3 + $0x8e0] ss:$16 sps:$4 sm:$0xff]  }
  0xac   : > { %13170 = vmatpush1.bf16.msra.mxu1 %v18722_v31  ;;  %13128 = vmatprep.subr.bf16.mxu0 %v18727_v32  ;;  %v18794_v31 = vld [vmem:[#allocation3 + $0xae0] ss:$16 sps:$4 sm:$0xff]   ;;  %v18799_v32 = vld [vmem:[#allocation3 + $0x8c4] ss:$16 sps:$4 sm:$0xff]  }
  0xad   : > { %13171 = vmatprep.subr.bf16.mxu1 %v18730_v33  ;;  %v18802_v33 = vld [vmem:[#allocation3 + $0xac4] ss:$16 sps:$4 sm:$0xff]  }
  0xaf   : > { %13129 = vmatpush1.bf16.msra.mxu0 %v18725_v34  ;;  %v18797_v34 = vld [vmem:[#allocation3 + $0x8c0] ss:$16 sps:$4 sm:$0xff]  }
  0xb0   : > { %13172 = vmatpush1.bf16.msra.mxu1 %v18728_v35  ;;  %13130 = vmatprep.subr.bf16.mxu0 %v18733_v36  ;;  %v18800_v35 = vld [vmem:[#allocation3 + $0xac0] ss:$16 sps:$4 sm:$0xff]   ;;  %v18805_v36 = vld [vmem:[#allocation3 + $0x8a4] ss:$16 sps:$4 sm:$0xff]  }
  0xb1   : > { %13173 = vmatprep.subr.bf16.mxu1 %v18736_v37  ;;  %v18808_v37 = vld [vmem:[#allocation3 + $0xaa4] ss:$16 sps:$4 sm:$0xff]  }
  0xb3   : > { %13131 = vmatpush1.bf16.msra.mxu0 %v18731_v38  ;;  %v363_v38 = vld [vmem:[%s22046_s14 + $0x48] sm:$0xff] }
  0xb4   : > { %13174 = vmatpush1.bf16.msra.mxu1 %v18734_v39  ;;  %13132 = vmatprep.subr.bf16.mxu0 %v18739_v43  ;;  %v428_v39 = vld [vmem:[%s22046_s14 + $0x250] sm:$0xff] }
  0xb5   : > { %13175 = vmatprep.subr.bf16.mxu1 %v18742_v44  ;;  %v22090_v40 = vpack.c.bf16 %v428_v39, %v363_v38  ;;  %v18803_v43 = vld [vmem:[#allocation3 + $0x8a0] ss:$16 sps:$4 sm:$0xff]   ;;  %v18883_v38 = vld [vmem:[#allocation3 + $0x904] ss:$16 sps:$4 sm:$0xff]  }
  0xb6   : > { %v18806_v44 = vld [vmem:[#allocation3 + $0xaa0] ss:$16 sps:$4 sm:$0xff]   ;;  %v18886_v39 = vld [vmem:[#allocation3 + $0xb04] ss:$16 sps:$4 sm:$0xff]  }
  0xb7   : > { %13133 = vmatpush1.bf16.msra.mxu0 %v18737_v48  ;;  %v18811_v48 = vld [vmem:[#allocation3 + $0x884] ss:$16 sps:$4 sm:$0xff]  }
  0xb8   : > { %13176 = vmatpush1.bf16.msra.mxu1 %v18740_v49  ;;  %13134 = vmatprep.subr.bf16.mxu0 %v18745_v50  ;;  %v18814_v49 = vld [vmem:[#allocation3 + $0xa84] ss:$16 sps:$4 sm:$0xff]   ;;  %v18809_v50 = vld [vmem:[#allocation3 + $0x880] ss:$16 sps:$4 sm:$0xff]  }
  0xb9   : > { %13177 = vmatprep.subr.bf16.mxu1 %v18748_v51  ;;  %v18812_v51 = vld [vmem:[#allocation3 + $0xa80] ss:$16 sps:$4 sm:$0xff]  }
  0xbb   : > { %13135 = vmatpush2.bf16.msra.mxu0 %v18743_v52  ;;  %v18817_v52 = vld [vmem:[#allocation3 + $0x864] ss:$16 sps:$4 sm:$0xff]  }
  0xbc   : > { %13178 = vmatpush2.bf16.msra.mxu1 %v18746_v55  ;;  %13136 = vmatprep.subr.bf16.mxu0 %v18751_v56  ;;  %v18820_v55 = vld [vmem:[#allocation3 + $0xa64] ss:$16 sps:$4 sm:$0xff]   ;;  %v18815_v56 = vld [vmem:[#allocation3 + $0x860] ss:$16 sps:$4 sm:$0xff]  }
  0xbd   : > { %13179 = vmatprep.subr.bf16.mxu1 %v18754_v57  ;;  %v18818_v57 = vld [vmem:[#allocation3 + $0xa60] ss:$16 sps:$4 sm:$0xff]  }
  0xbf   : > { %13137 = vmatpush2.bf16.msra.mxu0 %v18749_v58  ;;  %v18823_v58 = vld [vmem:[#allocation3 + $0x844] ss:$16 sps:$4 sm:$0xff]  }
  0xc0   : > { %13180 = vmatpush2.bf16.msra.mxu1 %v18752_v59  ;;  %13138 = vmatprep.subr.bf16.mxu0 %v18757_v60  ;;  %v18826_v59 = vld [vmem:[#allocation3 + $0xa44] ss:$16 sps:$4 sm:$0xff]   ;;  %v18821_v60 = vld [vmem:[#allocation3 + $0x840] ss:$16 sps:$4 sm:$0xff]  }
  0xc1   : > { %13181 = vmatprep.subr.bf16.mxu1 %v18760_v61  ;;  %v18824_v61 = vld [vmem:[#allocation3 + $0xa40] ss:$16 sps:$4 sm:$0xff]  }
  0xc3   : > { %13139 = vmatpush2.bf16.msra.mxu0 %v18755_v62  ;;  %v18829_v62 = vld [vmem:[#allocation3 + $0x824] ss:$16 sps:$4 sm:$0xff]  }
  0xc4   : > { %13182 = vmatpush2.bf16.msra.mxu1 %v18758_v63  ;;  %13140 = vmatprep.subr.bf16.mxu0 %v18763_v0  ;;  %v18832_v63 = vld [vmem:[#allocation3 + $0xa24] ss:$16 sps:$4 sm:$0xff]   ;;  %v18827_v0 = vld [vmem:[#allocation3 + $0x820] ss:$16 sps:$4 sm:$0xff]  }
  0xc5   : > { %13183 = vmatprep.subr.bf16.mxu1 %v18766_v1  ;;  %v18830_v1 = vld [vmem:[#allocation3 + $0xa20] ss:$16 sps:$4 sm:$0xff]  }
  0xc7   : > { %13141 = vmatpush2.bf16.msra.mxu0 %v18761_v2  ;;  %v18835_v2 = vld [vmem:[#allocation3 + $0x804] ss:$16 sps:$4 sm:$0xff]  }
  0xc8   : > { %13184 = vmatpush2.bf16.msra.mxu1 %v18764_v3  ;;  %13142 = vmatprep.subr.bf16.mxu0 %v18769_v4  ;;  %v18838_v3 = vld [vmem:[#allocation3 + $0xa04] ss:$16 sps:$4 sm:$0xff]   ;;  %v18833_v4 = vld [vmem:[#allocation3 + $0x800] ss:$16 sps:$4 sm:$0xff]  }
  0xc9   : > { %13185 = vmatprep.subr.bf16.mxu1 %v18772_v5  ;;  %v18836_v5 = vld [vmem:[#allocation3 + $0xa00] ss:$16 sps:$4 sm:$0xff]  }
  0xcb   : > { %13143 = vmatpush2.bf16.msra.mxu0 %v18767_v6  ;;  %v18841_v6 = vld [vmem:[#allocation3 + $0x9e4] ss:$16 sps:$4 sm:$0xff]  }
  0xcc   : > { %13186 = vmatpush2.bf16.msra.mxu1 %v18770_v7  ;;  %13144 = vmatprep.subr.bf16.mxu0 %v18775_v8  ;;  %v18844_v7 = vld [vmem:[#allocation3 + $0xbe4] ss:$16 sps:$4 sm:$0xff]   ;;  %v18839_v8 = vld [vmem:[#allocation3 + $0x9e0] ss:$16 sps:$4 sm:$0xff]  }
  0xcd   : > { %13187 = vmatprep.subr.bf16.mxu1 %v18778_v9  ;;  %v18842_v9 = vld [vmem:[#allocation3 + $0xbe0] ss:$16 sps:$4 sm:$0xff]  }
  0xcf   : > { %13145 = vmatpush2.bf16.msra.mxu0 %v18773_v10  ;;  %v18847_v10 = vld [vmem:[#allocation3 + $0x9c4] ss:$16 sps:$4 sm:$0xff]  }
  0xd0   : > { %13188 = vmatpush2.bf16.msra.mxu1 %v18776_v11  ;;  %13146 = vmatprep.subr.bf16.mxu0 %v18781_v14  ;;  %v18850_v11 = vld [vmem:[#allocation3 + $0xbc4] ss:$16 sps:$4 sm:$0xff]   ;;  %v18845_v14 = vld [vmem:[#allocation3 + $0x9c0] ss:$16 sps:$4 sm:$0xff]  }
  0xd1   : > { %13189 = vmatprep.subr.bf16.mxu1 %v18784_v15  ;;  %v18848_v15 = vld [vmem:[#allocation3 + $0xbc0] ss:$16 sps:$4 sm:$0xff]  }
  0xd3   : > { %13147 = vmatpush2.bf16.msra.mxu0 %v18779_v16  ;;  %v18853_v16 = vld [vmem:[#allocation3 + $0x9a4] ss:$16 sps:$4 sm:$0xff]  }
  0xd4   : > { %13190 = vmatpush2.bf16.msra.mxu1 %v18782_v17  ;;  %13148 = vmatprep.subr.bf16.mxu0 %v18787_v18  ;;  %v18856_v17 = vld [vmem:[#allocation3 + $0xba4] ss:$16 sps:$4 sm:$0xff]   ;;  %v18851_v18 = vld [vmem:[#allocation3 + $0x9a0] ss:$16 sps:$4 sm:$0xff]  }
  0xd5   : > { %13191 = vmatprep.subr.bf16.mxu1 %v18790_v19  ;;  %v18854_v19 = vld [vmem:[#allocation3 + $0xba0] ss:$16 sps:$4 sm:$0xff]  }
  0xd7   : > { %13149 = vmatpush2.bf16.msra.mxu0 %v18785_v20  ;;  %v18859_v20 = vld [vmem:[#allocation3 + $0x984] ss:$16 sps:$4 sm:$0xff]  }
  0xd8   : > { %13192 = vmatpush2.bf16.msra.mxu1 %v18788_v21  ;;  %13204 = vmatprep.subr.bf16.mxu0 %v18793_v26  ;;  %v18862_v21 = vld [vmem:[#allocation3 + $0xb84] ss:$16 sps:$4 sm:$0xff]   ;;  %v18863_v26 = vld [vmem:[#allocation3 + $0x960] ss:$16 sps:$4 sm:$0xff]  }
  0xd9   : > { %13247 = vmatprep.subr.bf16.mxu1 %v18796_v27  ;;  %v18866_v27 = vld [vmem:[#allocation3 + $0xb60] ss:$16 sps:$4 sm:$0xff]  }
  0xda   : > { %13151 = vmatmul.mubr.bf16.vlgmr.msra.gmra.mxu0 %v22082_v28 }
  0xdb   : > { %13194 = vmatmul.mubr.bf16.vlgmr.msra.gmra.mxu1 %v22084_v29  ;;  %13205 = vmatpush1.bf16.msra.mxu0 %v18791_v30  ;;  %v18871_v30 = vld [vmem:[#allocation3 + $0x944] ss:$16 sps:$4 sm:$0xff]  }
  0xdc   : > { %13248 = vmatpush1.bf16.msra.mxu1 %v18794_v31  ;;  %13206 = vmatprep.subr.bf16.mxu0 %v18799_v32  ;;  %v18874_v31 = vld [vmem:[#allocation3 + $0xb44] ss:$16 sps:$4 sm:$0xff]   ;;  %v18869_v32 = vld [vmem:[#allocation3 + $0x940] ss:$16 sps:$4 sm:$0xff]  }
  0xdd   : > { %13249 = vmatprep.subr.bf16.mxu1 %v18802_v33  ;;  %13236 = vmatprep.mubr.bf16.mxu0 %v22090_v40  ;;  %v18872_v33 = vld [vmem:[#allocation3 + $0xb40] ss:$16 sps:$4 sm:$0xff]  }
  0xde   : > { %13279 = vmatprep.mubr.bf16.mxu1 %v22094_v46 }
  0xdf   : > { %13207 = vmatpush1.bf16.msra.mxu0 %v18797_v34  ;;  %v18877_v34 = vld [vmem:[#allocation3 + $0x924] ss:$16 sps:$4 sm:$0xff]  }
  0xe0   : > { %13250 = vmatpush1.bf16.msra.mxu1 %v18800_v35  ;;  %13208 = vmatprep.subr.bf16.mxu0 %v18805_v36  ;;  %v18880_v35 = vld [vmem:[#allocation3 + $0xb24] ss:$16 sps:$4 sm:$0xff]   ;;  %v18875_v36 = vld [vmem:[#allocation3 + $0x920] ss:$16 sps:$4 sm:$0xff]  }
  0xe1   : > { %13251 = vmatprep.subr.bf16.mxu1 %v18808_v37  ;;  %v18878_v37 = vld [vmem:[#allocation3 + $0xb20] ss:$16 sps:$4 sm:$0xff]  }
  0xe3   : > { %13209 = vmatpush1.bf16.msra.mxu0 %v18803_v43  ;;  %v362_v43 = vld [vmem:[%s22046_s14 + $0x40] sm:$0xff] }
  0xe4   : > { %13252 = vmatpush1.bf16.msra.mxu1 %v18806_v44  ;;  %13210 = vmatprep.subr.bf16.mxu0 %v18811_v48  ;;  %v427_v44 = vld [vmem:[%s22046_s14 + $0x248] sm:$0xff]  ;;  %v364_v48 = vld [vmem:[%s22046_s14 + $0x50] sm:$0xff] }
  0xe5   : > { %13253 = vmatprep.subr.bf16.mxu1 %v18814_v49  ;;  %v429_v49 = vld [vmem:[%s22046_s14 + $0x258] sm:$0xff] }
  0xe7   : > { %13211 = vmatpush1.bf16.msra.mxu0 %v18809_v50  ;;  %v18889_v50 = vld [vmem:[#allocation3 + $0xce4] ss:$16 sps:$4 sm:$0xff]  }
  0xe8   : > { %13254 = vmatpush1.bf16.msra.mxu1 %v18812_v51  ;;  %13212 = vmatprep.subr.bf16.mxu0 %v18817_v52  ;;  %v18892_v51 = vld [vmem:[#allocation3 + $0xee4] ss:$16 sps:$4 sm:$0xff]   ;;  %v367_v52 = vld [vmem:[%s22046_s14 + $0x68] sm:$0xff] }
  0xe9   : > { %13255 = vmatprep.subr.bf16.mxu1 %v18820_v55  ;;  %v18887_v55 = vld [vmem:[#allocation3 + $0xce0] ss:$16 sps:$4 sm:$0xff]  }
  0xeb   : > { %13213 = vmatpush1.bf16.msra.mxu0 %v18815_v56  ;;  %v432_v56 = vld [vmem:[%s22046_s14 + $0x270] sm:$0xff] }
  0xec   : > { %13256 = vmatpush1.bf16.msra.mxu1 %v18818_v57  ;;  %13214 = vmatprep.subr.bf16.mxu0 %v18823_v58  ;;  %v369_v57 = vld [vmem:[%s22046_s14 + $0x78] sm:$0xff]  ;;  %v22105_v58 = vpack.c.bf16 %v427_v44, %v362_v43  ;;  %v18947_v43 = vld [vmem:[#allocation3 + $0xda0] ss:$16 sps:$4 sm:$0xff]  }
  0xed   : > { %13257 = vmatprep.subr.bf16.mxu1 %v18826_v59  ;;  %v22107_v59 = vpack.c.bf16 %v429_v49, %v364_v48  ;;  %v18950_v44 = vld [vmem:[#allocation3 + $0xfa0] ss:$16 sps:$4 sm:$0xff]   ;;  %v18955_v48 = vld [vmem:[#allocation3 + $0xd84] ss:$16 sps:$4 sm:$0xff]  }
  0xee   : > { %v18958_v49 = vld [vmem:[#allocation3 + $0xf84] ss:$16 sps:$4 sm:$0xff]  }
  0xef   : > { %13215 = vmatpush1.bf16.msra.mxu0 %v18821_v60  ;;  %v434_v60 = vld [vmem:[%s22046_s14 + $0x280] sm:$0xff] }
  0xf0   : > { %13258 = vmatpush1.bf16.msra.mxu1 %v18824_v61  ;;  %13216 = vmatprep.subr.bf16.mxu0 %v18829_v62  ;;  %v18890_v61 = vld [vmem:[#allocation3 + $0xee0] ss:$16 sps:$4 sm:$0xff]   ;;  %v18895_v62 = vld [vmem:[#allocation3 + $0xcc4] ss:$16 sps:$4 sm:$0xff]  }
  0xf1   : > { %13259 = vmatprep.subr.bf16.mxu1 %v18832_v63  ;;  %v18898_v63 = vld [vmem:[#allocation3 + $0xec4] ss:$16 sps:$4 sm:$0xff]  }
  0xf3   : > { %13217 = vmatpush1.bf16.msra.mxu0 %v18827_v0  ;;  %v22110_v0 = vpack.c.bf16 %v432_v56, %v367_v52  ;;  %v18961_v52 = vld [vmem:[#allocation3 + $0xd64] ss:$16 sps:$4 sm:$0xff]   ;;  %v18959_v56 = vld [vmem:[#allocation3 + $0xd60] ss:$16 sps:$4 sm:$0xff]  }
  0xf4   : > { %13260 = vmatpush1.bf16.msra.mxu1 %v18830_v1  ;;  %13218 = vmatprep.subr.bf16.mxu0 %v18835_v2  ;;  %v22112_v1 = vpack.c.bf16 %v434_v60, %v369_v57  ;;  %v18893_v2 = vld [vmem:[#allocation3 + $0xcc0] ss:$16 sps:$4 sm:$0xff]   ;;  %v18967_v60 = vld [vmem:[#allocation3 + $0xd44] ss:$16 sps:$4 sm:$0xff]  }
  0xf5   : > { %13261 = vmatprep.subr.bf16.mxu1 %v18838_v3  ;;  %v18896_v3 = vld [vmem:[#allocation3 + $0xec0] ss:$16 sps:$4 sm:$0xff]  }
  0xf6   : > { %v18962_v57 = vld [vmem:[#allocation3 + $0xf60] ss:$16 sps:$4 sm:$0xff]  }
  0xf7   : > { %13219 = vmatpush1.bf16.msra.mxu0 %v18833_v4  ;;  %v18901_v4 = vld [vmem:[#allocation3 + $0xca4] ss:$16 sps:$4 sm:$0xff]  }
  0xf8   : > { %13262 = vmatpush1.bf16.msra.mxu1 %v18836_v5  ;;  %13220 = vmatprep.subr.bf16.mxu0 %v18841_v6  ;;  %v18904_v5 = vld [vmem:[#allocation3 + $0xea4] ss:$16 sps:$4 sm:$0xff]   ;;  %v18899_v6 = vld [vmem:[#allocation3 + $0xca0] ss:$16 sps:$4 sm:$0xff]  }
  0xf9   : > { %13263 = vmatprep.subr.bf16.mxu1 %v18844_v7  ;;  %v18902_v7 = vld [vmem:[#allocation3 + $0xea0] ss:$16 sps:$4 sm:$0xff]  }
  0xfb   : > { %13221 = vmatpush2.bf16.msra.mxu0 %v18839_v8  ;;  %v18907_v8 = vld [vmem:[#allocation3 + $0xc84] ss:$16 sps:$4 sm:$0xff]  }
  0xfc   : > { %13264 = vmatpush2.bf16.msra.mxu1 %v18842_v9  ;;  %13222 = vmatprep.subr.bf16.mxu0 %v18847_v10  ;;  %v18910_v9 = vld [vmem:[#allocation3 + $0xe84] ss:$16 sps:$4 sm:$0xff]   ;;  %v18905_v10 = vld [vmem:[#allocation3 + $0xc80] ss:$16 sps:$4 sm:$0xff]  }
  0xfd   : > { %13265 = vmatprep.subr.bf16.mxu1 %v18850_v11  ;;  %v18908_v11 = vld [vmem:[#allocation3 + $0xe80] ss:$16 sps:$4 sm:$0xff]  }
  0xff   : > { %13223 = vmatpush2.bf16.msra.mxu0 %v18845_v14  ;;  %v18913_v14 = vld [vmem:[#allocation3 + $0xc64] ss:$16 sps:$4 sm:$0xff]  }
 0x100   : > { %13266 = vmatpush2.bf16.msra.mxu1 %v18848_v15  ;;  %13224 = vmatprep.subr.bf16.mxu0 %v18853_v16  ;;  %v18916_v15 = vld [vmem:[#allocation3 + $0xe64] ss:$16 sps:$4 sm:$0xff]   ;;  %v18911_v16 = vld [vmem:[#allocation3 + $0xc60] ss:$16 sps:$4 sm:$0xff]  }
 0x101   : > { %13267 = vmatprep.subr.bf16.mxu1 %v18856_v17  ;;  %v18914_v17 = vld [vmem:[#allocation3 + $0xe60] ss:$16 sps:$4 sm:$0xff]  }
 0x103   : > { %13225 = vmatpush2.bf16.msra.mxu0 %v18851_v18  ;;  %v18919_v18 = vld [vmem:[#allocation3 + $0xc44] ss:$16 sps:$4 sm:$0xff]  }
 0x104   : > { %13268 = vmatpush2.bf16.msra.mxu1 %v18854_v19  ;;  %13226 = vmatprep.subr.bf16.mxu0 %v18859_v20  ;;  %v18922_v19 = vld [vmem:[#allocation3 + $0xe44] ss:$16 sps:$4 sm:$0xff]   ;;  %v18917_v20 = vld [vmem:[#allocation3 + $0xc40] ss:$16 sps:$4 sm:$0xff]  }
 0x105   : > { %13269 = vmatprep.subr.bf16.mxu1 %v18862_v21  ;;  %v18920_v21 = vld [vmem:[#allocation3 + $0xe40] ss:$16 sps:$4 sm:$0xff]  }
 0x107   : > { %13227 = vmatpush2.bf16.msra.mxu0 %v18857_v22  ;;  %v18925_v22 = vld [vmem:[#allocation3 + $0xc24] ss:$16 sps:$4 sm:$0xff]  }
 0x108   : > { %13270 = vmatpush2.bf16.msra.mxu1 %v18860_v23  ;;  %13228 = vmatprep.subr.bf16.mxu0 %v18865_v24  ;;  %v18928_v23 = vld [vmem:[#allocation3 + $0xe24] ss:$16 sps:$4 sm:$0xff]   ;;  %v18923_v24 = vld [vmem:[#allocation3 + $0xc20] ss:$16 sps:$4 sm:$0xff]  }
 0x109   : > { %13271 = vmatprep.subr.bf16.mxu1 %v18868_v25  ;;  %v18926_v25 = vld [vmem:[#allocation3 + $0xe20] ss:$16 sps:$4 sm:$0xff]  }
 0x10b   : > { %13229 = vmatpush2.bf16.msra.mxu0 %v18863_v26  ;;  %v18931_v26 = vld [vmem:[#allocation3 + $0xc04] ss:$16 sps:$4 sm:$0xff]  }
 0x10c   : > { %13272 = vmatpush2.bf16.msra.mxu1 %v18866_v27  ;;  %13230 = vmatprep.subr.bf16.mxu0 %v18871_v30  ;;  %v18934_v27 = vld [vmem:[#allocation3 + $0xe04] ss:$16 sps:$4 sm:$0xff]   ;;  %v18929_v30 = vld [vmem:[#allocation3 + $0xc00] ss:$16 sps:$4 sm:$0xff]  }
 0x10d   : > { %13273 = vmatprep.subr.bf16.mxu1 %v18874_v31  ;;  %v18932_v31 = vld [vmem:[#allocation3 + $0xe00] ss:$16 sps:$4 sm:$0xff]  }
 0x10f   : > { %13231 = vmatpush2.bf16.msra.mxu0 %v18869_v32  ;;  %v18937_v32 = vld [vmem:[#allocation3 + $0xde4] ss:$16 sps:$4 sm:$0xff]  }
 0x110   : > { %13274 = vmatpush2.bf16.msra.mxu1 %v18872_v33  ;;  %13232 = vmatprep.subr.bf16.mxu0 %v18877_v34  ;;  %v18940_v33 = vld [vmem:[#allocation3 + $0xfe4] ss:$16 sps:$4 sm:$0xff]   ;;  %v18935_v34 = vld [vmem:[#allocation3 + $0xde0] ss:$16 sps:$4 sm:$0xff]  }
 0x111   : > { %13275 = vmatprep.subr.bf16.mxu1 %v18880_v35  ;;  %v18938_v35 = vld [vmem:[#allocation3 + $0xfe0] ss:$16 sps:$4 sm:$0xff]  }
 0x113   : > { %13233 = vmatpush2.bf16.msra.mxu0 %v18875_v36  ;;  %v18943_v36 = vld [vmem:[#allocation3 + $0xdc4] ss:$16 sps:$4 sm:$0xff]  }
 0x114   : > { %13276 = vmatpush2.bf16.msra.mxu1 %v18878_v37  ;;  %13234 = vmatprep.subr.bf16.mxu0 %v18883_v38  ;;  %v18946_v37 = vld [vmem:[#allocation3 + $0xfc4] ss:$16 sps:$4 sm:$0xff]   ;;  %v18941_v38 = vld [vmem:[#allocation3 + $0xdc0] ss:$16 sps:$4 sm:$0xff]  }
 0x115   : > { %13277 = vmatprep.subr.bf16.mxu1 %v18886_v39  ;;  %v18944_v39 = vld [vmem:[#allocation3 + $0xfc0] ss:$16 sps:$4 sm:$0xff]  }
 0x117   : > { %13235 = vmatpush2.bf16.msra.mxu0 %v18881_v41  ;;  %v18949_v41 = vld [vmem:[#allocation3 + $0xda4] ss:$16 sps:$4 sm:$0xff]  }
 0x118   : > { %13278 = vmatpush2.bf16.msra.mxu1 %v18884_v42  ;;  %13290 = vmatprep.subr.bf16.mxu0 %v18889_v50  ;;  %v18952_v42 = vld [vmem:[#allocation3 + $0xfa4] ss:$16 sps:$4 sm:$0xff]   ;;  %v18953_v50 = vld [vmem:[#allocation3 + $0xd80] ss:$16 sps:$4 sm:$0xff]  }
 0x119   : > { %13333 = vmatprep.subr.bf16.mxu1 %v18892_v51  ;;  %v18956_v51 = vld [vmem:[#allocation3 + $0xf80] ss:$16 sps:$4 sm:$0xff]  }
 0x11a   : > { %13237 = vmatmul.mubr.bf16.vlgmr.msra.gmra.mxu0 %v22105_v58 }
 0x11b   : > { %13280 = vmatmul.mubr.bf16.vlgmr.msra.gmra.mxu1 %v22107_v59  ;;  %13291 = vmatpush1.bf16.msra.mxu0 %v18887_v55  ;;  %v18964_v55 = vld [vmem:[#allocation3 + $0xf64] ss:$16 sps:$4 sm:$0xff]  }
 0x11c   : > { %13334 = vmatpush1.bf16.msra.mxu1 %v18890_v61  ;;  %13292 = vmatprep.subr.bf16.mxu0 %v18895_v62  ;;  %v18970_v61 = vld [vmem:[#allocation3 + $0xf44] ss:$16 sps:$4 sm:$0xff]   ;;  %v18965_v62 = vld [vmem:[#allocation3 + $0xd40] ss:$16 sps:$4 sm:$0xff]  }
 0x11d   : > { %13335 = vmatprep.subr.bf16.mxu1 %v18898_v63  ;;  %13322 = vmatprep.mubr.bf16.mxu0 %v22110_v0  ;;  %v18968_v63 = vld [vmem:[#allocation3 + $0xf40] ss:$16 sps:$4 sm:$0xff]  }
 0x11e   : > { %13365 = vmatprep.mubr.bf16.mxu1 %v22112_v1 }
 0x11f   : > { %13293 = vmatpush1.bf16.msra.mxu0 %v18893_v2  ;;  %v2625_v2 = vlaneseq }
 0x120   : > { %13336 = vmatpush1.bf16.msra.mxu1 %v18896_v3  ;;  %13294 = vmatprep.subr.bf16.mxu0 %v18901_v4  ;;  %v18973_v3 = vld [vmem:[#allocation3 + $0xd24] ss:$16 sps:$4 sm:$0xff]  }
 0x121   : > { %13337 = vmatprep.subr.bf16.mxu1 %v18904_v5  ;;  %v18976_v4 = vld [vmem:[#allocation3 + $0xf24] ss:$16 sps:$4 sm:$0xff]   ;;  %v18971_v5 = vld [vmem:[#allocation3 + $0xd20] ss:$16 sps:$4 sm:$0xff]  }
 0x123   : > { %13295 = vmatpush1.bf16.msra.mxu0 %v18899_v6  ;;  %v18974_v6 = vld [vmem:[#allocation3 + $0xf20] ss:$16 sps:$4 sm:$0xff]  }
 0x124   : > { %13338 = vmatpush1.bf16.msra.mxu1 %v18902_v7  ;;  %13296 = vmatprep.subr.bf16.mxu0 %v18907_v8  ;;  %v22118_v7 = vshrl.u32 %v2625_v2, 7  ;;  %v18979_v8 = vld [vmem:[#allocation3 + $0xd04] ss:$16 sps:$4 sm:$0xff]  }
 0x125   : > { %13339 = vmatprep.subr.bf16.mxu1 %v18910_v9  ;;  %v18982_v9 = vld [vmem:[#allocation3 + $0xf04] ss:$16 sps:$4 sm:$0xff]  }
 0x126   : > { %v19003_v2 = vld [vmem:[#allocation3 + $0x1084] ss:$16 sps:$4 sm:$0xff]  }
 0x127   : > { %13297 = vmatpush1.bf16.msra.mxu0 %v18905_v10  ;;  %v18977_v10 = vld [vmem:[#allocation3 + $0xd00] ss:$16 sps:$4 sm:$0xff]  }
 0x128   : > { %13340 = vmatpush1.bf16.msra.mxu1 %v18908_v11  ;;  %13298 = vmatprep.subr.bf16.mxu0 %v18913_v14  ;;  %v18980_v11 = vld [vmem:[#allocation3 + $0xf00] ss:$16 sps:$4 sm:$0xff]  }
 0x129   : > { %13341 = vmatprep.subr.bf16.mxu1 %v18916_v15  ;;  %v366_v14 = vld [vmem:[%s22046_s14 + $0x60] sm:$0xff]  ;;  %v431_v15 = vld [vmem:[%s22046_s14 + $0x268] sm:$0xff] }
 0x12b   : > { %13299 = vmatpush1.bf16.msra.mxu0 %v18911_v16  ;;  %v368_v16 = vld [vmem:[%s22046_s14 + $0x70] sm:$0xff] }
 0x12c   : > { %13342 = vmatpush1.bf16.msra.mxu1 %v18914_v17  ;;  %13300 = vmatprep.subr.bf16.mxu0 %v18919_v18  ;;  %v2623_v17 = vld [vmem:[#allocation5] sm:$0xf]  ;;  %v433_v18 = vld [vmem:[%s22046_s14 + $0x278] sm:$0xff] }
 0x12d   : > { %13343 = vmatprep.subr.bf16.mxu1 %v18922_v19  ;;  %v2627_v19 = vsub.s32 0, %v22118_v7 }
 0x12f   : > { %13301 = vmatpush1.bf16.msra.mxu0 %v18917_v20  ;;  %v18985_v20 = vld [vmem:[#allocation3 + $0x10e4] ss:$16 sps:$4 sm:$0xff]  }
 0x130   : > { %13344 = vmatpush1.bf16.msra.mxu1 %v18920_v21  ;;  %13302 = vmatprep.subr.bf16.mxu0 %v18925_v22  ;;  %v18988_v21 = vld [vmem:[#allocation3 + $0x12e4] ss:$16 sps:$4 sm:$0xff]   ;;  %v371_v22 = vld [vmem:[%s22046_s14 + $0x88] sm:$0xff] }
 0x131   : > { %13345 = vmatprep.subr.bf16.mxu1 %v18928_v23  ;;  %v18983_v23 = vld [vmem:[#allocation3 + $0x10e0] ss:$16 sps:$4 sm:$0xff]  }
 0x133   : > { %13303 = vmatpush1.bf16.msra.mxu0 %v18923_v24  ;;  %v2631_v24 = vsub.s32 1, %v22118_v7 }
 0x134   : > { %13346 = vmatpush1.bf16.msra.mxu1 %v18926_v25  ;;  %13304 = vmatprep.subr.bf16.mxu0 %v18931_v26  ;;  %v436_v25 = vld [vmem:[%s22046_s14 + $0x290] sm:$0xff]  ;;  %v373_v26 = vld [vmem:[%s22046_s14 + $0x98] sm:$0xff] }
 0x135   : > { %13347 = vmatprep.subr.bf16.mxu1 %v18934_v27  ;;  %v22129_v27 = vpack.c.bf16 %v431_v15, %v366_v14  ;;  %v19015_v14 = vld [vmem:[#allocation3 + $0x1044] ss:$16 sps:$4 sm:$0xff]  }
 0x136   : > { %v19018_v15 = vld [vmem:[#allocation3 + $0x1244] ss:$16 sps:$4 sm:$0xff]  }
 0x137   : > { %13305 = vmatpush1.bf16.msra.mxu0 %v18929_v30  ;;  %v22131_v30 = vpack.c.bf16 %v433_v18, %v368_v16  ;;  %v19013_v16 = vld [vmem:[#allocation3 + $0x1040] ss:$16 sps:$4 sm:$0xff]   ;;  %v19021_v18 = vld [vmem:[#allocation3 + $0x1024] ss:$16 sps:$4 sm:$0xff]  }
 0x138   : > { %13348 = vmatpush1.bf16.msra.mxu1 %v18932_v31  ;;  %13306 = vmatprep.subr.bf16.mxu0 %v18937_v32  ;;  %v438_v31 = vld [vmem:[%s22046_s14 + $0x2a0] sm:$0xff]  ;;  %v2628_v32 = vrot.slane %v2623_v17, %v2627_v19 }
 0x139   : > { %13349 = vmatprep.subr.bf16.mxu1 %v18940_v33  ;;  %v18986_v33 = vld [vmem:[#allocation3 + $0x12e0] ss:$16 sps:$4 sm:$0xff]   ;;  %v19024_v19 = vld [vmem:[#allocation3 + $0x1224] ss:$16 sps:$4 sm:$0xff]  }
 0x13b   : > { %13307 = vmatpush2.bf16.msra.mxu0 %v18935_v34  ;;  %v18991_v34 = vld [vmem:[#allocation3 + $0x10c4] ss:$16 sps:$4 sm:$0xff]  }
 0x13c   : > { %13350 = vmatpush2.bf16.msra.mxu1 %v18938_v35  ;;  %13308 = vmatprep.subr.bf16.mxu0 %v18943_v36  ;;  %v18994_v35 = vld [vmem:[#allocation3 + $0x12c4] ss:$16 sps:$4 sm:$0xff]   ;;  %v22134_v36 = vrot.slane %v2623_v17, %v2631_v24  ;;  %v19016_v17 = vld [vmem:[#allocation3 + $0x1240] ss:$16 sps:$4 sm:$0xff]  }
 0x13d   : > { %13351 = vmatprep.subr.bf16.mxu1 %v18946_v37  ;;  %v22136_v37 = vpack.c.bf16 %v436_v25, %v371_v22  ;;  %v19027_v22 = vld [vmem:[#allocation3 + $0x1004] ss:$16 sps:$4 sm:$0xff]   ;;  %v19025_v24 = vld [vmem:[#allocation3 + $0x1000] ss:$16 sps:$4 sm:$0xff]  }
 0x13e   : > { %23145 = vst [vmem:[#allocation14_spill] sm:$0xff] %v22134_v36  ;;  %v19028_v25 = vld [vmem:[#allocation3 + $0x1200] ss:$16 sps:$4 sm:$0xff]  }
 0x13f   : > { %13309 = vmatpush2.bf16.msra.mxu0 %v18941_v38  ;;  %v22138_v38 = vpack.c.bf16 %v438_v31, %v373_v26  ;;  %v19033_v26 = vld [vmem:[#allocation3 + $0x11e4] ss:$16 sps:$4 sm:$0xff]  }
 0x140   : > { %13352 = vmatpush2.bf16.msra.mxu1 %v18944_v39  ;;  %13310 = vmatprep.subr.bf16.mxu0 %v18949_v41  ;;  %v19036_v31 = vld [vmem:[#allocation3 + $0x13e4] ss:$16 sps:$4 sm:$0xff]  }
 0x141   : > { %13353 = vmatprep.subr.bf16.mxu1 %v18952_v42  ;;  %v18989_v42 = vld [vmem:[#allocation3 + $0x10c0] ss:$16 sps:$4 sm:$0xff]  }
 0x143   : > { %13311 = vmatpush2.bf16.msra.mxu0 %v18947_v43 }
 0x144   : > { %13354 = vmatpush2.bf16.msra.mxu1 %v18950_v44  ;;  %13312 = vmatprep.subr.bf16.mxu0 %v18955_v48  ;;  %v18992_v44 = vld [vmem:[#allocation3 + $0x12c0] ss:$16 sps:$4 sm:$0xff]  }
 0x145   : > { %13355 = vmatprep.subr.bf16.mxu1 %v18958_v49 }
 0x147   : > { %13313 = vmatpush2.bf16.msra.mxu0 %v18953_v50  ;;  %v18997_v50 = vld [vmem:[#allocation3 + $0x10a4] ss:$16 sps:$4 sm:$0xff]  }
 0x148   : > { %13356 = vmatpush2.bf16.msra.mxu1 %v18956_v51  ;;  %13314 = vmatprep.subr.bf16.mxu0 %v18961_v52  ;;  %v19000_v51 = vld [vmem:[#allocation3 + $0x12a4] ss:$16 sps:$4 sm:$0xff]  }
 0x149   : > { %13357 = vmatprep.subr.bf16.mxu1 %v18964_v55 }
 0x14b   : > { %13315 = vmatpush2.bf16.msra.mxu0 %v18959_v56 }
 0x14c   : > { %13358 = vmatpush2.bf16.msra.mxu1 %v18962_v57  ;;  %13316 = vmatprep.subr.bf16.mxu0 %v18967_v60  ;;  %v18995_v57 = vld [vmem:[#allocation3 + $0x10a0] ss:$16 sps:$4 sm:$0xff]  }
 0x14d   : > { %13359 = vmatprep.subr.bf16.mxu1 %v18970_v61 }
 0x14f   : > { %13317 = vmatpush2.bf16.msra.mxu0 %v18965_v62  ;;  %v18998_v62 = vld [vmem:[#allocation3 + $0x12a0] ss:$16 sps:$4 sm:$0xff]  }
 0x150   : > { %13360 = vmatpush2.bf16.msra.mxu1 %v18968_v63  ;;  %13318 = vmatprep.subr.bf16.mxu0 %v18973_v3  ;;  %v19006_v3 = vld [vmem:[#allocation3 + $0x1284] ss:$16 sps:$4 sm:$0xff]  }
 0x151   : > { %13361 = vmatprep.subr.bf16.mxu1 %v18976_v4 }
 0x153   : > { %13319 = vmatpush2.bf16.msra.mxu0 %v18971_v5  ;;  %v19001_v5 = vld [vmem:[#allocation3 + $0x1080] ss:$16 sps:$4 sm:$0xff]  }
 0x154   : > { %13362 = vmatpush2.bf16.msra.mxu1 %v18974_v6  ;;  %13320 = vmatprep.subr.bf16.mxu0 %v18979_v8  ;;  %v19004_v6 = vld [vmem:[#allocation3 + $0x1280] ss:$16 sps:$4 sm:$0xff]   ;;  %v19009_v8 = vld [vmem:[#allocation3 + $0x1064] ss:$16 sps:$4 sm:$0xff]  }
 0x155   : > { %13363 = vmatprep.subr.bf16.mxu1 %v18982_v9  ;;  %v19012_v9 = vld [vmem:[#allocation3 + $0x1264] ss:$16 sps:$4 sm:$0xff]  }
 0x157   : > { %13321 = vmatpush2.bf16.msra.mxu0 %v18977_v10  ;;  %v19007_v10 = vld [vmem:[#allocation3 + $0x1060] ss:$16 sps:$4 sm:$0xff]  }
 0x158   : > { %13364 = vmatpush2.bf16.msra.mxu1 %v18980_v11  ;;  %13376 = vmatprep.subr.bf16.mxu0 %v18985_v20  ;;  %v19010_v11 = vld [vmem:[#allocation3 + $0x1260] ss:$16 sps:$4 sm:$0xff]  }
 0x159   : > { %13419 = vmatprep.subr.bf16.mxu1 %v18988_v21  ;;  %v19019_v20 = vld [vmem:[#allocation3 + $0x1020] ss:$16 sps:$4 sm:$0xff]  }
 0x15a   : > { %v13066_v39 = vpop.f32.mrf.mxu0  ;;  %13323 = vmatmul.mubr.bf16.vlgmr.msra.gmra.mxu0 %v22129_v27  ;;  %v19022_v21 = vld [vmem:[#allocation3 + $0x1220] ss:$16 sps:$4 sm:$0xff]  }
 0x15b   : > { %v13109_v41 = vpop.f32.mrf.mxu1  ;;  %13366 = vmatmul.mubr.bf16.vlgmr.msra.gmra.mxu1 %v22131_v30  ;;  %v13067_v43 = vadd.f32 %v13066_v39, %v2628_v32  ;;  %13377 = vmatpush1.bf16.msra.mxu0 %v18983_v23  ;;  %v19030_v23 = vld [vmem:[#allocation3 + $0x1204] ss:$16 sps:$4 sm:$0xff]   ;;  %v19037_v39 = vld [vmem:[#allocation3 + $0x11c0] ss:$16 sps:$4 sm:$0xff]  }
 0x15c   : > { %13420 = vmatpush1.bf16.msra.mxu1 %v18986_v33  ;;  %v13068_v48 = vpop.f32.mrf.mxu0  ;;  %13378 = vmatprep.subr.bf16.mxu0 %v18991_v34  ;;  %v19034_v33 = vld [vmem:[#allocation3 + $0x13e0] ss:$16 sps:$4 sm:$0xff]   ;;  %v19039_v34 = vld [vmem:[#allocation3 + $0x11c4] ss:$16 sps:$4 sm:$0xff]  }
 0x15d   : > { %v13111_v49 = vpop.f32.mrf.mxu1  ;;  %13421 = vmatprep.subr.bf16.mxu1 %v18994_v35  ;;  %v22142_v52 = vadd.f32 %v13109_v41, %v13067_v43  ;;  %v13069_v55 = vadd.f32 %v13068_v48, %v22134_v36  ;;  %13408 = vmatprep.mubr.bf16.mxu0 %v22136_v37  ;;  %v19042_v35 = vld [vmem:[#allocation3 + $0x13c4] ss:$16 sps:$4 sm:$0xff]   ;;  %v19040_v41 = vld [vmem:[#allocation3 + $0x13c0] ss:$16 sps:$4 sm:$0xff]  }
 0x15e   : > { %13451 = vmatprep.mubr.bf16.mxu1 %v22138_v38  ;;  %v13070_v56 = vpop.f32.mrf.mxu0  ;;  %v19048_v43 = vld [vmem:[#allocation3 + $0x13a4] ss:$16 sps:$4 sm:$0xff]   ;;  %v19046_v48 = vld [vmem:[#allocation3 + $0x13a0] ss:$16 sps:$4 sm:$0xff]  }
 0x15f   : > { %v22147_v60 = vadd.f32 %v13111_v49, %v13069_v55  ;;  %v13071_v61 = vadd.f32 %v13070_v56, %v2628_v32  ;;  %13379 = vmatpush1.bf16.msra.mxu0 %v18989_v42  ;;  %v13113_v63 = vpop.f32.mrf.mxu1  ;;  %v19031_v32 = vld [vmem:[#allocation3 + $0x11e0] ss:$16 sps:$4 sm:$0xff]   ;;  %v19045_v42 = vld [vmem:[#allocation3 + $0x11a4] ss:$16 sps:$4 sm:$0xff]  }
 0x160   : > { %13422 = vmatpush1.bf16.msra.mxu1 %v18992_v44  ;;  %13380 = vmatprep.subr.bf16.mxu0 %v18997_v50  ;;  %v19043_v44 = vld [vmem:[#allocation3 + $0x11a0] ss:$16 sps:$4 sm:$0xff]   ;;  %v19051_v49 = vld [vmem:[#allocation3 + $0x1184] ss:$16 sps:$4 sm:$0xff]  }
 0x161   : > { %13423 = vmatprep.subr.bf16.mxu1 %v19000_v51  ;;  %v22149_v4 = vadd.f32 %v13113_v63, %v13071_v61  ;;  %v19054_v50 = vld [vmem:[#allocation3 + $0x1384] ss:$16 sps:$4 sm:$0xff]   ;;  %v19049_v51 = vld [vmem:[#allocation3 + $0x1180] ss:$16 sps:$4 sm:$0xff]  }
 0x162   : > { %v19052_v55 = vld [vmem:[#allocation3 + $0x1380] ss:$16 sps:$4 sm:$0xff]   ;;  %v19057_v56 = vld [vmem:[#allocation3 + $0x1164] ss:$16 sps:$4 sm:$0xff]  }
 0x163   : > { %13381 = vmatpush1.bf16.msra.mxu0 %v18995_v57  ;;  %v19060_v57 = vld [vmem:[#allocation3 + $0x1364] ss:$16 sps:$4 sm:$0xff]   ;;  %v19055_v61 = vld [vmem:[#allocation3 + $0x1160] ss:$16 sps:$4 sm:$0xff]  }
 0x164   : > { %13424 = vmatpush1.bf16.msra.mxu1 %v18998_v62  ;;  %13382 = vmatprep.subr.bf16.mxu0 %v19003_v2  ;;  %v19058_v62 = vld [vmem:[#allocation3 + $0x1360] ss:$16 sps:$4 sm:$0xff]   ;;  %v19063_v63 = vld [vmem:[#allocation3 + $0x1144] ss:$16 sps:$4 sm:$0xff]  }
 0x165   : > { %13425 = vmatprep.subr.bf16.mxu1 %v19006_v3  ;;  %v19066_v2 = vld [vmem:[#allocation3 + $0x1344] ss:$16 sps:$4 sm:$0xff]   ;;  %v19061_v3 = vld [vmem:[#allocation3 + $0x1140] ss:$16 sps:$4 sm:$0xff]  }
 0x166   : > { %v19655_v36 = vld [vmem:[#allocation3 + $0x2ce0] ss:$16 sps:$4 sm:$0xff]  }
 0x167   : > { %13383 = vmatpush1.bf16.msra.mxu0 %v19001_v5  ;;  %v19064_v5 = vld [vmem:[#allocation3 + $0x1340] ss:$16 sps:$4 sm:$0xff]  }
 0x168   : > { %13426 = vmatpush1.bf16.msra.mxu1 %v19004_v6  ;;  %13384 = vmatprep.subr.bf16.mxu0 %v19009_v8  ;;  %v19069_v6 = vld [vmem:[#allocation3 + $0x1124] ss:$16 sps:$4 sm:$0xff]  }
 0x169   : > { %13427 = vmatprep.subr.bf16.mxu1 %v19012_v9  ;;  %v19072_v8 = vld [vmem:[#allocation3 + $0x1324] ss:$16 sps:$4 sm:$0xff]   ;;  %v19067_v9 = vld [vmem:[#allocation3 + $0x1120] ss:$16 sps:$4 sm:$0xff]  }
 0x16b   : > { %13385 = vmatpush1.bf16.msra.mxu0 %v19007_v10  ;;  %v19070_v10 = vld [vmem:[#allocation3 + $0x1320] ss:$16 sps:$4 sm:$0xff]  }
 0x16c   : > { %13428 = vmatpush1.bf16.msra.mxu1 %v19010_v11  ;;  %13386 = vmatprep.subr.bf16.mxu0 %v19015_v14  ;;  %v19075_v11 = vld [vmem:[#allocation3 + $0x1104] ss:$16 sps:$4 sm:$0xff]  }
 0x16d   : > { %13429 = vmatprep.subr.bf16.mxu1 %v19018_v15  ;;  %v19078_v14 = vld [vmem:[#allocation3 + $0x1304] ss:$16 sps:$4 sm:$0xff]   ;;  %v19073_v15 = vld [vmem:[#allocation3 + $0x1100] ss:$16 sps:$4 sm:$0xff]  }
 0x16f   : > { %13387 = vmatpush1.bf16.msra.mxu0 %v19013_v16  ;;  %v19076_v16 = vld [vmem:[#allocation3 + $0x1300] ss:$16 sps:$4 sm:$0xff]  }
 0x170   : > { %13430 = vmatpush1.bf16.msra.mxu1 %v19016_v17  ;;  %13388 = vmatprep.subr.bf16.mxu0 %v19021_v18  ;;  %v370_v17 = vld [vmem:[%s22046_s14 + $0x80] sm:$0xff]  ;;  %v435_v18 = vld [vmem:[%s22046_s14 + $0x288] sm:$0xff] }
 0x171   : > { %13431 = vmatprep.subr.bf16.mxu1 %v19024_v19  ;;  %v372_v19 = vld [vmem:[%s22046_s14 + $0x90] sm:$0xff] }
 0x173   : > { %13389 = vmatpush1.bf16.msra.mxu0 %v19019_v20  ;;  %v437_v20 = vld [vmem:[%s22046_s14 + $0x298] sm:$0xff] }
 0x174   : > { %13432 = vmatpush1.bf16.msra.mxu1 %v19022_v21  ;;  %13390 = vmatprep.subr.bf16.mxu0 %v19027_v22  ;;  %v19081_v21 = vld [vmem:[#allocation3 + $0x14e4] ss:$16 sps:$4 sm:$0xff]  }
 0x175   : > { %13433 = vmatprep.subr.bf16.mxu1 %v19030_v23  ;;  %v19084_v22 = vld [vmem:[#allocation3 + $0x16e4] ss:$16 sps:$4 sm:$0xff]   ;;  %v375_v23 = vld [vmem:[%s22046_s14 + $0xa8] sm:$0xff] }
 0x177   : > { %13391 = vmatpush1.bf16.msra.mxu0 %v19025_v24  ;;  %v22156_v24 = vpack.c.bf16 %v435_v18, %v370_v17  ;;  %v19108_v17 = vld [vmem:[#allocation3 + $0x1664] ss:$16 sps:$4 sm:$0xff]   ;;  %v19106_v18 = vld [vmem:[#allocation3 + $0x1660] ss:$16 sps:$4 sm:$0xff]  }
 0x178   : > { %13434 = vmatpush1.bf16.msra.mxu1 %v19028_v25  ;;  %13392 = vmatprep.subr.bf16.mxu0 %v19033_v26  ;;  %v22158_v25 = vpack.c.bf16 %v437_v20, %v372_v19  ;;  %v440_v26 = vld [vmem:[%s22046_s14 + $0x2b0] sm:$0xff] }
 0x179   : > { %13435 = vmatprep.subr.bf16.mxu1 %v19036_v31  ;;  %v377_v31 = vld [vmem:[%s22046_s14 + $0xb8] sm:$0xff]  ;;  %v19111_v19 = vld [vmem:[#allocation3 + $0x1444] ss:$16 sps:$4 sm:$0xff]  }
 0x17a   : > { %v19114_v20 = vld [vmem:[#allocation3 + $0x1644] ss:$16 sps:$4 sm:$0xff]  }
 0x17b   : > { %13393 = vmatpush2.bf16.msra.mxu0 %v19031_v32  ;;  %v442_v32 = vld [vmem:[%s22046_s14 + $0x2c0] sm:$0xff] }
 0x17c   : > { %13436 = vmatpush2.bf16.msra.mxu1 %v19034_v33  ;;  %13394 = vmatprep.subr.bf16.mxu0 %v19039_v34  ;;  %v19079_v33 = vld [vmem:[#allocation3 + $0x14e0] ss:$16 sps:$4 sm:$0xff]  }
 0x17d   : > { %13437 = vmatprep.subr.bf16.mxu1 %v19042_v35  ;;  %v19082_v34 = vld [vmem:[#allocation3 + $0x16e0] ss:$16 sps:$4 sm:$0xff]   ;;  %v22163_v35 = vpop.f32.mrf.mxu0 }
 0x17e   : > { %23146 = vst [vmem:[#allocation15_spill] sm:$0xff] %v22163_v35 }
 0x17f   : > { %13395 = vmatpush2.bf16.msra.mxu0 %v19037_v39  ;;  %v22165_v39 = vpop.f32.mrf.mxu1 }
 0x180   : > { %13438 = vmatpush2.bf16.msra.mxu1 %v19040_v41  ;;  %13396 = vmatprep.subr.bf16.mxu0 %v19045_v42  ;;  %23147 = vst [vmem:[#allocation16_spill] sm:$0xff] %v22165_v39  ;;  %v19087_v41 = vld [vmem:[#allocation3 + $0x14c4] ss:$16 sps:$4 sm:$0xff]  }
 0x181   : > { %13439 = vmatprep.subr.bf16.mxu1 %v19048_v43  ;;  %v19090_v42 = vld [vmem:[#allocation3 + $0x16c4] ss:$16 sps:$4 sm:$0xff]   ;;  %v19085_v43 = vld [vmem:[#allocation3 + $0x14c0] ss:$16 sps:$4 sm:$0xff]  }
 0x183   : > { %13397 = vmatpush2.bf16.msra.mxu0 %v19043_v44  ;;  %v19088_v44 = vld [vmem:[#allocation3 + $0x16c0] ss:$16 sps:$4 sm:$0xff]  }
 0x184   : > { %13440 = vmatpush2.bf16.msra.mxu1 %v19046_v48  ;;  %13398 = vmatprep.subr.bf16.mxu0 %v19051_v49  ;;  %v22167_v48 = vpack.c.bf16 %v440_v26, %v375_v23  ;;  %v22169_v49 = vpack.c.bf16 %v442_v32, %v377_v31  ;;  %v19117_v23 = vld [vmem:[#allocation3 + $0x1424] ss:$16 sps:$4 sm:$0xff]   ;;  %v19115_v31 = vld [vmem:[#allocation3 + $0x1420] ss:$16 sps:$4 sm:$0xff]  }
 0x185   : > { %13441 = vmatprep.subr.bf16.mxu1 %v19054_v50  ;;  %v19120_v26 = vld [vmem:[#allocation3 + $0x1624] ss:$16 sps:$4 sm:$0xff]   ;;  %v19118_v32 = vld [vmem:[#allocation3 + $0x1620] ss:$16 sps:$4 sm:$0xff]  }
 0x187   : > { %13399 = vmatpush2.bf16.msra.mxu0 %v19049_v51 }
 0x188   : > { %13442 = vmatpush2.bf16.msra.mxu1 %v19052_v55  ;;  %13400 = vmatprep.subr.bf16.mxu0 %v19057_v56 }
 0x189   : > { %13443 = vmatprep.subr.bf16.mxu1 %v19060_v57 }
 0x18b   : > { %13401 = vmatpush2.bf16.msra.mxu0 %v19055_v61  ;;  %v19093_v61 = vld [vmem:[#allocation3 + $0x14a4] ss:$16 sps:$4 sm:$0xff]  }
 0x18c   : > { %13444 = vmatpush2.bf16.msra.mxu1 %v19058_v62  ;;  %13402 = vmatprep.subr.bf16.mxu0 %v19063_v63  ;;  %v19096_v62 = vld [vmem:[#allocation3 + $0x16a4] ss:$16 sps:$4 sm:$0xff]  }
 0x18d   : > { %13445 = vmatprep.subr.bf16.mxu1 %v19066_v2 }
 0x18f   : > { %13403 = vmatpush2.bf16.msra.mxu0 %v19061_v3  ;;  %v19091_v3 = vld [vmem:[#allocation3 + $0x14a0] ss:$16 sps:$4 sm:$0xff]  }
 0x190   : > { %13446 = vmatpush2.bf16.msra.mxu1 %v19064_v5  ;;  %13404 = vmatprep.subr.bf16.mxu0 %v19069_v6  ;;  %v19094_v5 = vld [vmem:[#allocation3 + $0x16a0] ss:$16 sps:$4 sm:$0xff]  }
 0x191   : > { %13447 = vmatprep.subr.bf16.mxu1 %v19072_v8 }
 0x193   : > { %13405 = vmatpush2.bf16.msra.mxu0 %v19067_v9 }
 0x194   : > { %13448 = vmatpush2.bf16.msra.mxu1 %v19070_v10  ;;  %13406 = vmatprep.subr.bf16.mxu0 %v19075_v11  ;;  %v19099_v10 = vld [vmem:[#allocation3 + $0x1484] ss:$16 sps:$4 sm:$0xff]  }
 0x195   : > { %13449 = vmatprep.subr.bf16.mxu1 %v19078_v14  ;;  %v19102_v11 = vld [vmem:[#allocation3 + $0x1684] ss:$16 sps:$4 sm:$0xff]  }
 0x197   : > { %13407 = vmatpush2.bf16.msra.mxu0 %v19073_v15  ;;  %v19100_v15 = vld [vmem:[#allocation3 + $0x1680] ss:$16 sps:$4 sm:$0xff]  }
 0x198   : > { %13450 = vmatpush2.bf16.msra.mxu1 %v19076_v16  ;;  %13462 = vmatprep.subr.bf16.mxu0 %v19081_v21  ;;  %v19105_v16 = vld [vmem:[#allocation3 + $0x1464] ss:$16 sps:$4 sm:$0xff]   ;;  %v19109_v21 = vld [vmem:[#allocation3 + $0x1440] ss:$16 sps:$4 sm:$0xff]  }
 0x199   : > { %13505 = vmatprep.subr.bf16.mxu1 %v19084_v22  ;;  %v19112_v22 = vld [vmem:[#allocation3 + $0x1640] ss:$16 sps:$4 sm:$0xff]  }
 0x19a   : > { %v13152_v50 = vpop.f32.mrf.mxu0  ;;  %13409 = vmatmul.mubr.bf16.vlgmr.msra.gmra.mxu0 %v22156_v24 }
 0x19b   : > { %v13195_v51 = vpop.f32.mrf.mxu1  ;;  %13452 = vmatmul.mubr.bf16.vlgmr.msra.gmra.mxu1 %v22158_v25  ;;  %v13153_v55 = vadd.f32 %v13152_v50, %v22142_v52  ;;  %13463 = vmatpush1.bf16.msra.mxu0 %v19079_v33  ;;  %v19123_v33 = vld [vmem:[#allocation3 + $0x1404] ss:$16 sps:$4 sm:$0xff]   ;;  %v19127_v50 = vld [vmem:[#allocation3 + $0x15e0] ss:$16 sps:$4 sm:$0xff]  }
 0x19c   : > { %13506 = vmatpush1.bf16.msra.mxu1 %v19082_v34  ;;  %v13154_v56 = vpop.f32.mrf.mxu0  ;;  %13464 = vmatprep.subr.bf16.mxu0 %v19087_v41  ;;  %v19126_v34 = vld [vmem:[#allocation3 + $0x1604] ss:$16 sps:$4 sm:$0xff]   ;;  %v19121_v41 = vld [vmem:[#allocation3 + $0x1400] ss:$16 sps:$4 sm:$0xff]  }
 0x19d   : > { %v13197_v57 = vpop.f32.mrf.mxu1  ;;  %13507 = vmatprep.subr.bf16.mxu1 %v19090_v42  ;;  %v22174_v63 = vadd.f32 %v13195_v51, %v13153_v55  ;;  %v13155_v2 = vadd.f32 %v13154_v56, %v22147_v60  ;;  %13494 = vmatprep.mubr.bf16.mxu0 %v22167_v48  ;;  %v19097_v60 = vld [vmem:[#allocation3 + $0x1480] ss:$16 sps:$4 sm:$0xff]   ;;  %v19135_v55 = vld [vmem:[#allocation3 + $0x15c4] ss:$16 sps:$4 sm:$0xff]  }
 0x19e   : > { %13537 = vmatprep.mubr.bf16.mxu1 %v22169_v49  ;;  %v13156_v6 = vpop.f32.mrf.mxu0  ;;  %v19124_v42 = vld [vmem:[#allocation3 + $0x1600] ss:$16 sps:$4 sm:$0xff]   ;;  %v19138_v56 = vld [vmem:[#allocation3 + $0x17c4] ss:$16 sps:$4 sm:$0xff]  }
 0x19f   : > { %v22179_v52 = vadd.f32 %v13197_v57, %v13155_v2  ;;  %v13157_v8 = vadd.f32 %v13156_v6, %v22149_v4  ;;  %13465 = vmatpush1.bf16.msra.mxu0 %v19085_v43  ;;  %v13199_v9 = vpop.f32.mrf.mxu1  ;;  %v19103_v4 = vld [vmem:[#allocation3 + $0x1460] ss:$16 sps:$4 sm:$0xff]   ;;  %v19129_v43 = vld [vmem:[#allocation3 + $0x15e4] ss:$16 sps:$4 sm:$0xff]  }
 0x1a0   : > { %13508 = vmatpush1.bf16.msra.mxu1 %v19088_v44  ;;  %13466 = vmatprep.subr.bf16.mxu0 %v19093_v61  ;;  %v19132_v44 = vld [vmem:[#allocation3 + $0x17e4] ss:$16 sps:$4 sm:$0xff]   ;;  %v19130_v51 = vld [vmem:[#allocation3 + $0x17e0] ss:$16 sps:$4 sm:$0xff]  }
 0x1a1   : > { %13509 = vmatprep.subr.bf16.mxu1 %v19096_v62  ;;  %v22182_v14 = vadd.f32 %v13199_v9, %v13157_v8  ;;  %v19133_v57 = vld [vmem:[#allocation3 + $0x15c0] ss:$16 sps:$4 sm:$0xff]   ;;  %v19141_v62 = vld [vmem:[#allocation3 + $0x15a4] ss:$16 sps:$4 sm:$0xff]  }
 0x1a2   : > { %v19136_v61 = vld [vmem:[#allocation3 + $0x17c0] ss:$16 sps:$4 sm:$0xff]   ;;  %v19144_v2 = vld [vmem:[#allocation3 + $0x17a4] ss:$16 sps:$4 sm:$0xff]  }
 0x1a3   : > { %13467 = vmatpush1.bf16.msra.mxu0 %v19091_v3  ;;  %v19139_v3 = vld [vmem:[#allocation3 + $0x15a0] ss:$16 sps:$4 sm:$0xff]   ;;  %v19147_v6 = vld [vmem:[#allocation3 + $0x1584] ss:$16 sps:$4 sm:$0xff]  }
 0x1a4   : > { %13510 = vmatpush1.bf16.msra.mxu1 %v19094_v5  ;;  %13468 = vmatprep.subr.bf16.mxu0 %v19099_v10  ;;  %v19142_v5 = vld [vmem:[#allocation3 + $0x17a0] ss:$16 sps:$4 sm:$0xff]   ;;  %v19150_v8 = vld [vmem:[#allocation3 + $0x1784] ss:$16 sps:$4 sm:$0xff]  }
 0x1a5   : > { %13511 = vmatprep.subr.bf16.mxu1 %v19102_v11  ;;  %v19145_v9 = vld [vmem:[#allocation3 + $0x1580] ss:$16 sps:$4 sm:$0xff]   ;;  %v19153_v11 = vld [vmem:[#allocation3 + $0x1564] ss:$16 sps:$4 sm:$0xff]  }
 0x1a6   : > { %v19148_v10 = vld [vmem:[#allocation3 + $0x1780] ss:$16 sps:$4 sm:$0xff]  }
 0x1a7   : > { %13469 = vmatpush1.bf16.msra.mxu0 %v19097_v60  ;;  %v19156_v60 = vld [vmem:[#allocation3 + $0x1764] ss:$16 sps:$4 sm:$0xff]  }
 0x1a8   : > { %13512 = vmatpush1.bf16.msra.mxu1 %v19100_v15  ;;  %13470 = vmatprep.subr.bf16.mxu0 %v19105_v16  ;;  %v19151_v15 = vld [vmem:[#allocation3 + $0x1560] ss:$16 sps:$4 sm:$0xff]  }
 0x1a9   : > { %13513 = vmatprep.subr.bf16.mxu1 %v19108_v17  ;;  %v19154_v16 = vld [vmem:[#allocation3 + $0x1760] ss:$16 sps:$4 sm:$0xff]   ;;  %v19159_v17 = vld [vmem:[#allocation3 + $0x1544] ss:$16 sps:$4 sm:$0xff]  }
 0x1ab   : > { %13471 = vmatpush1.bf16.msra.mxu0 %v19103_v4  ;;  %v19162_v4 = vld [vmem:[#allocation3 + $0x1744] ss:$16 sps:$4 sm:$0xff]  }
 0x1ac   : > { %13514 = vmatpush1.bf16.msra.mxu1 %v19106_v18  ;;  %13472 = vmatprep.subr.bf16.mxu0 %v19111_v19  ;;  %v19157_v18 = vld [vmem:[#allocation3 + $0x1540] ss:$16 sps:$4 sm:$0xff]  }
 0x1ad   : > { %13515 = vmatprep.subr.bf16.mxu1 %v19114_v20  ;;  %v19160_v19 = vld [vmem:[#allocation3 + $0x1740] ss:$16 sps:$4 sm:$0xff]   ;;  %v19165_v20 = vld [vmem:[#allocation3 + $0x1524] ss:$16 sps:$4 sm:$0xff]  }
 0x1af   : > { %13473 = vmatpush1.bf16.msra.mxu0 %v19109_v21  ;;  %v19168_v21 = vld [vmem:[#allocation3 + $0x1724] ss:$16 sps:$4 sm:$0xff]  }
 0x1b0   : > { %13516 = vmatpush1.bf16.msra.mxu1 %v19112_v22  ;;  %13474 = vmatprep.subr.bf16.mxu0 %v19117_v23  ;;  %v19163_v22 = vld [vmem:[#allocation3 + $0x1520] ss:$16 sps:$4 sm:$0xff]  }
 0x1b1   : > { %13517 = vmatprep.subr.bf16.mxu1 %v19120_v26  ;;  %v19166_v23 = vld [vmem:[#allocation3 + $0x1720] ss:$16 sps:$4 sm:$0xff]   ;;  %v19171_v26 = vld [vmem:[#allocation3 + $0x1504] ss:$16 sps:$4 sm:$0xff]  }
 0x1b3   : > { %13475 = vmatpush1.bf16.msra.mxu0 %v19115_v31  ;;  %v19174_v31 = vld [vmem:[#allocation3 + $0x1704] ss:$16 sps:$4 sm:$0xff]  }
 0x1b4   : > { %13518 = vmatpush1.bf16.msra.mxu1 %v19118_v32  ;;  %13476 = vmatprep.subr.bf16.mxu0 %v19123_v33  ;;  %v19169_v32 = vld [vmem:[#allocation3 + $0x1500] ss:$16 sps:$4 sm:$0xff]  }
 0x1b5   : > { %13519 = vmatprep.subr.bf16.mxu1 %v19126_v34  ;;  %v19172_v33 = vld [vmem:[#allocation3 + $0x1700] ss:$16 sps:$4 sm:$0xff]  }
 0x1b6   : > { %v374_v34 = vld [vmem:[%s22046_s14 + $0xa0] sm:$0xff] }
 0x1b7   : > { %13477 = vmatpush1.bf16.msra.mxu0 %v19121_v41  ;;  %v439_v41 = vld [vmem:[%s22046_s14 + $0x2a8] sm:$0xff] }
 0x1b8   : > { %13520 = vmatpush1.bf16.msra.mxu1 %v19124_v42  ;;  %13478 = vmatprep.subr.bf16.mxu0 %v19129_v43  ;;  %v376_v42 = vld [vmem:[%s22046_s14 + $0xb0] sm:$0xff]  ;;  %v441_v43 = vld [vmem:[%s22046_s14 + $0x2b8] sm:$0xff] }
 0x1b9   : > { %13521 = vmatprep.subr.bf16.mxu1 %v19132_v44  ;;  %v19177_v44 = vld [vmem:[#allocation3 + $0x18e4] ss:$16 sps:$4 sm:$0xff]  }
 0x1bb   : > { %13479 = vmatpush2.bf16.msra.mxu0 %v19127_v50  ;;  %v19180_v50 = vld [vmem:[#allocation3 + $0x1ae4] ss:$16 sps:$4 sm:$0xff]  }
 0x1bc   : > { %13522 = vmatpush2.bf16.msra.mxu1 %v19130_v51  ;;  %13480 = vmatprep.subr.bf16.mxu0 %v19135_v55  ;;  %v379_v51 = vld [vmem:[%s22046_s14 + $0xc8] sm:$0xff]  ;;  %v22189_v55 = vpack.c.bf16 %v439_v41, %v374_v34  ;;  %v19195_v34 = vld [vmem:[#allocation3 + $0x1884] ss:$16 sps:$4 sm:$0xff]  }
 0x1bd   : > { %13523 = vmatprep.subr.bf16.mxu1 %v19138_v56  ;;  %v22191_v56 = vpack.c.bf16 %v441_v43, %v376_v42  ;;  %v19198_v41 = vld [vmem:[#allocation3 + $0x1a84] ss:$16 sps:$4 sm:$0xff]   ;;  %v19196_v43 = vld [vmem:[#allocation3 + $0x1a80] ss:$16 sps:$4 sm:$0xff]  }
 0x1bf   : > { %13481 = vmatpush2.bf16.msra.mxu0 %v19133_v57  ;;  %v444_v57 = vld [vmem:[%s22046_s14 + $0x2d0] sm:$0xff] }
 0x1c0   : > { %13524 = vmatpush2.bf16.msra.mxu1 %v19136_v61  ;;  %13482 = vmatprep.subr.bf16.mxu0 %v19141_v62  ;;  %v381_v61 = vld [vmem:[%s22046_s14 + $0xd8] sm:$0xff]  ;;  %v446_v62 = vld [vmem:[%s22046_s14 + $0x2e0] sm:$0xff] }
 0x1c1   : > { %13525 = vmatprep.subr.bf16.mxu1 %v19144_v2  ;;  %v19175_v2 = vld [vmem:[#allocation3 + $0x18e0] ss:$16 sps:$4 sm:$0xff]  }
 0x1c3   : > { %13483 = vmatpush2.bf16.msra.mxu0 %v19139_v3  ;;  %v19178_v3 = vld [vmem:[#allocation3 + $0x1ae0] ss:$16 sps:$4 sm:$0xff]  }
 0x1c4   : > { %13526 = vmatpush2.bf16.msra.mxu1 %v19142_v5  ;;  %13484 = vmatprep.subr.bf16.mxu0 %v19147_v6  ;;  %v22196_v5 = vpop.f32.mrf.mxu0  ;;  %v22198_v6 = vpop.f32.mrf.mxu1 }
 0x1c5   : > { %13527 = vmatprep.subr.bf16.mxu1 %v19150_v8  ;;  %23148 = vst [vmem:[#allocation17_spill] sm:$0xff] %v22196_v5  ;;  %23149 = vst [vmem:[#allocation18_spill] sm:$0xff] %v22198_v6  ;;  %v19183_v8 = vld [vmem:[#allocation3 + $0x18c4] ss:$16 sps:$4 sm:$0xff]   ;;  %v19559_v6 = vld [vmem:[#allocation3 + $0x28e0] ss:$16 sps:$4 sm:$0xff]  }
 0x1c6   : > { %v19562_v5 = vld [vmem:[#allocation3 + $0x2ae0] ss:$16 sps:$4 sm:$0xff]  }
 0x1c7   : > { %13485 = vmatpush2.bf16.msra.mxu0 %v19145_v9  ;;  %v19186_v9 = vld [vmem:[#allocation3 + $0x1ac4] ss:$16 sps:$4 sm:$0xff]  }
 0x1c8   : > { %13528 = vmatpush2.bf16.msra.mxu1 %v19148_v10  ;;  %13486 = vmatprep.subr.bf16.mxu0 %v19153_v11  ;;  %v19181_v10 = vld [vmem:[#allocation3 + $0x18c0] ss:$16 sps:$4 sm:$0xff]  }
 0x1c9   : > { %13529 = vmatprep.subr.bf16.mxu1 %v19156_v60  ;;  %v19184_v11 = vld [vmem:[#allocation3 + $0x1ac0] ss:$16 sps:$4 sm:$0xff]   ;;  %v22200_v60 = vpack.c.bf16 %v444_v57, %v379_v51  ;;  %v19207_v57 = vld [vmem:[#allocation3 + $0x1844] ss:$16 sps:$4 sm:$0xff]  }
 0x1ca   : > { %v19202_v51 = vld [vmem:[#allocation3 + $0x1a60] ss:$16 sps:$4 sm:$0xff]  }
 0x1cb   : > { %13487 = vmatpush2.bf16.msra.mxu0 %v19151_v15  ;;  %v22202_v15 = vpack.c.bf16 %v446_v62, %v381_v61  ;;  %v19210_v61 = vld [vmem:[#allocation3 + $0x1a44] ss:$16 sps:$4 sm:$0xff]   ;;  %v19205_v62 = vld [vmem:[#allocation3 + $0x1840] ss:$16 sps:$4 sm:$0xff]  }
 0x1cc   : > { %13530 = vmatpush2.bf16.msra.mxu1 %v19154_v16  ;;  %13488 = vmatprep.subr.bf16.mxu0 %v19159_v17 }
 0x1cd   : > { %13531 = vmatprep.subr.bf16.mxu1 %v19162_v4 }
 0x1cf   : > { %13489 = vmatpush2.bf16.msra.mxu0 %v19157_v18 }
 0x1d0   : > { %13532 = vmatpush2.bf16.msra.mxu1 %v19160_v19  ;;  %13490 = vmatprep.subr.bf16.mxu0 %v19165_v20  ;;  %v19189_v20 = vld [vmem:[#allocation3 + $0x18a4] ss:$16 sps:$4 sm:$0xff]  }
 0x1d1   : > { %13533 = vmatprep.subr.bf16.mxu1 %v19168_v21  ;;  %v19192_v21 = vld [vmem:[#allocation3 + $0x1aa4] ss:$16 sps:$4 sm:$0xff]  }
 0x1d3   : > { %13491 = vmatpush2.bf16.msra.mxu0 %v19163_v22 }
 0x1d4   : > { %13534 = vmatpush2.bf16.msra.mxu1 %v19166_v23  ;;  %13492 = vmatprep.subr.bf16.mxu0 %v19171_v26  ;;  %v19187_v26 = vld [vmem:[#allocation3 + $0x18a0] ss:$16 sps:$4 sm:$0xff]  }
 0x1d5   : > { %13535 = vmatprep.subr.bf16.mxu1 %v19174_v31  ;;  %v19190_v31 = vld [vmem:[#allocation3 + $0x1aa0] ss:$16 sps:$4 sm:$0xff]  }
 0x1d7   : > { %13493 = vmatpush2.bf16.msra.mxu0 %v19169_v32 }
 0x1d8   : > { %13536 = vmatpush2.bf16.msra.mxu1 %v19172_v33  ;;  %13548 = vmatprep.subr.bf16.mxu0 %v19177_v44  ;;  %v19201_v44 = vld [vmem:[#allocation3 + $0x1864] ss:$16 sps:$4 sm:$0xff]  }
 0x1d9   : > { %13591 = vmatprep.subr.bf16.mxu1 %v19180_v50  ;;  %v19204_v50 = vld [vmem:[#allocation3 + $0x1a64] ss:$16 sps:$4 sm:$0xff]  }
 0x1da   : > { %v13238_v16 = vpop.f32.mrf.mxu0  ;;  %13495 = vmatmul.mubr.bf16.vlgmr.msra.gmra.mxu0 %v22189_v55 }
 0x1db   : > { %v13281_v17 = vpop.f32.mrf.mxu1  ;;  %13538 = vmatmul.mubr.bf16.vlgmr.msra.gmra.mxu1 %v22191_v56  ;;  %v13239_v4 = vadd.f32 %v13238_v16, %v22174_v63  ;;  %13549 = vmatpush1.bf16.msra.mxu0 %v19175_v2  ;;  %v19208_v2 = vld [vmem:[#allocation3 + $0x1a40] ss:$16 sps:$4 sm:$0xff]   ;;  %v19222_v16 = vld [vmem:[#allocation3 + $0x1a04] ss:$16 sps:$4 sm:$0xff]  }
 0x1dc   : > { %13592 = vmatpush1.bf16.msra.mxu1 %v19178_v3  ;;  %v13240_v18 = vpop.f32.mrf.mxu0  ;;  %13550 = vmatprep.subr.bf16.mxu0 %v19183_v8  ;;  %v19213_v3 = vld [vmem:[#allocation3 + $0x1824] ss:$16 sps:$4 sm:$0xff]  }
 0x1dd   : > { %v22207_v19 = vpop.f32.mrf.mxu1  ;;  %13593 = vmatprep.subr.bf16.mxu1 %v19186_v9  ;;  %v22209_v22 = vadd.f32 %v13281_v17, %v13239_v4  ;;  %v22212_v23 = vadd.f32 %v13240_v18, %v22179_v52  ;;  %13580 = vmatprep.mubr.bf16.mxu0 %v22200_v60  ;;  %v19193_v52 = vld [vmem:[#allocation3 + $0x1880] ss:$16 sps:$4 sm:$0xff]   ;;  %v19216_v8 = vld [vmem:[#allocation3 + $0x1a24] ss:$16 sps:$4 sm:$0xff]  }
 0x1de   : > { %23150 = vst [vmem:[#allocation19_spill] sm:$0xff] %v22207_v19  ;;  %13623 = vmatprep.mubr.bf16.mxu1 %v22202_v15  ;;  %v13242_v63 = vpop.f32.mrf.mxu0  ;;  %v19211_v9 = vld [vmem:[#allocation3 + $0x1820] ss:$16 sps:$4 sm:$0xff]   ;;  %v19225_v18 = vld [vmem:[#allocation3 + $0x19e4] ss:$16 sps:$4 sm:$0xff]  }
 0x1df   : > { %23151 = vst [vmem:[#allocation20_spill] sm:$0xff] %v22212_v23  ;;  %v13243_v32 = vadd.f32 %v13242_v63, %v22182_v14  ;;  %13551 = vmatpush1.bf16.msra.mxu0 %v19181_v10  ;;  %v13285_v33 = vpop.f32.mrf.mxu1  ;;  %v19199_v14 = vld [vmem:[#allocation3 + $0x1860] ss:$16 sps:$4 sm:$0xff]   ;;  %v19234_v63 = vld [vmem:[#allocation3 + $0x1bc4] ss:$16 sps:$4 sm:$0xff]  }
 0x1e0   : > { %13594 = vmatpush1.bf16.msra.mxu1 %v19184_v11  ;;  %13552 = vmatprep.subr.bf16.mxu0 %v19189_v20  ;;  %v19214_v10 = vld [vmem:[#allocation3 + $0x1a20] ss:$16 sps:$4 sm:$0xff]   ;;  %v19219_v11 = vld [vmem:[#allocation3 + $0x1804] ss:$16 sps:$4 sm:$0xff]  }
 0x1e1   : > { %13595 = vmatprep.subr.bf16.mxu1 %v19192_v21  ;;  %v22217_v42 = vadd.f32 %v13285_v33, %v13243_v32  ;;  %v19217_v17 = vld [vmem:[#allocation3 + $0x1800] ss:$16 sps:$4 sm:$0xff]   ;;  %v19228_v20 = vld [vmem:[#allocation3 + $0x1be4] ss:$16 sps:$4 sm:$0xff]  }
 0x1e2   : > { %v19220_v4 = vld [vmem:[#allocation3 + $0x1a00] ss:$16 sps:$4 sm:$0xff]  }
 0x1e3   : > { %13553 = vmatpush1.bf16.msra.mxu0 %v19187_v26  ;;  %v19223_v21 = vld [vmem:[#allocation3 + $0x19e0] ss:$16 sps:$4 sm:$0xff]  }
 0x1e4   : > { %13596 = vmatpush1.bf16.msra.mxu1 %v19190_v31  ;;  %13554 = vmatprep.subr.bf16.mxu0 %v19195_v34  ;;  %v19226_v26 = vld [vmem:[#allocation3 + $0x1be0] ss:$16 sps:$4 sm:$0xff]   ;;  %v19231_v31 = vld [vmem:[#allocation3 + $0x19c4] ss:$16 sps:$4 sm:$0xff]  }
 0x1e5   : > { %13597 = vmatprep.subr.bf16.mxu1 %v19198_v41  ;;  %v19229_v32 = vld [vmem:[#allocation3 + $0x19c0] ss:$16 sps:$4 sm:$0xff]   ;;  %v19237_v34 = vld [vmem:[#allocation3 + $0x19a4] ss:$16 sps:$4 sm:$0xff]  }
 0x1e6   : > { %v19232_v33 = vld [vmem:[#allocation3 + $0x1bc0] ss:$16 sps:$4 sm:$0xff]   ;;  %v19240_v41 = vld [vmem:[#allocation3 + $0x1ba4] ss:$16 sps:$4 sm:$0xff]  }
 0x1e7   : > { %13555 = vmatpush1.bf16.msra.mxu0 %v19193_v52  ;;  %v19235_v52 = vld [vmem:[#allocation3 + $0x19a0] ss:$16 sps:$4 sm:$0xff]  }
 0x1e8   : > { %13598 = vmatpush1.bf16.msra.mxu1 %v19196_v43  ;;  %13556 = vmatprep.subr.bf16.mxu0 %v19201_v44  ;;  %v19238_v43 = vld [vmem:[#allocation3 + $0x1ba0] ss:$16 sps:$4 sm:$0xff]   ;;  %v19243_v44 = vld [vmem:[#allocation3 + $0x1984] ss:$16 sps:$4 sm:$0xff]  }
 0x1e9   : > { %13599 = vmatprep.subr.bf16.mxu1 %v19204_v50  ;;  %v19246_v50 = vld [vmem:[#allocation3 + $0x1b84] ss:$16 sps:$4 sm:$0xff]   ;;  %v19463_v19 = vld [vmem:[#allocation3 + $0x24e0] ss:$16 sps:$4 sm:$0xff]  }
 0x1ea   : > { %v19466_v23 = vld [vmem:[#allocation3 + $0x26e0] ss:$16 sps:$4 sm:$0xff]  }
 0x1eb   : > { %13557 = vmatpush1.bf16.msra.mxu0 %v19199_v14  ;;  %v19241_v14 = vld [vmem:[#allocation3 + $0x1980] ss:$16 sps:$4 sm:$0xff]  }
 0x1ec   : > { %13600 = vmatpush1.bf16.msra.mxu1 %v19202_v51  ;;  %13558 = vmatprep.subr.bf16.mxu0 %v19207_v57  ;;  %v19244_v51 = vld [vmem:[#allocation3 + $0x1b80] ss:$16 sps:$4 sm:$0xff]   ;;  %v19249_v57 = vld [vmem:[#allocation3 + $0x1964] ss:$16 sps:$4 sm:$0xff]  }
 0x1ed   : > { %13601 = vmatprep.subr.bf16.mxu1 %v19210_v61  ;;  %v19252_v61 = vld [vmem:[#allocation3 + $0x1b64] ss:$16 sps:$4 sm:$0xff]  }
 0x1ef   : > { %13559 = vmatpush1.bf16.msra.mxu0 %v19205_v62  ;;  %v19247_v62 = vld [vmem:[#allocation3 + $0x1960] ss:$16 sps:$4 sm:$0xff]  }
 0x1f0   : > { %13602 = vmatpush1.bf16.msra.mxu1 %v19208_v2  ;;  %13560 = vmatprep.subr.bf16.mxu0 %v19213_v3  ;;  %v19250_v2 = vld [vmem:[#allocation3 + $0x1b60] ss:$16 sps:$4 sm:$0xff]   ;;  %v19255_v3 = vld [vmem:[#allocation3 + $0x1944] ss:$16 sps:$4 sm:$0xff]  }
 0x1f1   : > { %13603 = vmatprep.subr.bf16.mxu1 %v19216_v8  ;;  %v19258_v8 = vld [vmem:[#allocation3 + $0x1b44] ss:$16 sps:$4 sm:$0xff]  }
 0x1f3   : > { %13561 = vmatpush1.bf16.msra.mxu0 %v19211_v9  ;;  %v19253_v9 = vld [vmem:[#allocation3 + $0x1940] ss:$16 sps:$4 sm:$0xff]  }
 0x1f4   : > { %13604 = vmatpush1.bf16.msra.mxu1 %v19214_v10  ;;  %13562 = vmatprep.subr.bf16.mxu0 %v19219_v11  ;;  %v19256_v10 = vld [vmem:[#allocation3 + $0x1b40] ss:$16 sps:$4 sm:$0xff]   ;;  %v19261_v11 = vld [vmem:[#allocation3 + $0x1924] ss:$16 sps:$4 sm:$0xff]  }
 0x1f5   : > { %13605 = vmatprep.subr.bf16.mxu1 %v19222_v16  ;;  %v19264_v16 = vld [vmem:[#allocation3 + $0x1b24] ss:$16 sps:$4 sm:$0xff]  }
 0x1f7   : > { %13563 = vmatpush1.bf16.msra.mxu0 %v19217_v17  ;;  %v19259_v17 = vld [vmem:[#allocation3 + $0x1920] ss:$16 sps:$4 sm:$0xff]  }
 0x1f8   : > { %13606 = vmatpush1.bf16.msra.mxu1 %v19220_v4  ;;  %13564 = vmatprep.subr.bf16.mxu0 %v19225_v18  ;;  %v19262_v4 = vld [vmem:[#allocation3 + $0x1b20] ss:$16 sps:$4 sm:$0xff]   ;;  %v19267_v18 = vld [vmem:[#allocation3 + $0x1904] ss:$16 sps:$4 sm:$0xff]  }
 0x1f9   : > { %13607 = vmatprep.subr.bf16.mxu1 %v19228_v20  ;;  %v19270_v20 = vld [vmem:[#allocation3 + $0x1b04] ss:$16 sps:$4 sm:$0xff]  }
 0x1fb   : > { %13565 = vmatpush2.bf16.msra.mxu0 %v19223_v21  ;;  %v19265_v21 = vld [vmem:[#allocation3 + $0x1900] ss:$16 sps:$4 sm:$0xff]  }
 0x1fc   : > { %13608 = vmatpush2.bf16.msra.mxu1 %v19226_v26  ;;  %13566 = vmatprep.subr.bf16.mxu0 %v19231_v31  ;;  %v19268_v26 = vld [vmem:[#allocation3 + $0x1b00] ss:$16 sps:$4 sm:$0xff]  }
 0x1fd   : > { %13609 = vmatprep.subr.bf16.mxu1 %v19234_v63  ;;  %v378_v31 = vld [vmem:[%s22046_s14 + $0xc0] sm:$0xff]  ;;  %v443_v63 = vld [vmem:[%s22046_s14 + $0x2c8] sm:$0xff] }
 0x1ff   : > { %13567 = vmatpush2.bf16.msra.mxu0 %v19229_v32  ;;  %v380_v32 = vld [vmem:[%s22046_s14 + $0xd0] sm:$0xff] }
 0x200   : > { %13610 = vmatpush2.bf16.msra.mxu1 %v19232_v33  ;;  %13568 = vmatprep.subr.bf16.mxu0 %v19237_v34  ;;  %v445_v33 = vld [vmem:[%s22046_s14 + $0x2d8] sm:$0xff]  ;;  %v19273_v34 = vld [vmem:[#allocation3 + $0x1ce4] ss:$16 sps:$4 sm:$0xff]  }
 0x201   : > { %13611 = vmatprep.subr.bf16.mxu1 %v19240_v41  ;;  %v19276_v41 = vld [vmem:[#allocation3 + $0x1ee4] ss:$16 sps:$4 sm:$0xff]  }
 0x203   : > { %13569 = vmatpush2.bf16.msra.mxu0 %v19235_v52  ;;  %v383_v52 = vld [vmem:[%s22046_s14 + $0xe8] sm:$0xff] }
 0x204   : > { %13612 = vmatpush2.bf16.msra.mxu1 %v19238_v43  ;;  %13570 = vmatprep.subr.bf16.mxu0 %v19243_v44  ;;  %v22224_v43 = vpack.c.bf16 %v443_v63, %v378_v31  ;;  %v22226_v44 = vpack.c.bf16 %v445_v33, %v380_v32  ;;  %v19288_v31 = vld [vmem:[#allocation3 + $0x1ea4] ss:$16 sps:$4 sm:$0xff]   ;;  %v19283_v32 = vld [vmem:[#allocation3 + $0x1ca0] ss:$16 sps:$4 sm:$0xff]  }
 0x205   : > { %13613 = vmatprep.subr.bf16.mxu1 %v19246_v50  ;;  %v448_v50 = vld [vmem:[%s22046_s14 + $0x2f0] sm:$0xff] }
 0x206   : > { %v19286_v33 = vld [vmem:[#allocation3 + $0x1ea0] ss:$16 sps:$4 sm:$0xff]  }
 0x207   : > { %13571 = vmatpush2.bf16.msra.mxu0 %v19241_v14  ;;  %v385_v14 = vld [vmem:[%s22046_s14 + $0xf8] sm:$0xff] }
 0x208   : > { %13614 = vmatpush2.bf16.msra.mxu1 %v19244_v51  ;;  %13572 = vmatprep.subr.bf16.mxu0 %v19249_v57  ;;  %v450_v51 = vld [vmem:[%s22046_s14 + $0x300] sm:$0xff] }
 0x209   : > { %13615 = vmatprep.subr.bf16.mxu1 %v19252_v61  ;;  %v19271_v57 = vld [vmem:[#allocation3 + $0x1ce0] ss:$16 sps:$4 sm:$0xff]  }
 0x20a   : > { %v19274_v61 = vld [vmem:[#allocation3 + $0x1ee0] ss:$16 sps:$4 sm:$0xff]  }
 0x20b   : > { %13573 = vmatpush2.bf16.msra.mxu0 %v19247_v62  ;;  %v22231_v62 = vpop.f32.mrf.mxu0 }
 0x20c   : > { %13616 = vmatpush2.bf16.msra.mxu1 %v19250_v2  ;;  %13574 = vmatprep.subr.bf16.mxu0 %v19255_v3  ;;  %23152 = vst [vmem:[#allocation21_spill] sm:$0xff] %v22231_v62  ;;  %v22233_v2 = vpop.f32.mrf.mxu1  ;;  %v19279_v3 = vld [vmem:[#allocation3 + $0x1cc4] ss:$16 sps:$4 sm:$0xff]  }
 0x20d   : > { %13617 = vmatprep.subr.bf16.mxu1 %v19258_v8  ;;  %23153 = vst [vmem:[#allocation22_spill] sm:$0xff] %v22233_v2  ;;  %v19282_v8 = vld [vmem:[#allocation3 + $0x1ec4] ss:$16 sps:$4 sm:$0xff]  }
 0x20f   : > { %13575 = vmatpush2.bf16.msra.mxu0 %v19253_v9  ;;  %v19277_v9 = vld [vmem:[#allocation3 + $0x1cc0] ss:$16 sps:$4 sm:$0xff]  }
 0x210   : > { %13618 = vmatpush2.bf16.msra.mxu1 %v19256_v10  ;;  %13576 = vmatprep.subr.bf16.mxu0 %v19261_v11  ;;  %v19280_v10 = vld [vmem:[#allocation3 + $0x1ec0] ss:$16 sps:$4 sm:$0xff]   ;;  %v22235_v11 = vpack.c.bf16 %v448_v50, %v383_v52  ;;  %v19291_v52 = vld [vmem:[#allocation3 + $0x1c84] ss:$16 sps:$4 sm:$0xff]  }
 0x211   : > { %13619 = vmatprep.subr.bf16.mxu1 %v19264_v16  ;;  %v22237_v16 = vpack.c.bf16 %v450_v51, %v385_v14  ;;  %v19294_v50 = vld [vmem:[#allocation3 + $0x1e84] ss:$16 sps:$4 sm:$0xff]   ;;  %v19289_v51 = vld [vmem:[#allocation3 + $0x1c80] ss:$16 sps:$4 sm:$0xff]  }
 0x213   : > { %13577 = vmatpush2.bf16.msra.mxu0 %v19259_v17 }
 0x214   : > { %13620 = vmatpush2.bf16.msra.mxu1 %v19262_v4  ;;  %13578 = vmatprep.subr.bf16.mxu0 %v19267_v18 }
 0x215   : > { %13621 = vmatprep.subr.bf16.mxu1 %v19270_v20 }
 0x217   : > { %13579 = vmatpush2.bf16.msra.mxu0 %v19265_v21 }
 0x218   : > { %13622 = vmatpush2.bf16.msra.mxu1 %v19268_v26  ;;  %13634 = vmatprep.subr.bf16.mxu0 %v19273_v34  ;;  %v19285_v26 = vld [vmem:[#allocation3 + $0x1ca4] ss:$16 sps:$4 sm:$0xff]  }
 0x219   : > { %13677 = vmatprep.subr.bf16.mxu1 %v19276_v41 }
 0x21a   : > { %v13324_v17 = vpop.f32.mrf.mxu0  ;;  %13581 = vmatmul.mubr.bf16.vlgmr.msra.gmra.mxu0 %v22224_v43 }
 0x21b   : > { %v13367_v4 = vpop.f32.mrf.mxu1  ;;  %13624 = vmatmul.mubr.bf16.vlgmr.msra.gmra.mxu1 %v22226_v44  ;;  %v13325_v18 = vadd.f32 %v13324_v17, %v22209_v22  ;;  %13635 = vmatpush1.bf16.msra.mxu0 %v19271_v57  ;;  %v19292_v57 = vld [vmem:[#allocation3 + $0x1e80] ss:$16 sps:$4 sm:$0xff]  }
 0x21c   : > { %13678 = vmatpush1.bf16.msra.mxu1 %v19274_v61  ;;  %v22242_v20 = vpop.f32.mrf.mxu0  ;;  %13636 = vmatprep.subr.bf16.mxu0 %v19279_v3  ;;  %v19297_v61 = vld [vmem:[#allocation3 + $0x1c64] ss:$16 sps:$4 sm:$0xff]   ;;  %v19301_v17 = vld [vmem:[#allocation3 + $0x1c40] ss:$16 sps:$4 sm:$0xff]  }
 0x21d   : > { %23154 = vst [vmem:[#allocation23_spill] sm:$0xff] %v22242_v20  ;;  %v22244_v21 = vpop.f32.mrf.mxu1  ;;  %13679 = vmatprep.subr.bf16.mxu1 %v19282_v8  ;;  %v22246_v63 = vadd.f32 %v13367_v4, %v13325_v18  ;;  %13666 = vmatprep.mubr.bf16.mxu0 %v22235_v11  ;;  %v19300_v3 = vld [vmem:[#allocation3 + $0x1e64] ss:$16 sps:$4 sm:$0xff]   ;;  %v19298_v8 = vld [vmem:[#allocation3 + $0x1e60] ss:$16 sps:$4 sm:$0xff]  }
 0x21e   : > { %23155 = vst [vmem:[#allocation24_spill] sm:$0xff] %v22244_v21  ;;  %13709 = vmatprep.mubr.bf16.mxu1 %v22237_v16  ;;  %v13328_v34 = vpop.f32.mrf.mxu0  ;;  %v19304_v4 = vld [vmem:[#allocation3 + $0x1e40] ss:$16 sps:$4 sm:$0xff]   ;;  %v19309_v18 = vld [vmem:[#allocation3 + $0x1c24] ss:$16 sps:$4 sm:$0xff]  }
 0x21f   : > { %v13329_v22 = vadd.f32 %v13328_v34, %v22217_v42  ;;  %13637 = vmatpush1.bf16.msra.mxu0 %v19277_v9  ;;  %v13371_v41 = vpop.f32.mrf.mxu1  ;;  %v19295_v42 = vld [vmem:[#allocation3 + $0x1c60] ss:$16 sps:$4 sm:$0xff]   ;;  %v19303_v9 = vld [vmem:[#allocation3 + $0x1c44] ss:$16 sps:$4 sm:$0xff]  }
 0x220   : > { %13680 = vmatpush1.bf16.msra.mxu1 %v19280_v10  ;;  %13638 = vmatprep.subr.bf16.mxu0 %v19285_v26  ;;  %v19306_v10 = vld [vmem:[#allocation3 + $0x1e44] ss:$16 sps:$4 sm:$0xff]   ;;  %v22265_v21 = vpop.f32.mrf.mxu0 }
 0x221   : > { %13681 = vmatprep.subr.bf16.mxu1 %v19288_v31  ;;  %v22251_v14 = vadd.f32 %v13371_v41, %v13329_v22  ;;  %v19312_v26 = vld [vmem:[#allocation3 + $0x1e24] ss:$16 sps:$4 sm:$0xff]   ;;  %v19307_v31 = vld [vmem:[#allocation3 + $0x1c20] ss:$16 sps:$4 sm:$0xff]   ;;  %23156 = vst [vmem:[#allocation25_spill] sm:$0xff] %v22265_v21 }
 0x222   : > { %v19318_v34 = vld [vmem:[#allocation3 + $0x1e04] ss:$16 sps:$4 sm:$0xff]   ;;  %v19313_v22 = vld [vmem:[#allocation3 + $0x1c00] ss:$16 sps:$4 sm:$0xff]  }
 0x223   : > { %13639 = vmatpush1.bf16.msra.mxu0 %v19283_v32  ;;  %v19310_v32 = vld [vmem:[#allocation3 + $0x1e20] ss:$16 sps:$4 sm:$0xff]  }
 0x224   : > { %13682 = vmatpush1.bf16.msra.mxu1 %v19286_v33  ;;  %13640 = vmatprep.subr.bf16.mxu0 %v19291_v52  ;;  %v19315_v33 = vld [vmem:[#allocation3 + $0x1c04] ss:$16 sps:$4 sm:$0xff]   ;;  %v19316_v41 = vld [vmem:[#allocation3 + $0x1e00] ss:$16 sps:$4 sm:$0xff]  }
 0x225   : > { %13683 = vmatprep.subr.bf16.mxu1 %v19294_v50  ;;  %v19321_v52 = vld [vmem:[#allocation3 + $0x1de4] ss:$16 sps:$4 sm:$0xff]  }
 0x226   : > { %v19324_v50 = vld [vmem:[#allocation3 + $0x1fe4] ss:$16 sps:$4 sm:$0xff]  }
 0x227   : > { %13641 = vmatpush1.bf16.msra.mxu0 %v19289_v51  ;;  %v19319_v51 = vld [vmem:[#allocation3 + $0x1de0] ss:$16 sps:$4 sm:$0xff]  }
 0x228   : > { %13684 = vmatpush1.bf16.msra.mxu1 %v19292_v57  ;;  %13642 = vmatprep.subr.bf16.mxu0 %v19297_v61  ;;  %v19322_v57 = vld [vmem:[#allocation3 + $0x1fe0] ss:$16 sps:$4 sm:$0xff]   ;;  %v19327_v61 = vld [vmem:[#allocation3 + $0x1dc4] ss:$16 sps:$4 sm:$0xff]  }
 0x229   : > { %13685 = vmatprep.subr.bf16.mxu1 %v19300_v3  ;;  %v19330_v3 = vld [vmem:[#allocation3 + $0x1fc4] ss:$16 sps:$4 sm:$0xff]  }
 0x22a   : > { %v458_v21 = vld [vmem:[%s22046_s14 + $0x340] sm:$0xff] }
 0x22b   : > { %13643 = vmatpush1.bf16.msra.mxu0 %v19295_v42  ;;  %v19325_v42 = vld [vmem:[#allocation3 + $0x1dc0] ss:$16 sps:$4 sm:$0xff]  }
 0x22c   : > { %13686 = vmatpush1.bf16.msra.mxu1 %v19298_v8  ;;  %13644 = vmatprep.subr.bf16.mxu0 %v19303_v9  ;;  %v19328_v8 = vld [vmem:[#allocation3 + $0x1fc0] ss:$16 sps:$4 sm:$0xff]   ;;  %v19333_v9 = vld [vmem:[#allocation3 + $0x1da4] ss:$16 sps:$4 sm:$0xff]  }
 0x22d   : > { %13687 = vmatprep.subr.bf16.mxu1 %v19306_v10  ;;  %v19336_v10 = vld [vmem:[#allocation3 + $0x1fa4] ss:$16 sps:$4 sm:$0xff]  }
 0x22f   : > { %13645 = vmatpush1.bf16.msra.mxu0 %v19301_v17  ;;  %v19331_v17 = vld [vmem:[#allocation3 + $0x1da0] ss:$16 sps:$4 sm:$0xff]  }
 0x230   : > { %13688 = vmatpush1.bf16.msra.mxu1 %v19304_v4  ;;  %13646 = vmatprep.subr.bf16.mxu0 %v19309_v18  ;;  %v19334_v4 = vld [vmem:[#allocation3 + $0x1fa0] ss:$16 sps:$4 sm:$0xff]   ;;  %v19339_v18 = vld [vmem:[#allocation3 + $0x1d84] ss:$16 sps:$4 sm:$0xff]  }
 0x231   : > { %13689 = vmatprep.subr.bf16.mxu1 %v19312_v26  ;;  %v19342_v26 = vld [vmem:[#allocation3 + $0x1f84] ss:$16 sps:$4 sm:$0xff]  }
 0x233   : > { %13647 = vmatpush1.bf16.msra.mxu0 %v19307_v31  ;;  %v19337_v31 = vld [vmem:[#allocation3 + $0x1d80] ss:$16 sps:$4 sm:$0xff]  }
 0x234   : > { %13690 = vmatpush1.bf16.msra.mxu1 %v19310_v32  ;;  %13648 = vmatprep.subr.bf16.mxu0 %v19315_v33  ;;  %v19340_v32 = vld [vmem:[#allocation3 + $0x1f80] ss:$16 sps:$4 sm:$0xff]   ;;  %v19345_v33 = vld [vmem:[#allocation3 + $0x1d64] ss:$16 sps:$4 sm:$0xff]  }
 0x235   : > { %13691 = vmatprep.subr.bf16.mxu1 %v19318_v34  ;;  %v19348_v34 = vld [vmem:[#allocation3 + $0x1f64] ss:$16 sps:$4 sm:$0xff]  }
 0x237   : > { %13649 = vmatpush1.bf16.msra.mxu0 %v19313_v22  ;;  %v19343_v22 = vld [vmem:[#allocation3 + $0x1d60] ss:$16 sps:$4 sm:$0xff]  }
 0x238   : > { %13692 = vmatpush1.bf16.msra.mxu1 %v19316_v41  ;;  %13650 = vmatprep.subr.bf16.mxu0 %v19321_v52  ;;  %v19346_v41 = vld [vmem:[#allocation3 + $0x1f60] ss:$16 sps:$4 sm:$0xff]   ;;  %v19351_v52 = vld [vmem:[#allocation3 + $0x1d44] ss:$16 sps:$4 sm:$0xff]  }
 0x239   : > { %13693 = vmatprep.subr.bf16.mxu1 %v19324_v50  ;;  %v19354_v50 = vld [vmem:[#allocation3 + $0x1f44] ss:$16 sps:$4 sm:$0xff]  }
 0x23b   : > { %13651 = vmatpush2.bf16.msra.mxu0 %v19319_v51  ;;  %v19349_v51 = vld [vmem:[#allocation3 + $0x1d40] ss:$16 sps:$4 sm:$0xff]  }
 0x23c   : > { %13694 = vmatpush2.bf16.msra.mxu1 %v19322_v57  ;;  %13652 = vmatprep.subr.bf16.mxu0 %v19327_v61  ;;  %v19352_v57 = vld [vmem:[#allocation3 + $0x1f40] ss:$16 sps:$4 sm:$0xff]   ;;  %v19357_v61 = vld [vmem:[#allocation3 + $0x1d24] ss:$16 sps:$4 sm:$0xff]  }
 0x23d   : > { %13695 = vmatprep.subr.bf16.mxu1 %v19330_v3  ;;  %v19360_v3 = vld [vmem:[#allocation3 + $0x1f24] ss:$16 sps:$4 sm:$0xff]  }
 0x23f   : > { %13653 = vmatpush2.bf16.msra.mxu0 %v19325_v42  ;;  %v19355_v42 = vld [vmem:[#allocation3 + $0x1d20] ss:$16 sps:$4 sm:$0xff]  }
 0x240   : > { %13696 = vmatpush2.bf16.msra.mxu1 %v19328_v8  ;;  %13654 = vmatprep.subr.bf16.mxu0 %v19333_v9  ;;  %v19358_v8 = vld [vmem:[#allocation3 + $0x1f20] ss:$16 sps:$4 sm:$0xff]   ;;  %v19363_v9 = vld [vmem:[#allocation3 + $0x1d04] ss:$16 sps:$4 sm:$0xff]  }
 0x241   : > { %13697 = vmatprep.subr.bf16.mxu1 %v19336_v10  ;;  %v19366_v10 = vld [vmem:[#allocation3 + $0x1f04] ss:$16 sps:$4 sm:$0xff]  }
 0x243   : > { %13655 = vmatpush2.bf16.msra.mxu0 %v19331_v17  ;;  %v19361_v17 = vld [vmem:[#allocation3 + $0x1d00] ss:$16 sps:$4 sm:$0xff]  }
 0x244   : > { %13698 = vmatpush2.bf16.msra.mxu1 %v19334_v4  ;;  %13656 = vmatprep.subr.bf16.mxu0 %v19339_v18  ;;  %v19364_v4 = vld [vmem:[#allocation3 + $0x1f00] ss:$16 sps:$4 sm:$0xff]  }
 0x245   : > { %13699 = vmatprep.subr.bf16.mxu1 %v19342_v26  ;;  %v382_v18 = vld [vmem:[%s22046_s14 + $0xe0] sm:$0xff]  ;;  %v447_v26 = vld [vmem:[%s22046_s14 + $0x2e8] sm:$0xff] }
 0x247   : > { %13657 = vmatpush2.bf16.msra.mxu0 %v19337_v31  ;;  %v384_v31 = vld [vmem:[%s22046_s14 + $0xf0] sm:$0xff] }
 0x248   : > { %13700 = vmatpush2.bf16.msra.mxu1 %v19340_v32  ;;  %13658 = vmatprep.subr.bf16.mxu0 %v19345_v33  ;;  %v449_v32 = vld [vmem:[%s22046_s14 + $0x2f8] sm:$0xff]  ;;  %v19369_v33 = vld [vmem:[#allocation3 + $0x20e4] ss:$16 sps:$4 sm:$0xff]  }
 0x249   : > { %13701 = vmatprep.subr.bf16.mxu1 %v19348_v34  ;;  %v19372_v34 = vld [vmem:[#allocation3 + $0x22e4] ss:$16 sps:$4 sm:$0xff]  }
 0x24b   : > { %13659 = vmatpush2.bf16.msra.mxu0 %v19343_v22  ;;  %v387_v22 = vld [vmem:[%s22046_s14 + $0x108] sm:$0xff] }
 0x24c   : > { %13702 = vmatpush2.bf16.msra.mxu1 %v19346_v41  ;;  %13660 = vmatprep.subr.bf16.mxu0 %v19351_v52  ;;  %v22258_v41 = vpack.c.bf16 %v447_v26, %v382_v18  ;;  %v22260_v52 = vpack.c.bf16 %v449_v32, %v384_v31  ;;  %v19376_v18 = vld [vmem:[#allocation3 + $0x22c0] ss:$16 sps:$4 sm:$0xff]  }
 0x24d   : > { %13703 = vmatprep.subr.bf16.mxu1 %v19354_v50  ;;  %v452_v50 = vld [vmem:[%s22046_s14 + $0x310] sm:$0xff] }
 0x24e   : > { %v22269_v26 = vpack.c.bf16 %v452_v50, %v387_v22  ;;  %v19384_v22 = vld [vmem:[#allocation3 + $0x22a4] ss:$16 sps:$4 sm:$0xff]  }
 0x24f   : > { %13661 = vmatpush2.bf16.msra.mxu0 %v19349_v51  ;;  %v389_v51 = vld [vmem:[%s22046_s14 + $0x118] sm:$0xff] }
 0x250   : > { %13704 = vmatpush2.bf16.msra.mxu1 %v19352_v57  ;;  %13662 = vmatprep.subr.bf16.mxu0 %v19357_v61  ;;  %v454_v57 = vld [vmem:[%s22046_s14 + $0x320] sm:$0xff] }
 0x251   : > { %13705 = vmatprep.subr.bf16.mxu1 %v19360_v3  ;;  %v19367_v61 = vld [vmem:[#allocation3 + $0x20e0] ss:$16 sps:$4 sm:$0xff]   ;;  %v22271_v31 = vpack.c.bf16 %v454_v57, %v389_v51 }
 0x252   : > { %v19370_v3 = vld [vmem:[#allocation3 + $0x22e0] ss:$16 sps:$4 sm:$0xff]  }
 0x253   : > { %13663 = vmatpush2.bf16.msra.mxu0 %v19355_v42  ;;  %v22267_v42 = vpop.f32.mrf.mxu1  ;;  %v19379_v51 = vld [vmem:[#allocation3 + $0x20a0] ss:$16 sps:$4 sm:$0xff]  }
 0x254   : > { %13706 = vmatpush2.bf16.msra.mxu1 %v19358_v8  ;;  %13664 = vmatprep.subr.bf16.mxu0 %v19363_v9  ;;  %23157 = vst [vmem:[#allocation26_spill] sm:$0xff] %v22267_v42  ;;  %v19375_v8 = vld [vmem:[#allocation3 + $0x20c4] ss:$16 sps:$4 sm:$0xff]   ;;  %v19382_v57 = vld [vmem:[#allocation3 + $0x22a0] ss:$16 sps:$4 sm:$0xff]  }
 0x255   : > { %13707 = vmatprep.subr.bf16.mxu1 %v19366_v10  ;;  %v19378_v9 = vld [vmem:[#allocation3 + $0x22c4] ss:$16 sps:$4 sm:$0xff]   ;;  %v19373_v10 = vld [vmem:[#allocation3 + $0x20c0] ss:$16 sps:$4 sm:$0xff]  }
 0x257   : > { %13665 = vmatpush2.bf16.msra.mxu0 %v19361_v17 }
 0x258   : > { %13708 = vmatpush2.bf16.msra.mxu1 %v19364_v4  ;;  %13720 = vmatprep.subr.bf16.mxu0 %v19369_v33 }
 0x259   : > { %13763 = vmatprep.subr.bf16.mxu1 %v19372_v34  ;;  %v19381_v34 = vld [vmem:[#allocation3 + $0x20a4] ss:$16 sps:$4 sm:$0xff]  }
 0x25a   : > { %v13410_v32 = vpop.f32.mrf.mxu0  ;;  %13667 = vmatmul.mubr.bf16.vlgmr.msra.gmra.mxu0 %v22258_v41 }
 0x25b   : > { %v13453_v20 = vpop.f32.mrf.mxu1  ;;  %13710 = vmatmul.mubr.bf16.vlgmr.msra.gmra.mxu1 %v22260_v52  ;;  %v13411_v17 = vadd.f32 %v13410_v32, %v22246_v63  ;;  %13721 = vmatpush1.bf16.msra.mxu0 %v19367_v61  ;;  %v19388_v32 = vld [vmem:[#allocation3 + $0x2280] ss:$16 sps:$4 sm:$0xff]  }
 0x25c   : > { %13764 = vmatpush1.bf16.msra.mxu1 %v19370_v3  ;;  %v22276_v4 = vpop.f32.mrf.mxu0  ;;  %13722 = vmatprep.subr.bf16.mxu0 %v19375_v8  ;;  %v19387_v3 = vld [vmem:[#allocation3 + $0x2084] ss:$16 sps:$4 sm:$0xff]  }
 0x25d   : > { %23158 = vst [vmem:[#allocation27_spill] sm:$0xff] %v22276_v4  ;;  %v22278_v33 = vpop.f32.mrf.mxu1  ;;  %13765 = vmatprep.subr.bf16.mxu1 %v19378_v9  ;;  %v22280_v50 = vadd.f32 %v13453_v20, %v13411_v17  ;;  %13752 = vmatprep.mubr.bf16.mxu0 %v22269_v26  ;;  %v19390_v8 = vld [vmem:[#allocation3 + $0x2284] ss:$16 sps:$4 sm:$0xff]   ;;  %v19385_v20 = vld [vmem:[#allocation3 + $0x2080] ss:$16 sps:$4 sm:$0xff]   ;;  %v393_v4 = vld [vmem:[%s22046_s14 + $0x138] sm:$0xff] }
 0x25e   : > { %23159 = vst [vmem:[#allocation28_spill] sm:$0xff] %v22278_v33  ;;  %13795 = vmatprep.mubr.bf16.mxu1 %v22271_v31  ;;  %v13414_v42 = vpop.f32.mrf.mxu0  ;;  %v19393_v17 = vld [vmem:[#allocation3 + $0x2064] ss:$16 sps:$4 sm:$0xff]  }
 0x25f   : > { %v13415_v63 = vadd.f32 %v13414_v42, %v22251_v14  ;;  %13723 = vmatpush1.bf16.msra.mxu0 %v19373_v10  ;;  %v13457_v61 = vpop.f32.mrf.mxu1  ;;  %v19396_v33 = vld [vmem:[#allocation3 + $0x2264] ss:$16 sps:$4 sm:$0xff]   ;;  %v19391_v14 = vld [vmem:[#allocation3 + $0x2060] ss:$16 sps:$4 sm:$0xff]  }
 0x260   : > { %13766 = vmatpush1.bf16.msra.mxu1 %v19376_v18  ;;  %13724 = vmatprep.subr.bf16.mxu0 %v19381_v34  ;;  %v19394_v42 = vld [vmem:[#allocation3 + $0x2260] ss:$16 sps:$4 sm:$0xff]   ;;  %v19399_v10 = vld [vmem:[#allocation3 + $0x2044] ss:$16 sps:$4 sm:$0xff]   ;;  %v22299_v2 = vpop.f32.mrf.mxu0 }
 0x261   : > { %13767 = vmatprep.subr.bf16.mxu1 %v19384_v22  ;;  %v22285_v9 = vadd.f32 %v13457_v61, %v13415_v63  ;;  %v19402_v18 = vld [vmem:[#allocation3 + $0x2244] ss:$16 sps:$4 sm:$0xff]   ;;  %v19397_v34 = vld [vmem:[#allocation3 + $0x2040] ss:$16 sps:$4 sm:$0xff]   ;;  %23160 = vst [vmem:[#allocation29_spill] sm:$0xff] %v22299_v2 }
 0x262   : > { %v19400_v22 = vld [vmem:[#allocation3 + $0x2240] ss:$16 sps:$4 sm:$0xff]  }
 0x263   : > { %13725 = vmatpush1.bf16.msra.mxu0 %v19379_v51  ;;  %v19405_v51 = vld [vmem:[#allocation3 + $0x2024] ss:$16 sps:$4 sm:$0xff]   ;;  %v19403_v63 = vld [vmem:[#allocation3 + $0x2020] ss:$16 sps:$4 sm:$0xff]  }
 0x264   : > { %13768 = vmatpush1.bf16.msra.mxu1 %v19382_v57  ;;  %13726 = vmatprep.subr.bf16.mxu0 %v19387_v3  ;;  %v19408_v57 = vld [vmem:[#allocation3 + $0x2224] ss:$16 sps:$4 sm:$0xff]   ;;  %v19406_v61 = vld [vmem:[#allocation3 + $0x2220] ss:$16 sps:$4 sm:$0xff]  }
 0x265   : > { %13769 = vmatprep.subr.bf16.mxu1 %v19390_v8  ;;  %v19411_v3 = vld [vmem:[#allocation3 + $0x2004] ss:$16 sps:$4 sm:$0xff]  }
 0x266   : > { %v19414_v8 = vld [vmem:[#allocation3 + $0x2204] ss:$16 sps:$4 sm:$0xff]  }
 0x267   : > { %13727 = vmatpush1.bf16.msra.mxu0 %v19385_v20  ;;  %v19412_v20 = vld [vmem:[#allocation3 + $0x2200] ss:$16 sps:$4 sm:$0xff]  }
 0x268   : > { %13770 = vmatpush1.bf16.msra.mxu1 %v19388_v32  ;;  %13728 = vmatprep.subr.bf16.mxu0 %v19393_v17  ;;  %v19417_v32 = vld [vmem:[#allocation3 + $0x21e4] ss:$16 sps:$4 sm:$0xff]  }
 0x269   : > { %13771 = vmatprep.subr.bf16.mxu1 %v19396_v33  ;;  %v19409_v33 = vld [vmem:[#allocation3 + $0x2000] ss:$16 sps:$4 sm:$0xff]   ;;  %v19420_v17 = vld [vmem:[#allocation3 + $0x23e4] ss:$16 sps:$4 sm:$0xff]  }
 0x26a   : > { %v462_v2 = vld [vmem:[%s22046_s14 + $0x360] sm:$0xff] }
 0x26b   : > { %13729 = vmatpush1.bf16.msra.mxu0 %v19391_v14  ;;  %v19415_v14 = vld [vmem:[#allocation3 + $0x21e0] ss:$16 sps:$4 sm:$0xff]  }
 0x26c   : > { %13772 = vmatpush1.bf16.msra.mxu1 %v19394_v42  ;;  %13730 = vmatprep.subr.bf16.mxu0 %v19399_v10  ;;  %v19418_v42 = vld [vmem:[#allocation3 + $0x23e0] ss:$16 sps:$4 sm:$0xff]   ;;  %v19423_v10 = vld [vmem:[#allocation3 + $0x21c4] ss:$16 sps:$4 sm:$0xff]  }
 0x26d   : > { %13773 = vmatprep.subr.bf16.mxu1 %v19402_v18  ;;  %v19426_v18 = vld [vmem:[#allocation3 + $0x23c4] ss:$16 sps:$4 sm:$0xff]  }
 0x26f   : > { %13731 = vmatpush1.bf16.msra.mxu0 %v19397_v34  ;;  %v19421_v34 = vld [vmem:[#allocation3 + $0x21c0] ss:$16 sps:$4 sm:$0xff]  }
 0x270   : > { %13774 = vmatpush1.bf16.msra.mxu1 %v19400_v22  ;;  %13732 = vmatprep.subr.bf16.mxu0 %v19405_v51  ;;  %v19424_v22 = vld [vmem:[#allocation3 + $0x23c0] ss:$16 sps:$4 sm:$0xff]   ;;  %v19429_v51 = vld [vmem:[#allocation3 + $0x21a4] ss:$16 sps:$4 sm:$0xff]  }
 0x271   : > { %13775 = vmatprep.subr.bf16.mxu1 %v19408_v57  ;;  %v19432_v57 = vld [vmem:[#allocation3 + $0x23a4] ss:$16 sps:$4 sm:$0xff]  }
 0x273   : > { %13733 = vmatpush1.bf16.msra.mxu0 %v19403_v63  ;;  %v19427_v63 = vld [vmem:[#allocation3 + $0x21a0] ss:$16 sps:$4 sm:$0xff]  }
 0x274   : > { %13776 = vmatpush1.bf16.msra.mxu1 %v19406_v61  ;;  %13734 = vmatprep.subr.bf16.mxu0 %v19411_v3  ;;  %v19430_v61 = vld [vmem:[#allocation3 + $0x23a0] ss:$16 sps:$4 sm:$0xff]   ;;  %v19435_v3 = vld [vmem:[#allocation3 + $0x2184] ss:$16 sps:$4 sm:$0xff]  }
 0x275   : > { %13777 = vmatprep.subr.bf16.mxu1 %v19414_v8  ;;  %v19438_v8 = vld [vmem:[#allocation3 + $0x2384] ss:$16 sps:$4 sm:$0xff]  }
 0x277   : > { %13735 = vmatpush1.bf16.msra.mxu0 %v19409_v33  ;;  %v19433_v33 = vld [vmem:[#allocation3 + $0x2180] ss:$16 sps:$4 sm:$0xff]  }
 0x278   : > { %13778 = vmatpush1.bf16.msra.mxu1 %v19412_v20  ;;  %13736 = vmatprep.subr.bf16.mxu0 %v19417_v32  ;;  %v19436_v20 = vld [vmem:[#allocation3 + $0x2380] ss:$16 sps:$4 sm:$0xff]   ;;  %v19441_v32 = vld [vmem:[#allocation3 + $0x2164] ss:$16 sps:$4 sm:$0xff]  }
 0x279   : > { %13779 = vmatprep.subr.bf16.mxu1 %v19420_v17  ;;  %v19444_v17 = vld [vmem:[#allocation3 + $0x2364] ss:$16 sps:$4 sm:$0xff]  }
 0x27b   : > { %13737 = vmatpush2.bf16.msra.mxu0 %v19415_v14  ;;  %v19439_v14 = vld [vmem:[#allocation3 + $0x2160] ss:$16 sps:$4 sm:$0xff]  }
 0x27c   : > { %13780 = vmatpush2.bf16.msra.mxu1 %v19418_v42  ;;  %13738 = vmatprep.subr.bf16.mxu0 %v19423_v10  ;;  %v19442_v42 = vld [vmem:[#allocation3 + $0x2360] ss:$16 sps:$4 sm:$0xff]   ;;  %v19447_v10 = vld [vmem:[#allocation3 + $0x2144] ss:$16 sps:$4 sm:$0xff]  }
 0x27d   : > { %13781 = vmatprep.subr.bf16.mxu1 %v19426_v18  ;;  %v19450_v18 = vld [vmem:[#allocation3 + $0x2344] ss:$16 sps:$4 sm:$0xff]  }
 0x27f   : > { %13739 = vmatpush2.bf16.msra.mxu0 %v19421_v34  ;;  %v19445_v34 = vld [vmem:[#allocation3 + $0x2140] ss:$16 sps:$4 sm:$0xff]  }
 0x280   : > { %13782 = vmatpush2.bf16.msra.mxu1 %v19424_v22  ;;  %13740 = vmatprep.subr.bf16.mxu0 %v19429_v51  ;;  %v19448_v22 = vld [vmem:[#allocation3 + $0x2340] ss:$16 sps:$4 sm:$0xff]   ;;  %v19453_v51 = vld [vmem:[#allocation3 + $0x2124] ss:$16 sps:$4 sm:$0xff]  }
 0x281   : > { %13783 = vmatprep.subr.bf16.mxu1 %v19432_v57  ;;  %v19456_v57 = vld [vmem:[#allocation3 + $0x2324] ss:$16 sps:$4 sm:$0xff]  }
 0x283   : > { %13741 = vmatpush2.bf16.msra.mxu0 %v19427_v63  ;;  %v19451_v63 = vld [vmem:[#allocation3 + $0x2120] ss:$16 sps:$4 sm:$0xff]  }
 0x284   : > { %13784 = vmatpush2.bf16.msra.mxu1 %v19430_v61  ;;  %13742 = vmatprep.subr.bf16.mxu0 %v19435_v3  ;;  %v19454_v61 = vld [vmem:[#allocation3 + $0x2320] ss:$16 sps:$4 sm:$0xff]   ;;  %v19459_v3 = vld [vmem:[#allocation3 + $0x2104] ss:$16 sps:$4 sm:$0xff]  }
 0x285   : > { %13785 = vmatprep.subr.bf16.mxu1 %v19438_v8  ;;  %v19462_v8 = vld [vmem:[#allocation3 + $0x2304] ss:$16 sps:$4 sm:$0xff]  }
 0x287   : > { %13743 = vmatpush2.bf16.msra.mxu0 %v19433_v33  ;;  %v19457_v33 = vld [vmem:[#allocation3 + $0x2100] ss:$16 sps:$4 sm:$0xff]  }
 0x288   : > { %13786 = vmatpush2.bf16.msra.mxu1 %v19436_v20  ;;  %13744 = vmatprep.subr.bf16.mxu0 %v19441_v32  ;;  %v19460_v20 = vld [vmem:[#allocation3 + $0x2300] ss:$16 sps:$4 sm:$0xff]  }
 0x289   : > { %13787 = vmatprep.subr.bf16.mxu1 %v19444_v17  ;;  %v386_v32 = vld [vmem:[%s22046_s14 + $0x100] sm:$0xff]  ;;  %v451_v17 = vld [vmem:[%s22046_s14 + $0x308] sm:$0xff] }
 0x28b   : > { %13745 = vmatpush2.bf16.msra.mxu0 %v19439_v14  ;;  %v388_v14 = vld [vmem:[%s22046_s14 + $0x110] sm:$0xff] }
 0x28c   : > { %13788 = vmatpush2.bf16.msra.mxu1 %v19442_v42  ;;  %13746 = vmatprep.subr.bf16.mxu0 %v19447_v10  ;;  %v453_v42 = vld [vmem:[%s22046_s14 + $0x318] sm:$0xff]  ;;  %v19465_v10 = vld [vmem:[#allocation3 + $0x24e4] ss:$16 sps:$4 sm:$0xff]  }
 0x28d   : > { %13789 = vmatprep.subr.bf16.mxu1 %v19450_v18  ;;  %v19468_v18 = vld [vmem:[#allocation3 + $0x26e4] ss:$16 sps:$4 sm:$0xff]  }
 0x28f   : > { %13747 = vmatpush2.bf16.msra.mxu0 %v19445_v34  ;;  %v391_v34 = vld [vmem:[%s22046_s14 + $0x128] sm:$0xff] }
 0x290   : > { %13790 = vmatpush2.bf16.msra.mxu1 %v19448_v22  ;;  %13748 = vmatprep.subr.bf16.mxu0 %v19453_v51  ;;  %v22292_v22 = vpack.c.bf16 %v451_v17, %v386_v32  ;;  %v22294_v51 = vpack.c.bf16 %v453_v42, %v388_v14  ;;  %v19472_v32 = vld [vmem:[#allocation3 + $0x26c0] ss:$16 sps:$4 sm:$0xff]   ;;  %v22305_v14 = vpack.c.bf16 %v458_v21, %v393_v4 }
 0x291   : > { %13791 = vmatprep.subr.bf16.mxu1 %v19456_v57  ;;  %v456_v57 = vld [vmem:[%s22046_s14 + $0x330] sm:$0xff] }
 0x292   : > { %v22303_v17 = vpack.c.bf16 %v456_v57, %v391_v34  ;;  %v19480_v34 = vld [vmem:[#allocation3 + $0x26a4] ss:$16 sps:$4 sm:$0xff]   ;;  %v19475_v4 = vld [vmem:[#allocation3 + $0x24a0] ss:$16 sps:$4 sm:$0xff]  }
 0x293   : > { %13749 = vmatpush2.bf16.msra.mxu0 %v19451_v63  ;;  %v22301_v63 = vpop.f32.mrf.mxu1  ;;  %v19478_v57 = vld [vmem:[#allocation3 + $0x26a0] ss:$16 sps:$4 sm:$0xff]  }
 0x294   : > { %13792 = vmatpush2.bf16.msra.mxu1 %v19454_v61  ;;  %13750 = vmatprep.subr.bf16.mxu0 %v19459_v3  ;;  %23161 = vst [vmem:[#allocation30_spill] sm:$0xff] %v22301_v63  ;;  %v19471_v61 = vld [vmem:[#allocation3 + $0x24c4] ss:$16 sps:$4 sm:$0xff]  }
 0x295   : > { %13793 = vmatprep.subr.bf16.mxu1 %v19462_v8  ;;  %v19474_v3 = vld [vmem:[#allocation3 + $0x26c4] ss:$16 sps:$4 sm:$0xff]   ;;  %v19469_v8 = vld [vmem:[#allocation3 + $0x24c0] ss:$16 sps:$4 sm:$0xff]  }
 0x297   : > { %13751 = vmatpush2.bf16.msra.mxu0 %v19457_v33 }
 0x298   : > { %13794 = vmatpush2.bf16.msra.mxu1 %v19460_v20  ;;  %13806 = vmatprep.subr.bf16.mxu0 %v19465_v10 }
 0x299   : > { %13849 = vmatprep.subr.bf16.mxu1 %v19468_v18  ;;  %v19477_v18 = vld [vmem:[#allocation3 + $0x24a4] ss:$16 sps:$4 sm:$0xff]  }
 0x29a   : > { %v13496_v42 = vpop.f32.mrf.mxu0  ;;  %13753 = vmatmul.mubr.bf16.vlgmr.msra.gmra.mxu0 %v22292_v22 }
 0x29b   : > { %v13539_v62 = vpop.f32.mrf.mxu1  ;;  %13796 = vmatmul.mubr.bf16.vlgmr.msra.gmra.mxu1 %v22294_v51  ;;  %v13497_v33 = vadd.f32 %v13496_v42, %v22280_v50  ;;  %13807 = vmatpush1.bf16.msra.mxu0 %v19463_v19  ;;  %v19483_v50 = vld [vmem:[#allocation3 + $0x2484] ss:$16 sps:$4 sm:$0xff]   ;;  %v19484_v42 = vld [vmem:[#allocation3 + $0x2680] ss:$16 sps:$4 sm:$0xff]  }
 0x29c   : > { %13850 = vmatpush1.bf16.msra.mxu1 %v19466_v23  ;;  %v22310_v20 = vpop.f32.mrf.mxu0  ;;  %13808 = vmatprep.subr.bf16.mxu0 %v19471_v61  ;;  %v19486_v61 = vld [vmem:[#allocation3 + $0x2684] ss:$16 sps:$4 sm:$0xff]  }
 0x29d   : > { %23162 = vst [vmem:[#allocation31_spill] sm:$0xff] %v22310_v20  ;;  %v22312_v10 = vpop.f32.mrf.mxu1  ;;  %13851 = vmatprep.subr.bf16.mxu1 %v19474_v3  ;;  %v22314_v21 = vadd.f32 %v13539_v62, %v13497_v33  ;;  %13838 = vmatprep.mubr.bf16.mxu0 %v22303_v17  ;;  %v19481_v62 = vld [vmem:[#allocation3 + $0x2480] ss:$16 sps:$4 sm:$0xff]   ;;  %v19489_v33 = vld [vmem:[#allocation3 + $0x2464] ss:$16 sps:$4 sm:$0xff]   ;;  %v397_v20 = vld [vmem:[%s22046_s14 + $0x158] sm:$0xff] }
 0x29e   : > { %23163 = vst [vmem:[#allocation32_spill] sm:$0xff] %v22312_v10  ;;  %13881 = vmatprep.mubr.bf16.mxu1 %v22305_v14  ;;  %v13500_v63 = vpop.f32.mrf.mxu0  ;;  %v19492_v10 = vld [vmem:[#allocation3 + $0x2664] ss:$16 sps:$4 sm:$0xff]  }
 0x29f   : > { %v13501_v19 = vadd.f32 %v13500_v63, %v22285_v9  ;;  %13809 = vmatpush1.bf16.msra.mxu0 %v19469_v8  ;;  %v13543_v23 = vpop.f32.mrf.mxu1  ;;  %v19487_v9 = vld [vmem:[#allocation3 + $0x2460] ss:$16 sps:$4 sm:$0xff]   ;;  %v19495_v8 = vld [vmem:[#allocation3 + $0x2444] ss:$16 sps:$4 sm:$0xff]  }
 0x2a0   : > { %13852 = vmatpush1.bf16.msra.mxu1 %v19472_v32  ;;  %13810 = vmatprep.subr.bf16.mxu0 %v19477_v18  ;;  %v19490_v63 = vld [vmem:[#allocation3 + $0x2660] ss:$16 sps:$4 sm:$0xff]   ;;  %v19498_v32 = vld [vmem:[#allocation3 + $0x2644] ss:$16 sps:$4 sm:$0xff]   ;;  %v22333_v39 = vpop.f32.mrf.mxu0 }
 0x2a1   : > { %13853 = vmatprep.subr.bf16.mxu1 %v19480_v34  ;;  %v22319_v3 = vadd.f32 %v13543_v23, %v13501_v19  ;;  %v19493_v18 = vld [vmem:[#allocation3 + $0x2440] ss:$16 sps:$4 sm:$0xff]   ;;  %23165 = vst [vmem:[#allocation34_spill] sm:$0xff] %v22333_v39 }
 0x2a2   : > { %v19496_v34 = vld [vmem:[#allocation3 + $0x2640] ss:$16 sps:$4 sm:$0xff]  }
 0x2a3   : > { %13811 = vmatpush1.bf16.msra.mxu0 %v19475_v4  ;;  %v19501_v4 = vld [vmem:[#allocation3 + $0x2424] ss:$16 sps:$4 sm:$0xff]   ;;  %v19499_v19 = vld [vmem:[#allocation3 + $0x2420] ss:$16 sps:$4 sm:$0xff]  }
 0x2a4   : > { %13854 = vmatpush1.bf16.msra.mxu1 %v19478_v57  ;;  %13812 = vmatprep.subr.bf16.mxu0 %v19483_v50  ;;  %v19504_v57 = vld [vmem:[#allocation3 + $0x2624] ss:$16 sps:$4 sm:$0xff]   ;;  %v19502_v23 = vld [vmem:[#allocation3 + $0x2620] ss:$16 sps:$4 sm:$0xff]  }
 0x2a5   : > { %13855 = vmatprep.subr.bf16.mxu1 %v19486_v61  ;;  %v19507_v50 = vld [vmem:[#allocation3 + $0x2404] ss:$16 sps:$4 sm:$0xff]  }
 0x2a6   : > { %v19510_v61 = vld [vmem:[#allocation3 + $0x2604] ss:$16 sps:$4 sm:$0xff]  }
 0x2a7   : > { %13813 = vmatpush1.bf16.msra.mxu0 %v19481_v62  ;;  %v19508_v62 = vld [vmem:[#allocation3 + $0x2600] ss:$16 sps:$4 sm:$0xff]  }
 0x2a8   : > { %13856 = vmatpush1.bf16.msra.mxu1 %v19484_v42  ;;  %13814 = vmatprep.subr.bf16.mxu0 %v19489_v33  ;;  %v19513_v42 = vld [vmem:[#allocation3 + $0x25e4] ss:$16 sps:$4 sm:$0xff]  }
 0x2a9   : > { %13857 = vmatprep.subr.bf16.mxu1 %v19492_v10  ;;  %v19505_v10 = vld [vmem:[#allocation3 + $0x2400] ss:$16 sps:$4 sm:$0xff]   ;;  %v19516_v33 = vld [vmem:[#allocation3 + $0x27e4] ss:$16 sps:$4 sm:$0xff]  }
 0x2aa   : > { %v466_v39 = vld [vmem:[%s22046_s14 + $0x380] sm:$0xff] }
 0x2ab   : > { %13815 = vmatpush1.bf16.msra.mxu0 %v19487_v9  ;;  %v19511_v9 = vld [vmem:[#allocation3 + $0x25e0] ss:$16 sps:$4 sm:$0xff]  }
 0x2ac   : > { %13858 = vmatpush1.bf16.msra.mxu1 %v19490_v63  ;;  %13816 = vmatprep.subr.bf16.mxu0 %v19495_v8  ;;  %v19514_v63 = vld [vmem:[#allocation3 + $0x27e0] ss:$16 sps:$4 sm:$0xff]   ;;  %v19519_v8 = vld [vmem:[#allocation3 + $0x25c4] ss:$16 sps:$4 sm:$0xff]  }
 0x2ad   : > { %13859 = vmatprep.subr.bf16.mxu1 %v19498_v32  ;;  %v19522_v32 = vld [vmem:[#allocation3 + $0x27c4] ss:$16 sps:$4 sm:$0xff]  }
 0x2af   : > { %13817 = vmatpush1.bf16.msra.mxu0 %v19493_v18  ;;  %v19517_v18 = vld [vmem:[#allocation3 + $0x25c0] ss:$16 sps:$4 sm:$0xff]  }
 0x2b0   : > { %13860 = vmatpush1.bf16.msra.mxu1 %v19496_v34  ;;  %13818 = vmatprep.subr.bf16.mxu0 %v19501_v4  ;;  %v19520_v34 = vld [vmem:[#allocation3 + $0x27c0] ss:$16 sps:$4 sm:$0xff]   ;;  %v19525_v4 = vld [vmem:[#allocation3 + $0x25a4] ss:$16 sps:$4 sm:$0xff]  }
 0x2b1   : > { %13861 = vmatprep.subr.bf16.mxu1 %v19504_v57  ;;  %v19528_v57 = vld [vmem:[#allocation3 + $0x27a4] ss:$16 sps:$4 sm:$0xff]  }
 0x2b3   : > { %13819 = vmatpush1.bf16.msra.mxu0 %v19499_v19  ;;  %v19523_v19 = vld [vmem:[#allocation3 + $0x25a0] ss:$16 sps:$4 sm:$0xff]  }
 0x2b4   : > { %13862 = vmatpush1.bf16.msra.mxu1 %v19502_v23  ;;  %13820 = vmatprep.subr.bf16.mxu0 %v19507_v50  ;;  %v19526_v23 = vld [vmem:[#allocation3 + $0x27a0] ss:$16 sps:$4 sm:$0xff]   ;;  %v19531_v50 = vld [vmem:[#allocation3 + $0x2584] ss:$16 sps:$4 sm:$0xff]  }
 0x2b5   : > { %13863 = vmatprep.subr.bf16.mxu1 %v19510_v61  ;;  %v19534_v61 = vld [vmem:[#allocation3 + $0x2784] ss:$16 sps:$4 sm:$0xff]  }
 0x2b7   : > { %13821 = vmatpush1.bf16.msra.mxu0 %v19505_v10  ;;  %v19529_v10 = vld [vmem:[#allocation3 + $0x2580] ss:$16 sps:$4 sm:$0xff]  }
 0x2b8   : > { %13864 = vmatpush1.bf16.msra.mxu1 %v19508_v62  ;;  %13822 = vmatprep.subr.bf16.mxu0 %v19513_v42  ;;  %v19532_v62 = vld [vmem:[#allocation3 + $0x2780] ss:$16 sps:$4 sm:$0xff]   ;;  %v19537_v42 = vld [vmem:[#allocation3 + $0x2564] ss:$16 sps:$4 sm:$0xff]  }
 0x2b9   : > { %13865 = vmatprep.subr.bf16.mxu1 %v19516_v33  ;;  %v19540_v33 = vld [vmem:[#allocation3 + $0x2764] ss:$16 sps:$4 sm:$0xff]  }
 0x2bb   : > { %13823 = vmatpush2.bf16.msra.mxu0 %v19511_v9  ;;  %v19535_v9 = vld [vmem:[#allocation3 + $0x2560] ss:$16 sps:$4 sm:$0xff]  }
 0x2bc   : > { %13866 = vmatpush2.bf16.msra.mxu1 %v19514_v63  ;;  %13824 = vmatprep.subr.bf16.mxu0 %v19519_v8  ;;  %v19538_v63 = vld [vmem:[#allocation3 + $0x2760] ss:$16 sps:$4 sm:$0xff]   ;;  %v19543_v8 = vld [vmem:[#allocation3 + $0x2544] ss:$16 sps:$4 sm:$0xff]  }
 0x2bd   : > { %13867 = vmatprep.subr.bf16.mxu1 %v19522_v32  ;;  %v19546_v32 = vld [vmem:[#allocation3 + $0x2744] ss:$16 sps:$4 sm:$0xff]  }
 0x2bf   : > { %13825 = vmatpush2.bf16.msra.mxu0 %v19517_v18  ;;  %v19541_v18 = vld [vmem:[#allocation3 + $0x2540] ss:$16 sps:$4 sm:$0xff]  }
 0x2c0   : > { %13868 = vmatpush2.bf16.msra.mxu1 %v19520_v34  ;;  %13826 = vmatprep.subr.bf16.mxu0 %v19525_v4  ;;  %v19544_v34 = vld [vmem:[#allocation3 + $0x2740] ss:$16 sps:$4 sm:$0xff]   ;;  %v19549_v4 = vld [vmem:[#allocation3 + $0x2524] ss:$16 sps:$4 sm:$0xff]  }
 0x2c1   : > { %13869 = vmatprep.subr.bf16.mxu1 %v19528_v57  ;;  %v19552_v57 = vld [vmem:[#allocation3 + $0x2724] ss:$16 sps:$4 sm:$0xff]  }
 0x2c3   : > { %13827 = vmatpush2.bf16.msra.mxu0 %v19523_v19  ;;  %v19547_v19 = vld [vmem:[#allocation3 + $0x2520] ss:$16 sps:$4 sm:$0xff]  }
 0x2c4   : > { %13870 = vmatpush2.bf16.msra.mxu1 %v19526_v23  ;;  %13828 = vmatprep.subr.bf16.mxu0 %v19531_v50  ;;  %v19550_v23 = vld [vmem:[#allocation3 + $0x2720] ss:$16 sps:$4 sm:$0xff]   ;;  %v19555_v50 = vld [vmem:[#allocation3 + $0x2504] ss:$16 sps:$4 sm:$0xff]  }
 0x2c5   : > { %13871 = vmatprep.subr.bf16.mxu1 %v19534_v61  ;;  %v19558_v61 = vld [vmem:[#allocation3 + $0x2704] ss:$16 sps:$4 sm:$0xff]  }
 0x2c7   : > { %13829 = vmatpush2.bf16.msra.mxu0 %v19529_v10  ;;  %v19553_v10 = vld [vmem:[#allocation3 + $0x2500] ss:$16 sps:$4 sm:$0xff]  }
 0x2c8   : > { %13872 = vmatpush2.bf16.msra.mxu1 %v19532_v62  ;;  %13830 = vmatprep.subr.bf16.mxu0 %v19537_v42  ;;  %v19556_v62 = vld [vmem:[#allocation3 + $0x2700] ss:$16 sps:$4 sm:$0xff]  }
 0x2c9   : > { %13873 = vmatprep.subr.bf16.mxu1 %v19540_v33  ;;  %v390_v42 = vld [vmem:[%s22046_s14 + $0x120] sm:$0xff]  ;;  %v455_v33 = vld [vmem:[%s22046_s14 + $0x328] sm:$0xff] }
 0x2cb   : > { %13831 = vmatpush2.bf16.msra.mxu0 %v19535_v9  ;;  %v392_v9 = vld [vmem:[%s22046_s14 + $0x130] sm:$0xff] }
 0x2cc   : > { %13874 = vmatpush2.bf16.msra.mxu1 %v19538_v63  ;;  %13832 = vmatprep.subr.bf16.mxu0 %v19543_v8  ;;  %v457_v63 = vld [vmem:[%s22046_s14 + $0x338] sm:$0xff]  ;;  %v19561_v8 = vld [vmem:[#allocation3 + $0x28e4] ss:$16 sps:$4 sm:$0xff]  }
 0x2cd   : > { %13875 = vmatprep.subr.bf16.mxu1 %v19546_v32  ;;  %v19564_v32 = vld [vmem:[#allocation3 + $0x2ae4] ss:$16 sps:$4 sm:$0xff]  }
 0x2cf   : > { %13833 = vmatpush2.bf16.msra.mxu0 %v19541_v18  ;;  %v395_v18 = vld [vmem:[%s22046_s14 + $0x148] sm:$0xff] }
 0x2d0   : > { %13876 = vmatpush2.bf16.msra.mxu1 %v19544_v34  ;;  %13834 = vmatprep.subr.bf16.mxu0 %v19549_v4  ;;  %v22326_v34 = vpack.c.bf16 %v455_v33, %v390_v42  ;;  %v22328_v4 = vpack.c.bf16 %v457_v63, %v392_v9  ;;  %v19568_v42 = vld [vmem:[#allocation3 + $0x2ac0] ss:$16 sps:$4 sm:$0xff]   ;;  %v22339_v9 = vpack.c.bf16 %v462_v2, %v397_v20 }
 0x2d1   : > { %13877 = vmatprep.subr.bf16.mxu1 %v19552_v57  ;;  %v460_v57 = vld [vmem:[%s22046_s14 + $0x350] sm:$0xff] }
 0x2d2   : > { %23164 = vst [vmem:[#allocation33_spill] sm:$0xff] %v22328_v4  ;;  %v22337_v33 = vpack.c.bf16 %v460_v57, %v395_v18  ;;  %23168 = vst [vmem:[#allocation37_spill] sm:$0xff] %v22339_v9  ;;  %v19576_v18 = vld [vmem:[#allocation3 + $0x2aa4] ss:$16 sps:$4 sm:$0xff]   ;;  %v19571_v20 = vld [vmem:[#allocation3 + $0x28a0] ss:$16 sps:$4 sm:$0xff]  }
 0x2d3   : > { %13835 = vmatpush2.bf16.msra.mxu0 %v19547_v19  ;;  %v22335_v19 = vpop.f32.mrf.mxu1  ;;  %v19574_v57 = vld [vmem:[#allocation3 + $0x2aa0] ss:$16 sps:$4 sm:$0xff]  }
 0x2d4   : > { %13878 = vmatpush2.bf16.msra.mxu1 %v19550_v23  ;;  %13836 = vmatprep.subr.bf16.mxu0 %v19555_v50  ;;  %23166 = vst [vmem:[#allocation35_spill] sm:$0xff] %v22335_v19  ;;  %v19567_v23 = vld [vmem:[#allocation3 + $0x28c4] ss:$16 sps:$4 sm:$0xff]   ;;  %23167 = vst [vmem:[#allocation36_spill] sm:$0xff] %v22337_v33 }
 0x2d5   : > { %13879 = vmatprep.subr.bf16.mxu1 %v19558_v61  ;;  %v19570_v50 = vld [vmem:[#allocation3 + $0x2ac4] ss:$16 sps:$4 sm:$0xff]   ;;  %v19565_v61 = vld [vmem:[#allocation3 + $0x28c0] ss:$16 sps:$4 sm:$0xff]  }
 0x2d7   : > { %13837 = vmatpush2.bf16.msra.mxu0 %v19553_v10 }
 0x2d8   : > { %13880 = vmatpush2.bf16.msra.mxu1 %v19556_v62  ;;  %13892 = vmatprep.subr.bf16.mxu0 %v19561_v8 }
 0x2d9   : > { %13935 = vmatprep.subr.bf16.mxu1 %v19564_v32  ;;  %v19573_v32 = vld [vmem:[#allocation3 + $0x28a4] ss:$16 sps:$4 sm:$0xff]  }
 0x2da   : > { %v13582_v63 = vpop.f32.mrf.mxu0  ;;  %13839 = vmatmul.mubr.bf16.vlgmr.msra.gmra.mxu0 %v22326_v34 }
 0x2db   : > { %v13625_v35 = vpop.f32.mrf.mxu1  ;;  %13882 = vmatmul.mubr.bf16.vlgmr.msra.gmra.mxu1 %v22328_v4  ;;  %v13583_v10 = vadd.f32 %v13582_v63, %v22314_v21  ;;  %13893 = vmatpush1.bf16.msra.mxu0 %v19559_v6  ;;  %v19579_v21 = vld [vmem:[#allocation3 + $0x2884] ss:$16 sps:$4 sm:$0xff]   ;;  %v19580_v63 = vld [vmem:[#allocation3 + $0x2a80] ss:$16 sps:$4 sm:$0xff]  }
 0x2dc   : > { %13936 = vmatpush1.bf16.msra.mxu1 %v19562_v5  ;;  %v22344_v62 = vpop.f32.mrf.mxu0  ;;  %13894 = vmatprep.subr.bf16.mxu0 %v19567_v23  ;;  %v19582_v23 = vld [vmem:[#allocation3 + $0x2a84] ss:$16 sps:$4 sm:$0xff]  }
 0x2dd   : > { %23169 = vst [vmem:[#allocation38_spill] sm:$0xff] %v22344_v62  ;;  %v22346_v8 = vpop.f32.mrf.mxu1  ;;  %13937 = vmatprep.subr.bf16.mxu1 %v19570_v50  ;;  %v22348_v2 = vadd.f32 %v13625_v35, %v13583_v10  ;;  %13924 = vmatprep.mubr.bf16.mxu0 %v22337_v33  ;;  %v19577_v35 = vld [vmem:[#allocation3 + $0x2880] ss:$16 sps:$4 sm:$0xff]   ;;  %v19585_v10 = vld [vmem:[#allocation3 + $0x2864] ss:$16 sps:$4 sm:$0xff]   ;;  %v401_v62 = vld [vmem:[%s22046_s14 + $0x178] sm:$0xff] }
 0x2de   : > { %23170 = vst [vmem:[#allocation39_spill] sm:$0xff] %v22346_v8  ;;  %13967 = vmatprep.mubr.bf16.mxu1 %v22339_v9  ;;  %v13586_v19 = vpop.f32.mrf.mxu0  ;;  %v19588_v8 = vld [vmem:[#allocation3 + $0x2a64] ss:$16 sps:$4 sm:$0xff]   ;;  %v19658_v9 = vld [vmem:[#allocation3 + $0x2ee0] ss:$16 sps:$4 sm:$0xff]  }
 0x2df   : > { %v13587_v6 = vadd.f32 %v13586_v19, %v22319_v3  ;;  %13895 = vmatpush1.bf16.msra.mxu0 %v19565_v61  ;;  %v13629_v5 = vpop.f32.mrf.mxu1  ;;  %v19583_v3 = vld [vmem:[#allocation3 + $0x2860] ss:$16 sps:$4 sm:$0xff]   ;;  %v19591_v61 = vld [vmem:[#allocation3 + $0x2844] ss:$16 sps:$4 sm:$0xff]  }
 0x2e0   : > { %13938 = vmatpush1.bf16.msra.mxu1 %v19568_v42  ;;  %13896 = vmatprep.subr.bf16.mxu0 %v19573_v32  ;;  %v19586_v19 = vld [vmem:[#allocation3 + $0x2a60] ss:$16 sps:$4 sm:$0xff]   ;;  %v19594_v42 = vld [vmem:[#allocation3 + $0x2a44] ss:$16 sps:$4 sm:$0xff]   ;;  %v22367_v4 = vpop.f32.mrf.mxu0 }
 0x2e1   : > { %13939 = vmatprep.subr.bf16.mxu1 %v19576_v18  ;;  %v22353_v50 = vadd.f32 %v13629_v5, %v13587_v6  ;;  %v19589_v32 = vld [vmem:[#allocation3 + $0x2840] ss:$16 sps:$4 sm:$0xff]   ;;  %23173 = vst [vmem:[#allocation42_spill] sm:$0xff] %v22367_v4 }
 0x2e2   : > { %v19592_v18 = vld [vmem:[#allocation3 + $0x2a40] ss:$16 sps:$4 sm:$0xff]  }
 0x2e3   : > { %13897 = vmatpush1.bf16.msra.mxu0 %v19571_v20  ;;  %v19597_v20 = vld [vmem:[#allocation3 + $0x2824] ss:$16 sps:$4 sm:$0xff]   ;;  %v19595_v6 = vld [vmem:[#allocation3 + $0x2820] ss:$16 sps:$4 sm:$0xff]  }
 0x2e4   : > { %13940 = vmatpush1.bf16.msra.mxu1 %v19574_v57  ;;  %13898 = vmatprep.subr.bf16.mxu0 %v19579_v21  ;;  %v19600_v57 = vld [vmem:[#allocation3 + $0x2a24] ss:$16 sps:$4 sm:$0xff]   ;;  %v19598_v5 = vld [vmem:[#allocation3 + $0x2a20] ss:$16 sps:$4 sm:$0xff]  }
 0x2e5   : > { %13941 = vmatprep.subr.bf16.mxu1 %v19582_v23  ;;  %v19603_v21 = vld [vmem:[#allocation3 + $0x2804] ss:$16 sps:$4 sm:$0xff]  }
 0x2e6   : > { %v19606_v23 = vld [vmem:[#allocation3 + $0x2a04] ss:$16 sps:$4 sm:$0xff]  }
 0x2e7   : > { %13899 = vmatpush1.bf16.msra.mxu0 %v19577_v35  ;;  %v19604_v35 = vld [vmem:[#allocation3 + $0x2a00] ss:$16 sps:$4 sm:$0xff]  }
 0x2e8   : > { %13942 = vmatpush1.bf16.msra.mxu1 %v19580_v63  ;;  %13900 = vmatprep.subr.bf16.mxu0 %v19585_v10  ;;  %v19609_v63 = vld [vmem:[#allocation3 + $0x29e4] ss:$16 sps:$4 sm:$0xff]  }
 0x2e9   : > { %13943 = vmatprep.subr.bf16.mxu1 %v19588_v8  ;;  %v19601_v8 = vld [vmem:[#allocation3 + $0x2800] ss:$16 sps:$4 sm:$0xff]   ;;  %v19612_v10 = vld [vmem:[#allocation3 + $0x2be4] ss:$16 sps:$4 sm:$0xff]  }
 0x2ea   : > { %v470_v4 = vld [vmem:[%s22046_s14 + $0x3a0] sm:$0xff] }
 0x2eb   : > { %13901 = vmatpush1.bf16.msra.mxu0 %v19583_v3  ;;  %v19607_v3 = vld [vmem:[#allocation3 + $0x29e0] ss:$16 sps:$4 sm:$0xff]  }
 0x2ec   : > { %13944 = vmatpush1.bf16.msra.mxu1 %v19586_v19  ;;  %13902 = vmatprep.subr.bf16.mxu0 %v19591_v61  ;;  %v19610_v19 = vld [vmem:[#allocation3 + $0x2be0] ss:$16 sps:$4 sm:$0xff]   ;;  %v19615_v61 = vld [vmem:[#allocation3 + $0x29c4] ss:$16 sps:$4 sm:$0xff]  }
 0x2ed   : > { %13945 = vmatprep.subr.bf16.mxu1 %v19594_v42  ;;  %v19618_v42 = vld [vmem:[#allocation3 + $0x2bc4] ss:$16 sps:$4 sm:$0xff]  }
 0x2ef   : > { %13903 = vmatpush1.bf16.msra.mxu0 %v19589_v32  ;;  %v19613_v32 = vld [vmem:[#allocation3 + $0x29c0] ss:$16 sps:$4 sm:$0xff]  }
 0x2f0   : > { %13946 = vmatpush1.bf16.msra.mxu1 %v19592_v18  ;;  %13904 = vmatprep.subr.bf16.mxu0 %v19597_v20  ;;  %v19616_v18 = vld [vmem:[#allocation3 + $0x2bc0] ss:$16 sps:$4 sm:$0xff]   ;;  %v19621_v20 = vld [vmem:[#allocation3 + $0x29a4] ss:$16 sps:$4 sm:$0xff]  }
 0x2f1   : > { %13947 = vmatprep.subr.bf16.mxu1 %v19600_v57  ;;  %v19624_v57 = vld [vmem:[#allocation3 + $0x2ba4] ss:$16 sps:$4 sm:$0xff]  }
 0x2f3   : > { %13905 = vmatpush1.bf16.msra.mxu0 %v19595_v6  ;;  %v19619_v6 = vld [vmem:[#allocation3 + $0x29a0] ss:$16 sps:$4 sm:$0xff]  }
 0x2f4   : > { %13948 = vmatpush1.bf16.msra.mxu1 %v19598_v5  ;;  %13906 = vmatprep.subr.bf16.mxu0 %v19603_v21  ;;  %v19622_v5 = vld [vmem:[#allocation3 + $0x2ba0] ss:$16 sps:$4 sm:$0xff]   ;;  %v19627_v21 = vld [vmem:[#allocation3 + $0x2984] ss:$16 sps:$4 sm:$0xff]  }
 0x2f5   : > { %13949 = vmatprep.subr.bf16.mxu1 %v19606_v23  ;;  %v19630_v23 = vld [vmem:[#allocation3 + $0x2b84] ss:$16 sps:$4 sm:$0xff]  }
 0x2f7   : > { %13907 = vmatpush1.bf16.msra.mxu0 %v19601_v8  ;;  %v19625_v8 = vld [vmem:[#allocation3 + $0x2980] ss:$16 sps:$4 sm:$0xff]  }
 0x2f8   : > { %13950 = vmatpush1.bf16.msra.mxu1 %v19604_v35  ;;  %13908 = vmatprep.subr.bf16.mxu0 %v19609_v63  ;;  %v19628_v35 = vld [vmem:[#allocation3 + $0x2b80] ss:$16 sps:$4 sm:$0xff]   ;;  %v19633_v63 = vld [vmem:[#allocation3 + $0x2964] ss:$16 sps:$4 sm:$0xff]  }
 0x2f9   : > { %13951 = vmatprep.subr.bf16.mxu1 %v19612_v10  ;;  %v19636_v10 = vld [vmem:[#allocation3 + $0x2b64] ss:$16 sps:$4 sm:$0xff]  }
 0x2fb   : > { %13909 = vmatpush2.bf16.msra.mxu0 %v19607_v3  ;;  %v19631_v3 = vld [vmem:[#allocation3 + $0x2960] ss:$16 sps:$4 sm:$0xff]  }
 0x2fc   : > { %13952 = vmatpush2.bf16.msra.mxu1 %v19610_v19  ;;  %13910 = vmatprep.subr.bf16.mxu0 %v19615_v61  ;;  %v19634_v19 = vld [vmem:[#allocation3 + $0x2b60] ss:$16 sps:$4 sm:$0xff]   ;;  %v19639_v61 = vld [vmem:[#allocation3 + $0x2944] ss:$16 sps:$4 sm:$0xff]  }
 0x2fd   : > { %13953 = vmatprep.subr.bf16.mxu1 %v19618_v42  ;;  %v19642_v42 = vld [vmem:[#allocation3 + $0x2b44] ss:$16 sps:$4 sm:$0xff]  }
 0x2ff   : > { %13911 = vmatpush2.bf16.msra.mxu0 %v19613_v32  ;;  %v19637_v32 = vld [vmem:[#allocation3 + $0x2940] ss:$16 sps:$4 sm:$0xff]  }
 0x300   : > { %13954 = vmatpush2.bf16.msra.mxu1 %v19616_v18  ;;  %13912 = vmatprep.subr.bf16.mxu0 %v19621_v20  ;;  %v19640_v18 = vld [vmem:[#allocation3 + $0x2b40] ss:$16 sps:$4 sm:$0xff]   ;;  %v19645_v20 = vld [vmem:[#allocation3 + $0x2924] ss:$16 sps:$4 sm:$0xff]  }
 0x301   : > { %13955 = vmatprep.subr.bf16.mxu1 %v19624_v57  ;;  %v19648_v57 = vld [vmem:[#allocation3 + $0x2b24] ss:$16 sps:$4 sm:$0xff]  }
 0x303   : > { %13913 = vmatpush2.bf16.msra.mxu0 %v19619_v6  ;;  %v19643_v6 = vld [vmem:[#allocation3 + $0x2920] ss:$16 sps:$4 sm:$0xff]  }
 0x304   : > { %13956 = vmatpush2.bf16.msra.mxu1 %v19622_v5  ;;  %13914 = vmatprep.subr.bf16.mxu0 %v19627_v21  ;;  %v19646_v5 = vld [vmem:[#allocation3 + $0x2b20] ss:$16 sps:$4 sm:$0xff]   ;;  %v19651_v21 = vld [vmem:[#allocation3 + $0x2904] ss:$16 sps:$4 sm:$0xff]  }
 0x305   : > { %13957 = vmatprep.subr.bf16.mxu1 %v19630_v23  ;;  %v19654_v23 = vld [vmem:[#allocation3 + $0x2b04] ss:$16 sps:$4 sm:$0xff]  }
 0x307   : > { %13915 = vmatpush2.bf16.msra.mxu0 %v19625_v8  ;;  %v19649_v8 = vld [vmem:[#allocation3 + $0x2900] ss:$16 sps:$4 sm:$0xff]  }
 0x308   : > { %13958 = vmatpush2.bf16.msra.mxu1 %v19628_v35  ;;  %13916 = vmatprep.subr.bf16.mxu0 %v19633_v63  ;;  %v19652_v35 = vld [vmem:[#allocation3 + $0x2b00] ss:$16 sps:$4 sm:$0xff]  }
 0x309   : > { %13959 = vmatprep.subr.bf16.mxu1 %v19636_v10  ;;  %v394_v63 = vld [vmem:[%s22046_s14 + $0x140] sm:$0xff]  ;;  %v459_v10 = vld [vmem:[%s22046_s14 + $0x348] sm:$0xff] }
 0x30b   : > { %13917 = vmatpush2.bf16.msra.mxu0 %v19631_v3  ;;  %v396_v3 = vld [vmem:[%s22046_s14 + $0x150] sm:$0xff] }
 0x30c   : > { %13960 = vmatpush2.bf16.msra.mxu1 %v19634_v19  ;;  %13918 = vmatprep.subr.bf16.mxu0 %v19639_v61  ;;  %v461_v19 = vld [vmem:[%s22046_s14 + $0x358] sm:$0xff]  ;;  %v19657_v61 = vld [vmem:[#allocation3 + $0x2ce4] ss:$16 sps:$4 sm:$0xff]  }
 0x30d   : > { %13961 = vmatprep.subr.bf16.mxu1 %v19642_v42  ;;  %v19660_v42 = vld [vmem:[#allocation3 + $0x2ee4] ss:$16 sps:$4 sm:$0xff]  }
 0x30f   : > { %13919 = vmatpush2.bf16.msra.mxu0 %v19637_v32  ;;  %v399_v32 = vld [vmem:[%s22046_s14 + $0x168] sm:$0xff] }
 0x310   : > { %13962 = vmatpush2.bf16.msra.mxu1 %v19640_v18  ;;  %13920 = vmatprep.subr.bf16.mxu0 %v19645_v20  ;;  %v22360_v18 = vpack.c.bf16 %v459_v10, %v394_v63  ;;  %v22362_v20 = vpack.c.bf16 %v461_v19, %v396_v3  ;;  %v19664_v63 = vld [vmem:[#allocation3 + $0x2ec0] ss:$16 sps:$4 sm:$0xff]   ;;  %v22373_v3 = vpack.c.bf16 %v466_v39, %v401_v62 }
 0x311   : > { %13963 = vmatprep.subr.bf16.mxu1 %v19648_v57  ;;  %v464_v57 = vld [vmem:[%s22046_s14 + $0x370] sm:$0xff] }
 0x312   : > { %23171 = vst [vmem:[#allocation40_spill] sm:$0xff] %v22360_v18  ;;  %23172 = vst [vmem:[#allocation41_spill] sm:$0xff] %v22362_v20  ;;  %v22371_v10 = vpack.c.bf16 %v464_v57, %v399_v32  ;;  %v19672_v32 = vld [vmem:[#allocation3 + $0x2ea4] ss:$16 sps:$4 sm:$0xff]   ;;  %v19667_v62 = vld [vmem:[#allocation3 + $0x2ca0] ss:$16 sps:$4 sm:$0xff]  }
 0x313   : > { %13921 = vmatpush2.bf16.msra.mxu0 %v19643_v6  ;;  %v22369_v6 = vpop.f32.mrf.mxu1  ;;  %23176 = vst [vmem:[#allocation45_spill] sm:$0xff] %v22373_v3  ;;  %v19670_v57 = vld [vmem:[#allocation3 + $0x2ea0] ss:$16 sps:$4 sm:$0xff]  }
 0x314   : > { %13964 = vmatpush2.bf16.msra.mxu1 %v19646_v5  ;;  %13922 = vmatprep.subr.bf16.mxu0 %v19651_v21  ;;  %23174 = vst [vmem:[#allocation43_spill] sm:$0xff] %v22369_v6  ;;  %v19663_v5 = vld [vmem:[#allocation3 + $0x2cc4] ss:$16 sps:$4 sm:$0xff]   ;;  %23175 = vst [vmem:[#allocation44_spill] sm:$0xff] %v22371_v10 }
 0x315   : > { %13965 = vmatprep.subr.bf16.mxu1 %v19654_v23  ;;  %v19666_v21 = vld [vmem:[#allocation3 + $0x2ec4] ss:$16 sps:$4 sm:$0xff]   ;;  %v19661_v23 = vld [vmem:[#allocation3 + $0x2cc0] ss:$16 sps:$4 sm:$0xff]  }
 0x317   : > { %13923 = vmatpush2.bf16.msra.mxu0 %v19649_v8 }
 0x318   : > { %13966 = vmatpush2.bf16.msra.mxu1 %v19652_v35  ;;  %13978 = vmatprep.subr.bf16.mxu0 %v19657_v61 }
 0x319   : > { %14021 = vmatprep.subr.bf16.mxu1 %v19660_v42  ;;  %v19669_v42 = vld [vmem:[#allocation3 + $0x2ca4] ss:$16 sps:$4 sm:$0xff]  }
 0x31a   : > { %v13668_v19 = vpop.f32.mrf.mxu0  ;;  %13925 = vmatmul.mubr.bf16.vlgmr.msra.gmra.mxu0 %v22360_v18 }
 0x31b   : > { %v13711_v33 = vpop.f32.mrf.mxu1  ;;  %13968 = vmatmul.mubr.bf16.vlgmr.msra.gmra.mxu1 %v22362_v20  ;;  %v13669_v8 = vadd.f32 %v13668_v19, %v22348_v2  ;;  %13979 = vmatpush1.bf16.msra.mxu0 %v19655_v36  ;;  %v19675_v2 = vld [vmem:[#allocation3 + $0x2c84] ss:$16 sps:$4 sm:$0xff]   ;;  %v19676_v19 = vld [vmem:[#allocation3 + $0x2e80] ss:$16 sps:$4 sm:$0xff]  }
 0x31c   : > { %14022 = vmatpush1.bf16.msra.mxu1 %v19658_v9  ;;  %v22378_v35 = vpop.f32.mrf.mxu0  ;;  %13980 = vmatprep.subr.bf16.mxu0 %v19663_v5  ;;  %v19678_v5 = vld [vmem:[#allocation3 + $0x2e84] ss:$16 sps:$4 sm:$0xff]   ;;  %v19754_v20 = vld [vmem:[#allocation3 + $0x32e0] ss:$16 sps:$4 sm:$0xff]  }
 0x31d   : > { %23177 = vst [vmem:[#allocation46_spill] sm:$0xff] %v22378_v35  ;;  %v22380_v61 = vpop.f32.mrf.mxu1  ;;  %14023 = vmatprep.subr.bf16.mxu1 %v19666_v21  ;;  %v22382_v39 = vadd.f32 %v13711_v33, %v13669_v8  ;;  %14010 = vmatprep.mubr.bf16.mxu0 %v22371_v10  ;;  %v19673_v33 = vld [vmem:[#allocation3 + $0x2c80] ss:$16 sps:$4 sm:$0xff]   ;;  %v19681_v8 = vld [vmem:[#allocation3 + $0x2c64] ss:$16 sps:$4 sm:$0xff]   ;;  %v405_v35 = vld [vmem:[%s22046_s14 + $0x198] sm:$0xff] }
 0x31e   : > { %23178 = vst [vmem:[#allocation47_spill] sm:$0xff] %v22380_v61  ;;  %14053 = vmatprep.mubr.bf16.mxu1 %v22373_v3  ;;  %v13672_v6 = vpop.f32.mrf.mxu0  ;;  %v19684_v61 = vld [vmem:[#allocation3 + $0x2e64] ss:$16 sps:$4 sm:$0xff]   ;;  %v19751_v3 = vld [vmem:[#allocation3 + $0x30e0] ss:$16 sps:$4 sm:$0xff]  }
 0x31f   : > { %v13673_v36 = vadd.f32 %v13672_v6, %v22353_v50  ;;  %13981 = vmatpush1.bf16.msra.mxu0 %v19661_v23  ;;  %v13715_v9 = vpop.f32.mrf.mxu1  ;;  %v19679_v50 = vld [vmem:[#allocation3 + $0x2c60] ss:$16 sps:$4 sm:$0xff]   ;;  %v19687_v23 = vld [vmem:[#allocation3 + $0x2c44] ss:$16 sps:$4 sm:$0xff]  }
 0x320   : > { %14024 = vmatpush1.bf16.msra.mxu1 %v19664_v63  ;;  %13982 = vmatprep.subr.bf16.mxu0 %v19669_v42  ;;  %v19682_v6 = vld [vmem:[#allocation3 + $0x2e60] ss:$16 sps:$4 sm:$0xff]   ;;  %v19690_v63 = vld [vmem:[#allocation3 + $0x2e44] ss:$16 sps:$4 sm:$0xff]   ;;  %v22401_v10 = vpop.f32.mrf.mxu0 }
 0x321   : > { %14025 = vmatprep.subr.bf16.mxu1 %v19672_v32  ;;  %v22387_v21 = vadd.f32 %v13715_v9, %v13673_v36  ;;  %v19685_v42 = vld [vmem:[#allocation3 + $0x2c40] ss:$16 sps:$4 sm:$0xff]   ;;  %23181 = vst [vmem:[#allocation50_spill] sm:$0xff] %v22401_v10 }
 0x322   : > { %v19688_v32 = vld [vmem:[#allocation3 + $0x2e40] ss:$16 sps:$4 sm:$0xff]  }
 0x323   : > { %13983 = vmatpush1.bf16.msra.mxu0 %v19667_v62  ;;  %v19693_v62 = vld [vmem:[#allocation3 + $0x2c24] ss:$16 sps:$4 sm:$0xff]   ;;  %v19691_v36 = vld [vmem:[#allocation3 + $0x2c20] ss:$16 sps:$4 sm:$0xff]  }
 0x324   : > { %14026 = vmatpush1.bf16.msra.mxu1 %v19670_v57  ;;  %13984 = vmatprep.subr.bf16.mxu0 %v19675_v2  ;;  %v19696_v57 = vld [vmem:[#allocation3 + $0x2e24] ss:$16 sps:$4 sm:$0xff]   ;;  %v19694_v9 = vld [vmem:[#allocation3 + $0x2e20] ss:$16 sps:$4 sm:$0xff]  }
 0x325   : > { %14027 = vmatprep.subr.bf16.mxu1 %v19678_v5  ;;  %v19699_v2 = vld [vmem:[#allocation3 + $0x2c04] ss:$16 sps:$4 sm:$0xff]  }
 0x326   : > { %v19702_v5 = vld [vmem:[#allocation3 + $0x2e04] ss:$16 sps:$4 sm:$0xff]  }
 0x327   : > { %13985 = vmatpush1.bf16.msra.mxu0 %v19673_v33  ;;  %v19700_v33 = vld [vmem:[#allocation3 + $0x2e00] ss:$16 sps:$4 sm:$0xff]  }
 0x328   : > { %14028 = vmatpush1.bf16.msra.mxu1 %v19676_v19  ;;  %13986 = vmatprep.subr.bf16.mxu0 %v19681_v8  ;;  %v19705_v19 = vld [vmem:[#allocation3 + $0x2de4] ss:$16 sps:$4 sm:$0xff]  }
 0x329   : > { %14029 = vmatprep.subr.bf16.mxu1 %v19684_v61  ;;  %v19697_v61 = vld [vmem:[#allocation3 + $0x2c00] ss:$16 sps:$4 sm:$0xff]   ;;  %v19708_v8 = vld [vmem:[#allocation3 + $0x2fe4] ss:$16 sps:$4 sm:$0xff]  }
 0x32a   : > { %v474_v10 = vld [vmem:[%s22046_s14 + $0x3c0] sm:$0xff] }
 0x32b   : > { %13987 = vmatpush1.bf16.msra.mxu0 %v19679_v50  ;;  %v19703_v50 = vld [vmem:[#allocation3 + $0x2de0] ss:$16 sps:$4 sm:$0xff]  }
 0x32c   : > { %14030 = vmatpush1.bf16.msra.mxu1 %v19682_v6  ;;  %13988 = vmatprep.subr.bf16.mxu0 %v19687_v23  ;;  %v19706_v6 = vld [vmem:[#allocation3 + $0x2fe0] ss:$16 sps:$4 sm:$0xff]   ;;  %v19711_v23 = vld [vmem:[#allocation3 + $0x2dc4] ss:$16 sps:$4 sm:$0xff]  }
 0x32d   : > { %14031 = vmatprep.subr.bf16.mxu1 %v19690_v63  ;;  %v19714_v63 = vld [vmem:[#allocation3 + $0x2fc4] ss:$16 sps:$4 sm:$0xff]  }
 0x32f   : > { %13989 = vmatpush1.bf16.msra.mxu0 %v19685_v42  ;;  %v19709_v42 = vld [vmem:[#allocation3 + $0x2dc0] ss:$16 sps:$4 sm:$0xff]  }
 0x330   : > { %14032 = vmatpush1.bf16.msra.mxu1 %v19688_v32  ;;  %13990 = vmatprep.subr.bf16.mxu0 %v19693_v62  ;;  %v19712_v32 = vld [vmem:[#allocation3 + $0x2fc0] ss:$16 sps:$4 sm:$0xff]   ;;  %v19717_v62 = vld [vmem:[#allocation3 + $0x2da4] ss:$16 sps:$4 sm:$0xff]  }
 0x331   : > { %14033 = vmatprep.subr.bf16.mxu1 %v19696_v57  ;;  %v19720_v57 = vld [vmem:[#allocation3 + $0x2fa4] ss:$16 sps:$4 sm:$0xff]  }
 0x333   : > { %13991 = vmatpush1.bf16.msra.mxu0 %v19691_v36  ;;  %v19715_v36 = vld [vmem:[#allocation3 + $0x2da0] ss:$16 sps:$4 sm:$0xff]  }
 0x334   : > { %14034 = vmatpush1.bf16.msra.mxu1 %v19694_v9  ;;  %13992 = vmatprep.subr.bf16.mxu0 %v19699_v2  ;;  %v19718_v9 = vld [vmem:[#allocation3 + $0x2fa0] ss:$16 sps:$4 sm:$0xff]   ;;  %v19723_v2 = vld [vmem:[#allocation3 + $0x2d84] ss:$16 sps:$4 sm:$0xff]  }
 0x335   : > { %14035 = vmatprep.subr.bf16.mxu1 %v19702_v5  ;;  %v19726_v5 = vld [vmem:[#allocation3 + $0x2f84] ss:$16 sps:$4 sm:$0xff]  }
 0x337   : > { %13993 = vmatpush1.bf16.msra.mxu0 %v19697_v61  ;;  %v19721_v61 = vld [vmem:[#allocation3 + $0x2d80] ss:$16 sps:$4 sm:$0xff]  }
 0x338   : > { %14036 = vmatpush1.bf16.msra.mxu1 %v19700_v33  ;;  %13994 = vmatprep.subr.bf16.mxu0 %v19705_v19  ;;  %v19724_v33 = vld [vmem:[#allocation3 + $0x2f80] ss:$16 sps:$4 sm:$0xff]   ;;  %v19729_v19 = vld [vmem:[#allocation3 + $0x2d64] ss:$16 sps:$4 sm:$0xff]  }
 0x339   : > { %14037 = vmatprep.subr.bf16.mxu1 %v19708_v8  ;;  %v19732_v8 = vld [vmem:[#allocation3 + $0x2f64] ss:$16 sps:$4 sm:$0xff]  }
 0x33b   : > { %13995 = vmatpush2.bf16.msra.mxu0 %v19703_v50  ;;  %v19727_v50 = vld [vmem:[#allocation3 + $0x2d60] ss:$16 sps:$4 sm:$0xff]  }
 0x33c   : > { %14038 = vmatpush2.bf16.msra.mxu1 %v19706_v6  ;;  %13996 = vmatprep.subr.bf16.mxu0 %v19711_v23  ;;  %v19730_v6 = vld [vmem:[#allocation3 + $0x2f60] ss:$16 sps:$4 sm:$0xff]   ;;  %v19735_v23 = vld [vmem:[#allocation3 + $0x2d44] ss:$16 sps:$4 sm:$0xff]  }
 0x33d   : > { %14039 = vmatprep.subr.bf16.mxu1 %v19714_v63  ;;  %v19738_v63 = vld [vmem:[#allocation3 + $0x2f44] ss:$16 sps:$4 sm:$0xff]  }
 0x33f   : > { %13997 = vmatpush2.bf16.msra.mxu0 %v19709_v42  ;;  %v19733_v42 = vld [vmem:[#allocation3 + $0x2d40] ss:$16 sps:$4 sm:$0xff]  }
 0x340   : > { %14040 = vmatpush2.bf16.msra.mxu1 %v19712_v32  ;;  %13998 = vmatprep.subr.bf16.mxu0 %v19717_v62  ;;  %v19736_v32 = vld [vmem:[#allocation3 + $0x2f40] ss:$16 sps:$4 sm:$0xff]   ;;  %v19741_v62 = vld [vmem:[#allocation3 + $0x2d24] ss:$16 sps:$4 sm:$0xff]  }
 0x341   : > { %14041 = vmatprep.subr.bf16.mxu1 %v19720_v57  ;;  %v19744_v57 = vld [vmem:[#allocation3 + $0x2f24] ss:$16 sps:$4 sm:$0xff]  }
 0x343   : > { %13999 = vmatpush2.bf16.msra.mxu0 %v19715_v36  ;;  %v19739_v36 = vld [vmem:[#allocation3 + $0x2d20] ss:$16 sps:$4 sm:$0xff]  }
 0x344   : > { %14042 = vmatpush2.bf16.msra.mxu1 %v19718_v9  ;;  %14000 = vmatprep.subr.bf16.mxu0 %v19723_v2  ;;  %v19742_v9 = vld [vmem:[#allocation3 + $0x2f20] ss:$16 sps:$4 sm:$0xff]   ;;  %v19747_v2 = vld [vmem:[#allocation3 + $0x2d04] ss:$16 sps:$4 sm:$0xff]  }
 0x345   : > { %14043 = vmatprep.subr.bf16.mxu1 %v19726_v5  ;;  %v19750_v5 = vld [vmem:[#allocation3 + $0x2f04] ss:$16 sps:$4 sm:$0xff]  }
 0x347   : > { %14001 = vmatpush2.bf16.msra.mxu0 %v19721_v61  ;;  %v19745_v61 = vld [vmem:[#allocation3 + $0x2d00] ss:$16 sps:$4 sm:$0xff]  }
 0x348   : > { %14044 = vmatpush2.bf16.msra.mxu1 %v19724_v33  ;;  %14002 = vmatprep.subr.bf16.mxu0 %v19729_v19  ;;  %v19748_v33 = vld [vmem:[#allocation3 + $0x2f00] ss:$16 sps:$4 sm:$0xff]  }
 0x349   : > { %14045 = vmatprep.subr.bf16.mxu1 %v19732_v8  ;;  %v398_v19 = vld [vmem:[%s22046_s14 + $0x160] sm:$0xff]  ;;  %v463_v8 = vld [vmem:[%s22046_s14 + $0x368] sm:$0xff] }
 0x34b   : > { %14003 = vmatpush2.bf16.msra.mxu0 %v19727_v50  ;;  %v400_v50 = vld [vmem:[%s22046_s14 + $0x170] sm:$0xff] }
 0x34c   : > { %14046 = vmatpush2.bf16.msra.mxu1 %v19730_v6  ;;  %14004 = vmatprep.subr.bf16.mxu0 %v19735_v23  ;;  %v465_v6 = vld [vmem:[%s22046_s14 + $0x378] sm:$0xff]  ;;  %v19753_v23 = vld [vmem:[#allocation3 + $0x30e4] ss:$16 sps:$4 sm:$0xff]  }
 0x34d   : > { %14047 = vmatprep.subr.bf16.mxu1 %v19738_v63  ;;  %v19756_v63 = vld [vmem:[#allocation3 + $0x32e4] ss:$16 sps:$4 sm:$0xff]  }
 0x34f   : > { %14005 = vmatpush2.bf16.msra.mxu0 %v19733_v42  ;;  %v403_v42 = vld [vmem:[%s22046_s14 + $0x188] sm:$0xff] }
 0x350   : > { %14048 = vmatpush2.bf16.msra.mxu1 %v19736_v32  ;;  %14006 = vmatprep.subr.bf16.mxu0 %v19741_v62  ;;  %v22394_v32 = vpack.c.bf16 %v463_v8, %v398_v19  ;;  %v22396_v62 = vpack.c.bf16 %v465_v6, %v400_v50  ;;  %v22405_v19 = vpack.c.bf16 %v470_v4, %v405_v35  ;;  %v22407_v8 = vpop.f32.mrf.mxu1  ;;  %v19763_v35 = vld [vmem:[#allocation3 + $0x30a0] ss:$16 sps:$4 sm:$0xff]  }
 0x351   : > { %14049 = vmatprep.subr.bf16.mxu1 %v19744_v57  ;;  %v468_v57 = vld [vmem:[%s22046_s14 + $0x390] sm:$0xff]  ;;  %23184 = vst [vmem:[#allocation53_spill] sm:$0xff] %v22407_v8  ;;  %v409_v8 = vld [vmem:[%s22046_s14 + $0x1b8] sm:$0xff] }
 0x352   : > { %23179 = vst [vmem:[#allocation48_spill] sm:$0xff] %v22394_v32  ;;  %23180 = vst [vmem:[#allocation49_spill] sm:$0xff] %v22396_v62  ;;  %v22403_v18 = vpack.c.bf16 %v468_v57, %v403_v42  ;;  %v19766_v42 = vld [vmem:[#allocation3 + $0x32a0] ss:$16 sps:$4 sm:$0xff]  }
 0x353   : > { %14007 = vmatpush2.bf16.msra.mxu0 %v19739_v36  ;;  %v19759_v36 = vld [vmem:[#allocation3 + $0x30c4] ss:$16 sps:$4 sm:$0xff]   ;;  %23183 = vst [vmem:[#allocation52_spill] sm:$0xff] %v22405_v19 }
 0x354   : > { %14050 = vmatpush2.bf16.msra.mxu1 %v19742_v9  ;;  %14008 = vmatprep.subr.bf16.mxu0 %v19747_v2  ;;  %v19762_v9 = vld [vmem:[#allocation3 + $0x32c4] ss:$16 sps:$4 sm:$0xff]   ;;  %v19757_v2 = vld [vmem:[#allocation3 + $0x30c0] ss:$16 sps:$4 sm:$0xff]   ;;  %23182 = vst [vmem:[#allocation51_spill] sm:$0xff] %v22403_v18 }
 0x355   : > { %14051 = vmatprep.subr.bf16.mxu1 %v19750_v5  ;;  %v19760_v5 = vld [vmem:[#allocation3 + $0x32c0] ss:$16 sps:$4 sm:$0xff]  }
 0x357   : > { %14009 = vmatpush2.bf16.msra.mxu0 %v19745_v61 }
 0x358   : > { %14052 = vmatpush2.bf16.msra.mxu1 %v19748_v33  ;;  %14064 = vmatprep.subr.bf16.mxu0 %v19753_v23  ;;  %v19765_v23 = vld [vmem:[#allocation3 + $0x30a4] ss:$16 sps:$4 sm:$0xff]  }
 0x359   : > { %14107 = vmatprep.subr.bf16.mxu1 %v19756_v63  ;;  %v19768_v63 = vld [vmem:[#allocation3 + $0x32a4] ss:$16 sps:$4 sm:$0xff]  }
 0x35a   : > { %v13754_v50 = vpop.f32.mrf.mxu0  ;;  %14011 = vmatmul.mubr.bf16.vlgmr.msra.gmra.mxu0 %v22394_v32 }
 0x35b   : > { %14054 = vmatmul.mubr.bf16.vlgmr.msra.gmra.mxu1 %v22396_v62  ;;  %v13755_v61 = vadd.f32 %v13754_v50, %v22382_v39  ;;  %14065 = vmatpush1.bf16.msra.mxu0 %v19751_v3  ;;  %v13797_v33 = vpop.f32.mrf.mxu1  ;;  %v19774_v3 = vld [vmem:[#allocation3 + $0x3284] ss:$16 sps:$4 sm:$0xff]   ;;  %v19850_v62 = vld [vmem:[#allocation3 + $0x36e0] ss:$16 sps:$4 sm:$0xff]  }
 0x35c   : > { %14108 = vmatpush1.bf16.msra.mxu1 %v19754_v20  ;;  %v22412_v6 = vpop.f32.mrf.mxu0  ;;  %14066 = vmatprep.subr.bf16.mxu0 %v19759_v36  ;;  %v19771_v20 = vld [vmem:[#allocation3 + $0x3084] ss:$16 sps:$4 sm:$0xff]   ;;  %v19769_v36 = vld [vmem:[#allocation3 + $0x3080] ss:$16 sps:$4 sm:$0xff]  }
 0x35d   : > { %23185 = vst [vmem:[#allocation54_spill] sm:$0xff] %v22412_v6  ;;  %14109 = vmatprep.subr.bf16.mxu1 %v19762_v9  ;;  %v22414_v4 = vadd.f32 %v13797_v33, %v13755_v61  ;;  %14096 = vmatprep.mubr.bf16.mxu0 %v22403_v18  ;;  %v19772_v9 = vld [vmem:[#allocation3 + $0x3280] ss:$16 sps:$4 sm:$0xff]   ;;  %v19777_v50 = vld [vmem:[#allocation3 + $0x3064] ss:$16 sps:$4 sm:$0xff]  }
 0x35e   : > { %14139 = vmatprep.mubr.bf16.mxu1 %v22405_v19  ;;  %v13758_v57 = vpop.f32.mrf.mxu0  ;;  %v19780_v61 = vld [vmem:[#allocation3 + $0x3264] ss:$16 sps:$4 sm:$0xff]   ;;  %v19775_v33 = vld [vmem:[#allocation3 + $0x3060] ss:$16 sps:$4 sm:$0xff]  }
 0x35f   : > { %v22419_v39 = vadd.f32 %v13758_v57, %v22387_v21  ;;  %14067 = vmatpush1.bf16.msra.mxu0 %v19757_v2  ;;  %v19778_v6 = vld [vmem:[#allocation3 + $0x3260] ss:$16 sps:$4 sm:$0xff]   ;;  %v19783_v21 = vld [vmem:[#allocation3 + $0x3044] ss:$16 sps:$4 sm:$0xff]  }
 0x360   : > { %14110 = vmatpush1.bf16.msra.mxu1 %v19760_v5  ;;  %14068 = vmatprep.subr.bf16.mxu0 %v19765_v23  ;;  %v19786_v2 = vld [vmem:[#allocation3 + $0x3244] ss:$16 sps:$4 sm:$0xff]   ;;  %v19781_v5 = vld [vmem:[#allocation3 + $0x3040] ss:$16 sps:$4 sm:$0xff]   ;;  %v22433_v18 = vpop.f32.mrf.mxu0 }
 0x361   : > { %14111 = vmatprep.subr.bf16.mxu1 %v19768_v63  ;;  %v19784_v23 = vld [vmem:[#allocation3 + $0x3240] ss:$16 sps:$4 sm:$0xff]   ;;  %v19789_v63 = vld [vmem:[#allocation3 + $0x3024] ss:$16 sps:$4 sm:$0xff]   ;;  %23188 = vst [vmem:[#allocation57_spill] sm:$0xff] %v22433_v18 }
 0x362   : > { %v19790_v57 = vld [vmem:[#allocation3 + $0x3220] ss:$16 sps:$4 sm:$0xff]  }
 0x363   : > { %14069 = vmatpush1.bf16.msra.mxu0 %v19763_v35  ;;  %v19792_v35 = vld [vmem:[#allocation3 + $0x3224] ss:$16 sps:$4 sm:$0xff]   ;;  %v19847_v19 = vld [vmem:[#allocation3 + $0x34e0] ss:$16 sps:$4 sm:$0xff]  }
 0x364   : > { %14112 = vmatpush1.bf16.msra.mxu1 %v19766_v42  ;;  %14070 = vmatprep.subr.bf16.mxu0 %v19771_v20  ;;  %v19787_v42 = vld [vmem:[#allocation3 + $0x3020] ss:$16 sps:$4 sm:$0xff]   ;;  %v19795_v20 = vld [vmem:[#allocation3 + $0x3004] ss:$16 sps:$4 sm:$0xff]  }
 0x365   : > { %14113 = vmatprep.subr.bf16.mxu1 %v19774_v3  ;;  %v19798_v3 = vld [vmem:[#allocation3 + $0x3204] ss:$16 sps:$4 sm:$0xff]  }
 0x366   : > { %v478_v18 = vld [vmem:[%s22046_s14 + $0x3e0] sm:$0xff] }
 0x367   : > { %14071 = vmatpush1.bf16.msra.mxu0 %v19769_v36  ;;  %v19793_v36 = vld [vmem:[#allocation3 + $0x3000] ss:$16 sps:$4 sm:$0xff]  }
 0x368   : > { %14114 = vmatpush1.bf16.msra.mxu1 %v19772_v9  ;;  %14072 = vmatprep.subr.bf16.mxu0 %v19777_v50  ;;  %v19796_v9 = vld [vmem:[#allocation3 + $0x3200] ss:$16 sps:$4 sm:$0xff]   ;;  %v19804_v50 = vld [vmem:[#allocation3 + $0x33e4] ss:$16 sps:$4 sm:$0xff]  }
 0x369   : > { %14115 = vmatprep.subr.bf16.mxu1 %v19780_v61  ;;  %v19799_v61 = vld [vmem:[#allocation3 + $0x31e0] ss:$16 sps:$4 sm:$0xff]  }
 0x36b   : > { %14073 = vmatpush1.bf16.msra.mxu0 %v19775_v33  ;;  %v19802_v33 = vld [vmem:[#allocation3 + $0x33e0] ss:$16 sps:$4 sm:$0xff]  }
 0x36c   : > { %14116 = vmatpush1.bf16.msra.mxu1 %v19778_v6  ;;  %14074 = vmatprep.subr.bf16.mxu0 %v19783_v21  ;;  %v19801_v6 = vld [vmem:[#allocation3 + $0x31e4] ss:$16 sps:$4 sm:$0xff]  }
 0x36d   : > { %14117 = vmatprep.subr.bf16.mxu1 %v19786_v2  ;;  %v19807_v21 = vld [vmem:[#allocation3 + $0x31c4] ss:$16 sps:$4 sm:$0xff]  }
 0x36e   : > { %v19810_v2 = vld [vmem:[#allocation3 + $0x33c4] ss:$16 sps:$4 sm:$0xff]  }
 0x36f   : > { %14075 = vmatpush1.bf16.msra.mxu0 %v19781_v5  ;;  %v19805_v5 = vld [vmem:[#allocation3 + $0x31c0] ss:$16 sps:$4 sm:$0xff]  }
 0x370   : > { %14118 = vmatpush1.bf16.msra.mxu1 %v19784_v23  ;;  %14076 = vmatprep.subr.bf16.mxu0 %v19789_v63  ;;  %v19808_v23 = vld [vmem:[#allocation3 + $0x33c0] ss:$16 sps:$4 sm:$0xff]   ;;  %v19813_v63 = vld [vmem:[#allocation3 + $0x31a4] ss:$16 sps:$4 sm:$0xff]  }
 0x371   : > { %14119 = vmatprep.subr.bf16.mxu1 %v19792_v35  ;;  %v19816_v35 = vld [vmem:[#allocation3 + $0x33a4] ss:$16 sps:$4 sm:$0xff]  }
 0x373   : > { %14077 = vmatpush1.bf16.msra.mxu0 %v19787_v42  ;;  %v19811_v42 = vld [vmem:[#allocation3 + $0x31a0] ss:$16 sps:$4 sm:$0xff]  }
 0x374   : > { %14120 = vmatpush1.bf16.msra.mxu1 %v19790_v57  ;;  %14078 = vmatprep.subr.bf16.mxu0 %v19795_v20  ;;  %v19814_v57 = vld [vmem:[#allocation3 + $0x33a0] ss:$16 sps:$4 sm:$0xff]   ;;  %v19819_v20 = vld [vmem:[#allocation3 + $0x3184] ss:$16 sps:$4 sm:$0xff]  }
 0x375   : > { %14121 = vmatprep.subr.bf16.mxu1 %v19798_v3  ;;  %v19822_v3 = vld [vmem:[#allocation3 + $0x3384] ss:$16 sps:$4 sm:$0xff]  }
 0x377   : > { %14079 = vmatpush1.bf16.msra.mxu0 %v19793_v36  ;;  %v19817_v36 = vld [vmem:[#allocation3 + $0x3180] ss:$16 sps:$4 sm:$0xff]  }
 0x378   : > { %14122 = vmatpush1.bf16.msra.mxu1 %v19796_v9  ;;  %14080 = vmatprep.subr.bf16.mxu0 %v19801_v6  ;;  %v19820_v9 = vld [vmem:[#allocation3 + $0x3380] ss:$16 sps:$4 sm:$0xff]   ;;  %v19825_v6 = vld [vmem:[#allocation3 + $0x3164] ss:$16 sps:$4 sm:$0xff]  }
 0x379   : > { %14123 = vmatprep.subr.bf16.mxu1 %v19804_v50  ;;  %v19828_v50 = vld [vmem:[#allocation3 + $0x3364] ss:$16 sps:$4 sm:$0xff]  }
 0x37b   : > { %14081 = vmatpush2.bf16.msra.mxu0 %v19799_v61  ;;  %v19823_v61 = vld [vmem:[#allocation3 + $0x3160] ss:$16 sps:$4 sm:$0xff]  }
 0x37c   : > { %14124 = vmatpush2.bf16.msra.mxu1 %v19802_v33  ;;  %14082 = vmatprep.subr.bf16.mxu0 %v19807_v21  ;;  %v19826_v33 = vld [vmem:[#allocation3 + $0x3360] ss:$16 sps:$4 sm:$0xff]   ;;  %v19831_v21 = vld [vmem:[#allocation3 + $0x3144] ss:$16 sps:$4 sm:$0xff]  }
 0x37d   : > { %14125 = vmatprep.subr.bf16.mxu1 %v19810_v2  ;;  %v19834_v2 = vld [vmem:[#allocation3 + $0x3344] ss:$16 sps:$4 sm:$0xff]  }
 0x37f   : > { %14083 = vmatpush2.bf16.msra.mxu0 %v19805_v5  ;;  %v19829_v5 = vld [vmem:[#allocation3 + $0x3140] ss:$16 sps:$4 sm:$0xff]  }
 0x380   : > { %14126 = vmatpush2.bf16.msra.mxu1 %v19808_v23  ;;  %14084 = vmatprep.subr.bf16.mxu0 %v19813_v63  ;;  %v19832_v23 = vld [vmem:[#allocation3 + $0x3340] ss:$16 sps:$4 sm:$0xff]   ;;  %v19837_v63 = vld [vmem:[#allocation3 + $0x3124] ss:$16 sps:$4 sm:$0xff]  }
 0x381   : > { %14127 = vmatprep.subr.bf16.mxu1 %v19816_v35  ;;  %v19840_v35 = vld [vmem:[#allocation3 + $0x3324] ss:$16 sps:$4 sm:$0xff]  }
 0x383   : > { %14085 = vmatpush2.bf16.msra.mxu0 %v19811_v42  ;;  %v19835_v42 = vld [vmem:[#allocation3 + $0x3120] ss:$16 sps:$4 sm:$0xff]  }
 0x384   : > { %14128 = vmatpush2.bf16.msra.mxu1 %v19814_v57  ;;  %14086 = vmatprep.subr.bf16.mxu0 %v19819_v20  ;;  %v19838_v57 = vld [vmem:[#allocation3 + $0x3320] ss:$16 sps:$4 sm:$0xff]   ;;  %v19843_v20 = vld [vmem:[#allocation3 + $0x3104] ss:$16 sps:$4 sm:$0xff]  }
 0x385   : > { %14129 = vmatprep.subr.bf16.mxu1 %v19822_v3  ;;  %v19846_v3 = vld [vmem:[#allocation3 + $0x3304] ss:$16 sps:$4 sm:$0xff]  }
 0x387   : > { %14087 = vmatpush2.bf16.msra.mxu0 %v19817_v36  ;;  %v19841_v36 = vld [vmem:[#allocation3 + $0x3100] ss:$16 sps:$4 sm:$0xff]  }
 0x388   : > { %14130 = vmatpush2.bf16.msra.mxu1 %v19820_v9  ;;  %14088 = vmatprep.subr.bf16.mxu0 %v19825_v6  ;;  %v19844_v9 = vld [vmem:[#allocation3 + $0x3300] ss:$16 sps:$4 sm:$0xff]  }
 0x389   : > { %14131 = vmatprep.subr.bf16.mxu1 %v19828_v50  ;;  %v402_v6 = vld [vmem:[%s22046_s14 + $0x180] sm:$0xff]  ;;  %v467_v50 = vld [vmem:[%s22046_s14 + $0x388] sm:$0xff] }
 0x38b   : > { %14089 = vmatpush2.bf16.msra.mxu0 %v19823_v61  ;;  %v404_v61 = vld [vmem:[%s22046_s14 + $0x190] sm:$0xff] }
 0x38c   : > { %14132 = vmatpush2.bf16.msra.mxu1 %v19826_v33  ;;  %14090 = vmatprep.subr.bf16.mxu0 %v19831_v21  ;;  %v469_v33 = vld [vmem:[%s22046_s14 + $0x398] sm:$0xff]  ;;  %v19849_v21 = vld [vmem:[#allocation3 + $0x34e4] ss:$16 sps:$4 sm:$0xff]  }
 0x38d   : > { %14133 = vmatprep.subr.bf16.mxu1 %v19834_v2  ;;  %v19852_v2 = vld [vmem:[#allocation3 + $0x36e4] ss:$16 sps:$4 sm:$0xff]  }
 0x38f   : > { %14091 = vmatpush2.bf16.msra.mxu0 %v19829_v5  ;;  %v407_v5 = vld [vmem:[%s22046_s14 + $0x1a8] sm:$0xff] }
 0x390   : > { %14134 = vmatpush2.bf16.msra.mxu1 %v19832_v23  ;;  %14092 = vmatprep.subr.bf16.mxu0 %v19837_v63  ;;  %v22426_v23 = vpack.c.bf16 %v467_v50, %v402_v6  ;;  %v22428_v63 = vpack.c.bf16 %v469_v33, %v404_v61  ;;  %v22437_v6 = vpack.c.bf16 %v474_v10, %v409_v8  ;;  %v19864_v61 = vld [vmem:[#allocation3 + $0x36a4] ss:$16 sps:$4 sm:$0xff]   ;;  %v19859_v33 = vld [vmem:[#allocation3 + $0x34a0] ss:$16 sps:$4 sm:$0xff]  }
 0x391   : > { %14135 = vmatprep.subr.bf16.mxu1 %v19840_v35  ;;  %v472_v35 = vld [vmem:[%s22046_s14 + $0x3b0] sm:$0xff] }
 0x392   : > { %23186 = vst [vmem:[#allocation55_spill] sm:$0xff] %v22426_v23  ;;  %23187 = vst [vmem:[#allocation56_spill] sm:$0xff] %v22428_v63  ;;  %v22435_v32 = vpack.c.bf16 %v472_v35, %v407_v5  ;;  %v19867_v10 = vld [vmem:[#allocation3 + $0x3484] ss:$16 sps:$4 sm:$0xff]   ;;  %v19871_v5 = vld [vmem:[#allocation3 + $0x3460] ss:$16 sps:$4 sm:$0xff]  }
 0x393   : > { %14093 = vmatpush2.bf16.msra.mxu0 %v19835_v42  ;;  %v19855_v42 = vld [vmem:[#allocation3 + $0x34c4] ss:$16 sps:$4 sm:$0xff]   ;;  %23190 = vst [vmem:[#allocation59_spill] sm:$0xff] %v22437_v6  ;;  %v19874_v35 = vld [vmem:[#allocation3 + $0x3660] ss:$16 sps:$4 sm:$0xff]  }
 0x394   : > { %14136 = vmatpush2.bf16.msra.mxu1 %v19838_v57  ;;  %14094 = vmatprep.subr.bf16.mxu0 %v19843_v20  ;;  %v19858_v57 = vld [vmem:[#allocation3 + $0x36c4] ss:$16 sps:$4 sm:$0xff]   ;;  %v19853_v20 = vld [vmem:[#allocation3 + $0x34c0] ss:$16 sps:$4 sm:$0xff]   ;;  %23189 = vst [vmem:[#allocation58_spill] sm:$0xff] %v22435_v32 }
 0x395   : > { %14137 = vmatprep.subr.bf16.mxu1 %v19846_v3  ;;  %v19856_v3 = vld [vmem:[#allocation3 + $0x36c0] ss:$16 sps:$4 sm:$0xff]   ;;  %v19870_v8 = vld [vmem:[#allocation3 + $0x3684] ss:$16 sps:$4 sm:$0xff]  }
 0x397   : > { %14095 = vmatpush2.bf16.msra.mxu0 %v19841_v36 }
 0x398   : > { %14138 = vmatpush2.bf16.msra.mxu1 %v19844_v9  ;;  %14150 = vmatprep.subr.bf16.mxu0 %v19849_v21  ;;  %v19861_v9 = vld [vmem:[#allocation3 + $0x34a4] ss:$16 sps:$4 sm:$0xff]   ;;  %v19862_v21 = vld [vmem:[#allocation3 + $0x36a0] ss:$16 sps:$4 sm:$0xff]  }
 0x399   : > { %14193 = vmatprep.subr.bf16.mxu1 %v19852_v2  ;;  %v19876_v2 = vld [vmem:[#allocation3 + $0x3664] ss:$16 sps:$4 sm:$0xff]  }
 0x39a   : > { %v13840_v50 = vpop.f32.mrf.mxu0  ;;  %14097 = vmatmul.mubr.bf16.vlgmr.msra.gmra.mxu0 %v22426_v23 }
 0x39b   : > { %14140 = vmatmul.mubr.bf16.vlgmr.msra.gmra.mxu1 %v22428_v63  ;;  %v22442_v36 = vadd.f32 %v13840_v50, %v22414_v4  ;;  %14151 = vmatpush1.bf16.msra.mxu0 %v19847_v19  ;;  %v19865_v19 = vld [vmem:[#allocation3 + $0x3480] ss:$16 sps:$4 sm:$0xff]   ;;  %v19873_v4 = vld [vmem:[#allocation3 + $0x3464] ss:$16 sps:$4 sm:$0xff]  }
 0x39c   : > { %14194 = vmatpush1.bf16.msra.mxu1 %v19850_v62  ;;  %14152 = vmatprep.subr.bf16.mxu0 %v19855_v42  ;;  %v19868_v62 = vld [vmem:[#allocation3 + $0x3680] ss:$16 sps:$4 sm:$0xff]   ;;  %v19879_v42 = vld [vmem:[#allocation3 + $0x3444] ss:$16 sps:$4 sm:$0xff]  }
 0x39d   : > { %14195 = vmatprep.subr.bf16.mxu1 %v19858_v57  ;;  %14182 = vmatprep.mubr.bf16.mxu0 %v22435_v32  ;;  %v19882_v57 = vld [vmem:[#allocation3 + $0x3644] ss:$16 sps:$4 sm:$0xff]   ;;  %v19946_v63 = vld [vmem:[#allocation3 + $0x3ae0] ss:$16 sps:$4 sm:$0xff]  }
 0x39e   : > { %14225 = vmatprep.mubr.bf16.mxu1 %v22437_v6  ;;  %v19885_v50 = vld [vmem:[#allocation3 + $0x3424] ss:$16 sps:$4 sm:$0xff]   ;;  %v19943_v6 = vld [vmem:[#allocation3 + $0x38e0] ss:$16 sps:$4 sm:$0xff]  }
 0x39f   : > { %14153 = vmatpush1.bf16.msra.mxu0 %v19853_v20  ;;  %v19877_v20 = vld [vmem:[#allocation3 + $0x3440] ss:$16 sps:$4 sm:$0xff]  }
 0x3a0   : > { %14196 = vmatpush1.bf16.msra.mxu1 %v19856_v3  ;;  %14154 = vmatprep.subr.bf16.mxu0 %v19861_v9  ;;  %v19880_v3 = vld [vmem:[#allocation3 + $0x3640] ss:$16 sps:$4 sm:$0xff]   ;;  %v19888_v9 = vld [vmem:[#allocation3 + $0x3624] ss:$16 sps:$4 sm:$0xff]  }
 0x3a1   : > { %14197 = vmatprep.subr.bf16.mxu1 %v19864_v61  ;;  %v19883_v61 = vld [vmem:[#allocation3 + $0x3420] ss:$16 sps:$4 sm:$0xff]  }
 0x3a2   : > { %v19949_v32 = vld [vmem:[#allocation3 + $0x38c0] ss:$16 sps:$4 sm:$0xff]  }
 0x3a3   : > { %14155 = vmatpush1.bf16.msra.mxu0 %v19859_v33  ;;  %v19886_v33 = vld [vmem:[#allocation3 + $0x3620] ss:$16 sps:$4 sm:$0xff]  }
 0x3a4   : > { %14198 = vmatpush1.bf16.msra.mxu1 %v19862_v21  ;;  %14156 = vmatprep.subr.bf16.mxu0 %v19867_v10  ;;  %v19891_v21 = vld [vmem:[#allocation3 + $0x3404] ss:$16 sps:$4 sm:$0xff]  }
 0x3a5   : > { %14199 = vmatprep.subr.bf16.mxu1 %v19870_v8  ;;  %v19894_v10 = vld [vmem:[#allocation3 + $0x3604] ss:$16 sps:$4 sm:$0xff]   ;;  %v19889_v8 = vld [vmem:[#allocation3 + $0x3400] ss:$16 sps:$4 sm:$0xff]  }
 0x3a7   : > { %14157 = vmatpush1.bf16.msra.mxu0 %v19865_v19  ;;  %v19892_v19 = vld [vmem:[#allocation3 + $0x3600] ss:$16 sps:$4 sm:$0xff]  }
 0x3a8   : > { %14200 = vmatpush1.bf16.msra.mxu1 %v19868_v62  ;;  %14158 = vmatprep.subr.bf16.mxu0 %v19873_v4  ;;  %v19897_v62 = vld [vmem:[#allocation3 + $0x35e4] ss:$16 sps:$4 sm:$0xff]  }
 0x3a9   : > { %14201 = vmatprep.subr.bf16.mxu1 %v19876_v2  ;;  %v19900_v4 = vld [vmem:[#allocation3 + $0x37e4] ss:$16 sps:$4 sm:$0xff]   ;;  %v19895_v2 = vld [vmem:[#allocation3 + $0x35e0] ss:$16 sps:$4 sm:$0xff]  }
 0x3ab   : > { %14159 = vmatpush1.bf16.msra.mxu0 %v19871_v5  ;;  %v19898_v5 = vld [vmem:[#allocation3 + $0x37e0] ss:$16 sps:$4 sm:$0xff]  }
 0x3ac   : > { %14202 = vmatpush1.bf16.msra.mxu1 %v19874_v35  ;;  %14160 = vmatprep.subr.bf16.mxu0 %v19879_v42  ;;  %v19903_v35 = vld [vmem:[#allocation3 + $0x35c4] ss:$16 sps:$4 sm:$0xff]  }
 0x3ad   : > { %14203 = vmatprep.subr.bf16.mxu1 %v19882_v57  ;;  %v19906_v42 = vld [vmem:[#allocation3 + $0x37c4] ss:$16 sps:$4 sm:$0xff]   ;;  %v19901_v57 = vld [vmem:[#allocation3 + $0x35c0] ss:$16 sps:$4 sm:$0xff]  }
 0x3af   : > { %14161 = vmatpush1.bf16.msra.mxu0 %v19877_v20  ;;  %v19904_v20 = vld [vmem:[#allocation3 + $0x37c0] ss:$16 sps:$4 sm:$0xff]  }
 0x3b0   : > { %14204 = vmatpush1.bf16.msra.mxu1 %v19880_v3  ;;  %14162 = vmatprep.subr.bf16.mxu0 %v19885_v50  ;;  %v19909_v3 = vld [vmem:[#allocation3 + $0x35a4] ss:$16 sps:$4 sm:$0xff]  }
 0x3b1   : > { %14205 = vmatprep.subr.bf16.mxu1 %v19888_v9  ;;  %v19912_v50 = vld [vmem:[#allocation3 + $0x37a4] ss:$16 sps:$4 sm:$0xff]   ;;  %v19907_v9 = vld [vmem:[#allocation3 + $0x35a0] ss:$16 sps:$4 sm:$0xff]  }
 0x3b3   : > { %14163 = vmatpush1.bf16.msra.mxu0 %v19883_v61  ;;  %v19910_v61 = vld [vmem:[#allocation3 + $0x37a0] ss:$16 sps:$4 sm:$0xff]  }
 0x3b4   : > { %14206 = vmatpush1.bf16.msra.mxu1 %v19886_v33  ;;  %14164 = vmatprep.subr.bf16.mxu0 %v19891_v21  ;;  %v19915_v33 = vld [vmem:[#allocation3 + $0x3584] ss:$16 sps:$4 sm:$0xff]  }
 0x3b5   : > { %14207 = vmatprep.subr.bf16.mxu1 %v19894_v10  ;;  %v19918_v21 = vld [vmem:[#allocation3 + $0x3784] ss:$16 sps:$4 sm:$0xff]   ;;  %v19913_v10 = vld [vmem:[#allocation3 + $0x3580] ss:$16 sps:$4 sm:$0xff]  }
 0x3b7   : > { %14165 = vmatpush1.bf16.msra.mxu0 %v19889_v8  ;;  %v19916_v8 = vld [vmem:[#allocation3 + $0x3780] ss:$16 sps:$4 sm:$0xff]  }
 0x3b8   : > { %14208 = vmatpush1.bf16.msra.mxu1 %v19892_v19  ;;  %14166 = vmatprep.subr.bf16.mxu0 %v19897_v62  ;;  %v19921_v19 = vld [vmem:[#allocation3 + $0x3564] ss:$16 sps:$4 sm:$0xff]  }
 0x3b9   : > { %14209 = vmatprep.subr.bf16.mxu1 %v19900_v4  ;;  %v19924_v62 = vld [vmem:[#allocation3 + $0x3764] ss:$16 sps:$4 sm:$0xff]   ;;  %v19919_v4 = vld [vmem:[#allocation3 + $0x3560] ss:$16 sps:$4 sm:$0xff]  }
 0x3bb   : > { %14167 = vmatpush2.bf16.msra.mxu0 %v19895_v2  ;;  %v19922_v2 = vld [vmem:[#allocation3 + $0x3760] ss:$16 sps:$4 sm:$0xff]  }
 0x3bc   : > { %14210 = vmatpush2.bf16.msra.mxu1 %v19898_v5  ;;  %14168 = vmatprep.subr.bf16.mxu0 %v19903_v35  ;;  %v19927_v5 = vld [vmem:[#allocation3 + $0x3544] ss:$16 sps:$4 sm:$0xff]  }
 0x3bd   : > { %14211 = vmatprep.subr.bf16.mxu1 %v19906_v42  ;;  %v19930_v35 = vld [vmem:[#allocation3 + $0x3744] ss:$16 sps:$4 sm:$0xff]   ;;  %v19925_v42 = vld [vmem:[#allocation3 + $0x3540] ss:$16 sps:$4 sm:$0xff]  }
 0x3bf   : > { %14169 = vmatpush2.bf16.msra.mxu0 %v19901_v57  ;;  %v19928_v57 = vld [vmem:[#allocation3 + $0x3740] ss:$16 sps:$4 sm:$0xff]  }
 0x3c0   : > { %14212 = vmatpush2.bf16.msra.mxu1 %v19904_v20  ;;  %14170 = vmatprep.subr.bf16.mxu0 %v19909_v3  ;;  %v19933_v20 = vld [vmem:[#allocation3 + $0x3524] ss:$16 sps:$4 sm:$0xff]  }
 0x3c1   : > { %14213 = vmatprep.subr.bf16.mxu1 %v19912_v50  ;;  %v19936_v3 = vld [vmem:[#allocation3 + $0x3724] ss:$16 sps:$4 sm:$0xff]   ;;  %v19931_v50 = vld [vmem:[#allocation3 + $0x3520] ss:$16 sps:$4 sm:$0xff]  }
 0x3c3   : > { %14171 = vmatpush2.bf16.msra.mxu0 %v19907_v9  ;;  %v19934_v9 = vld [vmem:[#allocation3 + $0x3720] ss:$16 sps:$4 sm:$0xff]  }
 0x3c4   : > { %14214 = vmatpush2.bf16.msra.mxu1 %v19910_v61  ;;  %14172 = vmatprep.subr.bf16.mxu0 %v19915_v33  ;;  %v19939_v61 = vld [vmem:[#allocation3 + $0x3504] ss:$16 sps:$4 sm:$0xff]  }
 0x3c5   : > { %14215 = vmatprep.subr.bf16.mxu1 %v19918_v21  ;;  %v19942_v33 = vld [vmem:[#allocation3 + $0x3704] ss:$16 sps:$4 sm:$0xff]   ;;  %v19937_v21 = vld [vmem:[#allocation3 + $0x3500] ss:$16 sps:$4 sm:$0xff]  }
 0x3c7   : > { %14173 = vmatpush2.bf16.msra.mxu0 %v19913_v10  ;;  %v19940_v10 = vld [vmem:[#allocation3 + $0x3700] ss:$16 sps:$4 sm:$0xff]  }
 0x3c8   : > { %14216 = vmatpush2.bf16.msra.mxu1 %v19916_v8  ;;  %14174 = vmatprep.subr.bf16.mxu0 %v19921_v19  ;;  %v406_v8 = vld [vmem:[%s22046_s14 + $0x1a0] sm:$0xff]  ;;  %v471_v19 = vld [vmem:[%s22046_s14 + $0x3a8] sm:$0xff] }
 0x3c9   : > { %14217 = vmatprep.subr.bf16.mxu1 %v19924_v62  ;;  %v408_v62 = vld [vmem:[%s22046_s14 + $0x1b0] sm:$0xff] }
 0x3cb   : > { %14175 = vmatpush2.bf16.msra.mxu0 %v19919_v4  ;;  %v473_v4 = vld [vmem:[%s22046_s14 + $0x3b8] sm:$0xff] }
 0x3cc   : > { %14218 = vmatpush2.bf16.msra.mxu1 %v19922_v2  ;;  %14176 = vmatprep.subr.bf16.mxu0 %v19927_v5  ;;  %v19945_v2 = vld [vmem:[#allocation3 + $0x38e4] ss:$16 sps:$4 sm:$0xff]  }
 0x3cd   : > { %14219 = vmatprep.subr.bf16.mxu1 %v19930_v35  ;;  %v19948_v5 = vld [vmem:[#allocation3 + $0x3ae4] ss:$16 sps:$4 sm:$0xff]   ;;  %v411_v35 = vld [vmem:[%s22046_s14 + $0x1c8] sm:$0xff] }
 0x3cf   : > { %14177 = vmatpush2.bf16.msra.mxu0 %v19925_v42  ;;  %v22451_v42 = vpack.c.bf16 %v471_v19, %v406_v8  ;;  %v19955_v8 = vld [vmem:[#allocation3 + $0x38a0] ss:$16 sps:$4 sm:$0xff]  }
 0x3d0   : > { %14220 = vmatpush2.bf16.msra.mxu1 %v19928_v57  ;;  %14178 = vmatprep.subr.bf16.mxu0 %v19933_v20  ;;  %v22453_v57 = vpack.c.bf16 %v473_v4, %v408_v62  ;;  %v476_v20 = vld [vmem:[%s22046_s14 + $0x3d0] sm:$0xff] }
 0x3d1   : > { %14221 = vmatprep.subr.bf16.mxu1 %v19936_v3  ;;  %23191 = vst [vmem:[#allocation60_spill] sm:$0xff] %v22451_v42  ;;  %v413_v3 = vld [vmem:[%s22046_s14 + $0x1d8] sm:$0xff]  ;;  %v19958_v19 = vld [vmem:[#allocation3 + $0x3aa0] ss:$16 sps:$4 sm:$0xff]   ;;  %v19966_v62 = vld [vmem:[#allocation3 + $0x3a84] ss:$16 sps:$4 sm:$0xff]  }
 0x3d2   : > { %23192 = vst [vmem:[#allocation61_spill] sm:$0xff] %v22453_v57  ;;  %v22460_v23 = vpack.c.bf16 %v478_v18, %v413_v3  ;;  %v19963_v18 = vld [vmem:[#allocation3 + $0x3884] ss:$16 sps:$4 sm:$0xff]   ;;  %v19973_v3 = vld [vmem:[#allocation3 + $0x3840] ss:$16 sps:$4 sm:$0xff]  }
 0x3d3   : > { %14179 = vmatpush2.bf16.msra.mxu0 %v19931_v50  ;;  %v19951_v50 = vld [vmem:[#allocation3 + $0x38c4] ss:$16 sps:$4 sm:$0xff]  }
 0x3d4   : > { %14222 = vmatpush2.bf16.msra.mxu1 %v19934_v9  ;;  %14180 = vmatprep.subr.bf16.mxu0 %v19939_v61  ;;  %v19954_v9 = vld [vmem:[#allocation3 + $0x3ac4] ss:$16 sps:$4 sm:$0xff]   ;;  %v19952_v61 = vld [vmem:[#allocation3 + $0x3ac0] ss:$16 sps:$4 sm:$0xff]   ;;  %23194 = vst [vmem:[#allocation63_spill] sm:$0xff] %v22460_v23 }
 0x3d5   : > { %14223 = vmatprep.subr.bf16.mxu1 %v19942_v33  ;;  %v22458_v33 = vpack.c.bf16 %v476_v20, %v411_v35  ;;  %v19969_v4 = vld [vmem:[#allocation3 + $0x3864] ss:$16 sps:$4 sm:$0xff]   ;;  %v19970_v35 = vld [vmem:[#allocation3 + $0x3a60] ss:$16 sps:$4 sm:$0xff]  }
 0x3d6   : > { %v19978_v20 = vld [vmem:[#allocation3 + $0x3a44] ss:$16 sps:$4 sm:$0xff]  }
 0x3d7   : > { %14181 = vmatpush2.bf16.msra.mxu0 %v19937_v21  ;;  %23193 = vst [vmem:[#allocation62_spill] sm:$0xff] %v22458_v33  ;;  %v19957_v21 = vld [vmem:[#allocation3 + $0x38a4] ss:$16 sps:$4 sm:$0xff]  }
 0x3d8   : > { %14224 = vmatpush2.bf16.msra.mxu1 %v19940_v10  ;;  %14236 = vmatprep.subr.bf16.mxu0 %v19945_v2  ;;  %v19960_v10 = vld [vmem:[#allocation3 + $0x3aa4] ss:$16 sps:$4 sm:$0xff]  }
 0x3d9   : > { %14279 = vmatprep.subr.bf16.mxu1 %v19948_v5  ;;  %v19972_v2 = vld [vmem:[#allocation3 + $0x3a64] ss:$16 sps:$4 sm:$0xff]   ;;  %v19967_v5 = vld [vmem:[#allocation3 + $0x3860] ss:$16 sps:$4 sm:$0xff]  }
 0x3da   : > { %14183 = vmatmul.mubr.bf16.vlgmr.msra.gmra.mxu0 %v22451_v42  ;;  %v20048_v42 = vld [vmem:[#allocation3 + $0x3ec0] ss:$16 sps:$4 sm:$0xff]  }
 0x3db   : > { %14226 = vmatmul.mubr.bf16.vlgmr.msra.gmra.mxu1 %v22453_v57  ;;  %14237 = vmatpush1.bf16.msra.mxu0 %v19943_v6  ;;  %v19961_v6 = vld [vmem:[#allocation3 + $0x3880] ss:$16 sps:$4 sm:$0xff]  }
 0x3dc   : > { %14280 = vmatpush1.bf16.msra.mxu1 %v19946_v63  ;;  %14238 = vmatprep.subr.bf16.mxu0 %v19951_v50  ;;  %v19964_v63 = vld [vmem:[#allocation3 + $0x3a80] ss:$16 sps:$4 sm:$0xff]  }
 0x3dd   : > { %14281 = vmatprep.subr.bf16.mxu1 %v19954_v9  ;;  %14268 = vmatprep.mubr.bf16.mxu0 %v22458_v33  ;;  %v19976_v50 = vld [vmem:[#allocation3 + $0x3a40] ss:$16 sps:$4 sm:$0xff]   ;;  %v19981_v9 = vld [vmem:[#allocation3 + $0x3824] ss:$16 sps:$4 sm:$0xff]  }
 0x3de   : > { %14311 = vmatprep.mubr.bf16.mxu1 %v22460_v23  ;;  %v20045_v33 = vld [vmem:[#allocation3 + $0x3cc0] ss:$16 sps:$4 sm:$0xff]  }
 0x3df   : > { %14239 = vmatpush1.bf16.msra.mxu0 %v19949_v32  ;;  %v19975_v32 = vld [vmem:[#allocation3 + $0x3844] ss:$16 sps:$4 sm:$0xff]  }
 0x3e0   : > { %14282 = vmatpush1.bf16.msra.mxu1 %v19952_v61  ;;  %14240 = vmatprep.subr.bf16.mxu0 %v19957_v21  ;;  %v19984_v61 = vld [vmem:[#allocation3 + $0x3a24] ss:$16 sps:$4 sm:$0xff]   ;;  %v19979_v21 = vld [vmem:[#allocation3 + $0x3820] ss:$16 sps:$4 sm:$0xff]  }
 0x3e1   : > { %14283 = vmatprep.subr.bf16.mxu1 %v19960_v10  ;;  %v19982_v10 = vld [vmem:[#allocation3 + $0x3a20] ss:$16 sps:$4 sm:$0xff]  }
 0x3e3   : > { %14241 = vmatpush1.bf16.msra.mxu0 %v19955_v8  ;;  %v19987_v8 = vld [vmem:[#allocation3 + $0x3804] ss:$16 sps:$4 sm:$0xff]  }
 0x3e4   : > { %14284 = vmatpush1.bf16.msra.mxu1 %v19958_v19  ;;  %14242 = vmatprep.subr.bf16.mxu0 %v19963_v18  ;;  %v19990_v19 = vld [vmem:[#allocation3 + $0x3a04] ss:$16 sps:$4 sm:$0xff]   ;;  %v19985_v18 = vld [vmem:[#allocation3 + $0x3800] ss:$16 sps:$4 sm:$0xff]  }
 0x3e5   : > { %14285 = vmatprep.subr.bf16.mxu1 %v19966_v62  ;;  %v19988_v62 = vld [vmem:[#allocation3 + $0x3a00] ss:$16 sps:$4 sm:$0xff]  }
 0x3e7   : > { %14243 = vmatpush1.bf16.msra.mxu0 %v19961_v6  ;;  %v19993_v6 = vld [vmem:[#allocation3 + $0x39e4] ss:$16 sps:$4 sm:$0xff]  }
 0x3e8   : > { %14286 = vmatpush1.bf16.msra.mxu1 %v19964_v63  ;;  %14244 = vmatprep.subr.bf16.mxu0 %v19969_v4  ;;  %v19996_v63 = vld [vmem:[#allocation3 + $0x3be4] ss:$16 sps:$4 sm:$0xff]   ;;  %v19991_v4 = vld [vmem:[#allocation3 + $0x39e0] ss:$16 sps:$4 sm:$0xff]  }
 0x3e9   : > { %14287 = vmatprep.subr.bf16.mxu1 %v19972_v2  ;;  %v19994_v2 = vld [vmem:[#allocation3 + $0x3be0] ss:$16 sps:$4 sm:$0xff]  }
 0x3eb   : > { %14245 = vmatpush1.bf16.msra.mxu0 %v19967_v5  ;;  %v19999_v5 = vld [vmem:[#allocation3 + $0x39c4] ss:$16 sps:$4 sm:$0xff]  }
 0x3ec   : > { %14288 = vmatpush1.bf16.msra.mxu1 %v19970_v35  ;;  %14246 = vmatprep.subr.bf16.mxu0 %v19975_v32  ;;  %v20002_v35 = vld [vmem:[#allocation3 + $0x3bc4] ss:$16 sps:$4 sm:$0xff]   ;;  %v19997_v32 = vld [vmem:[#allocation3 + $0x39c0] ss:$16 sps:$4 sm:$0xff]  }
 0x3ed   : > { %14289 = vmatprep.subr.bf16.mxu1 %v19978_v20  ;;  %v20000_v20 = vld [vmem:[#allocation3 + $0x3bc0] ss:$16 sps:$4 sm:$0xff]  }
 0x3ef   : > { %14247 = vmatpush1.bf16.msra.mxu0 %v19973_v3  ;;  %v20005_v3 = vld [vmem:[#allocation3 + $0x39a4] ss:$16 sps:$4 sm:$0xff]  }
 0x3f0   : > { %14290 = vmatpush1.bf16.msra.mxu1 %v19976_v50  ;;  %14248 = vmatprep.subr.bf16.mxu0 %v19981_v9  ;;  %v20008_v50 = vld [vmem:[#allocation3 + $0x3ba4] ss:$16 sps:$4 sm:$0xff]   ;;  %v20003_v9 = vld [vmem:[#allocation3 + $0x39a0] ss:$16 sps:$4 sm:$0xff]  }
 0x3f1   : > { %14291 = vmatprep.subr.bf16.mxu1 %v19984_v61  ;;  %v20006_v61 = vld [vmem:[#allocation3 + $0x3ba0] ss:$16 sps:$4 sm:$0xff]  }
 0x3f3   : > { %14249 = vmatpush1.bf16.msra.mxu0 %v19979_v21  ;;  %v20011_v21 = vld [vmem:[#allocation3 + $0x3984] ss:$16 sps:$4 sm:$0xff]  }
 0x3f4   : > { %14292 = vmatpush1.bf16.msra.mxu1 %v19982_v10  ;;  %14250 = vmatprep.subr.bf16.mxu0 %v19987_v8  ;;  %v20014_v10 = vld [vmem:[#allocation3 + $0x3b84] ss:$16 sps:$4 sm:$0xff]   ;;  %v20009_v8 = vld [vmem:[#allocation3 + $0x3980] ss:$16 sps:$4 sm:$0xff]  }
 0x3f5   : > { %14293 = vmatprep.subr.bf16.mxu1 %v19990_v19  ;;  %v20012_v19 = vld [vmem:[#allocation3 + $0x3b80] ss:$16 sps:$4 sm:$0xff]  }
 0x3f7   : > { %14251 = vmatpush1.bf16.msra.mxu0 %v19985_v18  ;;  %v20017_v18 = vld [vmem:[#allocation3 + $0x3964] ss:$16 sps:$4 sm:$0xff]  }
 0x3f8   : > { %14294 = vmatpush1.bf16.msra.mxu1 %v19988_v62  ;;  %14252 = vmatprep.subr.bf16.mxu0 %v19993_v6  ;;  %v20020_v62 = vld [vmem:[#allocation3 + $0x3b64] ss:$16 sps:$4 sm:$0xff]   ;;  %v20015_v6 = vld [vmem:[#allocation3 + $0x3960] ss:$16 sps:$4 sm:$0xff]  }
 0x3f9   : > { %14295 = vmatprep.subr.bf16.mxu1 %v19996_v63  ;;  %v20018_v63 = vld [vmem:[#allocation3 + $0x3b60] ss:$16 sps:$4 sm:$0xff]  }
 0x3fb   : > { %14253 = vmatpush2.bf16.msra.mxu0 %v19991_v4  ;;  %v20023_v4 = vld [vmem:[#allocation3 + $0x3944] ss:$16 sps:$4 sm:$0xff]  }
 0x3fc   : > { %14296 = vmatpush2.bf16.msra.mxu1 %v19994_v2  ;;  %14254 = vmatprep.subr.bf16.mxu0 %v19999_v5  ;;  %v20026_v2 = vld [vmem:[#allocation3 + $0x3b44] ss:$16 sps:$4 sm:$0xff]   ;;  %v20021_v5 = vld [vmem:[#allocation3 + $0x3940] ss:$16 sps:$4 sm:$0xff]  }
 0x3fd   : > { %14297 = vmatprep.subr.bf16.mxu1 %v20002_v35  ;;  %v20024_v35 = vld [vmem:[#allocation3 + $0x3b40] ss:$16 sps:$4 sm:$0xff]  }
 0x3ff   : > { %14255 = vmatpush2.bf16.msra.mxu0 %v19997_v32  ;;  %v20029_v32 = vld [vmem:[#allocation3 + $0x3924] ss:$16 sps:$4 sm:$0xff]  }
 0x400   : > { %14298 = vmatpush2.bf16.msra.mxu1 %v20000_v20  ;;  %14256 = vmatprep.subr.bf16.mxu0 %v20005_v3  ;;  %v20032_v20 = vld [vmem:[#allocation3 + $0x3b24] ss:$16 sps:$4 sm:$0xff]   ;;  %v20027_v3 = vld [vmem:[#allocation3 + $0x3920] ss:$16 sps:$4 sm:$0xff]  }
 0x401   : > { %14299 = vmatprep.subr.bf16.mxu1 %v20008_v50  ;;  %v20030_v50 = vld [vmem:[#allocation3 + $0x3b20] ss:$16 sps:$4 sm:$0xff]  }
 0x403   : > { %14257 = vmatpush2.bf16.msra.mxu0 %v20003_v9  ;;  %v20035_v9 = vld [vmem:[#allocation3 + $0x3904] ss:$16 sps:$4 sm:$0xff]  }
 0x404   : > { %14300 = vmatpush2.bf16.msra.mxu1 %v20006_v61  ;;  %14258 = vmatprep.subr.bf16.mxu0 %v20011_v21  ;;  %v20038_v61 = vld [vmem:[#allocation3 + $0x3b04] ss:$16 sps:$4 sm:$0xff]   ;;  %v20033_v21 = vld [vmem:[#allocation3 + $0x3900] ss:$16 sps:$4 sm:$0xff]  }
 0x405   : > { %14301 = vmatprep.subr.bf16.mxu1 %v20014_v10  ;;  %v20036_v10 = vld [vmem:[#allocation3 + $0x3b00] ss:$16 sps:$4 sm:$0xff]  }
 0x407   : > { %14259 = vmatpush2.bf16.msra.mxu0 %v20009_v8  ;;  %v410_v8 = vld [vmem:[%s22046_s14 + $0x1c0] sm:$0xff] }
 0x408   : > { %14302 = vmatpush2.bf16.msra.mxu1 %v20012_v19  ;;  %14260 = vmatprep.subr.bf16.mxu0 %v20017_v18  ;;  %v475_v19 = vld [vmem:[%s22046_s14 + $0x3c8] sm:$0xff]  ;;  %v412_v18 = vld [vmem:[%s22046_s14 + $0x1d0] sm:$0xff] }
 0x409   : > { %14303 = vmatprep.subr.bf16.mxu1 %v20020_v62  ;;  %v477_v62 = vld [vmem:[%s22046_s14 + $0x3d8] sm:$0xff]  ;;  %v22474_v23 = vpack.c.bf16 %v475_v19, %v410_v8  ;;  %v20051_v8 = vld [vmem:[#allocation3 + $0x3ca0] ss:$16 sps:$4 sm:$0xff]  }
 0x40a   : > { %v22476_v57 = vpack.c.bf16 %v477_v62, %v412_v18  ;;  %v20054_v19 = vld [vmem:[#allocation3 + $0x3ea0] ss:$16 sps:$4 sm:$0xff]   ;;  %v20059_v18 = vld [vmem:[#allocation3 + $0x3c84] ss:$16 sps:$4 sm:$0xff]  }
 0x40b   : > { %14261 = vmatpush2.bf16.msra.mxu0 %v20015_v6  ;;  %v20041_v6 = vld [vmem:[#allocation3 + $0x3ce4] ss:$16 sps:$4 sm:$0xff]  }
 0x40c   : > { %14304 = vmatpush2.bf16.msra.mxu1 %v20018_v63  ;;  %14262 = vmatprep.subr.bf16.mxu0 %v20023_v4  ;;  %v20044_v63 = vld [vmem:[#allocation3 + $0x3ee4] ss:$16 sps:$4 sm:$0xff]   ;;  %v415_v4 = vld [vmem:[%s22046_s14 + $0x1e8] sm:$0xff]  ;;  %23195 = vst [vmem:[#allocation64_spill] sm:$0xff] %v22476_v57 }
 0x40d   : > { %14305 = vmatprep.subr.bf16.mxu1 %v20026_v2  ;;  %v480_v2 = vld [vmem:[%s22046_s14 + $0x3f0] sm:$0xff] }
 0x40e   : > { %v20062_v62 = vld [vmem:[#allocation3 + $0x3e84] ss:$16 sps:$4 sm:$0xff]  }
 0x40f   : > { %14263 = vmatpush2.bf16.msra.mxu0 %v20021_v5  ;;  %v417_v5 = vld [vmem:[%s22046_s14 + $0x1f8] sm:$0xff] }
 0x410   : > { %14306 = vmatpush2.bf16.msra.mxu1 %v20024_v35  ;;  %14264 = vmatprep.subr.bf16.mxu0 %v20029_v32  ;;  %v482_v35 = vld [vmem:[%s22046_s14 + $0x400] sm:$0xff] }
 0x411   : > { %14307 = vmatprep.subr.bf16.mxu1 %v20032_v20  ;;  %v20039_v32 = vld [vmem:[#allocation3 + $0x3ce0] ss:$16 sps:$4 sm:$0xff]  }
 0x412   : > { %v20042_v20 = vld [vmem:[#allocation3 + $0x3ee0] ss:$16 sps:$4 sm:$0xff]  }
 0x413   : > { %14265 = vmatpush2.bf16.msra.mxu0 %v20027_v3  ;;  %v20047_v3 = vld [vmem:[#allocation3 + $0x3cc4] ss:$16 sps:$4 sm:$0xff]  }
 0x414   : > { %14308 = vmatpush2.bf16.msra.mxu1 %v20030_v50  ;;  %14266 = vmatprep.subr.bf16.mxu0 %v20035_v9  ;;  %v20050_v50 = vld [vmem:[#allocation3 + $0x3ec4] ss:$16 sps:$4 sm:$0xff]   ;;  %v22478_v9 = vpack.c.bf16 %v480_v2, %v415_v4 }
 0x415   : > { %14309 = vmatprep.subr.bf16.mxu1 %v20038_v61  ;;  %v22480_v61 = vpack.c.bf16 %v482_v35, %v417_v5  ;;  %v20065_v4 = vld [vmem:[#allocation3 + $0x3c64] ss:$16 sps:$4 sm:$0xff]   ;;  %v20063_v5 = vld [vmem:[#allocation3 + $0x3c60] ss:$16 sps:$4 sm:$0xff]  }
 0x416   : > { %23196 = vst [vmem:[#allocation65_spill] sm:$0xff] %v22478_v9  ;;  %v20068_v2 = vld [vmem:[#allocation3 + $0x3e64] ss:$16 sps:$4 sm:$0xff]   ;;  %v20066_v35 = vld [vmem:[#allocation3 + $0x3e60] ss:$16 sps:$4 sm:$0xff]  }
 0x417   : > { %14267 = vmatpush2.bf16.msra.mxu0 %v20033_v21  ;;  %23197 = vst [vmem:[#allocation66_spill] sm:$0xff] %v22480_v61  ;;  %v20053_v21 = vld [vmem:[#allocation3 + $0x3ca4] ss:$16 sps:$4 sm:$0xff]  }
 0x418   : > { %14310 = vmatpush2.bf16.msra.mxu1 %v20036_v10  ;;  %14322 = vmatprep.subr.bf16.mxu0 %v20041_v6  ;;  %v20056_v10 = vld [vmem:[#allocation3 + $0x3ea4] ss:$16 sps:$4 sm:$0xff]   ;;  %v20057_v6 = vld [vmem:[#allocation3 + $0x3c80] ss:$16 sps:$4 sm:$0xff]  }
 0x419   : > { %14365 = vmatprep.subr.bf16.mxu1 %v20044_v63  ;;  %v20060_v63 = vld [vmem:[#allocation3 + $0x3e80] ss:$16 sps:$4 sm:$0xff]  }
 0x41a   : > { %14269 = vmatmul.mubr.bf16.vlgmr.msra.gmra.mxu0 %v22474_v23 }
 0x41b   : > { %14312 = vmatmul.mubr.bf16.vlgmr.msra.gmra.mxu1 %v22476_v57  ;;  %14323 = vmatpush1.bf16.msra.mxu0 %v20039_v32  ;;  %v20069_v32 = vld [vmem:[#allocation3 + $0x3c40] ss:$16 sps:$4 sm:$0xff]  }
 0x41c   : > { %14366 = vmatpush1.bf16.msra.mxu1 %v20042_v20  ;;  %14324 = vmatprep.subr.bf16.mxu0 %v20047_v3  ;;  %v20072_v20 = vld [vmem:[#allocation3 + $0x3e40] ss:$16 sps:$4 sm:$0xff]   ;;  %v20077_v3 = vld [vmem:[#allocation3 + $0x3c24] ss:$16 sps:$4 sm:$0xff]  }
 0x41d   : > { %14367 = vmatprep.subr.bf16.mxu1 %v20050_v50  ;;  %14354 = vmatprep.mubr.bf16.mxu0 %v22478_v9  ;;  %v20080_v50 = vld [vmem:[#allocation3 + $0x3e24] ss:$16 sps:$4 sm:$0xff]  }
 0x41e   : > { %14397 = vmatprep.mubr.bf16.mxu1 %v22480_v61 }
 0x41f   : > { %14325 = vmatpush1.bf16.msra.mxu0 %v20045_v33  ;;  %v20071_v33 = vld [vmem:[#allocation3 + $0x3c44] ss:$16 sps:$4 sm:$0xff]  }
 0x420   : > { %14368 = vmatpush1.bf16.msra.mxu1 %v20048_v42  ;;  %14326 = vmatprep.subr.bf16.mxu0 %v20053_v21  ;;  %v20074_v42 = vld [vmem:[#allocation3 + $0x3e44] ss:$16 sps:$4 sm:$0xff]   ;;  %v20075_v21 = vld [vmem:[#allocation3 + $0x3c20] ss:$16 sps:$4 sm:$0xff]  }
 0x421   : > { %14369 = vmatprep.subr.bf16.mxu1 %v20056_v10  ;;  %v20078_v10 = vld [vmem:[#allocation3 + $0x3e20] ss:$16 sps:$4 sm:$0xff]  }
 0x423   : > { %14327 = vmatpush1.bf16.msra.mxu0 %v20051_v8  ;;  %v20083_v8 = vld [vmem:[#allocation3 + $0x3c04] ss:$16 sps:$4 sm:$0xff]  }
 0x424   : > { %14370 = vmatpush1.bf16.msra.mxu1 %v20054_v19  ;;  %14328 = vmatprep.subr.bf16.mxu0 %v20059_v18  ;;  %v20086_v19 = vld [vmem:[#allocation3 + $0x3e04] ss:$16 sps:$4 sm:$0xff]   ;;  %v20081_v18 = vld [vmem:[#allocation3 + $0x3c00] ss:$16 sps:$4 sm:$0xff]  }
 0x425   : > { %14371 = vmatprep.subr.bf16.mxu1 %v20062_v62  ;;  %v20084_v62 = vld [vmem:[#allocation3 + $0x3e00] ss:$16 sps:$4 sm:$0xff]  }
 0x427   : > { %14329 = vmatpush1.bf16.msra.mxu0 %v20057_v6  ;;  %v20089_v6 = vld [vmem:[#allocation3 + $0x3de4] ss:$16 sps:$4 sm:$0xff]  }
 0x428   : > { %14372 = vmatpush1.bf16.msra.mxu1 %v20060_v63  ;;  %14330 = vmatprep.subr.bf16.mxu0 %v20065_v4  ;;  %v20092_v63 = vld [vmem:[#allocation3 + $0x3fe4] ss:$16 sps:$4 sm:$0xff]   ;;  %v20087_v4 = vld [vmem:[#allocation3 + $0x3de0] ss:$16 sps:$4 sm:$0xff]  }
 0x429   : > { %14373 = vmatprep.subr.bf16.mxu1 %v20068_v2  ;;  %v20090_v2 = vld [vmem:[#allocation3 + $0x3fe0] ss:$16 sps:$4 sm:$0xff]  }
 0x42b   : > { %14331 = vmatpush1.bf16.msra.mxu0 %v20063_v5  ;;  %v20095_v5 = vld [vmem:[#allocation3 + $0x3dc4] ss:$16 sps:$4 sm:$0xff]  }
 0x42c   : > { %14374 = vmatpush1.bf16.msra.mxu1 %v20066_v35  ;;  %14332 = vmatprep.subr.bf16.mxu0 %v20071_v33  ;;  %v20098_v35 = vld [vmem:[#allocation3 + $0x3fc4] ss:$16 sps:$4 sm:$0xff]   ;;  %v20093_v33 = vld [vmem:[#allocation3 + $0x3dc0] ss:$16 sps:$4 sm:$0xff]  }
 0x42d   : > { %14375 = vmatprep.subr.bf16.mxu1 %v20074_v42  ;;  %v20096_v42 = vld [vmem:[#allocation3 + $0x3fc0] ss:$16 sps:$4 sm:$0xff]  }
 0x42f   : > { %14333 = vmatpush1.bf16.msra.mxu0 %v20069_v32  ;;  %v20101_v32 = vld [vmem:[#allocation3 + $0x3da4] ss:$16 sps:$4 sm:$0xff]  }
 0x430   : > { %14376 = vmatpush1.bf16.msra.mxu1 %v20072_v20  ;;  %14334 = vmatprep.subr.bf16.mxu0 %v20077_v3  ;;  %v20104_v20 = vld [vmem:[#allocation3 + $0x3fa4] ss:$16 sps:$4 sm:$0xff]   ;;  %v20099_v3 = vld [vmem:[#allocation3 + $0x3da0] ss:$16 sps:$4 sm:$0xff]  }
 0x431   : > { %14377 = vmatprep.subr.bf16.mxu1 %v20080_v50  ;;  %v20102_v50 = vld [vmem:[#allocation3 + $0x3fa0] ss:$16 sps:$4 sm:$0xff]  }
 0x433   : > { %14335 = vmatpush1.bf16.msra.mxu0 %v20075_v21  ;;  %v20107_v21 = vld [vmem:[#allocation3 + $0x3d84] ss:$16 sps:$4 sm:$0xff]  }
 0x434   : > { %14378 = vmatpush1.bf16.msra.mxu1 %v20078_v10  ;;  %14336 = vmatprep.subr.bf16.mxu0 %v20083_v8  ;;  %v20110_v10 = vld [vmem:[#allocation3 + $0x3f84] ss:$16 sps:$4 sm:$0xff]   ;;  %v20105_v8 = vld [vmem:[#allocation3 + $0x3d80] ss:$16 sps:$4 sm:$0xff]  }
 0x435   : > { %14379 = vmatprep.subr.bf16.mxu1 %v20086_v19  ;;  %v20108_v19 = vld [vmem:[#allocation3 + $0x3f80] ss:$16 sps:$4 sm:$0xff]  }
 0x437   : > { %14337 = vmatpush1.bf16.msra.mxu0 %v20081_v18  ;;  %v20113_v18 = vld [vmem:[#allocation3 + $0x3d64] ss:$16 sps:$4 sm:$0xff]  }
 0x438   : > { %14380 = vmatpush1.bf16.msra.mxu1 %v20084_v62  ;;  %14338 = vmatprep.subr.bf16.mxu0 %v20089_v6  ;;  %v20116_v62 = vld [vmem:[#allocation3 + $0x3f64] ss:$16 sps:$4 sm:$0xff]   ;;  %v20111_v6 = vld [vmem:[#allocation3 + $0x3d60] ss:$16 sps:$4 sm:$0xff]  }
 0x439   : > { %14381 = vmatprep.subr.bf16.mxu1 %v20092_v63  ;;  %v20114_v63 = vld [vmem:[#allocation3 + $0x3f60] ss:$16 sps:$4 sm:$0xff]  }
 0x43b   : > { %14339 = vmatpush2.bf16.msra.mxu0 %v20087_v4  ;;  %v20119_v4 = vld [vmem:[#allocation3 + $0x3d44] ss:$16 sps:$4 sm:$0xff]  }
 0x43c   : > { %14382 = vmatpush2.bf16.msra.mxu1 %v20090_v2  ;;  %14340 = vmatprep.subr.bf16.mxu0 %v20095_v5  ;;  %v20122_v2 = vld [vmem:[#allocation3 + $0x3f44] ss:$16 sps:$4 sm:$0xff]   ;;  %v20117_v5 = vld [vmem:[#allocation3 + $0x3d40] ss:$16 sps:$4 sm:$0xff]  }
 0x43d   : > { %14383 = vmatprep.subr.bf16.mxu1 %v20098_v35  ;;  %v20120_v35 = vld [vmem:[#allocation3 + $0x3f40] ss:$16 sps:$4 sm:$0xff]  }
 0x43f   : > { %14341 = vmatpush2.bf16.msra.mxu0 %v20093_v33  ;;  %v20125_v33 = vld [vmem:[#allocation3 + $0x3d24] ss:$16 sps:$4 sm:$0xff]  }
 0x440   : > { %14384 = vmatpush2.bf16.msra.mxu1 %v20096_v42  ;;  %14342 = vmatprep.subr.bf16.mxu0 %v20101_v32  ;;  %v20128_v42 = vld [vmem:[#allocation3 + $0x3f24] ss:$16 sps:$4 sm:$0xff]   ;;  %v20123_v32 = vld [vmem:[#allocation3 + $0x3d20] ss:$16 sps:$4 sm:$0xff]  }
 0x441   : > { %14385 = vmatprep.subr.bf16.mxu1 %v20104_v20  ;;  %v20126_v20 = vld [vmem:[#allocation3 + $0x3f20] ss:$16 sps:$4 sm:$0xff]  }
 0x443   : > { %14343 = vmatpush2.bf16.msra.mxu0 %v20099_v3  ;;  %v20131_v3 = vld [vmem:[#allocation3 + $0x3d04] ss:$16 sps:$4 sm:$0xff]  }
 0x444   : > { %14386 = vmatpush2.bf16.msra.mxu1 %v20102_v50  ;;  %14344 = vmatprep.subr.bf16.mxu0 %v20107_v21  ;;  %v20134_v50 = vld [vmem:[#allocation3 + $0x3f04] ss:$16 sps:$4 sm:$0xff]  }
 0x445   : > { %14387 = vmatprep.subr.bf16.mxu1 %v20110_v10  ;;  %v2621_v21 = vld [vmem:[#allocation3 + $0x40c0] sm:$0x33] }
 0x446   : > { %v20129_v10 = vld [vmem:[#allocation3 + $0x3d00] ss:$16 sps:$4 sm:$0xff]  }
 0x447   : > { %14345 = vmatpush2.bf16.msra.mxu0 %v20105_v8  ;;  %v20132_v8 = vld [vmem:[#allocation3 + $0x3f00] ss:$16 sps:$4 sm:$0xff]  }
 0x448   : > { %14388 = vmatpush2.bf16.msra.mxu1 %v20108_v19  ;;  %14346 = vmatprep.subr.bf16.mxu0 %v20113_v18  ;;  %v414_v19 = vld [vmem:[%s22046_s14 + $0x1e0] sm:$0xff]  ;;  %v479_v18 = vld [vmem:[%s22046_s14 + $0x3e8] sm:$0xff] }
 0x449   : > { %14389 = vmatprep.subr.bf16.mxu1 %v20116_v62  ;;  %v416_v62 = vld [vmem:[%s22046_s14 + $0x1f0] sm:$0xff] }
 0x44b   : > { %14347 = vmatpush2.bf16.msra.mxu0 %v20111_v6  ;;  %v481_v6 = vld [vmem:[%s22046_s14 + $0x3f8] sm:$0xff] }
 0x44c   : > { %14390 = vmatpush2.bf16.msra.mxu1 %v20114_v63  ;;  %14348 = vmatprep.subr.bf16.mxu0 %v20119_v4  ;;  %v18447_v63 = vcombine.high %v2621_v21, %v2621_v21  ;;  %v20138_v4 = vld [vmem:[#allocation3 + $0xec] ss:$16 sps:$4 sm:$0xff]  }
 0x44d   : > { %14391 = vmatprep.subr.bf16.mxu1 %v20122_v2  ;;  %v18446_v2 = vcombine.low %v2621_v21, %v2621_v21  ;;  %v20148_v21 = vld [vmem:[#allocation3 + $0x4084] ss:$16 sps:$4 sm:$0xff]  }
 0x44f   : > { %14349 = vmatpush2.bf16.msra.mxu0 %v20117_v5  ;;  %v20136_v5 = vld [vmem:[#allocation3 + $0xe8] ss:$16 sps:$4 sm:$0xff]  }
 0x450   : > { %14392 = vmatpush2.bf16.msra.mxu1 %v20120_v35  ;;  %14350 = vmatprep.subr.bf16.mxu0 %v20125_v33  ;;  %v22490_v35 = vpack.c.bf16 %v479_v18, %v414_v19  ;;  %v22492_v33 = vpack.c.bf16 %v481_v6, %v416_v62  ;;  %v20149_v19 = vld [vmem:[#allocation3 + $0xa8] ss:$16 sps:$4 sm:$0xff]   ;;  %v23132_v18 = vmov 0   ;;  %v20154_v62 = vld [vmem:[#allocation3 + $0x4064] ss:$16 sps:$4 sm:$0xff]  }
 0x451   : > { %14393 = vmatprep.subr.bf16.mxu1 %v20128_v42  ;;  %v13021_v42 = vsel %vm13019_vm0, %v18446_v2, 0  ;;  %v20157_v6 = vld [vmem:[#allocation3 + $0x8c] ss:$16 sps:$4 sm:$0xff]   ;;  %v20160_v2 = vld [vmem:[#allocation3 + $0x4044] ss:$16 sps:$4 sm:$0xff]  }
 0x452   : > { %23198 = vst [vmem:[#allocation67_spill] sm:$0xff] %v22490_v35  ;;  %23199 = vst [vmem:[#allocation68_spill] sm:$0xff] %v22492_v33 }
 0x453   : > { %14351 = vmatpush2.bf16.msra.mxu0 %v20123_v32  ;;  %v20142_v32 = vld [vmem:[#allocation3 + $0x40a4] ss:$16 sps:$4 sm:$0xff]  }
 0x454   : > { %14394 = vmatpush2.bf16.msra.mxu1 %v20126_v20  ;;  %14352 = vmatprep.subr.bf16.mxu0 %v20131_v3  ;;  %v20145_v20 = vld [vmem:[#allocation3 + $0xcc] ss:$16 sps:$4 sm:$0xff]   ;;  %v20140_v3 = vld [vmem:[#allocation3 + $0x40a0] ss:$16 sps:$4 sm:$0xff]  }
 0x455   : > { %14395 = vmatprep.subr.bf16.mxu1 %v20134_v50  ;;  %v20143_v50 = vld [vmem:[#allocation3 + $0xc8] ss:$16 sps:$4 sm:$0xff]  }
 0x457   : > { %14353 = vmatpush2.bf16.msra.mxu0 %v20129_v10  ;;  %v20151_v10 = vld [vmem:[#allocation3 + $0xac] ss:$16 sps:$4 sm:$0xff]  }
 0x458   : > { %14396 = vmatpush2.bf16.msra.mxu1 %v20132_v8  ;;  %18450 = vmatprep.subr.msk.bf16.mxu0 %vm13019_vm0, %v18447_v63  ;;  %v20146_v8 = vld [vmem:[#allocation3 + $0x4080] ss:$16 sps:$4 sm:$0xff]  }
 0x459   : > { %14451 = vmatprep.subr.bf16.mxu1 %v20138_v4  ;;  %v20152_v63 = vld [vmem:[#allocation3 + $0x4060] ss:$16 sps:$4 sm:$0xff]   ;;  %v20155_v4 = vld [vmem:[#allocation3 + $0x88] ss:$16 sps:$4 sm:$0xff]  }
 0x45a   : > { %14355 = vmatmul.mubr.bf16.vlgmr.msra.gmra.mxu0 %v22490_v35 }
 0x45b   : > { %14398 = vmatmul.mubr.bf16.vlgmr.msra.gmra.mxu1 %v22492_v33  ;;  %14411 = vmatpush1.bf16.msra.mxu0 %v13021_v42  ;;  %v20158_v42 = vld [vmem:[#allocation3 + $0x4040] ss:$16 sps:$4 sm:$0xff]  }
 0x45c   : > { %14452 = vmatpush1.bf16.msra.mxu1 %v20136_v5  ;;  %14412 = vmatprep.subr.bf16.mxu0 %v20142_v32  ;;  %v20163_v5 = vld [vmem:[#allocation3 + $0x6c] ss:$16 sps:$4 sm:$0xff]   ;;  %v20161_v32 = vld [vmem:[#allocation3 + $0x68] ss:$16 sps:$4 sm:$0xff]  }
 0x45d   : > { %14453 = vmatprep.subr.bf16.mxu1 %v20145_v20  ;;  %14440 = vmatprep.mubr.bf16.mxu0 %v23132_v18  ;;  %v20169_v20 = vld [vmem:[#allocation3 + $0x4c] ss:$16 sps:$4 sm:$0xff]  }
 0x45e   : > { %14483 = vmatprep.mubr.bf16.mxu1 %v22052_v53  ;;  %v20166_v53 = vld [vmem:[#allocation3 + $0x4024] ss:$16 sps:$4 sm:$0xff]  }
 0x45f   : > { %14413 = vmatpush1.bf16.msra.mxu0 %v20140_v3  ;;  %v20164_v3 = vld [vmem:[#allocation3 + $0x4020] ss:$16 sps:$4 sm:$0xff]  }
 0x460   : > { %14454 = vmatpush1.bf16.msra.mxu1 %v20143_v50  ;;  %14414 = vmatprep.subr.bf16.mxu0 %v20148_v21  ;;  %v20167_v50 = vld [vmem:[#allocation3 + $0x48] ss:$16 sps:$4 sm:$0xff]   ;;  %v20172_v21 = vld [vmem:[#allocation3 + $0x4004] ss:$16 sps:$4 sm:$0xff]  }
 0x461   : > { %14455 = vmatprep.subr.bf16.mxu1 %v20151_v10  ;;  %v20175_v10 = vld [vmem:[#allocation3 + $0x2c] ss:$16 sps:$4 sm:$0xff]  }
 0x463   : > { %14415 = vmatpush1.bf16.msra.mxu0 %v20146_v8  ;;  %v20170_v8 = vld [vmem:[#allocation3 + $0x4000] ss:$16 sps:$4 sm:$0xff]  }
 0x464   : > { %14456 = vmatpush1.bf16.msra.mxu1 %v20149_v19  ;;  %14416 = vmatprep.subr.bf16.mxu0 %v20154_v62  ;;  %v20173_v19 = vld [vmem:[#allocation3 + $0x28] ss:$16 sps:$4 sm:$0xff]   ;;  %v418_v62 = vld [vmem:[%s22046_s14 + $0x200] sm:$0xff] }
 0x465   : > { %14457 = vmatprep.subr.bf16.mxu1 %v20157_v6  ;;  %v483_v6 = vld [vmem:[%s22046_s14 + $0x408] sm:$0xff] }
 0x467   : > { %14417 = vmatpush1.bf16.msra.mxu0 %v20152_v63  ;;  %v20178_v63 = vld [vmem:[#allocation3 + $0xc] ss:$16 sps:$4 sm:$0xff]  }
 0x468   : > { %14458 = vmatpush1.bf16.msra.mxu1 %v20155_v4  ;;  %14418 = vmatprep.subr.bf16.mxu0 %v20160_v2  ;;  %v20181_v4 = vld [vmem:[#allocation3 + $0x2ec] ss:$16 sps:$4 sm:$0xff]   ;;  %v20176_v2 = vld [vmem:[#allocation3 + $0x8] ss:$16 sps:$4 sm:$0xff]  }
 0x469   : > { %14459 = vmatprep.subr.bf16.mxu1 %v20163_v5  ;;  %v20179_v5 = vld [vmem:[#allocation3 + $0x2e8] ss:$16 sps:$4 sm:$0xff]  }
 0x46b   : > { %14419 = vmatpush1.bf16.msra.mxu0 %v20158_v42  ;;  %v22502_v42 = vpack.c.bf16 %v483_v6, %v418_v62  ;;  %v20199_v62 = vld [vmem:[#allocation3 + $0x28c] ss:$16 sps:$4 sm:$0xff]   ;;  %v20194_v6 = vld [vmem:[#allocation3 + $0x1a8] ss:$16 sps:$4 sm:$0xff]  }
 0x46c   : > { %14460 = vmatpush1.bf16.msra.mxu1 %v20161_v32  ;;  %14420 = vmatprep.subr.bf16.mxu0 %v20166_v53  ;;  %v20184_v32 = vld [vmem:[#allocation3 + $0x1ec] ss:$16 sps:$4 sm:$0xff]  }
 0x46d   : > { %14461 = vmatprep.subr.bf16.mxu1 %v20169_v20  ;;  %23200 = vst [vmem:[#allocation69_spill] sm:$0xff] %v22502_v42  ;;  %v20187_v53 = vld [vmem:[#allocation3 + $0x2cc] ss:$16 sps:$4 sm:$0xff]   ;;  %v20182_v20 = vld [vmem:[#allocation3 + $0x1e8] ss:$16 sps:$4 sm:$0xff]  }
 0x46f   : > { %14421 = vmatpush1.bf16.msra.mxu0 %v20164_v3  ;;  %v20185_v3 = vld [vmem:[#allocation3 + $0x2c8] ss:$16 sps:$4 sm:$0xff]  }
 0x470   : > { %14462 = vmatpush1.bf16.msra.mxu1 %v20167_v50  ;;  %14422 = vmatprep.subr.bf16.mxu0 %v20172_v21  ;;  %v20190_v50 = vld [vmem:[#allocation3 + $0x1cc] ss:$16 sps:$4 sm:$0xff]  }
 0x471   : > { %14463 = vmatprep.subr.bf16.mxu1 %v20175_v10  ;;  %v20193_v21 = vld [vmem:[#allocation3 + $0x2ac] ss:$16 sps:$4 sm:$0xff]   ;;  %v20188_v10 = vld [vmem:[#allocation3 + $0x1c8] ss:$16 sps:$4 sm:$0xff]  }
 0x473   : > { %14423 = vmatpush1.bf16.msra.mxu0 %v20170_v8  ;;  %v20191_v8 = vld [vmem:[#allocation3 + $0x2a8] ss:$16 sps:$4 sm:$0xff]  }
 0x474   : > { %14464 = vmatpush1.bf16.msra.mxu1 %v20173_v19  ;;  %14494 = vmatprep.subr.bf16.mxu0 %v20181_v4  ;;  %v20196_v19 = vld [vmem:[#allocation3 + $0x1ac] ss:$16 sps:$4 sm:$0xff]  }
 0x475   : > { %14465 = vmatprep.subr.bf16.mxu1 %v20178_v63  ;;  %v20197_v63 = vld [vmem:[#allocation3 + $0x288] ss:$16 sps:$4 sm:$0xff]   ;;  %v20202_v4 = vld [vmem:[#allocation3 + $0x18c] ss:$16 sps:$4 sm:$0xff]  }
 0x476   : > { %18451 = vmatmul.mubr.msk.bf16.vlgmr.msra.gmra.mxu0 %vm13015_vm1, %v22502_v42 }
 0x477   : > { %14495 = vmatpush1.bf16.msra.mxu0 %v20179_v5  ;;  %14526 = vmatprep.mubr.bf16.mxu0 %v22054_v54  ;;  %v20200_v5 = vld [vmem:[#allocation3 + $0x188] ss:$16 sps:$4 sm:$0xff]  }
 0x478   : > { %14466 = vmatpush1.bf16.msra.mxu1 %v20176_v2  ;;  %14496 = vmatprep.subr.bf16.mxu0 %v20187_v53  ;;  %v20205_v2 = vld [vmem:[#allocation3 + $0x26c] ss:$16 sps:$4 sm:$0xff]   ;;  %v20203_v54 = vld [vmem:[#allocation3 + $0x268] ss:$16 sps:$4 sm:$0xff]  }
 0x479   : > { %14467 = vmatprep.subr.bf16.mxu1 %v20184_v32  ;;  %v20208_v32 = vld [vmem:[#allocation3 + $0x16c] ss:$16 sps:$4 sm:$0xff]  }
 0x47a   : > { %v20211_v53 = vld [vmem:[#allocation3 + $0x24c] ss:$16 sps:$4 sm:$0xff]  }
 0x47b   : > { %14497 = vmatpush1.bf16.msra.mxu0 %v20185_v3  ;;  %v20209_v3 = vld [vmem:[#allocation3 + $0x248] ss:$16 sps:$4 sm:$0xff]  }
 0x47c   : > { %14468 = vmatpush2.bf16.msra.mxu1 %v20182_v20  ;;  %14498 = vmatprep.subr.bf16.mxu0 %v20193_v21  ;;  %v20206_v20 = vld [vmem:[#allocation3 + $0x168] ss:$16 sps:$4 sm:$0xff]   ;;  %v20217_v21 = vld [vmem:[#allocation3 + $0x22c] ss:$16 sps:$4 sm:$0xff]  }
 0x47d   : > { %14469 = vmatprep.subr.bf16.mxu1 %v20190_v50  ;;  %v20214_v50 = vld [vmem:[#allocation3 + $0x14c] ss:$16 sps:$4 sm:$0xff]  }
 0x47f   : > { %14499 = vmatpush1.bf16.msra.mxu0 %v20191_v8  ;;  %v20215_v8 = vld [vmem:[#allocation3 + $0x228] ss:$16 sps:$4 sm:$0xff]  }
 0x480   : > { %14470 = vmatpush2.bf16.msra.mxu1 %v20188_v10  ;;  %14500 = vmatprep.subr.bf16.mxu0 %v20199_v62  ;;  %v20212_v10 = vld [vmem:[#allocation3 + $0x148] ss:$16 sps:$4 sm:$0xff]   ;;  %v20223_v62 = vld [vmem:[#allocation3 + $0x20c] ss:$16 sps:$4 sm:$0xff]  }
 0x481   : > { %14471 = vmatprep.subr.bf16.mxu1 %v20196_v19  ;;  %v20220_v19 = vld [vmem:[#allocation3 + $0x12c] ss:$16 sps:$4 sm:$0xff]  }
 0x483   : > { %14501 = vmatpush1.bf16.msra.mxu0 %v20197_v63  ;;  %v20221_v63 = vld [vmem:[#allocation3 + $0x208] ss:$16 sps:$4 sm:$0xff]  }
 0x484   : > { %14472 = vmatpush2.bf16.msra.mxu1 %v20194_v6  ;;  %14502 = vmatprep.subr.bf16.mxu0 %v20205_v2  ;;  %v20218_v6 = vld [vmem:[#allocation3 + $0x128] ss:$16 sps:$4 sm:$0xff]   ;;  %v20229_v2 = vld [vmem:[#allocation3 + $0x3ec] ss:$16 sps:$4 sm:$0xff]  }
 0x485   : > { %14473 = vmatprep.subr.bf16.mxu1 %v20202_v4  ;;  %v20226_v4 = vld [vmem:[#allocation3 + $0x10c] ss:$16 sps:$4 sm:$0xff]  }
 0x487   : > { %14503 = vmatpush1.bf16.msra.mxu0 %v20203_v54  ;;  %v20227_v54 = vld [vmem:[#allocation3 + $0x3e8] ss:$16 sps:$4 sm:$0xff]  }
 0x488   : > { %14474 = vmatpush2.bf16.msra.mxu1 %v20200_v5  ;;  %14504 = vmatprep.subr.bf16.mxu0 %v20211_v53  ;;  %v20224_v5 = vld [vmem:[#allocation3 + $0x108] ss:$16 sps:$4 sm:$0xff]   ;;  %v20235_v53 = vld [vmem:[#allocation3 + $0x4ec] ss:$16 sps:$4 sm:$0xff]  }
 0x489   : > { %14475 = vmatprep.subr.bf16.mxu1 %v20208_v32  ;;  %v20232_v32 = vld [vmem:[#allocation3 + $0x3cc] ss:$16 sps:$4 sm:$0xff]  }
 0x48b   : > { %14505 = vmatpush1.bf16.msra.mxu0 %v20209_v3  ;;  %v20233_v3 = vld [vmem:[#allocation3 + $0x4e8] ss:$16 sps:$4 sm:$0xff]  }
 0x48c   : > { %14476 = vmatpush2.bf16.msra.mxu1 %v20206_v20  ;;  %14506 = vmatprep.subr.bf16.mxu0 %v20217_v21  ;;  %v20230_v20 = vld [vmem:[#allocation3 + $0x3c8] ss:$16 sps:$4 sm:$0xff]   ;;  %v20241_v21 = vld [vmem:[#allocation3 + $0x4cc] ss:$16 sps:$4 sm:$0xff]  }
 0x48d   : > { %14477 = vmatprep.subr.bf16.mxu1 %v20214_v50  ;;  %v20238_v50 = vld [vmem:[#allocation3 + $0x3ac] ss:$16 sps:$4 sm:$0xff]  }
 0x48f   : > { %14507 = vmatpush1.bf16.msra.mxu0 %v20215_v8  ;;  %v20239_v8 = vld [vmem:[#allocation3 + $0x4c8] ss:$16 sps:$4 sm:$0xff]  }
 0x490   : > { %14478 = vmatpush2.bf16.msra.mxu1 %v20212_v10  ;;  %14508 = vmatprep.subr.bf16.mxu0 %v20223_v62  ;;  %v20236_v10 = vld [vmem:[#allocation3 + $0x3a8] ss:$16 sps:$4 sm:$0xff]   ;;  %v20247_v62 = vld [vmem:[#allocation3 + $0x4ac] ss:$16 sps:$4 sm:$0xff]  }
 0x491   : > { %14479 = vmatprep.subr.bf16.mxu1 %v20220_v19  ;;  %v20244_v19 = vld [vmem:[#allocation3 + $0x38c] ss:$16 sps:$4 sm:$0xff]  }
 0x493   : > { %14509 = vmatpush1.bf16.msra.mxu0 %v20221_v63  ;;  %v20245_v63 = vld [vmem:[#allocation3 + $0x4a8] ss:$16 sps:$4 sm:$0xff]  }
 0x494   : > { %14480 = vmatpush2.bf16.msra.mxu1 %v20218_v6  ;;  %14510 = vmatprep.subr.bf16.mxu0 %v20229_v2  ;;  %v20242_v6 = vld [vmem:[#allocation3 + $0x388] ss:$16 sps:$4 sm:$0xff]   ;;  %v20253_v2 = vld [vmem:[#allocation3 + $0x48c] ss:$16 sps:$4 sm:$0xff]  }
 0x495   : > { %14481 = vmatprep.subr.bf16.mxu1 %v20226_v4  ;;  %v20250_v4 = vld [vmem:[#allocation3 + $0x36c] ss:$16 sps:$4 sm:$0xff]  }
 0x497   : > { %14511 = vmatpush2.bf16.msra.mxu0 %v20227_v54  ;;  %v20256_v54 = vld [vmem:[#allocation3 + $0x34c] ss:$16 sps:$4 sm:$0xff]  }
 0x498   : > { %14482 = vmatpush2.bf16.msra.mxu1 %v20224_v5  ;;  %14512 = vmatprep.subr.bf16.mxu0 %v20232_v32  ;;  %v20248_v5 = vld [vmem:[#allocation3 + $0x368] ss:$16 sps:$4 sm:$0xff]   ;;  %v20259_v32 = vld [vmem:[#allocation3 + $0x46c] ss:$16 sps:$4 sm:$0xff]  }
 0x499   : > { %14537 = vmatprep.subr.bf16.mxu1 %v20235_v53  ;;  %v20254_v53 = vld [vmem:[#allocation3 + $0x348] ss:$16 sps:$4 sm:$0xff]  }
 0x49b   : > { %14484 = vmatmul.mubr.bf16.vlgmr.msra.gmra.mxu1 %v22062_v12  ;;  %14513 = vmatpush2.bf16.msra.mxu0 %v20230_v20  ;;  %v20251_v12 = vld [vmem:[#allocation3 + $0x488] ss:$16 sps:$4 sm:$0xff]  }
 0x49c   : > { %14538 = vmatpush1.bf16.msra.mxu1 %v20233_v3  ;;  %14514 = vmatprep.subr.bf16.mxu0 %v20238_v50  ;;  %v20257_v20 = vld [vmem:[#allocation3 + $0x468] ss:$16 sps:$4 sm:$0xff]   ;;  %v20265_v3 = vld [vmem:[#allocation3 + $0x44c] ss:$16 sps:$4 sm:$0xff]  }
 0x49d   : > { %14539 = vmatprep.subr.bf16.mxu1 %v20241_v21  ;;  %14569 = vmatprep.mubr.bf16.mxu1 %v22071_v45  ;;  %v20262_v45 = vld [vmem:[#allocation3 + $0x32c] ss:$16 sps:$4 sm:$0xff]   ;;  %v20260_v50 = vld [vmem:[#allocation3 + $0x328] ss:$16 sps:$4 sm:$0xff]  }
 0x49e   : > { %v20263_v21 = vld [vmem:[#allocation3 + $0x448] ss:$16 sps:$4 sm:$0xff]  }
 0x49f   : > { %14515 = vmatpush2.bf16.msra.mxu0 %v20236_v10  ;;  %v20268_v10 = vld [vmem:[#allocation3 + $0x30c] ss:$16 sps:$4 sm:$0xff]  }
 0x4a0   : > { %14540 = vmatpush1.bf16.msra.mxu1 %v20239_v8  ;;  %14516 = vmatprep.subr.bf16.mxu0 %v20244_v19  ;;  %v20271_v8 = vld [vmem:[#allocation3 + $0x42c] ss:$16 sps:$4 sm:$0xff]   ;;  %v20266_v19 = vld [vmem:[#allocation3 + $0x308] ss:$16 sps:$4 sm:$0xff]  }
 0x4a1   : > { %14541 = vmatprep.subr.bf16.mxu1 %v20247_v62  ;;  %v20269_v62 = vld [vmem:[#allocation3 + $0x428] ss:$16 sps:$4 sm:$0xff]  }
 0x4a3   : > { %14517 = vmatpush2.bf16.msra.mxu0 %v20242_v6  ;;  %v20274_v6 = vld [vmem:[#allocation3 + $0x40c] ss:$16 sps:$4 sm:$0xff]  }
 0x4a4   : > { %14542 = vmatpush1.bf16.msra.mxu1 %v20245_v63  ;;  %14518 = vmatprep.subr.bf16.mxu0 %v20250_v4  ;;  %v20277_v63 = vld [vmem:[#allocation3 + $0x6ec] ss:$16 sps:$4 sm:$0xff]   ;;  %v20272_v4 = vld [vmem:[#allocation3 + $0x408] ss:$16 sps:$4 sm:$0xff]  }
 0x4a5   : > { %14543 = vmatprep.subr.bf16.mxu1 %v20253_v2  ;;  %v20275_v2 = vld [vmem:[#allocation3 + $0x6e8] ss:$16 sps:$4 sm:$0xff]  }
 0x4a7   : > { %14519 = vmatpush2.bf16.msra.mxu0 %v20248_v5  ;;  %v20280_v5 = vld [vmem:[#allocation3 + $0x5ec] ss:$16 sps:$4 sm:$0xff]  }
 0x4a8   : > { %14544 = vmatpush1.bf16.msra.mxu1 %v20251_v12  ;;  %14520 = vmatprep.subr.bf16.mxu0 %v20256_v54  ;;  %v20283_v12 = vld [vmem:[#allocation3 + $0x6cc] ss:$16 sps:$4 sm:$0xff]   ;;  %v20278_v54 = vld [vmem:[#allocation3 + $0x5e8] ss:$16 sps:$4 sm:$0xff]  }
 0x4a9   : > { %14545 = vmatprep.subr.bf16.mxu1 %v20259_v32  ;;  %v20281_v32 = vld [vmem:[#allocation3 + $0x6c8] ss:$16 sps:$4 sm:$0xff]  }
 0x4ab   : > { %14521 = vmatpush2.bf16.msra.mxu0 %v20254_v53  ;;  %v20286_v53 = vld [vmem:[#allocation3 + $0x5cc] ss:$16 sps:$4 sm:$0xff]  }
 0x4ac   : > { %14546 = vmatpush1.bf16.msra.mxu1 %v20257_v20  ;;  %14522 = vmatprep.subr.bf16.mxu0 %v20262_v45  ;;  %v20289_v20 = vld [vmem:[#allocation3 + $0x6ac] ss:$16 sps:$4 sm:$0xff]   ;;  %v20284_v45 = vld [vmem:[#allocation3 + $0x5c8] ss:$16 sps:$4 sm:$0xff]  }
 0x4ad   : > { %14547 = vmatprep.subr.bf16.mxu1 %v20265_v3  ;;  %v20287_v3 = vld [vmem:[#allocation3 + $0x6a8] ss:$16 sps:$4 sm:$0xff]  }
 0x4af   : > { %14523 = vmatpush2.bf16.msra.mxu0 %v20260_v50  ;;  %v20292_v50 = vld [vmem:[#allocation3 + $0x5ac] ss:$16 sps:$4 sm:$0xff]  }
 0x4b0   : > { %14548 = vmatpush1.bf16.msra.mxu1 %v20263_v21  ;;  %14524 = vmatprep.subr.bf16.mxu0 %v20268_v10  ;;  %v20295_v21 = vld [vmem:[#allocation3 + $0x68c] ss:$16 sps:$4 sm:$0xff]   ;;  %v20290_v10 = vld [vmem:[#allocation3 + $0x5a8] ss:$16 sps:$4 sm:$0xff]  }
 0x4b1   : > { %14549 = vmatprep.subr.bf16.mxu1 %v20271_v8  ;;  %v20293_v8 = vld [vmem:[#allocation3 + $0x688] ss:$16 sps:$4 sm:$0xff]  }
 0x4b3   : > { %14525 = vmatpush2.bf16.msra.mxu0 %v20266_v19  ;;  %v20301_v19 = vld [vmem:[#allocation3 + $0x66c] ss:$16 sps:$4 sm:$0xff]  }
 0x4b4   : > { %14550 = vmatpush1.bf16.msra.mxu1 %v20269_v62  ;;  %14580 = vmatprep.subr.bf16.mxu0 %v20277_v63  ;;  %v20296_v62 = vld [vmem:[#allocation3 + $0x588] ss:$16 sps:$4 sm:$0xff]   ;;  %v20307_v63 = vld [vmem:[#allocation3 + $0x64c] ss:$16 sps:$4 sm:$0xff]  }
 0x4b5   : > { %14551 = vmatprep.subr.bf16.mxu1 %v20274_v6  ;;  %v20299_v6 = vld [vmem:[#allocation3 + $0x668] ss:$16 sps:$4 sm:$0xff]  }
 0x4b6   : > { %14527 = vmatmul.mubr.bf16.vlgmr.msra.gmra.mxu0 %v22064_v13  ;;  %v20298_v13 = vld [vmem:[#allocation3 + $0x58c] ss:$16 sps:$4 sm:$0xff]  }
 0x4b7   : > { %14581 = vmatpush1.bf16.msra.mxu0 %v20275_v2  ;;  %14612 = vmatprep.mubr.bf16.mxu0 %v22074_v47  ;;  %v20304_v47 = vld [vmem:[#allocation3 + $0x56c] ss:$16 sps:$4 sm:$0xff]   ;;  %v20305_v2 = vld [vmem:[#allocation3 + $0x648] ss:$16 sps:$4 sm:$0xff]  }
 0x4b8   : > { %14552 = vmatpush1.bf16.msra.mxu1 %v20272_v4  ;;  %14582 = vmatprep.subr.bf16.mxu0 %v20283_v12  ;;  %v20302_v4 = vld [vmem:[#allocation3 + $0x568] ss:$16 sps:$4 sm:$0xff]   ;;  %v20313_v12 = vld [vmem:[#allocation3 + $0x62c] ss:$16 sps:$4 sm:$0xff]  }
 0x4b9   : > { %14553 = vmatprep.subr.bf16.mxu1 %v20280_v5  ;;  %v20310_v5 = vld [vmem:[#allocation3 + $0x54c] ss:$16 sps:$4 sm:$0xff]  }
 0x4bb   : > { %14583 = vmatpush1.bf16.msra.mxu0 %v20281_v32  ;;  %v20311_v32 = vld [vmem:[#allocation3 + $0x628] ss:$16 sps:$4 sm:$0xff]  }
 0x4bc   : > { %14554 = vmatpush2.bf16.msra.mxu1 %v20278_v54  ;;  %14584 = vmatprep.subr.bf16.mxu0 %v20289_v20  ;;  %v20308_v54 = vld [vmem:[#allocation3 + $0x548] ss:$16 sps:$4 sm:$0xff]   ;;  %v20319_v20 = vld [vmem:[#allocation3 + $0x60c] ss:$16 sps:$4 sm:$0xff]  }
 0x4bd   : > { %14555 = vmatprep.subr.bf16.mxu1 %v20286_v53  ;;  %v20316_v53 = vld [vmem:[#allocation3 + $0x52c] ss:$16 sps:$4 sm:$0xff]  }
 0x4bf   : > { %14585 = vmatpush1.bf16.msra.mxu0 %v20287_v3  ;;  %v20317_v3 = vld [vmem:[#allocation3 + $0x608] ss:$16 sps:$4 sm:$0xff]  }
 0x4c0   : > { %14556 = vmatpush2.bf16.msra.mxu1 %v20284_v45  ;;  %14586 = vmatprep.subr.bf16.mxu0 %v20295_v21  ;;  %v20314_v45 = vld [vmem:[#allocation3 + $0x528] ss:$16 sps:$4 sm:$0xff]   ;;  %v20325_v21 = vld [vmem:[#allocation3 + $0x7ec] ss:$16 sps:$4 sm:$0xff]  }
 0x4c1   : > { %14557 = vmatprep.subr.bf16.mxu1 %v20292_v50  ;;  %v20322_v50 = vld [vmem:[#allocation3 + $0x50c] ss:$16 sps:$4 sm:$0xff]  }
 0x4c3   : > { %14587 = vmatpush1.bf16.msra.mxu0 %v20293_v8  ;;  %v20320_v8 = vld [vmem:[#allocation3 + $0x508] ss:$16 sps:$4 sm:$0xff]  }
 0x4c4   : > { %14558 = vmatpush2.bf16.msra.mxu1 %v20290_v10  ;;  %14588 = vmatprep.subr.bf16.mxu0 %v20301_v19  ;;  %v22511_v10 = vpop.f32.mrf.mxu1  ;;  %v20328_v19 = vld [vmem:[#allocation3 + $0x7cc] ss:$16 sps:$4 sm:$0xff]  }
 0x4c5   : > { %14559 = vmatprep.subr.bf16.mxu1 %v20298_v13  ;;  %23201 = vst [vmem:[#allocation70_spill] sm:$0xff] %v22511_v10  ;;  %v20323_v13 = vld [vmem:[#allocation3 + $0x7e8] ss:$16 sps:$4 sm:$0xff]  }
 0x4c7   : > { %14589 = vmatpush1.bf16.msra.mxu0 %v20299_v6  ;;  %v20326_v6 = vld [vmem:[#allocation3 + $0x7c8] ss:$16 sps:$4 sm:$0xff]  }
 0x4c8   : > { %14560 = vmatpush2.bf16.msra.mxu1 %v20296_v62  ;;  %14590 = vmatprep.subr.bf16.mxu0 %v20307_v63  ;;  %v20331_v62 = vld [vmem:[#allocation3 + $0x8ec] ss:$16 sps:$4 sm:$0xff]   ;;  %v22513_v63 = vpop.f32.mrf.mxu1 }
 0x4c9   : > { %14561 = vmatprep.subr.bf16.mxu1 %v20304_v47  ;;  %v20329_v47 = vld [vmem:[#allocation3 + $0x8e8] ss:$16 sps:$4 sm:$0xff]  }
 0x4cb   : > { %14591 = vmatpush1.bf16.msra.mxu0 %v20305_v2  ;;  %v20334_v2 = vld [vmem:[#allocation3 + $0x7ac] ss:$16 sps:$4 sm:$0xff]  }
 0x4cc   : > { %14562 = vmatpush2.bf16.msra.mxu1 %v20302_v4  ;;  %14592 = vmatprep.subr.bf16.mxu0 %v20313_v12  ;;  %v22515_v4 = vpop.f32.mrf.mxu0  ;;  %v20332_v12 = vld [vmem:[#allocation3 + $0x7a8] ss:$16 sps:$4 sm:$0xff]  }
 0x4cd   : > { %14563 = vmatprep.subr.bf16.mxu1 %v20310_v5  ;;  %23202 = vst [vmem:[#allocation71_spill] sm:$0xff] %v22515_v4  ;;  %v20337_v5 = vld [vmem:[#allocation3 + $0x8cc] ss:$16 sps:$4 sm:$0xff]  }
 0x4cf   : > { %14593 = vmatpush1.bf16.msra.mxu0 %v20311_v32  ;;  %v22517_v32 = vpop.f32.mrf.mxu1 }
 0x4d0   : > { %14564 = vmatpush2.bf16.msra.mxu1 %v20308_v54  ;;  %14594 = vmatprep.subr.bf16.mxu0 %v20319_v20  ;;  %v20335_v54 = vld [vmem:[#allocation3 + $0x8c8] ss:$16 sps:$4 sm:$0xff]   ;;  %23203 = vst [vmem:[#allocation72_spill] sm:$0xff] %v22517_v32  ;;  %v22522_v20 = vpop.f32.mrf.mxu0 }
 0x4d1   : > { %14565 = vmatprep.subr.bf16.mxu1 %v20316_v53  ;;  %v22520_v53 = vpop.f32.mrf.mxu1 }
 0x4d2   : > { %v13884_v57 = vadd.f32 %v22520_v53, %v22442_v36  ;;  %v20422_v36 = vld [vmem:[#allocation3 + $0xbc8] ss:$16 sps:$4 sm:$0xff]  }
 0x4d3   : > { %14595 = vmatpush1.bf16.msra.mxu0 %v20317_v3  ;;  %v20343_v3 = vld [vmem:[#allocation3 + $0x8ac] ss:$16 sps:$4 sm:$0xff]   ;;  %v20425_v53 = vld [vmem:[#allocation3 + $0xce8] ss:$16 sps:$4 sm:$0xff]  }
 0x4d4   : > { %14566 = vmatpush2.bf16.msra.mxu1 %v20314_v45  ;;  %14596 = vmatprep.subr.bf16.mxu0 %v20325_v21  ;;  %v20340_v45 = vld [vmem:[#allocation3 + $0x78c] ss:$16 sps:$4 sm:$0xff]   ;;  %v20341_v21 = vld [vmem:[#allocation3 + $0x8a8] ss:$16 sps:$4 sm:$0xff]  }
 0x4d5   : > { %14567 = vmatprep.subr.bf16.mxu1 %v20322_v50  ;;  %v20338_v50 = vld [vmem:[#allocation3 + $0x788] ss:$16 sps:$4 sm:$0xff]  }
 0x4d7   : > { %14597 = vmatpush2.bf16.msra.mxu0 %v20323_v13  ;;  %v22527_v13 = vpop.f32.mrf.mxu0 }
 0x4d8   : > { %14568 = vmatpush2.bf16.msra.mxu1 %v20320_v8  ;;  %14598 = vmatprep.subr.bf16.mxu0 %v20328_v19  ;;  %v22525_v8 = vpop.f32.mrf.mxu1  ;;  %23205 = vst [vmem:[#allocation74_spill] sm:$0xff] %v22527_v13  ;;  %v20349_v19 = vld [vmem:[#allocation3 + $0x88c] ss:$16 sps:$4 sm:$0xff]  }
 0x4d9   : > { %14623 = vmatprep.subr.bf16.mxu1 %v20331_v62  ;;  %23204 = vst [vmem:[#allocation73_spill] sm:$0xff] %v22525_v8  ;;  %v22529_v62 = vpop.f32.mrf.mxu0  ;;  %v20368_v8 = vld [vmem:[#allocation3 + $0x808] ss:$16 sps:$4 sm:$0xff]  }
 0x4db   : > { %14570 = vmatmul.mubr.bf16.vlgmr.msra.gmra.mxu1 %v22082_v28  ;;  %14599 = vmatpush2.bf16.msra.mxu0 %v20326_v6  ;;  %v20346_v28 = vld [vmem:[#allocation3 + $0x76c] ss:$16 sps:$4 sm:$0xff]   ;;  %v20344_v6 = vld [vmem:[#allocation3 + $0x768] ss:$16 sps:$4 sm:$0xff]  }
 0x4dc   : > { %14624 = vmatpush1.bf16.msra.mxu1 %v20329_v47  ;;  %14600 = vmatprep.subr.bf16.mxu0 %v20334_v2  ;;  %v20347_v47 = vld [vmem:[#allocation3 + $0x888] ss:$16 sps:$4 sm:$0xff]   ;;  %v22531_v2 = vpop.f32.mrf.mxu1 }
 0x4dd   : > { %14625 = vmatprep.subr.bf16.mxu1 %v20337_v5  ;;  %14655 = vmatprep.mubr.bf16.mxu1 %v22090_v40  ;;  %v20352_v40 = vld [vmem:[#allocation3 + $0x74c] ss:$16 sps:$4 sm:$0xff]  }
 0x4de   : > { %v20355_v5 = vld [vmem:[#allocation3 + $0x86c] ss:$16 sps:$4 sm:$0xff]  }
 0x4df   : > { %14601 = vmatpush2.bf16.msra.mxu0 %v20332_v12  ;;  %v22533_v12 = vpop.f32.mrf.mxu0 }
 0x4e0   : > { %14626 = vmatpush1.bf16.msra.mxu1 %v20335_v54  ;;  %14602 = vmatprep.subr.bf16.mxu0 %v20340_v45  ;;  %23206 = vst [vmem:[#allocation75_spill] sm:$0xff] %v22533_v12  ;;  %v20350_v54 = vld [vmem:[#allocation3 + $0x748] ss:$16 sps:$4 sm:$0xff]  }
 0x4e1   : > { %14627 = vmatprep.subr.bf16.mxu1 %v20343_v3  ;;  %v20353_v45 = vld [vmem:[#allocation3 + $0x868] ss:$16 sps:$4 sm:$0xff]   ;;  %v22535_v3 = vpop.f32.mrf.mxu1  ;;  %v22539_v42 = vpop.f32.mrf.mxu0 }
 0x4e2   : > { %23207 = vst [vmem:[#allocation76_spill] sm:$0xff] %v22535_v3  ;;  %v20371_v3 = vld [vmem:[#allocation3 + $0xae8] ss:$16 sps:$4 sm:$0xff]  }
 0x4e3   : > { %14603 = vmatpush2.bf16.msra.mxu0 %v20338_v50  ;;  %v20358_v50 = vld [vmem:[#allocation3 + $0x72c] ss:$16 sps:$4 sm:$0xff]   ;;  %v22537_v18 = vpop.f32.mrf.mxu1  ;;  %v22543_v35 = vpop.f32.mrf.mxu0 }
 0x4e4   : > { %14628 = vmatpush1.bf16.msra.mxu1 %v20341_v21  ;;  %14604 = vmatprep.subr.bf16.mxu0 %v20346_v28  ;;  %v20361_v21 = vld [vmem:[#allocation3 + $0x84c] ss:$16 sps:$4 sm:$0xff]   ;;  %v20356_v28 = vld [vmem:[#allocation3 + $0x728] ss:$16 sps:$4 sm:$0xff]   ;;  %23209 = vst [vmem:[#allocation78_spill] sm:$0xff] %v22543_v35 }
 0x4e5   : > { %14629 = vmatprep.subr.bf16.mxu1 %v20349_v19  ;;  %v20359_v19 = vld [vmem:[#allocation3 + $0x848] ss:$16 sps:$4 sm:$0xff]   ;;  %v22541_v33 = vpop.f32.mrf.mxu1  ;;  %v22545_v12 = vpop.f32.mrf.mxu0 }
 0x4e6   : > { %23208 = vst [vmem:[#allocation77_spill] sm:$0xff] %v22541_v33  ;;  %v20374_v33 = vld [vmem:[#allocation3 + $0x9e8] ss:$16 sps:$4 sm:$0xff]  }
 0x4e7   : > { %14605 = vmatpush2.bf16.msra.mxu0 %v20344_v6  ;;  %v20364_v6 = vld [vmem:[#allocation3 + $0x70c] ss:$16 sps:$4 sm:$0xff]   ;;  %v20377_v35 = vld [vmem:[#allocation3 + $0xac8] ss:$16 sps:$4 sm:$0xff]  }
 0x4e8   : > { %14630 = vmatpush1.bf16.msra.mxu1 %v20347_v47  ;;  %14606 = vmatprep.subr.bf16.mxu0 %v20352_v40  ;;  %v20367_v47 = vld [vmem:[#allocation3 + $0x82c] ss:$16 sps:$4 sm:$0xff]   ;;  %v20362_v40 = vld [vmem:[#allocation3 + $0x708] ss:$16 sps:$4 sm:$0xff]  }
 0x4e9   : > { %14631 = vmatprep.subr.bf16.mxu1 %v20355_v5  ;;  %v20365_v5 = vld [vmem:[#allocation3 + $0x828] ss:$16 sps:$4 sm:$0xff]  }
 0x4eb   : > { %14607 = vmatpush2.bf16.msra.mxu0 %v20350_v54  ;;  %v20370_v54 = vld [vmem:[#allocation3 + $0x80c] ss:$16 sps:$4 sm:$0xff]  }
 0x4ec   : > { %14632 = vmatpush1.bf16.msra.mxu1 %v20353_v45  ;;  %14608 = vmatprep.subr.bf16.mxu0 %v20358_v50  ;;  %v20373_v45 = vld [vmem:[#allocation3 + $0xaec] ss:$16 sps:$4 sm:$0xff]   ;;  %v22547_v50 = vpop.f32.mrf.mxu1 }
 0x4ed   : > { %14633 = vmatprep.subr.bf16.mxu1 %v20361_v21  ;;  %v22549_v21 = vpop.f32.mrf.mxu0 }
 0x4ee   : > { %23210 = vst [vmem:[#allocation79_spill] sm:$0xff] %v22549_v21  ;;  %v22551_v4 = vpop.f32.mrf.mxu1 }
 0x4ef   : > { %14609 = vmatpush2.bf16.msra.mxu0 %v20356_v28  ;;  %v20376_v28 = vld [vmem:[#allocation3 + $0x9ec] ss:$16 sps:$4 sm:$0xff]   ;;  %23211 = vst [vmem:[#allocation80_spill] sm:$0xff] %v22551_v4 }
 0x4f0   : > { %14634 = vmatpush1.bf16.msra.mxu1 %v20359_v19  ;;  %14610 = vmatprep.subr.bf16.mxu0 %v20364_v6  ;;  %v20379_v19 = vld [vmem:[#allocation3 + $0xacc] ss:$16 sps:$4 sm:$0xff]   ;;  %v22554_v6 = vpop.f32.mrf.mxu1 }
 0x4f1   : > { %14635 = vmatprep.subr.bf16.mxu1 %v20367_v47  ;;  %v22556_v47 = vpop.f32.mrf.mxu0 }
 0x4f2   : > { %v22559_v21 = vpop.f32.mrf.mxu1 }
 0x4f3   : > { %14611 = vmatpush2.bf16.msra.mxu0 %v20362_v40  ;;  %v20382_v40 = vld [vmem:[#allocation3 + $0x9cc] ss:$16 sps:$4 sm:$0xff]   ;;  %23212 = vst [vmem:[#allocation81_spill] sm:$0xff] %v22559_v21  ;;  %v22561_v4 = vpop.f32.mrf.mxu0 }
 0x4f4   : > { %14636 = vmatpush1.bf16.msra.mxu1 %v20365_v5  ;;  %14666 = vmatprep.subr.bf16.mxu0 %v20373_v45  ;;  %v20385_v5 = vld [vmem:[#allocation3 + $0xaac] ss:$16 sps:$4 sm:$0xff]   ;;  %v20383_v45 = vld [vmem:[#allocation3 + $0xaa8] ss:$16 sps:$4 sm:$0xff]   ;;  %23213 = vst [vmem:[#allocation82_spill] sm:$0xff] %v22561_v4  ;;  %v22565_v13 = vpop.f32.mrf.mxu1 }
 0x4f5   : > { %14637 = vmatprep.subr.bf16.mxu1 %v20370_v54  ;;  %v20380_v54 = vld [vmem:[#allocation3 + $0x9c8] ss:$16 sps:$4 sm:$0xff]  }
 0x4f6   : > { %14613 = vmatmul.mubr.bf16.vlgmr.msra.gmra.mxu0 %v22084_v29  ;;  %v20388_v29 = vld [vmem:[#allocation3 + $0x9ac] ss:$16 sps:$4 sm:$0xff]   ;;  %v22569_v21 = vpop.f32.mrf.mxu1 }
 0x4f7   : > { %14667 = vmatpush1.bf16.msra.mxu0 %v20371_v3  ;;  %14698 = vmatprep.mubr.bf16.mxu0 %v22094_v46  ;;  %v22563_v3 = vpop.f32.mrf.mxu0  ;;  %v20394_v46 = vld [vmem:[#allocation3 + $0x98c] ss:$16 sps:$4 sm:$0xff]   ;;  %23215 = vst [vmem:[#allocation84_spill] sm:$0xff] %v22569_v21 }
 0x4f8   : > { %14638 = vmatpush1.bf16.msra.mxu1 %v20368_v8  ;;  %14668 = vmatprep.subr.bf16.mxu0 %v20379_v19  ;;  %v20391_v8 = vld [vmem:[#allocation3 + $0xa8c] ss:$16 sps:$4 sm:$0xff]   ;;  %v20389_v19 = vld [vmem:[#allocation3 + $0xa88] ss:$16 sps:$4 sm:$0xff]   ;;  %v22571_v4 = vpop.f32.mrf.mxu1 }
 0x4f9   : > { %14639 = vmatprep.subr.bf16.mxu1 %v20376_v28  ;;  %v20386_v28 = vld [vmem:[#allocation3 + $0x9a8] ss:$16 sps:$4 sm:$0xff]  }
 0x4fb   : > { %14669 = vmatpush1.bf16.msra.mxu0 %v20377_v35  ;;  %v20397_v35 = vld [vmem:[#allocation3 + $0xa6c] ss:$16 sps:$4 sm:$0xff]  }
 0x4fc   : > { %14640 = vmatpush2.bf16.msra.mxu1 %v20374_v33  ;;  %14670 = vmatprep.subr.bf16.mxu0 %v20385_v5  ;;  %v22567_v33 = vpop.f32.mrf.mxu0  ;;  %v20395_v5 = vld [vmem:[#allocation3 + $0xa68] ss:$16 sps:$4 sm:$0xff]  }
 0x4fd   : > { %14641 = vmatprep.subr.bf16.mxu1 %v20382_v40  ;;  %23214 = vst [vmem:[#allocation83_spill] sm:$0xff] %v22567_v33  ;;  %v20392_v40 = vld [vmem:[#allocation3 + $0x988] ss:$16 sps:$4 sm:$0xff]   ;;  %v22575_v33 = vpop.f32.mrf.mxu1 }
 0x4fe   : > { %v22573_v10 = vpop.f32.mrf.mxu0  ;;  %23216 = vst [vmem:[#allocation85_spill] sm:$0xff] %v22575_v33  ;;  %v20413_v33 = vld [vmem:[#allocation3 + $0xa08] ss:$16 sps:$4 sm:$0xff]  }
 0x4ff   : > { %14671 = vmatpush1.bf16.msra.mxu0 %v20383_v45  ;;  %v20403_v45 = vld [vmem:[#allocation3 + $0xa4c] ss:$16 sps:$4 sm:$0xff]   ;;  %v22581_v61 = vpop.f32.mrf.mxu1 }
 0x500   : > { %14642 = vmatpush2.bf16.msra.mxu1 %v20380_v54  ;;  %14672 = vmatprep.subr.bf16.mxu0 %v20391_v8  ;;  %v20400_v54 = vld [vmem:[#allocation3 + $0x96c] ss:$16 sps:$4 sm:$0xff]   ;;  %v20401_v8 = vld [vmem:[#allocation3 + $0xa48] ss:$16 sps:$4 sm:$0xff]   ;;  %v22577_v32 = vpop.f32.mrf.mxu0 }
 0x501   : > { %14643 = vmatprep.subr.bf16.mxu1 %v20388_v29  ;;  %v20398_v29 = vld [vmem:[#allocation3 + $0x968] ss:$16 sps:$4 sm:$0xff]   ;;  %23217 = vst [vmem:[#allocation86_spill] sm:$0xff] %v22577_v32 }
 0x502   : > { %v22579_v21 = vpop.f32.mrf.mxu0 }
 0x503   : > { %14673 = vmatpush1.bf16.msra.mxu0 %v20389_v19  ;;  %v20409_v19 = vld [vmem:[#allocation3 + $0xa2c] ss:$16 sps:$4 sm:$0xff]  }
 0x504   : > { %14644 = vmatpush2.bf16.msra.mxu1 %v20386_v28  ;;  %14674 = vmatprep.subr.bf16.mxu0 %v20397_v35  ;;  %v20406_v28 = vld [vmem:[#allocation3 + $0x94c] ss:$16 sps:$4 sm:$0xff]   ;;  %v20407_v35 = vld [vmem:[#allocation3 + $0xa28] ss:$16 sps:$4 sm:$0xff]   ;;  %v22585_v32 = vpop.f32.mrf.mxu0 }
 0x505   : > { %14645 = vmatprep.subr.bf16.mxu1 %v20394_v46  ;;  %v20404_v46 = vld [vmem:[#allocation3 + $0x948] ss:$16 sps:$4 sm:$0xff]   ;;  %23218 = vst [vmem:[#allocation87_spill] sm:$0xff] %v22585_v32 }
 0x507   : > { %14675 = vmatpush1.bf16.msra.mxu0 %v20395_v5  ;;  %v20415_v5 = vld [vmem:[#allocation3 + $0xa0c] ss:$16 sps:$4 sm:$0xff]  }
 0x508   : > { %14646 = vmatpush2.bf16.msra.mxu1 %v20392_v40  ;;  %14676 = vmatprep.subr.bf16.mxu0 %v20403_v45  ;;  %v20412_v40 = vld [vmem:[#allocation3 + $0x92c] ss:$16 sps:$4 sm:$0xff]   ;;  %v20410_v45 = vld [vmem:[#allocation3 + $0x928] ss:$16 sps:$4 sm:$0xff]  }
 0x509   : > { %14647 = vmatprep.subr.bf16.mxu1 %v20400_v54  ;;  %v13802_v54 = vadd.f32 %v22513_v63, %v22419_v39  ;;  %v20416_v39 = vld [vmem:[#allocation3 + $0x908] ss:$16 sps:$4 sm:$0xff]  }
 0x50a   : > { %v20419_v63 = vld [vmem:[#allocation3 + $0xbe8] ss:$16 sps:$4 sm:$0xff]  }
 0x50b   : > { %14677 = vmatpush1.bf16.msra.mxu0 %v20401_v8  ;;  %v20421_v8 = vld [vmem:[#allocation3 + $0xbec] ss:$16 sps:$4 sm:$0xff]  }
 0x50c   : > { %14648 = vmatpush2.bf16.msra.mxu1 %v20398_v29  ;;  %14678 = vmatprep.subr.bf16.mxu0 %v20409_v19  ;;  %v20418_v29 = vld [vmem:[#allocation3 + $0x90c] ss:$16 sps:$4 sm:$0xff]   ;;  %v22588_v19 = vpop.f32.mrf.mxu1 }
 0x50d   : > { %14649 = vmatprep.subr.bf16.mxu1 %v20406_v28  ;;  %v13845_v28 = vadd.f32 %v22522_v20, %v13802_v54  ;;  %23219 = vst [vmem:[#allocation88_spill] sm:$0xff] %v22588_v19  ;;  %v13927_v20 = vadd.f32 %v22529_v62, %v13884_v57  ;;  %v20431_v62 = vld [vmem:[#allocation3 + $0xcc8] ss:$16 sps:$4 sm:$0xff]  }
 0x50f   : > { %14679 = vmatpush1.bf16.msra.mxu0 %v20407_v35  ;;  %v22594_v35 = vpop.f32.mrf.mxu0  ;;  %v13888_v32 = vadd.f32 %v22531_v2, %v13845_v28  ;;  %v13970_v19 = vadd.f32 %v22537_v18, %v13927_v20  ;;  %v20436_v28 = vld [vmem:[#allocation3 + $0xb8c] ss:$16 sps:$4 sm:$0xff]  }
 0x510   : > { %14650 = vmatpush2.bf16.msra.mxu1 %v20404_v46  ;;  %14680 = vmatprep.subr.bf16.mxu0 %v20415_v5  ;;  %v22592_v46 = vpop.f32.mrf.mxu1  ;;  %v20427_v5 = vld [vmem:[#allocation3 + $0xcec] ss:$16 sps:$4 sm:$0xff]  }
 0x511   : > { %14651 = vmatprep.subr.bf16.mxu1 %v20412_v40  ;;  %v20424_v40 = vld [vmem:[#allocation3 + $0xbcc] ss:$16 sps:$4 sm:$0xff]   ;;  %v13931_v54 = vadd.f32 %v22539_v42, %v13888_v32  ;;  %v14013_v42 = vadd.f32 %v22545_v12, %v13970_v19  ;;  %v20428_v32 = vld [vmem:[#allocation3 + $0xba8] ss:$16 sps:$4 sm:$0xff]  }
 0x512   : > { %v20434_v12 = vld [vmem:[#allocation3 + $0xb88] ss:$16 sps:$4 sm:$0xff]  }
 0x513   : > { %14681 = vmatpush1.bf16.msra.mxu0 %v20413_v33  ;;  %v22599_v33 = vpop.f32.mrf.mxu1  ;;  %v13974_v57 = vadd.f32 %v22547_v50, %v13931_v54  ;;  %v20437_v50 = vld [vmem:[#allocation3 + $0xca8] ss:$16 sps:$4 sm:$0xff]  }
 0x514   : > { %14652 = vmatpush2.bf16.msra.mxu1 %v20410_v45  ;;  %14682 = vmatprep.subr.bf16.mxu0 %v20421_v8  ;;  %v22601_v45 = vpop.f32.mrf.mxu0  ;;  %v20433_v8 = vld [vmem:[#allocation3 + $0xccc] ss:$16 sps:$4 sm:$0xff]  }
 0x515   : > { %14653 = vmatprep.subr.bf16.mxu1 %v20418_v29  ;;  %v20430_v29 = vld [vmem:[#allocation3 + $0xbac] ss:$16 sps:$4 sm:$0xff]   ;;  %v14231_v2 = vpop.f32.mrf.mxu1 }
 0x516   : > { %v22604_v9 = vpop.f32.mrf.mxu0 }
 0x517   : > { %14683 = vmatpush2.bf16.msra.mxu0 %v20419_v63  ;;  %v14017_v63 = vadd.f32 %v22556_v47, %v13974_v57  ;;  %v22614_v19 = vpop.f32.mrf.mxu1 }
 0x518   : > { %14654 = vmatpush2.bf16.msra.mxu1 %v20416_v39  ;;  %14684 = vmatprep.subr.bf16.mxu0 %v20424_v40  ;;  %v20439_v39 = vld [vmem:[#allocation3 + $0xcac] ss:$16 sps:$4 sm:$0xff]   ;;  %v22611_v18 = vpop.f32.mrf.mxu0 }
 0x519   : > { %14709 = vmatprep.subr.bf16.mxu1 %v20427_v5  ;;  %v20442_v40 = vld [vmem:[#allocation3 + $0xb6c] ss:$16 sps:$4 sm:$0xff]   ;;  %v14060_v20 = vadd.f32 %v22565_v13, %v14017_v63  ;;  %v14313_v54 = vpop.f32.mrf.mxu1 }
 0x51a   : > { %v20445_v5 = vld [vmem:[#allocation3 + $0xc8c] ss:$16 sps:$4 sm:$0xff]  }
 0x51b   : > { %14656 = vmatmul.mubr.bf16.vlgmr.msra.gmra.mxu1 %v22105_v58  ;;  %14685 = vmatpush2.bf16.msra.mxu0 %v20422_v36  ;;  %v14056_v58 = vadd.f32 %v22554_v6, %v14013_v42  ;;  %v14103_v36 = vadd.f32 %v22573_v10, %v14060_v20  ;;  %v20440_v6 = vld [vmem:[#allocation3 + $0xb68] ss:$16 sps:$4 sm:$0xff]   ;;  %v22620_v42 = vpop.f32.mrf.mxu1  ;;  %v20457_v63 = vld [vmem:[#allocation3 + $0xc4c] ss:$16 sps:$4 sm:$0xff]  }
 0x51c   : > { %14710 = vmatpush1.bf16.msra.mxu1 %v20425_v53  ;;  %14686 = vmatprep.subr.bf16.mxu0 %v20430_v29  ;;  %v20443_v53 = vld [vmem:[#allocation3 + $0xc88] ss:$16 sps:$4 sm:$0xff]   ;;  %v20448_v29 = vld [vmem:[#allocation3 + $0xb4c] ss:$16 sps:$4 sm:$0xff]  }
 0x51d   : > { %14711 = vmatprep.subr.bf16.mxu1 %v20433_v8  ;;  %14741 = vmatprep.mubr.bf16.mxu1 %v22110_v0  ;;  %v14099_v47 = vadd.f32 %v22563_v3, %v14056_v58  ;;  %v14274_v0 = vpop.f32.mrf.mxu0  ;;  %v20451_v8 = vld [vmem:[#allocation3 + $0xc6c] ss:$16 sps:$4 sm:$0xff]   ;;  %v14146_v13 = vadd.f32 %v22581_v61, %v14103_v36  ;;  %v20446_v10 = vld [vmem:[#allocation3 + $0xb48] ss:$16 sps:$4 sm:$0xff]  }
 0x51e   : > { %v20455_v61 = vld [vmem:[#allocation3 + $0xc48] ss:$16 sps:$4 sm:$0xff]  }
 0x51f   : > { %14687 = vmatpush2.bf16.msra.mxu0 %v20428_v32  ;;  %v14142_v57 = vadd.f32 %v22571_v4, %v14099_v47  ;;  %v22622_v32 = vpop.f32.mrf.mxu0  ;;  %v14189_v58 = vadd.f32 %v22594_v35, %v14146_v13  ;;  %v14317_v4 = vpop.f32.mrf.mxu1  ;;  %v20458_v35 = vld [vmem:[#allocation3 + $0xb08] ss:$16 sps:$4 sm:$0xff]  }
 0x520   : > { %14712 = vmatpush1.bf16.msra.mxu1 %v20431_v62  ;;  %14688 = vmatprep.subr.bf16.mxu0 %v20436_v28  ;;  %v20449_v62 = vld [vmem:[#allocation3 + $0xc68] ss:$16 sps:$4 sm:$0xff]  }
 0x521   : > { %14713 = vmatprep.subr.bf16.mxu1 %v20439_v39  ;;  %v14185_v3 = vadd.f32 %v22579_v21, %v14142_v57  ;;  %v14356_v28 = vpop.f32.mrf.mxu0  ;;  %v20454_v39 = vld [vmem:[#allocation3 + $0xb2c] ss:$16 sps:$4 sm:$0xff]   ;;  %v14232_v20 = vadd.f32 %v14231_v2, %v14189_v58  ;;  %v22631_v36 = vpop.f32.mrf.mxu1  ;;  %v20464_v2 = vld [vmem:[#allocation3 + $0xc08] ss:$16 sps:$4 sm:$0xff]  }
 0x522   : > { %v20460_v21 = vld [vmem:[#allocation3 + $0xb0c] ss:$16 sps:$4 sm:$0xff]  }
 0x523   : > { %14689 = vmatpush2.bf16.msra.mxu0 %v20434_v12  ;;  %v14228_v12 = vadd.f32 %v22592_v46, %v14185_v3  ;;  %v20461_v46 = vld [vmem:[#allocation3 + $0xc28] ss:$16 sps:$4 sm:$0xff]   ;;  %v20469_v57 = vld [vmem:[#allocation3 + $0xeec] ss:$16 sps:$4 sm:$0xff]  }
 0x524   : > { %14714 = vmatpush1.bf16.msra.mxu1 %v20437_v50  ;;  %14690 = vmatprep.subr.bf16.mxu0 %v20442_v40  ;;  %v20452_v50 = vld [vmem:[#allocation3 + $0xb28] ss:$16 sps:$4 sm:$0xff]   ;;  %v22628_v40 = vpop.f32.mrf.mxu0 }
 0x525   : > { %14715 = vmatprep.subr.bf16.mxu1 %v20445_v5  ;;  %v20463_v5 = vld [vmem:[#allocation3 + $0xc2c] ss:$16 sps:$4 sm:$0xff]   ;;  %v14271_v47 = vadd.f32 %v22604_v9, %v14228_v12  ;;  %v20467_v9 = vld [vmem:[#allocation3 + $0xee8] ss:$16 sps:$4 sm:$0xff]  }
 0x527   : > { %14691 = vmatpush2.bf16.msra.mxu0 %v20440_v6  ;;  %v14275_v6 = vadd.f32 %v14274_v0, %v14232_v20  ;;  %v14314_v13 = vadd.f32 %v14313_v54, %v14271_v47  ;;  %v20470_v54 = vld [vmem:[#allocation3 + $0xde8] ss:$16 sps:$4 sm:$0xff]  }
 0x528   : > { %14716 = vmatpush1.bf16.msra.mxu1 %v20443_v53  ;;  %14692 = vmatprep.subr.bf16.mxu0 %v20448_v29  ;;  %v14399_v53 = vpop.f32.mrf.mxu1  ;;  %v14360_v29 = vpop.f32.mrf.mxu0 }
 0x529   : > { %14717 = vmatprep.subr.bf16.mxu1 %v20451_v8  ;;  %v20466_v8 = vld [vmem:[#allocation3 + $0xc0c] ss:$16 sps:$4 sm:$0xff]   ;;  %v14318_v3 = vadd.f32 %v14317_v4, %v14275_v6 }
 0x52a   : > { %v22635_v0 = vpop.f32.mrf.mxu0 }
 0x52b   : > { %14693 = vmatpush2.bf16.msra.mxu0 %v20446_v10  ;;  %v14357_v10 = vadd.f32 %v14356_v28, %v14314_v13  ;;  %v14361_v58 = vadd.f32 %v14360_v29, %v14318_v3  ;;  %v20473_v28 = vld [vmem:[#allocation3 + $0xec8] ss:$16 sps:$4 sm:$0xff]   ;;  %v20487_v29 = vld [vmem:[#allocation3 + $0xe8c] ss:$16 sps:$4 sm:$0xff]  }
 0x52c   : > { %14718 = vmatpush1.bf16.msra.mxu1 %v20449_v62  ;;  %14694 = vmatprep.subr.bf16.mxu0 %v20454_v39  ;;  %v22633_v62 = vpop.f32.mrf.mxu1  ;;  %v20472_v39 = vld [vmem:[#allocation3 + $0xdec] ss:$16 sps:$4 sm:$0xff]   ;;  %v20482_v3 = vld [vmem:[#allocation3 + $0xda8] ss:$16 sps:$4 sm:$0xff]  }
 0x52d   : > { %14719 = vmatprep.subr.bf16.mxu1 %v20457_v63  ;;  %v20475_v63 = vld [vmem:[#allocation3 + $0xecc] ss:$16 sps:$4 sm:$0xff]  }
 0x52e   : > { %v14403_v4 = vpop.f32.mrf.mxu1 }
 0x52f   : > { %14695 = vmatpush2.bf16.msra.mxu0 %v20452_v50  ;;  %v14400_v50 = vadd.f32 %v14399_v53, %v14357_v10  ;;  %v14404_v20 = vadd.f32 %v14403_v4, %v14361_v58  ;;  %v20484_v53 = vld [vmem:[#allocation3 + $0xdac] ss:$16 sps:$4 sm:$0xff]   ;;  %v20485_v10 = vld [vmem:[#allocation3 + $0xe88] ss:$16 sps:$4 sm:$0xff]  }
 0x530   : > { %14720 = vmatpush1.bf16.msra.mxu1 %v20455_v61  ;;  %14696 = vmatprep.subr.bf16.mxu0 %v20460_v21  ;;  %v20478_v21 = vld [vmem:[#allocation3 + $0xdcc] ss:$16 sps:$4 sm:$0xff]   ;;  %v20500_v4 = vld [vmem:[#allocation3 + $0xd48] ss:$16 sps:$4 sm:$0xff]  }
 0x531   : > { %14721 = vmatprep.subr.bf16.mxu1 %v20463_v5  ;;  %v20481_v5 = vld [vmem:[#allocation3 + $0xeac] ss:$16 sps:$4 sm:$0xff]  }
 0x532   : > { %v20499_v58 = vld [vmem:[#allocation3 + $0xe4c] ss:$16 sps:$4 sm:$0xff]  }
 0x533   : > { %14697 = vmatpush2.bf16.msra.mxu0 %v20458_v35 }
 0x534   : > { %14722 = vmatpush1.bf16.msra.mxu1 %v20461_v46  ;;  %14752 = vmatprep.subr.bf16.mxu0 %v20469_v57  ;;  %v20479_v46 = vld [vmem:[#allocation3 + $0xea8] ss:$16 sps:$4 sm:$0xff]  }
 0x535   : > { %14723 = vmatprep.subr.bf16.mxu1 %v20466_v8 }
 0x536   : > { %v14442_v12 = vpop.f32.mrf.mxu0  ;;  %14699 = vmatmul.mubr.bf16.vlgmr.msra.gmra.mxu0 %v22107_v59  ;;  %v20476_v59 = vld [vmem:[#allocation3 + $0xdc8] ss:$16 sps:$4 sm:$0xff]  }
 0x537   : > { %14753 = vmatpush1.bf16.msra.mxu0 %v20467_v9  ;;  %v14443_v47 = vadd.f32 %v14442_v12, %v14400_v50  ;;  %14784 = vmatprep.mubr.bf16.mxu0 %v22112_v1  ;;  %v20490_v1 = vld [vmem:[#allocation3 + $0xd8c] ss:$16 sps:$4 sm:$0xff]   ;;  %v20488_v9 = vld [vmem:[#allocation3 + $0xd88] ss:$16 sps:$4 sm:$0xff]  }
 0x538   : > { %14724 = vmatpush1.bf16.msra.mxu1 %v20464_v2  ;;  %v22638_v61 = vpop.f32.mrf.mxu0  ;;  %14754 = vmatprep.subr.bf16.mxu0 %v20475_v63  ;;  %v20493_v2 = vld [vmem:[#allocation3 + $0xe6c] ss:$16 sps:$4 sm:$0xff]   ;;  %v20494_v12 = vld [vmem:[#allocation3 + $0xd68] ss:$16 sps:$4 sm:$0xff]  }
 0x539   : > { %14725 = vmatprep.subr.bf16.mxu1 %v20472_v39  ;;  %v15870_v8 = vmax.f32 %v14443_v47, 0.0  ;;  %v20491_v39 = vld [vmem:[#allocation3 + $0xe68] ss:$16 sps:$4 sm:$0xff]   ;;  %v20496_v63 = vld [vmem:[#allocation3 + $0xd6c] ss:$16 sps:$4 sm:$0xff]  }
 0x53a   : > { %v14446_v6 = vpop.f32.mrf.mxu0  ;;  %v20497_v50 = vld [vmem:[#allocation3 + $0xe48] ss:$16 sps:$4 sm:$0xff]  }
 0x53b   : > { %v14447_v35 = vadd.f32 %v14446_v6, %v14404_v20  ;;  %14755 = vmatpush1.bf16.msra.mxu0 %v20473_v28  ;;  %v20505_v28 = vld [vmem:[#allocation3 + $0xe2c] ss:$16 sps:$4 sm:$0xff]   ;;  %v20506_v47 = vld [vmem:[#allocation3 + $0xd28] ss:$16 sps:$4 sm:$0xff]  }
 0x53c   : > { %14726 = vmatpush2.bf16.msra.mxu1 %v20470_v54  ;;  %14756 = vmatprep.subr.bf16.mxu0 %v20481_v5  ;;  %v20502_v54 = vld [vmem:[#allocation3 + $0xd4c] ss:$16 sps:$4 sm:$0xff]   ;;  %v20509_v6 = vld [vmem:[#allocation3 + $0xe08] ss:$16 sps:$4 sm:$0xff]  }
 0x53d   : > { %14727 = vmatprep.subr.bf16.mxu1 %v20478_v21  ;;  %v15874_v57 = vmax.f32 %v14447_v35, 0.0  ;;  %v20503_v21 = vld [vmem:[#allocation3 + $0xe28] ss:$16 sps:$4 sm:$0xff]   ;;  %v20508_v5 = vld [vmem:[#allocation3 + $0xd2c] ss:$16 sps:$4 sm:$0xff]  }
 0x53e   : > { %v20511_v20 = vld [vmem:[#allocation3 + $0xe0c] ss:$16 sps:$4 sm:$0xff]  }
 0x53f   : > { %v22641_v13 = vpack.c.bf16 %v15874_v57, %v15870_v8  ;;  %14757 = vmatpush1.bf16.msra.mxu0 %v20479_v46  ;;  %v20514_v35 = vld [vmem:[#allocation3 + $0xd0c] ss:$16 sps:$4 sm:$0xff]   ;;  %v20512_v46 = vld [vmem:[#allocation3 + $0xd08] ss:$16 sps:$4 sm:$0xff]  }
 0x540   : > { %14728 = vmatpush2.bf16.msra.mxu1 %v20476_v59  ;;  %14758 = vmatprep.subr.bf16.mxu0 %v20487_v29  ;;  %v20517_v59 = vld [vmem:[#allocation3 + $0xfec] ss:$16 sps:$4 sm:$0xff]   ;;  %v20518_v57 = vld [vmem:[#allocation3 + $0xfc8] ss:$16 sps:$4 sm:$0xff]  }
 0x541   : > { %14729 = vmatprep.subr.bf16.mxu1 %v20484_v53  ;;  %v20515_v53 = vld [vmem:[#allocation3 + $0xfe8] ss:$16 sps:$4 sm:$0xff]   ;;  %v20520_v29 = vld [vmem:[#allocation3 + $0xfcc] ss:$16 sps:$4 sm:$0xff]  }
 0x542   : > { %v20523_v8 = vld [vmem:[#allocation3 + $0x10ec] ss:$16 sps:$4 sm:$0xff]  }
 0x543   : > { %14759 = vmatpush1.bf16.msra.mxu0 %v20485_v10  ;;  %v20526_v10 = vld [vmem:[#allocation3 + $0xfac] ss:$16 sps:$4 sm:$0xff]  }
 0x544   : > { %14730 = vmatpush2.bf16.msra.mxu1 %v20482_v3  ;;  %14760 = vmatprep.subr.bf16.mxu0 %v20493_v2  ;;  %v20521_v3 = vld [vmem:[#allocation3 + $0x10e8] ss:$16 sps:$4 sm:$0xff]  }
 0x545   : > { %14731 = vmatprep.subr.bf16.mxu1 %v20490_v1  ;;  %v20529_v1 = vld [vmem:[#allocation3 + $0x10cc] ss:$16 sps:$4 sm:$0xff]   ;;  %v20524_v2 = vld [vmem:[#allocation3 + $0xfa8] ss:$16 sps:$4 sm:$0xff]  }
 0x547   : > { %14761 = vmatpush1.bf16.msra.mxu0 %v20491_v39  ;;  %v20532_v39 = vld [vmem:[#allocation3 + $0xf8c] ss:$16 sps:$4 sm:$0xff]  }
 0x548   : > { %14732 = vmatpush2.bf16.msra.mxu1 %v20488_v9  ;;  %14762 = vmatprep.subr.bf16.mxu0 %v20499_v58  ;;  %v20527_v9 = vld [vmem:[#allocation3 + $0x10c8] ss:$16 sps:$4 sm:$0xff]  }
 0x549   : > { %14733 = vmatprep.subr.bf16.mxu1 %v20496_v63  ;;  %v20535_v63 = vld [vmem:[#allocation3 + $0x10ac] ss:$16 sps:$4 sm:$0xff]   ;;  %v20530_v58 = vld [vmem:[#allocation3 + $0xf88] ss:$16 sps:$4 sm:$0xff]  }
 0x54b   : > { %14763 = vmatpush1.bf16.msra.mxu0 %v20497_v50  ;;  %v20538_v50 = vld [vmem:[#allocation3 + $0xf6c] ss:$16 sps:$4 sm:$0xff]  }
 0x54c   : > { %14734 = vmatpush2.bf16.msra.mxu1 %v20494_v12  ;;  %14764 = vmatprep.subr.bf16.mxu0 %v20505_v28  ;;  %v20533_v12 = vld [vmem:[#allocation3 + $0x10a8] ss:$16 sps:$4 sm:$0xff]  }
 0x54d   : > { %14735 = vmatprep.subr.bf16.mxu1 %v20502_v54  ;;  %v20541_v54 = vld [vmem:[#allocation3 + $0x108c] ss:$16 sps:$4 sm:$0xff]   ;;  %v20539_v28 = vld [vmem:[#allocation3 + $0x1088] ss:$16 sps:$4 sm:$0xff]  }
 0x54f   : > { %14765 = vmatpush1.bf16.msra.mxu0 %v20503_v21  ;;  %v20547_v21 = vld [vmem:[#allocation3 + $0x106c] ss:$16 sps:$4 sm:$0xff]  }
 0x550   : > { %14736 = vmatpush2.bf16.msra.mxu1 %v20500_v4  ;;  %14766 = vmatprep.subr.bf16.mxu0 %v20511_v20  ;;  %v20544_v4 = vld [vmem:[#allocation3 + $0xf4c] ss:$16 sps:$4 sm:$0xff]  }
 0x551   : > { %14737 = vmatprep.subr.bf16.mxu1 %v20508_v5  ;;  %v20542_v5 = vld [vmem:[#allocation3 + $0xf48] ss:$16 sps:$4 sm:$0xff]   ;;  %v20550_v20 = vld [vmem:[#allocation3 + $0xf2c] ss:$16 sps:$4 sm:$0xff]  }
 0x553   : > { %14767 = vmatpush1.bf16.msra.mxu0 %v20509_v6  ;;  %v20548_v6 = vld [vmem:[#allocation3 + $0xf28] ss:$16 sps:$4 sm:$0xff]  }
 0x554   : > { %14738 = vmatpush2.bf16.msra.mxu1 %v20506_v47  ;;  %14768 = vmatprep.subr.bf16.mxu0 %v20517_v59  ;;  %v20553_v47 = vld [vmem:[#allocation3 + $0x104c] ss:$16 sps:$4 sm:$0xff]  }
 0x555   : > { %14739 = vmatprep.subr.bf16.mxu1 %v20514_v35  ;;  %v20551_v35 = vld [vmem:[#allocation3 + $0x1048] ss:$16 sps:$4 sm:$0xff]   ;;  %v20556_v59 = vld [vmem:[#allocation3 + $0xf0c] ss:$16 sps:$4 sm:$0xff]  }
 0x557   : > { %14769 = vmatpush2.bf16.msra.mxu0 %v20515_v53  ;;  %v2635_v53 = vsub.s32 2, %v22118_v7 }
 0x558   : > { %14740 = vmatpush2.bf16.msra.mxu1 %v20512_v46  ;;  %14770 = vmatprep.subr.bf16.mxu0 %v20520_v29  ;;  %v20559_v46 = vld [vmem:[#allocation3 + $0x102c] ss:$16 sps:$4 sm:$0xff]   ;;  %v22646_v29 = vpop.f32.mrf.mxu1 }
 0x559   : > { %14795 = vmatprep.subr.bf16.mxu1 %v20523_v8  ;;  %v2639_v8 = vsub.s32 3, %v22118_v7 }
 0x55b   : > { %14742 = vmatmul.mubr.bf16.vlgmr.msra.gmra.mxu1 %v22129_v27  ;;  %14771 = vmatpush2.bf16.msra.mxu0 %v20518_v57  ;;  %v20536_v27 = vld [vmem:[#allocation3 + $0xf68] ss:$16 sps:$4 sm:$0xff]  }
 0x55c   : > { %14796 = vmatpush1.bf16.msra.mxu1 %v20521_v3  ;;  %14772 = vmatprep.subr.bf16.mxu0 %v20526_v10  ;;  %v20554_v57 = vld [vmem:[#allocation3 + $0xf08] ss:$16 sps:$4 sm:$0xff]   ;;  %v14485_v10 = vpop.f32.mrf.mxu1 }
 0x55d   : > { %14797 = vmatprep.subr.bf16.mxu1 %v20529_v1  ;;  %14827 = vmatprep.mubr.bf16.mxu1 %v22136_v37  ;;  %v20545_v37 = vld [vmem:[#allocation3 + $0x1068] ss:$16 sps:$4 sm:$0xff]   ;;  %v20562_v1 = vld [vmem:[#allocation3 + $0x100c] ss:$16 sps:$4 sm:$0xff]  }
 0x55e   : > { %v20557_v3 = vld [vmem:[#allocation3 + $0x1028] ss:$16 sps:$4 sm:$0xff]   ;;  %v14487_v7 = vpop.f32.mrf.mxu1 }
 0x55f   : > { %14773 = vmatpush2.bf16.msra.mxu0 %v20524_v2  ;;  %v20565_v2 = vld [vmem:[#allocation3 + $0x12ec] ss:$16 sps:$4 sm:$0xff]  }
 0x560   : > { %14798 = vmatpush1.bf16.msra.mxu1 %v20527_v9  ;;  %14774 = vmatprep.subr.bf16.mxu0 %v20532_v39  ;;  %v21743_v9 = vld [vmem:[#allocation5] sm:$0xf] }
 0x561   : > { %14799 = vmatprep.subr.bf16.mxu1 %v20535_v63  ;;  %v22649_v39 = vrot.slane %v21743_v9, %v2635_v53  ;;  %v22651_v63 = vrot.slane %v21743_v9, %v2639_v8  ;;  %v20580_v53 = vld [vmem:[#allocation3 + $0x11ac] ss:$16 sps:$4 sm:$0xff]  }
 0x562   : > { %v20583_v8 = vld [vmem:[#allocation3 + $0x128c] ss:$16 sps:$4 sm:$0xff]  }
 0x563   : > { %14775 = vmatpush2.bf16.msra.mxu0 %v20530_v58  ;;  %v20560_v58 = vld [vmem:[#allocation3 + $0x1008] ss:$16 sps:$4 sm:$0xff]   ;;  %v20592_v9 = vld [vmem:[#allocation3 + $0x116c] ss:$16 sps:$4 sm:$0xff]  }
 0x564   : > { %14800 = vmatpush1.bf16.msra.mxu1 %v20533_v12  ;;  %14776 = vmatprep.subr.bf16.mxu0 %v20538_v50  ;;  %v20563_v12 = vld [vmem:[#allocation3 + $0x12e8] ss:$16 sps:$4 sm:$0xff]   ;;  %v22653_v50 = vpop.f32.mrf.mxu0 }
 0x565   : > { %14801 = vmatprep.subr.bf16.mxu1 %v20541_v54  ;;  %v20568_v54 = vld [vmem:[#allocation3 + $0x11ec] ss:$16 sps:$4 sm:$0xff]  }
 0x567   : > { %14777 = vmatpush2.bf16.msra.mxu0 %v20536_v27  ;;  %v20571_v27 = vld [vmem:[#allocation3 + $0x12cc] ss:$16 sps:$4 sm:$0xff]  }
 0x568   : > { %14802 = vmatpush1.bf16.msra.mxu1 %v20539_v28  ;;  %14778 = vmatprep.subr.bf16.mxu0 %v20544_v4  ;;  %v14486_v28 = vadd.f32 %v14485_v10, %v22649_v39  ;;  %v20586_v10 = vld [vmem:[#allocation3 + $0x118c] ss:$16 sps:$4 sm:$0xff]  }
 0x569   : > { %14803 = vmatprep.subr.bf16.mxu1 %v20547_v21  ;;  %v14488_v21 = vadd.f32 %v14487_v7, %v22651_v63  ;;  %v20593_v7 = vld [vmem:[#allocation3 + $0x1248] ss:$16 sps:$4 sm:$0xff]  }
 0x56b   : > { %14779 = vmatpush2.bf16.msra.mxu0 %v20542_v5 }
 0x56c   : > { %14804 = vmatpush1.bf16.msra.mxu1 %v20545_v37  ;;  %14780 = vmatprep.subr.bf16.mxu0 %v20550_v20  ;;  %v20566_v37 = vld [vmem:[#allocation3 + $0x11e8] ss:$16 sps:$4 sm:$0xff]  }
 0x56d   : > { %14805 = vmatprep.subr.bf16.mxu1 %v20553_v47  ;;  %v20569_v20 = vld [vmem:[#allocation3 + $0x12c8] ss:$16 sps:$4 sm:$0xff]  }
 0x56f   : > { %14781 = vmatpush2.bf16.msra.mxu0 %v20548_v6  ;;  %v20574_v6 = vld [vmem:[#allocation3 + $0x11cc] ss:$16 sps:$4 sm:$0xff]  }
 0x570   : > { %14806 = vmatpush1.bf16.msra.mxu1 %v20551_v35  ;;  %14782 = vmatprep.subr.bf16.mxu0 %v20556_v59  ;;  %v20577_v35 = vld [vmem:[#allocation3 + $0x12ac] ss:$16 sps:$4 sm:$0xff]  }
 0x571   : > { %14807 = vmatprep.subr.bf16.mxu1 %v20559_v46  ;;  %v20575_v46 = vld [vmem:[#allocation3 + $0x12a8] ss:$16 sps:$4 sm:$0xff]  }
 0x573   : > { %14783 = vmatpush2.bf16.msra.mxu0 %v20554_v57  ;;  %v20578_v57 = vld [vmem:[#allocation3 + $0x11a8] ss:$16 sps:$4 sm:$0xff]  }
 0x574   : > { %14808 = vmatpush1.bf16.msra.mxu1 %v20557_v3  ;;  %14838 = vmatprep.subr.bf16.mxu0 %v20565_v2  ;;  %v20581_v3 = vld [vmem:[#allocation3 + $0x1288] ss:$16 sps:$4 sm:$0xff]  }
 0x575   : > { %14809 = vmatprep.subr.bf16.mxu1 %v20562_v1  ;;  %v20589_v1 = vld [vmem:[#allocation3 + $0x126c] ss:$16 sps:$4 sm:$0xff]   ;;  %v20584_v2 = vld [vmem:[#allocation3 + $0x1188] ss:$16 sps:$4 sm:$0xff]  }
 0x576   : > { %v14528_v4 = vpop.f32.mrf.mxu0  ;;  %14785 = vmatmul.mubr.bf16.vlgmr.msra.gmra.mxu0 %v22131_v30  ;;  %v20572_v30 = vld [vmem:[#allocation3 + $0x11c8] ss:$16 sps:$4 sm:$0xff]  }
 0x577   : > { %v22658_v5 = vadd.f32 %v14528_v4, %v14486_v28  ;;  %14839 = vmatpush1.bf16.msra.mxu0 %v20563_v12  ;;  %14870 = vmatprep.mubr.bf16.mxu0 %v22138_v38  ;;  %v20587_v38 = vld [vmem:[#allocation3 + $0x1268] ss:$16 sps:$4 sm:$0xff]  }
 0x578   : > { %14810 = vmatpush1.bf16.msra.mxu1 %v20560_v58  ;;  %v14530_v47 = vpop.f32.mrf.mxu0  ;;  %14840 = vmatprep.subr.bf16.mxu0 %v20571_v27  ;;  %v20595_v58 = vld [vmem:[#allocation3 + $0x124c] ss:$16 sps:$4 sm:$0xff]   ;;  %v20590_v12 = vld [vmem:[#allocation3 + $0x1168] ss:$16 sps:$4 sm:$0xff]  }
 0x579   : > { %14811 = vmatprep.subr.bf16.mxu1 %v20568_v54  ;;  %v22660_v59 = vadd.f32 %v14530_v47, %v14488_v21  ;;  %v20598_v54 = vld [vmem:[#allocation3 + $0x114c] ss:$16 sps:$4 sm:$0xff]   ;;  %v20596_v28 = vld [vmem:[#allocation3 + $0x1148] ss:$16 sps:$4 sm:$0xff]  }
 0x57a   : > { %v20601_v27 = vld [vmem:[#allocation3 + $0x122c] ss:$16 sps:$4 sm:$0xff]   ;;  %v20599_v4 = vld [vmem:[#allocation3 + $0x1228] ss:$16 sps:$4 sm:$0xff]  }
 0x57b   : > { %14841 = vmatpush1.bf16.msra.mxu0 %v20569_v20  ;;  %v20604_v21 = vld [vmem:[#allocation3 + $0x112c] ss:$16 sps:$4 sm:$0xff]   ;;  %v20602_v20 = vld [vmem:[#allocation3 + $0x1128] ss:$16 sps:$4 sm:$0xff]  }
 0x57c   : > { %14812 = vmatpush2.bf16.msra.mxu1 %v20566_v37  ;;  %14842 = vmatprep.subr.bf16.mxu0 %v20577_v35  ;;  %v20607_v37 = vld [vmem:[#allocation3 + $0x120c] ss:$16 sps:$4 sm:$0xff]   ;;  %v20605_v47 = vld [vmem:[#allocation3 + $0x1208] ss:$16 sps:$4 sm:$0xff]  }
 0x57d   : > { %14813 = vmatprep.subr.bf16.mxu1 %v20574_v6  ;;  %v20610_v6 = vld [vmem:[#allocation3 + $0x110c] ss:$16 sps:$4 sm:$0xff]  }
 0x57e   : > { %v20613_v35 = vld [vmem:[#allocation3 + $0x13ec] ss:$16 sps:$4 sm:$0xff]  }
 0x57f   : > { %14843 = vmatpush1.bf16.msra.mxu0 %v20575_v46  ;;  %v20611_v46 = vld [vmem:[#allocation3 + $0x13e8] ss:$16 sps:$4 sm:$0xff]  }
 0x580   : > { %14814 = vmatpush2.bf16.msra.mxu1 %v20572_v30  ;;  %14844 = vmatprep.subr.bf16.mxu0 %v20583_v8  ;;  %v20608_v30 = vld [vmem:[#allocation3 + $0x1108] ss:$16 sps:$4 sm:$0xff]   ;;  %v20616_v8 = vld [vmem:[#allocation3 + $0x13cc] ss:$16 sps:$4 sm:$0xff]  }
 0x581   : > { %14815 = vmatprep.subr.bf16.mxu1 %v20580_v53  ;;  %v22663_v53 = vpop.f32.mrf.mxu1 }
 0x583   : > { %14845 = vmatpush1.bf16.msra.mxu0 %v20581_v3  ;;  %v20614_v3 = vld [vmem:[#allocation3 + $0x13c8] ss:$16 sps:$4 sm:$0xff]  }
 0x584   : > { %14816 = vmatpush2.bf16.msra.mxu1 %v20578_v57  ;;  %14846 = vmatprep.subr.bf16.mxu0 %v20589_v1  ;;  %v20619_v57 = vld [vmem:[#allocation3 + $0x14ec] ss:$16 sps:$4 sm:$0xff]   ;;  %v22665_v1 = vpop.f32.mrf.mxu1 }
 0x585   : > { %14817 = vmatprep.subr.bf16.mxu1 %v20586_v10  ;;  %v20617_v10 = vld [vmem:[#allocation3 + $0x14e8] ss:$16 sps:$4 sm:$0xff]  }
 0x587   : > { %14847 = vmatpush1.bf16.msra.mxu0 %v20587_v38  ;;  %v20625_v38 = vld [vmem:[#allocation3 + $0x14cc] ss:$16 sps:$4 sm:$0xff]  }
 0x588   : > { %14818 = vmatpush2.bf16.msra.mxu1 %v20584_v2  ;;  %14848 = vmatprep.subr.bf16.mxu0 %v20595_v58  ;;  %v20622_v2 = vld [vmem:[#allocation3 + $0x13ac] ss:$16 sps:$4 sm:$0xff]  }
 0x589   : > { %14819 = vmatprep.subr.bf16.mxu1 %v20592_v9 }
 0x58b   : > { %14849 = vmatpush1.bf16.msra.mxu0 %v20593_v7  ;;  %v20623_v7 = vld [vmem:[#allocation3 + $0x14c8] ss:$16 sps:$4 sm:$0xff]  }
 0x58c   : > { %14820 = vmatpush2.bf16.msra.mxu1 %v20590_v12  ;;  %14850 = vmatprep.subr.bf16.mxu0 %v20601_v27  ;;  %v20620_v12 = vld [vmem:[#allocation3 + $0x13a8] ss:$16 sps:$4 sm:$0xff]   ;;  %v20628_v27 = vld [vmem:[#allocation3 + $0x138c] ss:$16 sps:$4 sm:$0xff]  }
 0x58d   : > { %14821 = vmatprep.subr.bf16.mxu1 %v20598_v54 }
 0x58f   : > { %14851 = vmatpush1.bf16.msra.mxu0 %v20599_v4 }
 0x590   : > { %14822 = vmatpush2.bf16.msra.mxu1 %v20596_v28  ;;  %14852 = vmatprep.subr.bf16.mxu0 %v20607_v37  ;;  %v20631_v28 = vld [vmem:[#allocation3 + $0x14ac] ss:$16 sps:$4 sm:$0xff]  }
 0x591   : > { %14823 = vmatprep.subr.bf16.mxu1 %v20604_v21  ;;  %v20629_v21 = vld [vmem:[#allocation3 + $0x14a8] ss:$16 sps:$4 sm:$0xff]   ;;  %v20637_v37 = vld [vmem:[#allocation3 + $0x148c] ss:$16 sps:$4 sm:$0xff]  }
 0x593   : > { %14853 = vmatpush1.bf16.msra.mxu0 %v20605_v47  ;;  %v20635_v47 = vld [vmem:[#allocation3 + $0x1488] ss:$16 sps:$4 sm:$0xff]  }
 0x594   : > { %14824 = vmatpush2.bf16.msra.mxu1 %v20602_v20  ;;  %14854 = vmatprep.subr.bf16.mxu0 %v20613_v35  ;;  %v20632_v20 = vld [vmem:[#allocation3 + $0x1368] ss:$16 sps:$4 sm:$0xff]   ;;  %v20643_v35 = vld [vmem:[#allocation3 + $0x146c] ss:$16 sps:$4 sm:$0xff]  }
 0x595   : > { %14825 = vmatprep.subr.bf16.mxu1 %v20610_v6  ;;  %v20640_v6 = vld [vmem:[#allocation3 + $0x134c] ss:$16 sps:$4 sm:$0xff]  }
 0x597   : > { %14855 = vmatpush2.bf16.msra.mxu0 %v20611_v46  ;;  %v20649_v46 = vld [vmem:[#allocation3 + $0x144c] ss:$16 sps:$4 sm:$0xff]  }
 0x598   : > { %14826 = vmatpush2.bf16.msra.mxu1 %v20608_v30  ;;  %14856 = vmatprep.subr.bf16.mxu0 %v20616_v8  ;;  %v20646_v30 = vld [vmem:[#allocation3 + $0x132c] ss:$16 sps:$4 sm:$0xff]   ;;  %v20644_v8 = vld [vmem:[#allocation3 + $0x1328] ss:$16 sps:$4 sm:$0xff]  }
 0x599   : > { %14881 = vmatprep.subr.bf16.mxu1 %v20619_v57  ;;  %v20647_v57 = vld [vmem:[#allocation3 + $0x1448] ss:$16 sps:$4 sm:$0xff]  }
 0x59b   : > { %v14571_v9 = vpop.f32.mrf.mxu1  ;;  %14828 = vmatmul.mubr.bf16.vlgmr.msra.gmra.mxu1 %v22156_v24  ;;  %14857 = vmatpush2.bf16.msra.mxu0 %v20614_v3  ;;  %v20626_v24 = vld [vmem:[#allocation3 + $0x1388] ss:$16 sps:$4 sm:$0xff]   ;;  %v20652_v3 = vld [vmem:[#allocation3 + $0x130c] ss:$16 sps:$4 sm:$0xff]  }
 0x59c   : > { %v22669_v58 = vadd.f32 %v14571_v9, %v22658_v5  ;;  %14882 = vmatpush1.bf16.msra.mxu1 %v20617_v10  ;;  %14858 = vmatprep.subr.bf16.mxu0 %v20622_v2  ;;  %v20634_v5 = vld [vmem:[#allocation3 + $0x136c] ss:$16 sps:$4 sm:$0xff]   ;;  %v20650_v2 = vld [vmem:[#allocation3 + $0x1308] ss:$16 sps:$4 sm:$0xff]  }
 0x59d   : > { %v14573_v54 = vpop.f32.mrf.mxu1  ;;  %14883 = vmatprep.subr.bf16.mxu1 %v20625_v38  ;;  %14913 = vmatprep.mubr.bf16.mxu1 %v22167_v48  ;;  %v20641_v48 = vld [vmem:[#allocation3 + $0x1468] ss:$16 sps:$4 sm:$0xff]   ;;  %v20655_v10 = vld [vmem:[#allocation3 + $0x142c] ss:$16 sps:$4 sm:$0xff]  }
 0x59e   : > { %v22672_v4 = vadd.f32 %v14573_v54, %v22660_v59  ;;  %v20638_v59 = vld [vmem:[#allocation3 + $0x1348] ss:$16 sps:$4 sm:$0xff]   ;;  %v20658_v9 = vld [vmem:[#allocation3 + $0x140c] ss:$16 sps:$4 sm:$0xff]  }
 0x59f   : > { %14859 = vmatpush2.bf16.msra.mxu0 %v20620_v12  ;;  %v20653_v38 = vld [vmem:[#allocation3 + $0x1428] ss:$16 sps:$4 sm:$0xff]   ;;  %v20661_v12 = vld [vmem:[#allocation3 + $0x16ec] ss:$16 sps:$4 sm:$0xff]  }
 0x5a0   : > { %14884 = vmatpush1.bf16.msra.mxu1 %v20623_v7  ;;  %14860 = vmatprep.subr.bf16.mxu0 %v20628_v27  ;;  %v20656_v7 = vld [vmem:[#allocation3 + $0x1408] ss:$16 sps:$4 sm:$0xff]   ;;  %v20664_v27 = vld [vmem:[#allocation3 + $0x15ec] ss:$16 sps:$4 sm:$0xff]  }
 0x5a1   : > { %14885 = vmatprep.subr.bf16.mxu1 %v20631_v28  ;;  %v20659_v54 = vld [vmem:[#allocation3 + $0x16e8] ss:$16 sps:$4 sm:$0xff]   ;;  %v20667_v28 = vld [vmem:[#allocation3 + $0x16cc] ss:$16 sps:$4 sm:$0xff]  }
 0x5a3   : > { %14861 = vmatpush2.bf16.msra.mxu0 %v20626_v24  ;;  %v20662_v24 = vld [vmem:[#allocation3 + $0x15e8] ss:$16 sps:$4 sm:$0xff]  }
 0x5a4   : > { %14886 = vmatpush1.bf16.msra.mxu1 %v20629_v21  ;;  %14862 = vmatprep.subr.bf16.mxu0 %v20634_v5  ;;  %v20665_v21 = vld [vmem:[#allocation3 + $0x16c8] ss:$16 sps:$4 sm:$0xff]   ;;  %v20670_v5 = vld [vmem:[#allocation3 + $0x15cc] ss:$16 sps:$4 sm:$0xff]  }
 0x5a5   : > { %14887 = vmatprep.subr.bf16.mxu1 %v20637_v37  ;;  %v20673_v37 = vld [vmem:[#allocation3 + $0x16ac] ss:$16 sps:$4 sm:$0xff]  }
 0x5a7   : > { %14863 = vmatpush2.bf16.msra.mxu0 %v20632_v20  ;;  %v20668_v20 = vld [vmem:[#allocation3 + $0x15c8] ss:$16 sps:$4 sm:$0xff]  }
 0x5a8   : > { %14888 = vmatpush1.bf16.msra.mxu1 %v20635_v47  ;;  %14864 = vmatprep.subr.bf16.mxu0 %v20640_v6  ;;  %v20671_v47 = vld [vmem:[#allocation3 + $0x16a8] ss:$16 sps:$4 sm:$0xff]   ;;  %v20676_v6 = vld [vmem:[#allocation3 + $0x15ac] ss:$16 sps:$4 sm:$0xff]  }
 0x5a9   : > { %14889 = vmatprep.subr.bf16.mxu1 %v20643_v35  ;;  %v20679_v35 = vld [vmem:[#allocation3 + $0x168c] ss:$16 sps:$4 sm:$0xff]  }
 0x5ab   : > { %14865 = vmatpush2.bf16.msra.mxu0 %v20638_v59  ;;  %v20677_v59 = vld [vmem:[#allocation3 + $0x1688] ss:$16 sps:$4 sm:$0xff]  }
 0x5ac   : > { %14890 = vmatpush1.bf16.msra.mxu1 %v20641_v48  ;;  %14866 = vmatprep.subr.bf16.mxu0 %v20646_v30  ;;  %v20682_v48 = vld [vmem:[#allocation3 + $0x158c] ss:$16 sps:$4 sm:$0xff]  }
 0x5ad   : > { %14891 = vmatprep.subr.bf16.mxu1 %v20649_v46  ;;  %v20685_v30 = vld [vmem:[#allocation3 + $0x166c] ss:$16 sps:$4 sm:$0xff]   ;;  %v20680_v46 = vld [vmem:[#allocation3 + $0x1588] ss:$16 sps:$4 sm:$0xff]  }
 0x5af   : > { %14867 = vmatpush2.bf16.msra.mxu0 %v20644_v8  ;;  %v20688_v8 = vld [vmem:[#allocation3 + $0x156c] ss:$16 sps:$4 sm:$0xff]  }
 0x5b0   : > { %14892 = vmatpush1.bf16.msra.mxu1 %v20647_v57  ;;  %14868 = vmatprep.subr.bf16.mxu0 %v20652_v3  ;;  %v20691_v57 = vld [vmem:[#allocation3 + $0x164c] ss:$16 sps:$4 sm:$0xff]   ;;  %v20686_v3 = vld [vmem:[#allocation3 + $0x1568] ss:$16 sps:$4 sm:$0xff]  }
 0x5b1   : > { %14893 = vmatprep.subr.bf16.mxu1 %v20655_v10  ;;  %v20689_v10 = vld [vmem:[#allocation3 + $0x1648] ss:$16 sps:$4 sm:$0xff]  }
 0x5b3   : > { %14869 = vmatpush2.bf16.msra.mxu0 %v20650_v2  ;;  %v20694_v2 = vld [vmem:[#allocation3 + $0x154c] ss:$16 sps:$4 sm:$0xff]  }
 0x5b4   : > { %14894 = vmatpush1.bf16.msra.mxu1 %v20653_v38  ;;  %14924 = vmatprep.subr.bf16.mxu0 %v20661_v12  ;;  %v20697_v38 = vld [vmem:[#allocation3 + $0x162c] ss:$16 sps:$4 sm:$0xff]   ;;  %v20695_v12 = vld [vmem:[#allocation3 + $0x1628] ss:$16 sps:$4 sm:$0xff]  }
 0x5b5   : > { %14895 = vmatprep.subr.bf16.mxu1 %v20658_v9  ;;  %v20692_v9 = vld [vmem:[#allocation3 + $0x1548] ss:$16 sps:$4 sm:$0xff]  }
 0x5b6   : > { %14871 = vmatmul.mubr.bf16.vlgmr.msra.gmra.mxu0 %v22158_v25  ;;  %v20674_v25 = vld [vmem:[#allocation3 + $0x15a8] ss:$16 sps:$4 sm:$0xff]  }
 0x5b7   : > { %14925 = vmatpush1.bf16.msra.mxu0 %v20659_v54  ;;  %14956 = vmatprep.mubr.bf16.mxu0 %v22169_v49  ;;  %v20683_v49 = vld [vmem:[#allocation3 + $0x1668] ss:$16 sps:$4 sm:$0xff]   ;;  %v20703_v54 = vld [vmem:[#allocation3 + $0x160c] ss:$16 sps:$4 sm:$0xff]  }
 0x5b8   : > { %14896 = vmatpush1.bf16.msra.mxu1 %v20656_v7  ;;  %14926 = vmatprep.subr.bf16.mxu0 %v20667_v28  ;;  %v20700_v7 = vld [vmem:[#allocation3 + $0x152c] ss:$16 sps:$4 sm:$0xff]   ;;  %v20701_v28 = vld [vmem:[#allocation3 + $0x1608] ss:$16 sps:$4 sm:$0xff]  }
 0x5b9   : > { %14897 = vmatprep.subr.bf16.mxu1 %v20664_v27  ;;  %v20698_v27 = vld [vmem:[#allocation3 + $0x1528] ss:$16 sps:$4 sm:$0xff]  }
 0x5bb   : > { %14927 = vmatpush1.bf16.msra.mxu0 %v20665_v21  ;;  %v20709_v21 = vld [vmem:[#allocation3 + $0x17ec] ss:$16 sps:$4 sm:$0xff]  }
 0x5bc   : > { %14898 = vmatpush2.bf16.msra.mxu1 %v20662_v24  ;;  %14928 = vmatprep.subr.bf16.mxu0 %v20673_v37  ;;  %v20706_v24 = vld [vmem:[#allocation3 + $0x150c] ss:$16 sps:$4 sm:$0xff]   ;;  %v20707_v37 = vld [vmem:[#allocation3 + $0x17e8] ss:$16 sps:$4 sm:$0xff]  }
 0x5bd   : > { %14899 = vmatprep.subr.bf16.mxu1 %v20670_v5  ;;  %v20704_v5 = vld [vmem:[#allocation3 + $0x1508] ss:$16 sps:$4 sm:$0xff]  }
 0x5bf   : > { %14929 = vmatpush1.bf16.msra.mxu0 %v20671_v47  ;;  %v20715_v47 = vld [vmem:[#allocation3 + $0x18ec] ss:$16 sps:$4 sm:$0xff]  }
 0x5c0   : > { %14900 = vmatpush2.bf16.msra.mxu1 %v20668_v20  ;;  %14930 = vmatprep.subr.bf16.mxu0 %v20679_v35  ;;  %v20712_v20 = vld [vmem:[#allocation3 + $0x17cc] ss:$16 sps:$4 sm:$0xff]   ;;  %v20713_v35 = vld [vmem:[#allocation3 + $0x18e8] ss:$16 sps:$4 sm:$0xff]  }
 0x5c1   : > { %14901 = vmatprep.subr.bf16.mxu1 %v20676_v6  ;;  %v20710_v6 = vld [vmem:[#allocation3 + $0x17c8] ss:$16 sps:$4 sm:$0xff]  }
 0x5c3   : > { %14931 = vmatpush1.bf16.msra.mxu0 %v20677_v59  ;;  %v20721_v59 = vld [vmem:[#allocation3 + $0x18cc] ss:$16 sps:$4 sm:$0xff]  }
 0x5c4   : > { %14902 = vmatpush2.bf16.msra.mxu1 %v20674_v25  ;;  %14932 = vmatprep.subr.bf16.mxu0 %v20685_v30  ;;  %v20718_v25 = vld [vmem:[#allocation3 + $0x17ac] ss:$16 sps:$4 sm:$0xff]   ;;  %v20719_v30 = vld [vmem:[#allocation3 + $0x18c8] ss:$16 sps:$4 sm:$0xff]  }
 0x5c5   : > { %14903 = vmatprep.subr.bf16.mxu1 %v20682_v48  ;;  %v20716_v48 = vld [vmem:[#allocation3 + $0x17a8] ss:$16 sps:$4 sm:$0xff]  }
 0x5c7   : > { %14933 = vmatpush1.bf16.msra.mxu0 %v20683_v49  ;;  %v20727_v49 = vld [vmem:[#allocation3 + $0x18ac] ss:$16 sps:$4 sm:$0xff]  }
 0x5c8   : > { %14904 = vmatpush2.bf16.msra.mxu1 %v20680_v46  ;;  %14934 = vmatprep.subr.bf16.mxu0 %v20691_v57  ;;  %v20724_v46 = vld [vmem:[#allocation3 + $0x178c] ss:$16 sps:$4 sm:$0xff]   ;;  %v20725_v57 = vld [vmem:[#allocation3 + $0x18a8] ss:$16 sps:$4 sm:$0xff]  }
 0x5c9   : > { %14905 = vmatprep.subr.bf16.mxu1 %v20688_v8  ;;  %v20722_v8 = vld [vmem:[#allocation3 + $0x1788] ss:$16 sps:$4 sm:$0xff]  }
 0x5cb   : > { %14935 = vmatpush1.bf16.msra.mxu0 %v20689_v10  ;;  %v20733_v10 = vld [vmem:[#allocation3 + $0x188c] ss:$16 sps:$4 sm:$0xff]  }
 0x5cc   : > { %14906 = vmatpush2.bf16.msra.mxu1 %v20686_v3  ;;  %14936 = vmatprep.subr.bf16.mxu0 %v20697_v38  ;;  %v20730_v3 = vld [vmem:[#allocation3 + $0x176c] ss:$16 sps:$4 sm:$0xff]  }
 0x5cd   : > { %14907 = vmatprep.subr.bf16.mxu1 %v20694_v2  ;;  %v20731_v2 = vld [vmem:[#allocation3 + $0x1888] ss:$16 sps:$4 sm:$0xff]   ;;  %v20736_v38 = vld [vmem:[#allocation3 + $0x174c] ss:$16 sps:$4 sm:$0xff]  }
 0x5cf   : > { %14937 = vmatpush1.bf16.msra.mxu0 %v20695_v12  ;;  %v20734_v12 = vld [vmem:[#allocation3 + $0x1748] ss:$16 sps:$4 sm:$0xff]  }
 0x5d0   : > { %14908 = vmatpush2.bf16.msra.mxu1 %v20692_v9  ;;  %14938 = vmatprep.subr.bf16.mxu0 %v20703_v54  ;;  %v20739_v9 = vld [vmem:[#allocation3 + $0x186c] ss:$16 sps:$4 sm:$0xff]  }
 0x5d1   : > { %14909 = vmatprep.subr.bf16.mxu1 %v20700_v7  ;;  %v20742_v7 = vld [vmem:[#allocation3 + $0x172c] ss:$16 sps:$4 sm:$0xff]  }
 0x5d2   : > { %v20745_v54 = vld [vmem:[#allocation3 + $0x184c] ss:$16 sps:$4 sm:$0xff]  }
 0x5d3   : > { %14939 = vmatpush1.bf16.msra.mxu0 %v20701_v28  ;;  %v20743_v28 = vld [vmem:[#allocation3 + $0x1848] ss:$16 sps:$4 sm:$0xff]  }
 0x5d4   : > { %14910 = vmatpush2.bf16.msra.mxu1 %v20698_v27  ;;  %14940 = vmatprep.subr.bf16.mxu0 %v20709_v21  ;;  %v20740_v27 = vld [vmem:[#allocation3 + $0x1728] ss:$16 sps:$4 sm:$0xff]   ;;  %v20751_v21 = vld [vmem:[#allocation3 + $0x182c] ss:$16 sps:$4 sm:$0xff]  }
 0x5d5   : > { %14911 = vmatprep.subr.bf16.mxu1 %v20706_v24  ;;  %v20748_v24 = vld [vmem:[#allocation3 + $0x170c] ss:$16 sps:$4 sm:$0xff]  }
 0x5d7   : > { %14941 = vmatpush2.bf16.msra.mxu0 %v20707_v37  ;;  %v20749_v37 = vld [vmem:[#allocation3 + $0x1828] ss:$16 sps:$4 sm:$0xff]  }
 0x5d8   : > { %14912 = vmatpush2.bf16.msra.mxu1 %v20704_v5  ;;  %14942 = vmatprep.subr.bf16.mxu0 %v20712_v20  ;;  %v20746_v5 = vld [vmem:[#allocation3 + $0x1708] ss:$16 sps:$4 sm:$0xff]   ;;  %v20754_v20 = vld [vmem:[#allocation3 + $0x180c] ss:$16 sps:$4 sm:$0xff]  }
 0x5d9   : > { %14967 = vmatprep.subr.bf16.mxu1 %v20715_v47  ;;  %v20757_v47 = vld [vmem:[#allocation3 + $0x1aec] ss:$16 sps:$4 sm:$0xff]  }
 0x5db   : > { %14914 = vmatmul.mubr.bf16.vlgmr.msra.gmra.mxu1 %v22189_v55  ;;  %14943 = vmatpush2.bf16.msra.mxu0 %v20710_v6  ;;  %v20728_v55 = vld [vmem:[#allocation3 + $0x1768] ss:$16 sps:$4 sm:$0xff]  }
 0x5dc   : > { %14968 = vmatpush1.bf16.msra.mxu1 %v20713_v35  ;;  %14944 = vmatprep.subr.bf16.mxu0 %v20718_v25  ;;  %v20752_v6 = vld [vmem:[#allocation3 + $0x1808] ss:$16 sps:$4 sm:$0xff]   ;;  %v20760_v25 = vld [vmem:[#allocation3 + $0x19ec] ss:$16 sps:$4 sm:$0xff]  }
 0x5dd   : > { %14969 = vmatprep.subr.bf16.mxu1 %v20721_v59  ;;  %14999 = vmatprep.mubr.bf16.mxu1 %v22200_v60  ;;  %v20737_v60 = vld [vmem:[#allocation3 + $0x1868] ss:$16 sps:$4 sm:$0xff]   ;;  %v20763_v59 = vld [vmem:[#allocation3 + $0x1acc] ss:$16 sps:$4 sm:$0xff]  }
 0x5de   : > { %v20755_v35 = vld [vmem:[#allocation3 + $0x1ae8] ss:$16 sps:$4 sm:$0xff]  }
 0x5df   : > { %14945 = vmatpush2.bf16.msra.mxu0 %v20716_v48  ;;  %v20758_v48 = vld [vmem:[#allocation3 + $0x19e8] ss:$16 sps:$4 sm:$0xff]  }
 0x5e0   : > { %14970 = vmatpush1.bf16.msra.mxu1 %v20719_v30  ;;  %14946 = vmatprep.subr.bf16.mxu0 %v20724_v46  ;;  %v20761_v30 = vld [vmem:[#allocation3 + $0x1ac8] ss:$16 sps:$4 sm:$0xff]   ;;  %v20766_v46 = vld [vmem:[#allocation3 + $0x19cc] ss:$16 sps:$4 sm:$0xff]  }
 0x5e1   : > { %14971 = vmatprep.subr.bf16.mxu1 %v20727_v49  ;;  %v20769_v49 = vld [vmem:[#allocation3 + $0x1aac] ss:$16 sps:$4 sm:$0xff]  }
 0x5e3   : > { %14947 = vmatpush2.bf16.msra.mxu0 %v20722_v8  ;;  %v20764_v8 = vld [vmem:[#allocation3 + $0x19c8] ss:$16 sps:$4 sm:$0xff]  }
 0x5e4   : > { %14972 = vmatpush1.bf16.msra.mxu1 %v20725_v57  ;;  %14948 = vmatprep.subr.bf16.mxu0 %v20730_v3  ;;  %v20767_v57 = vld [vmem:[#allocation3 + $0x1aa8] ss:$16 sps:$4 sm:$0xff]   ;;  %v20772_v3 = vld [vmem:[#allocation3 + $0x19ac] ss:$16 sps:$4 sm:$0xff]  }
 0x5e5   : > { %14973 = vmatprep.subr.bf16.mxu1 %v20733_v10  ;;  %v20775_v10 = vld [vmem:[#allocation3 + $0x1a8c] ss:$16 sps:$4 sm:$0xff]  }
 0x5e7   : > { %14949 = vmatpush2.bf16.msra.mxu0 %v20728_v55  ;;  %v20773_v55 = vld [vmem:[#allocation3 + $0x1a88] ss:$16 sps:$4 sm:$0xff]  }
 0x5e8   : > { %14974 = vmatpush1.bf16.msra.mxu1 %v20731_v2  ;;  %14950 = vmatprep.subr.bf16.mxu0 %v20736_v38  ;;  %v20778_v2 = vld [vmem:[#allocation3 + $0x198c] ss:$16 sps:$4 sm:$0xff]  }
 0x5e9   : > { %14975 = vmatprep.subr.bf16.mxu1 %v20739_v9  ;;  %v20781_v38 = vld [vmem:[#allocation3 + $0x1a6c] ss:$16 sps:$4 sm:$0xff]   ;;  %v20776_v9 = vld [vmem:[#allocation3 + $0x1988] ss:$16 sps:$4 sm:$0xff]  }
 0x5eb   : > { %14951 = vmatpush2.bf16.msra.mxu0 %v20734_v12  ;;  %v20784_v12 = vld [vmem:[#allocation3 + $0x196c] ss:$16 sps:$4 sm:$0xff]  }
 0x5ec   : > { %14976 = vmatpush1.bf16.msra.mxu1 %v20737_v60  ;;  %14952 = vmatprep.subr.bf16.mxu0 %v20742_v7  ;;  %v20787_v60 = vld [vmem:[#allocation3 + $0x1a4c] ss:$16 sps:$4 sm:$0xff]   ;;  %v20782_v7 = vld [vmem:[#allocation3 + $0x1968] ss:$16 sps:$4 sm:$0xff]  }
 0x5ed   : > { %14977 = vmatprep.subr.bf16.mxu1 %v20745_v54  ;;  %v20785_v54 = vld [vmem:[#allocation3 + $0x1a48] ss:$16 sps:$4 sm:$0xff]  }
 0x5ef   : > { %14953 = vmatpush2.bf16.msra.mxu0 %v20740_v27  ;;  %v20790_v27 = vld [vmem:[#allocation3 + $0x194c] ss:$16 sps:$4 sm:$0xff]  }
 0x5f0   : > { %14978 = vmatpush1.bf16.msra.mxu1 %v20743_v28  ;;  %14954 = vmatprep.subr.bf16.mxu0 %v20748_v24  ;;  %v20793_v28 = vld [vmem:[#allocation3 + $0x1a2c] ss:$16 sps:$4 sm:$0xff]   ;;  %v20788_v24 = vld [vmem:[#allocation3 + $0x1948] ss:$16 sps:$4 sm:$0xff]  }
 0x5f1   : > { %14979 = vmatprep.subr.bf16.mxu1 %v20751_v21  ;;  %v20791_v21 = vld [vmem:[#allocation3 + $0x1a28] ss:$16 sps:$4 sm:$0xff]  }
 0x5f3   : > { %14955 = vmatpush2.bf16.msra.mxu0 %v20746_v5  ;;  %v20796_v5 = vld [vmem:[#allocation3 + $0x192c] ss:$16 sps:$4 sm:$0xff]  }
 0x5f4   : > { %14980 = vmatpush1.bf16.msra.mxu1 %v20749_v37  ;;  %15010 = vmatprep.subr.bf16.mxu0 %v20757_v47  ;;  %v20799_v37 = vld [vmem:[#allocation3 + $0x1a0c] ss:$16 sps:$4 sm:$0xff]   ;;  %v20797_v47 = vld [vmem:[#allocation3 + $0x1a08] ss:$16 sps:$4 sm:$0xff]  }
 0x5f5   : > { %14981 = vmatprep.subr.bf16.mxu1 %v20754_v20  ;;  %v20794_v20 = vld [vmem:[#allocation3 + $0x1928] ss:$16 sps:$4 sm:$0xff]  }
 0x5f6   : > { %14957 = vmatmul.mubr.bf16.vlgmr.msra.gmra.mxu0 %v22191_v56  ;;  %v20770_v56 = vld [vmem:[#allocation3 + $0x19a8] ss:$16 sps:$4 sm:$0xff]  }
 0x5f7   : > { %15011 = vmatpush1.bf16.msra.mxu0 %v20755_v35  ;;  %15042 = vmatprep.mubr.bf16.mxu0 %v22202_v15  ;;  %v20779_v15 = vld [vmem:[#allocation3 + $0x1a68] ss:$16 sps:$4 sm:$0xff]   ;;  %v20805_v35 = vld [vmem:[#allocation3 + $0x1bec] ss:$16 sps:$4 sm:$0xff]  }
 0x5f8   : > { %14982 = vmatpush1.bf16.msra.mxu1 %v20752_v6  ;;  %15012 = vmatprep.subr.bf16.mxu0 %v20763_v59  ;;  %v20802_v6 = vld [vmem:[#allocation3 + $0x190c] ss:$16 sps:$4 sm:$0xff]   ;;  %v20803_v59 = vld [vmem:[#allocation3 + $0x1be8] ss:$16 sps:$4 sm:$0xff]  }
 0x5f9   : > { %14983 = vmatprep.subr.bf16.mxu1 %v20760_v25  ;;  %v20800_v25 = vld [vmem:[#allocation3 + $0x1908] ss:$16 sps:$4 sm:$0xff]  }
 0x5fb   : > { %15013 = vmatpush1.bf16.msra.mxu0 %v20761_v30  ;;  %v20811_v30 = vld [vmem:[#allocation3 + $0x1cec] ss:$16 sps:$4 sm:$0xff]  }
 0x5fc   : > { %14984 = vmatpush2.bf16.msra.mxu1 %v20758_v48  ;;  %15014 = vmatprep.subr.bf16.mxu0 %v20769_v49  ;;  %v20808_v48 = vld [vmem:[#allocation3 + $0x1bcc] ss:$16 sps:$4 sm:$0xff]   ;;  %v20809_v49 = vld [vmem:[#allocation3 + $0x1ce8] ss:$16 sps:$4 sm:$0xff]  }
 0x5fd   : > { %14985 = vmatprep.subr.bf16.mxu1 %v20766_v46  ;;  %v20806_v46 = vld [vmem:[#allocation3 + $0x1bc8] ss:$16 sps:$4 sm:$0xff]  }
 0x5ff   : > { %15015 = vmatpush1.bf16.msra.mxu0 %v20767_v57  ;;  %v20817_v57 = vld [vmem:[#allocation3 + $0x1ccc] ss:$16 sps:$4 sm:$0xff]  }
 0x600   : > { %14986 = vmatpush2.bf16.msra.mxu1 %v20764_v8  ;;  %15016 = vmatprep.subr.bf16.mxu0 %v20775_v10  ;;  %v20814_v8 = vld [vmem:[#allocation3 + $0x1bac] ss:$16 sps:$4 sm:$0xff]   ;;  %v20815_v10 = vld [vmem:[#allocation3 + $0x1cc8] ss:$16 sps:$4 sm:$0xff]  }
 0x601   : > { %14987 = vmatprep.subr.bf16.mxu1 %v20772_v3  ;;  %v20812_v3 = vld [vmem:[#allocation3 + $0x1ba8] ss:$16 sps:$4 sm:$0xff]  }
 0x603   : > { %15017 = vmatpush1.bf16.msra.mxu0 %v20773_v55  ;;  %v20823_v55 = vld [vmem:[#allocation3 + $0x1cac] ss:$16 sps:$4 sm:$0xff]  }
 0x604   : > { %14988 = vmatpush2.bf16.msra.mxu1 %v20770_v56  ;;  %15018 = vmatprep.subr.bf16.mxu0 %v20781_v38  ;;  %v20820_v56 = vld [vmem:[#allocation3 + $0x1b8c] ss:$16 sps:$4 sm:$0xff]   ;;  %v20821_v38 = vld [vmem:[#allocation3 + $0x1ca8] ss:$16 sps:$4 sm:$0xff]  }
 0x605   : > { %14989 = vmatprep.subr.bf16.mxu1 %v20778_v2  ;;  %v20818_v2 = vld [vmem:[#allocation3 + $0x1b88] ss:$16 sps:$4 sm:$0xff]  }
 0x607   : > { %15019 = vmatpush1.bf16.msra.mxu0 %v20779_v15  ;;  %v20829_v15 = vld [vmem:[#allocation3 + $0x1c8c] ss:$16 sps:$4 sm:$0xff]  }
 0x608   : > { %14990 = vmatpush2.bf16.msra.mxu1 %v20776_v9  ;;  %15020 = vmatprep.subr.bf16.mxu0 %v20787_v60  ;;  %v20826_v9 = vld [vmem:[#allocation3 + $0x1b6c] ss:$16 sps:$4 sm:$0xff]  }
 0x609   : > { %14991 = vmatprep.subr.bf16.mxu1 %v20784_v12  ;;  %v20827_v12 = vld [vmem:[#allocation3 + $0x1c88] ss:$16 sps:$4 sm:$0xff]   ;;  %v20832_v60 = vld [vmem:[#allocation3 + $0x1b4c] ss:$16 sps:$4 sm:$0xff]  }
 0x60b   : > { %15021 = vmatpush1.bf16.msra.mxu0 %v20785_v54  ;;  %v20830_v54 = vld [vmem:[#allocation3 + $0x1b48] ss:$16 sps:$4 sm:$0xff]  }
 0x60c   : > { %14992 = vmatpush2.bf16.msra.mxu1 %v20782_v7  ;;  %15022 = vmatprep.subr.bf16.mxu0 %v20793_v28  ;;  %v20835_v7 = vld [vmem:[#allocation3 + $0x1c6c] ss:$16 sps:$4 sm:$0xff]  }
 0x60d   : > { %14993 = vmatprep.subr.bf16.mxu1 %v20790_v27  ;;  %v20838_v27 = vld [vmem:[#allocation3 + $0x1b2c] ss:$16 sps:$4 sm:$0xff]  }
 0x60e   : > { %v20841_v28 = vld [vmem:[#allocation3 + $0x1c4c] ss:$16 sps:$4 sm:$0xff]  }
 0x60f   : > { %15023 = vmatpush1.bf16.msra.mxu0 %v20791_v21  ;;  %v20839_v21 = vld [vmem:[#allocation3 + $0x1c48] ss:$16 sps:$4 sm:$0xff]  }
 0x610   : > { %14994 = vmatpush2.bf16.msra.mxu1 %v20788_v24  ;;  %15024 = vmatprep.subr.bf16.mxu0 %v20799_v37  ;;  %v20836_v24 = vld [vmem:[#allocation3 + $0x1b28] ss:$16 sps:$4 sm:$0xff]   ;;  %v20847_v37 = vld [vmem:[#allocation3 + $0x1c2c] ss:$16 sps:$4 sm:$0xff]  }
 0x611   : > { %14995 = vmatprep.subr.bf16.mxu1 %v20796_v5  ;;  %v20844_v5 = vld [vmem:[#allocation3 + $0x1b0c] ss:$16 sps:$4 sm:$0xff]  }
 0x613   : > { %15025 = vmatpush1.bf16.msra.mxu0 %v20797_v47  ;;  %v20845_v47 = vld [vmem:[#allocation3 + $0x1c28] ss:$16 sps:$4 sm:$0xff]  }
 0x614   : > { %14996 = vmatpush2.bf16.msra.mxu1 %v20794_v20  ;;  %15026 = vmatprep.subr.bf16.mxu0 %v20805_v35  ;;  %v20842_v20 = vld [vmem:[#allocation3 + $0x1b08] ss:$16 sps:$4 sm:$0xff]   ;;  %v20853_v35 = vld [vmem:[#allocation3 + $0x1eec] ss:$16 sps:$4 sm:$0xff]  }
 0x615   : > { %14997 = vmatprep.subr.bf16.mxu1 %v20802_v6  ;;  %v20850_v6 = vld [vmem:[#allocation3 + $0x1c0c] ss:$16 sps:$4 sm:$0xff]  }
 0x617   : > { %15027 = vmatpush2.bf16.msra.mxu0 %v20803_v59  ;;  %v20851_v59 = vld [vmem:[#allocation3 + $0x1ee8] ss:$16 sps:$4 sm:$0xff]  }
 0x618   : > { %14998 = vmatpush2.bf16.msra.mxu1 %v20800_v25  ;;  %15028 = vmatprep.subr.bf16.mxu0 %v20808_v48  ;;  %v20848_v25 = vld [vmem:[#allocation3 + $0x1c08] ss:$16 sps:$4 sm:$0xff]   ;;  %v20856_v48 = vld [vmem:[#allocation3 + $0x1dec] ss:$16 sps:$4 sm:$0xff]  }
 0x619   : > { %15053 = vmatprep.subr.bf16.mxu1 %v20811_v30  ;;  %v20859_v30 = vld [vmem:[#allocation3 + $0x1ecc] ss:$16 sps:$4 sm:$0xff]  }
 0x61b   : > { %15000 = vmatmul.mubr.bf16.vlgmr.msra.gmra.mxu1 %v22224_v43  ;;  %15029 = vmatpush2.bf16.msra.mxu0 %v20806_v46  ;;  %v20824_v43 = vld [vmem:[#allocation3 + $0x1b68] ss:$16 sps:$4 sm:$0xff]  }
 0x61c   : > { %15054 = vmatpush1.bf16.msra.mxu1 %v20809_v49  ;;  %15030 = vmatprep.subr.bf16.mxu0 %v20814_v8  ;;  %v20854_v46 = vld [vmem:[#allocation3 + $0x1de8] ss:$16 sps:$4 sm:$0xff]   ;;  %v20862_v8 = vld [vmem:[#allocation3 + $0x1dcc] ss:$16 sps:$4 sm:$0xff]  }
 0x61d   : > { %15055 = vmatprep.subr.bf16.mxu1 %v20817_v57  ;;  %15085 = vmatprep.mubr.bf16.mxu1 %v22235_v11  ;;  %v20833_v11 = vld [vmem:[#allocation3 + $0x1c68] ss:$16 sps:$4 sm:$0xff]   ;;  %v20865_v57 = vld [vmem:[#allocation3 + $0x1eac] ss:$16 sps:$4 sm:$0xff]  }
 0x61e   : > { %v20857_v49 = vld [vmem:[#allocation3 + $0x1ec8] ss:$16 sps:$4 sm:$0xff]  }
 0x61f   : > { %15031 = vmatpush2.bf16.msra.mxu0 %v20812_v3  ;;  %v20860_v3 = vld [vmem:[#allocation3 + $0x1dc8] ss:$16 sps:$4 sm:$0xff]  }
 0x620   : > { %15056 = vmatpush1.bf16.msra.mxu1 %v20815_v10  ;;  %15032 = vmatprep.subr.bf16.mxu0 %v20820_v56  ;;  %v20863_v10 = vld [vmem:[#allocation3 + $0x1ea8] ss:$16 sps:$4 sm:$0xff]   ;;  %v20868_v56 = vld [vmem:[#allocation3 + $0x1dac] ss:$16 sps:$4 sm:$0xff]  }
 0x621   : > { %15057 = vmatprep.subr.bf16.mxu1 %v20823_v55  ;;  %v20871_v55 = vld [vmem:[#allocation3 + $0x1e8c] ss:$16 sps:$4 sm:$0xff]  }
 0x623   : > { %15033 = vmatpush2.bf16.msra.mxu0 %v20818_v2  ;;  %v20869_v2 = vld [vmem:[#allocation3 + $0x1e88] ss:$16 sps:$4 sm:$0xff]  }
 0x624   : > { %15058 = vmatpush1.bf16.msra.mxu1 %v20821_v38  ;;  %15034 = vmatprep.subr.bf16.mxu0 %v20826_v9  ;;  %v20874_v38 = vld [vmem:[#allocation3 + $0x1d8c] ss:$16 sps:$4 sm:$0xff]  }
 0x625   : > { %15059 = vmatprep.subr.bf16.mxu1 %v20829_v15  ;;  %v20877_v9 = vld [vmem:[#allocation3 + $0x1e6c] ss:$16 sps:$4 sm:$0xff]   ;;  %v20872_v15 = vld [vmem:[#allocation3 + $0x1d88] ss:$16 sps:$4 sm:$0xff]  }
 0x627   : > { %15035 = vmatpush2.bf16.msra.mxu0 %v20824_v43  ;;  %v20880_v43 = vld [vmem:[#allocation3 + $0x1d6c] ss:$16 sps:$4 sm:$0xff]  }
 0x628   : > { %15060 = vmatpush1.bf16.msra.mxu1 %v20827_v12  ;;  %15036 = vmatprep.subr.bf16.mxu0 %v20832_v60  ;;  %v20883_v12 = vld [vmem:[#allocation3 + $0x1e4c] ss:$16 sps:$4 sm:$0xff]   ;;  %v20878_v60 = vld [vmem:[#allocation3 + $0x1d68] ss:$16 sps:$4 sm:$0xff]  }
 0x629   : > { %15061 = vmatprep.subr.bf16.mxu1 %v20835_v7  ;;  %v20881_v7 = vld [vmem:[#allocation3 + $0x1e48] ss:$16 sps:$4 sm:$0xff]  }
 0x62b   : > { %15037 = vmatpush2.bf16.msra.mxu0 %v20830_v54  ;;  %v20886_v54 = vld [vmem:[#allocation3 + $0x1d4c] ss:$16 sps:$4 sm:$0xff]  }
 0x62c   : > { %15062 = vmatpush1.bf16.msra.mxu1 %v20833_v11  ;;  %15038 = vmatprep.subr.bf16.mxu0 %v20838_v27  ;;  %v20889_v11 = vld [vmem:[#allocation3 + $0x1e2c] ss:$16 sps:$4 sm:$0xff]   ;;  %v20884_v27 = vld [vmem:[#allocation3 + $0x1d48] ss:$16 sps:$4 sm:$0xff]  }
 0x62d   : > { %15063 = vmatprep.subr.bf16.mxu1 %v20841_v28  ;;  %v20887_v28 = vld [vmem:[#allocation3 + $0x1e28] ss:$16 sps:$4 sm:$0xff]  }
 0x62f   : > { %15039 = vmatpush2.bf16.msra.mxu0 %v20836_v24  ;;  %v20892_v24 = vld [vmem:[#allocation3 + $0x1d2c] ss:$16 sps:$4 sm:$0xff]  }
 0x630   : > { %15064 = vmatpush1.bf16.msra.mxu1 %v20839_v21  ;;  %15040 = vmatprep.subr.bf16.mxu0 %v20844_v5  ;;  %v20895_v21 = vld [vmem:[#allocation3 + $0x1e0c] ss:$16 sps:$4 sm:$0xff]   ;;  %v20890_v5 = vld [vmem:[#allocation3 + $0x1d28] ss:$16 sps:$4 sm:$0xff]  }
 0x631   : > { %15065 = vmatprep.subr.bf16.mxu1 %v20847_v37  ;;  %v20893_v37 = vld [vmem:[#allocation3 + $0x1e08] ss:$16 sps:$4 sm:$0xff]  }
 0x633   : > { %15041 = vmatpush2.bf16.msra.mxu0 %v20842_v20  ;;  %v20898_v20 = vld [vmem:[#allocation3 + $0x1d0c] ss:$16 sps:$4 sm:$0xff]  }
 0x634   : > { %15066 = vmatpush1.bf16.msra.mxu1 %v20845_v47  ;;  %15096 = vmatprep.subr.bf16.mxu0 %v20853_v35  ;;  %v20901_v47 = vld [vmem:[#allocation3 + $0x1fec] ss:$16 sps:$4 sm:$0xff]   ;;  %v20899_v35 = vld [vmem:[#allocation3 + $0x1fe8] ss:$16 sps:$4 sm:$0xff]  }
 0x635   : > { %15067 = vmatprep.subr.bf16.mxu1 %v20850_v6  ;;  %v20896_v6 = vld [vmem:[#allocation3 + $0x1d08] ss:$16 sps:$4 sm:$0xff]  }
 0x636   : > { %15043 = vmatmul.mubr.bf16.vlgmr.msra.gmra.mxu0 %v22226_v44  ;;  %v20866_v44 = vld [vmem:[#allocation3 + $0x1da8] ss:$16 sps:$4 sm:$0xff]  }
 0x637   : > { %15097 = vmatpush1.bf16.msra.mxu0 %v20851_v59  ;;  %15128 = vmatprep.mubr.bf16.mxu0 %v22237_v16  ;;  %v20875_v16 = vld [vmem:[#allocation3 + $0x1e68] ss:$16 sps:$4 sm:$0xff]   ;;  %v20907_v59 = vld [vmem:[#allocation3 + $0x20ec] ss:$16 sps:$4 sm:$0xff]  }
 0x638   : > { %15068 = vmatpush1.bf16.msra.mxu1 %v20848_v25  ;;  %15098 = vmatprep.subr.bf16.mxu0 %v20859_v30  ;;  %v20904_v25 = vld [vmem:[#allocation3 + $0x1fcc] ss:$16 sps:$4 sm:$0xff]   ;;  %v20905_v30 = vld [vmem:[#allocation3 + $0x20e8] ss:$16 sps:$4 sm:$0xff]  }
 0x639   : > { %15069 = vmatprep.subr.bf16.mxu1 %v20856_v48  ;;  %v20902_v48 = vld [vmem:[#allocation3 + $0x1fc8] ss:$16 sps:$4 sm:$0xff]  }
 0x63b   : > { %15099 = vmatpush1.bf16.msra.mxu0 %v20857_v49  ;;  %v20913_v49 = vld [vmem:[#allocation3 + $0x20cc] ss:$16 sps:$4 sm:$0xff]  }
 0x63c   : > { %15070 = vmatpush2.bf16.msra.mxu1 %v20854_v46  ;;  %15100 = vmatprep.subr.bf16.mxu0 %v20865_v57  ;;  %v20910_v46 = vld [vmem:[#allocation3 + $0x1fac] ss:$16 sps:$4 sm:$0xff]   ;;  %v20911_v57 = vld [vmem:[#allocation3 + $0x20c8] ss:$16 sps:$4 sm:$0xff]  }
 0x63d   : > { %15071 = vmatprep.subr.bf16.mxu1 %v20862_v8  ;;  %v20908_v8 = vld [vmem:[#allocation3 + $0x1fa8] ss:$16 sps:$4 sm:$0xff]  }
 0x63f   : > { %15101 = vmatpush1.bf16.msra.mxu0 %v20863_v10  ;;  %v20919_v10 = vld [vmem:[#allocation3 + $0x20ac] ss:$16 sps:$4 sm:$0xff]  }
 0x640   : > { %15072 = vmatpush2.bf16.msra.mxu1 %v20860_v3  ;;  %15102 = vmatprep.subr.bf16.mxu0 %v20871_v55  ;;  %v20916_v3 = vld [vmem:[#allocation3 + $0x1f8c] ss:$16 sps:$4 sm:$0xff]   ;;  %v20917_v55 = vld [vmem:[#allocation3 + $0x20a8] ss:$16 sps:$4 sm:$0xff]  }
 0x641   : > { %15073 = vmatprep.subr.bf16.mxu1 %v20868_v56  ;;  %v20914_v56 = vld [vmem:[#allocation3 + $0x1f88] ss:$16 sps:$4 sm:$0xff]  }
 0x643   : > { %15103 = vmatpush1.bf16.msra.mxu0 %v20869_v2  ;;  %v20925_v2 = vld [vmem:[#allocation3 + $0x208c] ss:$16 sps:$4 sm:$0xff]  }
 0x644   : > { %15074 = vmatpush2.bf16.msra.mxu1 %v20866_v44  ;;  %15104 = vmatprep.subr.bf16.mxu0 %v20877_v9  ;;  %v20922_v44 = vld [vmem:[#allocation3 + $0x1f6c] ss:$16 sps:$4 sm:$0xff]  }
 0x645   : > { %15075 = vmatprep.subr.bf16.mxu1 %v20874_v38  ;;  %v20923_v38 = vld [vmem:[#allocation3 + $0x2088] ss:$16 sps:$4 sm:$0xff]   ;;  %v20928_v9 = vld [vmem:[#allocation3 + $0x1f4c] ss:$16 sps:$4 sm:$0xff]  }
 0x647   : > { %15105 = vmatpush1.bf16.msra.mxu0 %v20875_v16  ;;  %v20926_v16 = vld [vmem:[#allocation3 + $0x1f48] ss:$16 sps:$4 sm:$0xff]  }
 0x648   : > { %15076 = vmatpush2.bf16.msra.mxu1 %v20872_v15  ;;  %15106 = vmatprep.subr.bf16.mxu0 %v20883_v12  ;;  %v20931_v15 = vld [vmem:[#allocation3 + $0x206c] ss:$16 sps:$4 sm:$0xff]  }
 0x649   : > { %15077 = vmatprep.subr.bf16.mxu1 %v20880_v43  ;;  %v20934_v43 = vld [vmem:[#allocation3 + $0x1f2c] ss:$16 sps:$4 sm:$0xff]  }
 0x64a   : > { %v20937_v12 = vld [vmem:[#allocation3 + $0x204c] ss:$16 sps:$4 sm:$0xff]  }
 0x64b   : > { %15107 = vmatpush1.bf16.msra.mxu0 %v20881_v7  ;;  %v20935_v7 = vld [vmem:[#allocation3 + $0x2048] ss:$16 sps:$4 sm:$0xff]  }
 0x64c   : > { %15078 = vmatpush2.bf16.msra.mxu1 %v20878_v60  ;;  %15108 = vmatprep.subr.bf16.mxu0 %v20889_v11  ;;  %v20932_v60 = vld [vmem:[#allocation3 + $0x1f28] ss:$16 sps:$4 sm:$0xff]   ;;  %v20943_v11 = vld [vmem:[#allocation3 + $0x202c] ss:$16 sps:$4 sm:$0xff]  }
 0x64d   : > { %15079 = vmatprep.subr.bf16.mxu1 %v20886_v54  ;;  %v20940_v54 = vld [vmem:[#allocation3 + $0x1f0c] ss:$16 sps:$4 sm:$0xff]  }
 0x64f   : > { %15109 = vmatpush1.bf16.msra.mxu0 %v20887_v28  ;;  %v20941_v28 = vld [vmem:[#allocation3 + $0x2028] ss:$16 sps:$4 sm:$0xff]  }
 0x650   : > { %15080 = vmatpush2.bf16.msra.mxu1 %v20884_v27  ;;  %15110 = vmatprep.subr.bf16.mxu0 %v20895_v21  ;;  %v20938_v27 = vld [vmem:[#allocation3 + $0x1f08] ss:$16 sps:$4 sm:$0xff]   ;;  %v20949_v21 = vld [vmem:[#allocation3 + $0x22ec] ss:$16 sps:$4 sm:$0xff]  }
 0x651   : > { %15081 = vmatprep.subr.bf16.mxu1 %v20892_v24  ;;  %v20946_v24 = vld [vmem:[#allocation3 + $0x200c] ss:$16 sps:$4 sm:$0xff]  }
 0x653   : > { %15111 = vmatpush1.bf16.msra.mxu0 %v20893_v37  ;;  %v20947_v37 = vld [vmem:[#allocation3 + $0x22e8] ss:$16 sps:$4 sm:$0xff]  }
 0x654   : > { %15082 = vmatpush2.bf16.msra.mxu1 %v20890_v5  ;;  %15112 = vmatprep.subr.bf16.mxu0 %v20901_v47  ;;  %v20944_v5 = vld [vmem:[#allocation3 + $0x2008] ss:$16 sps:$4 sm:$0xff]   ;;  %v20955_v47 = vld [vmem:[#allocation3 + $0x22cc] ss:$16 sps:$4 sm:$0xff]  }
 0x655   : > { %15083 = vmatprep.subr.bf16.mxu1 %v20898_v20  ;;  %v20952_v20 = vld [vmem:[#allocation3 + $0x21ec] ss:$16 sps:$4 sm:$0xff]  }
 0x657   : > { %15113 = vmatpush2.bf16.msra.mxu0 %v20899_v35  ;;  %v20953_v35 = vld [vmem:[#allocation3 + $0x22c8] ss:$16 sps:$4 sm:$0xff]  }
 0x658   : > { %15084 = vmatpush2.bf16.msra.mxu1 %v20896_v6  ;;  %15114 = vmatprep.subr.bf16.mxu0 %v20904_v25  ;;  %v20950_v6 = vld [vmem:[#allocation3 + $0x21e8] ss:$16 sps:$4 sm:$0xff]   ;;  %v20958_v25 = vld [vmem:[#allocation3 + $0x21cc] ss:$16 sps:$4 sm:$0xff]  }
 0x659   : > { %15139 = vmatprep.subr.bf16.mxu1 %v20907_v59  ;;  %v20961_v59 = vld [vmem:[#allocation3 + $0x22ac] ss:$16 sps:$4 sm:$0xff]  }
 0x65b   : > { %15086 = vmatmul.mubr.bf16.vlgmr.msra.gmra.mxu1 %v22258_v41  ;;  %15115 = vmatpush2.bf16.msra.mxu0 %v20902_v48  ;;  %v20920_v41 = vld [vmem:[#allocation3 + $0x1f68] ss:$16 sps:$4 sm:$0xff]  }
 0x65c   : > { %15140 = vmatpush1.bf16.msra.mxu1 %v20905_v30  ;;  %15116 = vmatprep.subr.bf16.mxu0 %v20910_v46  ;;  %v20956_v48 = vld [vmem:[#allocation3 + $0x21c8] ss:$16 sps:$4 sm:$0xff]   ;;  %v20964_v46 = vld [vmem:[#allocation3 + $0x21ac] ss:$16 sps:$4 sm:$0xff]  }
 0x65d   : > { %15141 = vmatprep.subr.bf16.mxu1 %v20913_v49  ;;  %15171 = vmatprep.mubr.bf16.mxu1 %v22269_v26  ;;  %v20929_v26 = vld [vmem:[#allocation3 + $0x2068] ss:$16 sps:$4 sm:$0xff]   ;;  %v20967_v49 = vld [vmem:[#allocation3 + $0x228c] ss:$16 sps:$4 sm:$0xff]  }
 0x65e   : > { %v20959_v30 = vld [vmem:[#allocation3 + $0x22a8] ss:$16 sps:$4 sm:$0xff]  }
 0x65f   : > { %15117 = vmatpush2.bf16.msra.mxu0 %v20908_v8  ;;  %v20965_v8 = vld [vmem:[#allocation3 + $0x2288] ss:$16 sps:$4 sm:$0xff]  }
 0x660   : > { %15142 = vmatpush1.bf16.msra.mxu1 %v20911_v57  ;;  %15118 = vmatprep.subr.bf16.mxu0 %v20916_v3  ;;  %v20970_v57 = vld [vmem:[#allocation3 + $0x218c] ss:$16 sps:$4 sm:$0xff]  }
 0x661   : > { %15143 = vmatprep.subr.bf16.mxu1 %v20919_v10  ;;  %v20973_v3 = vld [vmem:[#allocation3 + $0x226c] ss:$16 sps:$4 sm:$0xff]   ;;  %v20968_v10 = vld [vmem:[#allocation3 + $0x2188] ss:$16 sps:$4 sm:$0xff]  }
 0x663   : > { %15119 = vmatpush2.bf16.msra.mxu0 %v20914_v56  ;;  %v20976_v56 = vld [vmem:[#allocation3 + $0x216c] ss:$16 sps:$4 sm:$0xff]  }
 0x664   : > { %15144 = vmatpush1.bf16.msra.mxu1 %v20917_v55  ;;  %15120 = vmatprep.subr.bf16.mxu0 %v20922_v44  ;;  %v20979_v55 = vld [vmem:[#allocation3 + $0x224c] ss:$16 sps:$4 sm:$0xff]   ;;  %v20974_v44 = vld [vmem:[#allocation3 + $0x2168] ss:$16 sps:$4 sm:$0xff]  }
 0x665   : > { %15145 = vmatprep.subr.bf16.mxu1 %v20925_v2  ;;  %v20977_v2 = vld [vmem:[#allocation3 + $0x2248] ss:$16 sps:$4 sm:$0xff]  }
 0x667   : > { %15121 = vmatpush2.bf16.msra.mxu0 %v20920_v41  ;;  %v20982_v41 = vld [vmem:[#allocation3 + $0x214c] ss:$16 sps:$4 sm:$0xff]  }
 0x668   : > { %15146 = vmatpush1.bf16.msra.mxu1 %v20923_v38  ;;  %15122 = vmatprep.subr.bf16.mxu0 %v20928_v9  ;;  %v20985_v38 = vld [vmem:[#allocation3 + $0x222c] ss:$16 sps:$4 sm:$0xff]   ;;  %v20980_v9 = vld [vmem:[#allocation3 + $0x2148] ss:$16 sps:$4 sm:$0xff]  }
 0x669   : > { %15147 = vmatprep.subr.bf16.mxu1 %v20931_v15  ;;  %v20983_v15 = vld [vmem:[#allocation3 + $0x2228] ss:$16 sps:$4 sm:$0xff]  }
 0x66b   : > { %15123 = vmatpush2.bf16.msra.mxu0 %v20926_v16  ;;  %v20988_v16 = vld [vmem:[#allocation3 + $0x212c] ss:$16 sps:$4 sm:$0xff]  }
 0x66c   : > { %15148 = vmatpush1.bf16.msra.mxu1 %v20929_v26  ;;  %15124 = vmatprep.subr.bf16.mxu0 %v20934_v43  ;;  %v20991_v26 = vld [vmem:[#allocation3 + $0x220c] ss:$16 sps:$4 sm:$0xff]   ;;  %v20986_v43 = vld [vmem:[#allocation3 + $0x2128] ss:$16 sps:$4 sm:$0xff]  }
 0x66d   : > { %15149 = vmatprep.subr.bf16.mxu1 %v20937_v12  ;;  %v20989_v12 = vld [vmem:[#allocation3 + $0x2208] ss:$16 sps:$4 sm:$0xff]  }
 0x66f   : > { %15125 = vmatpush2.bf16.msra.mxu0 %v20932_v60  ;;  %v20994_v60 = vld [vmem:[#allocation3 + $0x210c] ss:$16 sps:$4 sm:$0xff]  }
 0x670   : > { %15150 = vmatpush1.bf16.msra.mxu1 %v20935_v7  ;;  %15126 = vmatprep.subr.bf16.mxu0 %v20940_v54  ;;  %v20997_v7 = vld [vmem:[#allocation3 + $0x23ec] ss:$16 sps:$4 sm:$0xff]   ;;  %v20992_v54 = vld [vmem:[#allocation3 + $0x2108] ss:$16 sps:$4 sm:$0xff]  }
 0x671   : > { %15151 = vmatprep.subr.bf16.mxu1 %v20943_v11  ;;  %v20995_v11 = vld [vmem:[#allocation3 + $0x23e8] ss:$16 sps:$4 sm:$0xff]  }
 0x673   : > { %15127 = vmatpush2.bf16.msra.mxu0 %v20938_v27  ;;  %v21000_v27 = vld [vmem:[#allocation3 + $0x23cc] ss:$16 sps:$4 sm:$0xff]  }
 0x674   : > { %15152 = vmatpush1.bf16.msra.mxu1 %v20941_v28  ;;  %15182 = vmatprep.subr.bf16.mxu0 %v20949_v21  ;;  %v21003_v28 = vld [vmem:[#allocation3 + $0x24ec] ss:$16 sps:$4 sm:$0xff]   ;;  %v21001_v21 = vld [vmem:[#allocation3 + $0x24e8] ss:$16 sps:$4 sm:$0xff]  }
 0x675   : > { %15153 = vmatprep.subr.bf16.mxu1 %v20946_v24  ;;  %v20998_v24 = vld [vmem:[#allocation3 + $0x23c8] ss:$16 sps:$4 sm:$0xff]  }
 0x676   : > { %15129 = vmatmul.mubr.bf16.vlgmr.msra.gmra.mxu0 %v22260_v52  ;;  %v20962_v52 = vld [vmem:[#allocation3 + $0x21a8] ss:$16 sps:$4 sm:$0xff]  }
 0x677   : > { %15183 = vmatpush1.bf16.msra.mxu0 %v20947_v37  ;;  %15214 = vmatprep.mubr.bf16.mxu0 %v22271_v31  ;;  %v20971_v31 = vld [vmem:[#allocation3 + $0x2268] ss:$16 sps:$4 sm:$0xff]   ;;  %v21009_v37 = vld [vmem:[#allocation3 + $0x24cc] ss:$16 sps:$4 sm:$0xff]  }
 0x678   : > { %15154 = vmatpush1.bf16.msra.mxu1 %v20944_v5  ;;  %15184 = vmatprep.subr.bf16.mxu0 %v20955_v47  ;;  %v21006_v5 = vld [vmem:[#allocation3 + $0x23ac] ss:$16 sps:$4 sm:$0xff]   ;;  %v21007_v47 = vld [vmem:[#allocation3 + $0x24c8] ss:$16 sps:$4 sm:$0xff]  }
 0x679   : > { %15155 = vmatprep.subr.bf16.mxu1 %v20952_v20  ;;  %v21004_v20 = vld [vmem:[#allocation3 + $0x23a8] ss:$16 sps:$4 sm:$0xff]  }
 0x67b   : > { %15185 = vmatpush1.bf16.msra.mxu0 %v20953_v35  ;;  %v21015_v35 = vld [vmem:[#allocation3 + $0x24ac] ss:$16 sps:$4 sm:$0xff]  }
 0x67c   : > { %15156 = vmatpush2.bf16.msra.mxu1 %v20950_v6  ;;  %15186 = vmatprep.subr.bf16.mxu0 %v20961_v59  ;;  %v21012_v6 = vld [vmem:[#allocation3 + $0x238c] ss:$16 sps:$4 sm:$0xff]   ;;  %v21013_v59 = vld [vmem:[#allocation3 + $0x24a8] ss:$16 sps:$4 sm:$0xff]  }
 0x67d   : > { %15157 = vmatprep.subr.bf16.mxu1 %v20958_v25  ;;  %v21010_v25 = vld [vmem:[#allocation3 + $0x2388] ss:$16 sps:$4 sm:$0xff]  }
 0x67f   : > { %15187 = vmatpush1.bf16.msra.mxu0 %v20959_v30  ;;  %v21021_v30 = vld [vmem:[#allocation3 + $0x248c] ss:$16 sps:$4 sm:$0xff]  }
 0x680   : > { %15158 = vmatpush2.bf16.msra.mxu1 %v20956_v48  ;;  %15188 = vmatprep.subr.bf16.mxu0 %v20967_v49  ;;  %v21018_v48 = vld [vmem:[#allocation3 + $0x236c] ss:$16 sps:$4 sm:$0xff]  }
 0x681   : > { %15159 = vmatprep.subr.bf16.mxu1 %v20964_v46  ;;  %v21019_v46 = vld [vmem:[#allocation3 + $0x2488] ss:$16 sps:$4 sm:$0xff]   ;;  %v21024_v49 = vld [vmem:[#allocation3 + $0x234c] ss:$16 sps:$4 sm:$0xff]  }
 0x683   : > { %15189 = vmatpush1.bf16.msra.mxu0 %v20965_v8  ;;  %v21022_v8 = vld [vmem:[#allocation3 + $0x2348] ss:$16 sps:$4 sm:$0xff]  }
 0x684   : > { %15160 = vmatpush2.bf16.msra.mxu1 %v20962_v52  ;;  %15190 = vmatprep.subr.bf16.mxu0 %v20973_v3  ;;  %v21027_v52 = vld [vmem:[#allocation3 + $0x246c] ss:$16 sps:$4 sm:$0xff]  }
 0x685   : > { %15161 = vmatprep.subr.bf16.mxu1 %v20970_v57  ;;  %v21030_v57 = vld [vmem:[#allocation3 + $0x232c] ss:$16 sps:$4 sm:$0xff]  }
 0x686   : > { %v21033_v3 = vld [vmem:[#allocation3 + $0x244c] ss:$16 sps:$4 sm:$0xff]  }
 0x687   : > { %15191 = vmatpush1.bf16.msra.mxu0 %v20971_v31  ;;  %v21031_v31 = vld [vmem:[#allocation3 + $0x2448] ss:$16 sps:$4 sm:$0xff]  }
 0x688   : > { %15162 = vmatpush2.bf16.msra.mxu1 %v20968_v10  ;;  %15192 = vmatprep.subr.bf16.mxu0 %v20979_v55  ;;  %v21028_v10 = vld [vmem:[#allocation3 + $0x2328] ss:$16 sps:$4 sm:$0xff]   ;;  %v21039_v55 = vld [vmem:[#allocation3 + $0x242c] ss:$16 sps:$4 sm:$0xff]  }
 0x689   : > { %15163 = vmatprep.subr.bf16.mxu1 %v20976_v56  ;;  %v21036_v56 = vld [vmem:[#allocation3 + $0x230c] ss:$16 sps:$4 sm:$0xff]  }
 0x68b   : > { %15193 = vmatpush1.bf16.msra.mxu0 %v20977_v2  ;;  %v21037_v2 = vld [vmem:[#allocation3 + $0x2428] ss:$16 sps:$4 sm:$0xff]  }
 0x68c   : > { %15164 = vmatpush2.bf16.msra.mxu1 %v20974_v44  ;;  %15194 = vmatprep.subr.bf16.mxu0 %v20985_v38  ;;  %v21034_v44 = vld [vmem:[#allocation3 + $0x2308] ss:$16 sps:$4 sm:$0xff]   ;;  %v21045_v38 = vld [vmem:[#allocation3 + $0x26ec] ss:$16 sps:$4 sm:$0xff]  }
 0x68d   : > { %15165 = vmatprep.subr.bf16.mxu1 %v20982_v41  ;;  %v21042_v41 = vld [vmem:[#allocation3 + $0x240c] ss:$16 sps:$4 sm:$0xff]  }
 0x68f   : > { %15195 = vmatpush1.bf16.msra.mxu0 %v20983_v15  ;;  %v21043_v15 = vld [vmem:[#allocation3 + $0x26e8] ss:$16 sps:$4 sm:$0xff]  }
 0x690   : > { %15166 = vmatpush2.bf16.msra.mxu1 %v20980_v9  ;;  %15196 = vmatprep.subr.bf16.mxu0 %v20991_v26  ;;  %v21040_v9 = vld [vmem:[#allocation3 + $0x2408] ss:$16 sps:$4 sm:$0xff]   ;;  %v21051_v26 = vld [vmem:[#allocation3 + $0x26cc] ss:$16 sps:$4 sm:$0xff]  }
 0x691   : > { %15167 = vmatprep.subr.bf16.mxu1 %v20988_v16  ;;  %v21048_v16 = vld [vmem:[#allocation3 + $0x25ec] ss:$16 sps:$4 sm:$0xff]  }
 0x693   : > { %15197 = vmatpush1.bf16.msra.mxu0 %v20989_v12  ;;  %v21049_v12 = vld [vmem:[#allocation3 + $0x26c8] ss:$16 sps:$4 sm:$0xff]  }
 0x694   : > { %15168 = vmatpush2.bf16.msra.mxu1 %v20986_v43  ;;  %15198 = vmatprep.subr.bf16.mxu0 %v20997_v7  ;;  %v21046_v43 = vld [vmem:[#allocation3 + $0x25e8] ss:$16 sps:$4 sm:$0xff]   ;;  %v21057_v7 = vld [vmem:[#allocation3 + $0x26ac] ss:$16 sps:$4 sm:$0xff]  }
 0x695   : > { %15169 = vmatprep.subr.bf16.mxu1 %v20994_v60  ;;  %v21054_v60 = vld [vmem:[#allocation3 + $0x25cc] ss:$16 sps:$4 sm:$0xff]  }
 0x697   : > { %15199 = vmatpush2.bf16.msra.mxu0 %v20995_v11  ;;  %v21055_v11 = vld [vmem:[#allocation3 + $0x26a8] ss:$16 sps:$4 sm:$0xff]  }
 0x698   : > { %15170 = vmatpush2.bf16.msra.mxu1 %v20992_v54  ;;  %15200 = vmatprep.subr.bf16.mxu0 %v21000_v27  ;;  %v21052_v54 = vld [vmem:[#allocation3 + $0x25c8] ss:$16 sps:$4 sm:$0xff]   ;;  %v21060_v27 = vld [vmem:[#allocation3 + $0x25ac] ss:$16 sps:$4 sm:$0xff]  }
 0x699   : > { %15225 = vmatprep.subr.bf16.mxu1 %v21003_v28  ;;  %v21063_v28 = vld [vmem:[#allocation3 + $0x268c] ss:$16 sps:$4 sm:$0xff]  }
 0x69b   : > { %15172 = vmatmul.mubr.bf16.vlgmr.msra.gmra.mxu1 %v22292_v22  ;;  %15201 = vmatpush2.bf16.msra.mxu0 %v20998_v24  ;;  %v21016_v22 = vld [vmem:[#allocation3 + $0x2368] ss:$16 sps:$4 sm:$0xff]  }
 0x69c   : > { %15226 = vmatpush1.bf16.msra.mxu1 %v21001_v21  ;;  %15202 = vmatprep.subr.bf16.mxu0 %v21006_v5  ;;  %v21061_v24 = vld [vmem:[#allocation3 + $0x2688] ss:$16 sps:$4 sm:$0xff]   ;;  %v21066_v21 = vld [vmem:[#allocation3 + $0x258c] ss:$16 sps:$4 sm:$0xff]  }
 0x69d   : > { %15227 = vmatprep.subr.bf16.mxu1 %v21009_v37  ;;  %15257 = vmatprep.mubr.bf16.mxu1 %v22303_v17  ;;  %v21025_v17 = vld [vmem:[#allocation3 + $0x2468] ss:$16 sps:$4 sm:$0xff]   ;;  %v21069_v5 = vld [vmem:[#allocation3 + $0x266c] ss:$16 sps:$4 sm:$0xff]  }
 0x69e   : > { %v21064_v37 = vld [vmem:[#allocation3 + $0x2588] ss:$16 sps:$4 sm:$0xff]  }
 0x69f   : > { %15203 = vmatpush2.bf16.msra.mxu0 %v21004_v20  ;;  %v21072_v20 = vld [vmem:[#allocation3 + $0x256c] ss:$16 sps:$4 sm:$0xff]  }
 0x6a0   : > { %15228 = vmatpush1.bf16.msra.mxu1 %v21007_v47  ;;  %15204 = vmatprep.subr.bf16.mxu0 %v21012_v6  ;;  %v21075_v47 = vld [vmem:[#allocation3 + $0x264c] ss:$16 sps:$4 sm:$0xff]   ;;  %v21070_v6 = vld [vmem:[#allocation3 + $0x2568] ss:$16 sps:$4 sm:$0xff]  }
 0x6a1   : > { %15229 = vmatprep.subr.bf16.mxu1 %v21015_v35  ;;  %v21073_v35 = vld [vmem:[#allocation3 + $0x2648] ss:$16 sps:$4 sm:$0xff]  }
 0x6a3   : > { %15205 = vmatpush2.bf16.msra.mxu0 %v21010_v25  ;;  %v21078_v25 = vld [vmem:[#allocation3 + $0x254c] ss:$16 sps:$4 sm:$0xff]  }
 0x6a4   : > { %15230 = vmatpush1.bf16.msra.mxu1 %v21013_v59  ;;  %15206 = vmatprep.subr.bf16.mxu0 %v21018_v48  ;;  %v21081_v59 = vld [vmem:[#allocation3 + $0x262c] ss:$16 sps:$4 sm:$0xff]   ;;  %v21076_v48 = vld [vmem:[#allocation3 + $0x2548] ss:$16 sps:$4 sm:$0xff]  }
 0x6a5   : > { %15231 = vmatprep.subr.bf16.mxu1 %v21021_v30  ;;  %v21079_v30 = vld [vmem:[#allocation3 + $0x2628] ss:$16 sps:$4 sm:$0xff]  }
 0x6a7   : > { %15207 = vmatpush2.bf16.msra.mxu0 %v21016_v22  ;;  %v21084_v22 = vld [vmem:[#allocation3 + $0x252c] ss:$16 sps:$4 sm:$0xff]  }
 0x6a8   : > { %15232 = vmatpush1.bf16.msra.mxu1 %v21019_v46  ;;  %15208 = vmatprep.subr.bf16.mxu0 %v21024_v49  ;;  %v21087_v46 = vld [vmem:[#allocation3 + $0x260c] ss:$16 sps:$4 sm:$0xff]   ;;  %v21082_v49 = vld [vmem:[#allocation3 + $0x2528] ss:$16 sps:$4 sm:$0xff]  }
 0x6a9   : > { %15233 = vmatprep.subr.bf16.mxu1 %v21027_v52  ;;  %v21085_v52 = vld [vmem:[#allocation3 + $0x2608] ss:$16 sps:$4 sm:$0xff]  }
 0x6ab   : > { %15209 = vmatpush2.bf16.msra.mxu0 %v21022_v8  ;;  %v21090_v8 = vld [vmem:[#allocation3 + $0x250c] ss:$16 sps:$4 sm:$0xff]  }
 0x6ac   : > { %15234 = vmatpush1.bf16.msra.mxu1 %v21025_v17  ;;  %15210 = vmatprep.subr.bf16.mxu0 %v21030_v57  ;;  %v21093_v17 = vld [vmem:[#allocation3 + $0x27ec] ss:$16 sps:$4 sm:$0xff]   ;;  %v21088_v57 = vld [vmem:[#allocation3 + $0x2508] ss:$16 sps:$4 sm:$0xff]  }
 0x6ad   : > { %15235 = vmatprep.subr.bf16.mxu1 %v21033_v3  ;;  %v21091_v3 = vld [vmem:[#allocation3 + $0x27e8] ss:$16 sps:$4 sm:$0xff]  }
 0x6af   : > { %15211 = vmatpush2.bf16.msra.mxu0 %v21028_v10  ;;  %v21096_v10 = vld [vmem:[#allocation3 + $0x27cc] ss:$16 sps:$4 sm:$0xff]  }
 0x6b0   : > { %15236 = vmatpush1.bf16.msra.mxu1 %v21031_v31  ;;  %15212 = vmatprep.subr.bf16.mxu0 %v21036_v56  ;;  %v21099_v31 = vld [vmem:[#allocation3 + $0x28ec] ss:$16 sps:$4 sm:$0xff]   ;;  %v21094_v56 = vld [vmem:[#allocation3 + $0x27c8] ss:$16 sps:$4 sm:$0xff]  }
 0x6b1   : > { %15237 = vmatprep.subr.bf16.mxu1 %v21039_v55  ;;  %v21097_v55 = vld [vmem:[#allocation3 + $0x28e8] ss:$16 sps:$4 sm:$0xff]  }
 0x6b3   : > { %15213 = vmatpush2.bf16.msra.mxu0 %v21034_v44  ;;  %v21102_v44 = vld [vmem:[#allocation3 + $0x27ac] ss:$16 sps:$4 sm:$0xff]  }
 0x6b4   : > { %15238 = vmatpush1.bf16.msra.mxu1 %v21037_v2  ;;  %15268 = vmatprep.subr.bf16.mxu0 %v21045_v38  ;;  %v21105_v2 = vld [vmem:[#allocation3 + $0x28cc] ss:$16 sps:$4 sm:$0xff]   ;;  %v21103_v38 = vld [vmem:[#allocation3 + $0x28c8] ss:$16 sps:$4 sm:$0xff]  }
 0x6b5   : > { %15239 = vmatprep.subr.bf16.mxu1 %v21042_v41  ;;  %v21100_v41 = vld [vmem:[#allocation3 + $0x27a8] ss:$16 sps:$4 sm:$0xff]  }
 0x6b6   : > { %15215 = vmatmul.mubr.bf16.vlgmr.msra.gmra.mxu0 %v22294_v51  ;;  %v21058_v51 = vld [vmem:[#allocation3 + $0x25a8] ss:$16 sps:$4 sm:$0xff]  }
 0x6b7   : > { %15269 = vmatpush1.bf16.msra.mxu0 %v21043_v15  ;;  %15300 = vmatprep.mubr.bf16.mxu0 %v22305_v14  ;;  %v21067_v14 = vld [vmem:[#allocation3 + $0x2668] ss:$16 sps:$4 sm:$0xff]   ;;  %v21111_v15 = vld [vmem:[#allocation3 + $0x28ac] ss:$16 sps:$4 sm:$0xff]  }
 0x6b8   : > { %15240 = vmatpush1.bf16.msra.mxu1 %v21040_v9  ;;  %15270 = vmatprep.subr.bf16.mxu0 %v21051_v26  ;;  %v21108_v9 = vld [vmem:[#allocation3 + $0x278c] ss:$16 sps:$4 sm:$0xff]   ;;  %v21106_v26 = vld [vmem:[#allocation3 + $0x2788] ss:$16 sps:$4 sm:$0xff]  }
 0x6b9   : > { %15241 = vmatprep.subr.bf16.mxu1 %v21048_v16  ;;  %v23220_v16 = vld [vmem:[#allocation36_spill] sm:$0xff] }
 0x6bb   : > { %15271 = vmatpush1.bf16.msra.mxu0 %v21049_v12  ;;  %v21114_v12 = vld [vmem:[#allocation3 + $0x276c] ss:$16 sps:$4 sm:$0xff]  }
 0x6bc   : > { %15242 = vmatpush2.bf16.msra.mxu1 %v21046_v43  ;;  %15272 = vmatprep.subr.bf16.mxu0 %v21057_v7  ;;  %v21109_v43 = vld [vmem:[#allocation3 + $0x28a8] ss:$16 sps:$4 sm:$0xff]  }
 0x6bd   : > { %15243 = vmatprep.subr.bf16.mxu1 %v21054_v60  ;;  %v21117_v60 = vld [vmem:[#allocation3 + $0x288c] ss:$16 sps:$4 sm:$0xff]   ;;  %v21115_v7 = vld [vmem:[#allocation3 + $0x2888] ss:$16 sps:$4 sm:$0xff]  }
 0x6bf   : > { %15273 = vmatpush1.bf16.msra.mxu0 %v21055_v11  ;;  %v21123_v11 = vld [vmem:[#allocation3 + $0x286c] ss:$16 sps:$4 sm:$0xff]  }
 0x6c0   : > { %15244 = vmatpush2.bf16.msra.mxu1 %v21052_v54  ;;  %15274 = vmatprep.subr.bf16.mxu0 %v21063_v28  ;;  %v21120_v54 = vld [vmem:[#allocation3 + $0x274c] ss:$16 sps:$4 sm:$0xff]   ;;  %v21121_v28 = vld [vmem:[#allocation3 + $0x2868] ss:$16 sps:$4 sm:$0xff]  }
 0x6c1   : > { %15245 = vmatprep.subr.bf16.mxu1 %v21060_v27  ;;  %v21118_v27 = vld [vmem:[#allocation3 + $0x2748] ss:$16 sps:$4 sm:$0xff]  }
 0x6c3   : > { %15275 = vmatpush1.bf16.msra.mxu0 %v21061_v24  ;;  %v21129_v24 = vld [vmem:[#allocation3 + $0x284c] ss:$16 sps:$4 sm:$0xff]  }
 0x6c4   : > { %15246 = vmatpush2.bf16.msra.mxu1 %v21058_v51  ;;  %15276 = vmatprep.subr.bf16.mxu0 %v21069_v5  ;;  %v21126_v51 = vld [vmem:[#allocation3 + $0x272c] ss:$16 sps:$4 sm:$0xff]   ;;  %v21127_v5 = vld [vmem:[#allocation3 + $0x2848] ss:$16 sps:$4 sm:$0xff]  }
 0x6c5   : > { %15247 = vmatprep.subr.bf16.mxu1 %v21066_v21  ;;  %v21124_v21 = vld [vmem:[#allocation3 + $0x2728] ss:$16 sps:$4 sm:$0xff]  }
 0x6c7   : > { %15277 = vmatpush1.bf16.msra.mxu0 %v21067_v14  ;;  %v21135_v14 = vld [vmem:[#allocation3 + $0x282c] ss:$16 sps:$4 sm:$0xff]  }
 0x6c8   : > { %15248 = vmatpush2.bf16.msra.mxu1 %v21064_v37  ;;  %15278 = vmatprep.subr.bf16.mxu0 %v21075_v47  ;;  %v21132_v37 = vld [vmem:[#allocation3 + $0x270c] ss:$16 sps:$4 sm:$0xff]   ;;  %v21133_v47 = vld [vmem:[#allocation3 + $0x2828] ss:$16 sps:$4 sm:$0xff]  }
 0x6c9   : > { %15249 = vmatprep.subr.bf16.mxu1 %v21072_v20  ;;  %v21130_v20 = vld [vmem:[#allocation3 + $0x2708] ss:$16 sps:$4 sm:$0xff]  }
 0x6cb   : > { %15279 = vmatpush1.bf16.msra.mxu0 %v21073_v35  ;;  %v21141_v35 = vld [vmem:[#allocation3 + $0x2aec] ss:$16 sps:$4 sm:$0xff]  }
 0x6cc   : > { %15250 = vmatpush2.bf16.msra.mxu1 %v21070_v6  ;;  %15280 = vmatprep.subr.bf16.mxu0 %v21081_v59  ;;  %v21138_v6 = vld [vmem:[#allocation3 + $0x280c] ss:$16 sps:$4 sm:$0xff]   ;;  %v21139_v59 = vld [vmem:[#allocation3 + $0x2ae8] ss:$16 sps:$4 sm:$0xff]  }
 0x6cd   : > { %15251 = vmatprep.subr.bf16.mxu1 %v21078_v25  ;;  %v21136_v25 = vld [vmem:[#allocation3 + $0x2808] ss:$16 sps:$4 sm:$0xff]  }
 0x6cf   : > { %15281 = vmatpush1.bf16.msra.mxu0 %v21079_v30  ;;  %v21147_v30 = vld [vmem:[#allocation3 + $0x2acc] ss:$16 sps:$4 sm:$0xff]  }
 0x6d0   : > { %15252 = vmatpush2.bf16.msra.mxu1 %v21076_v48  ;;  %15282 = vmatprep.subr.bf16.mxu0 %v21087_v46  ;;  %v21144_v48 = vld [vmem:[#allocation3 + $0x29ec] ss:$16 sps:$4 sm:$0xff]   ;;  %v21142_v46 = vld [vmem:[#allocation3 + $0x29e8] ss:$16 sps:$4 sm:$0xff]  }
 0x6d1   : > { %15253 = vmatprep.subr.bf16.mxu1 %v21084_v22  ;;  %v23221_v22 = vld [vmem:[#allocation33_spill] sm:$0xff] }
 0x6d3   : > { %15283 = vmatpush1.bf16.msra.mxu0 %v21085_v52  ;;  %v21150_v52 = vld [vmem:[#allocation3 + $0x29cc] ss:$16 sps:$4 sm:$0xff]  }
 0x6d4   : > { %15254 = vmatpush2.bf16.msra.mxu1 %v21082_v49  ;;  %15284 = vmatprep.subr.bf16.mxu0 %v21093_v17  ;;  %v21145_v49 = vld [vmem:[#allocation3 + $0x2ac8] ss:$16 sps:$4 sm:$0xff]   ;;  %v23222_v17 = vld [vmem:[#allocation37_spill] sm:$0xff] }
 0x6d5   : > { %15255 = vmatprep.subr.bf16.mxu1 %v21090_v8  ;;  %v21153_v8 = vld [vmem:[#allocation3 + $0x2aac] ss:$16 sps:$4 sm:$0xff]  }
 0x6d7   : > { %15285 = vmatpush2.bf16.msra.mxu0 %v21091_v3  ;;  %v21151_v3 = vld [vmem:[#allocation3 + $0x2aa8] ss:$16 sps:$4 sm:$0xff]  }
 0x6d8   : > { %15256 = vmatpush2.bf16.msra.mxu1 %v21088_v57  ;;  %15286 = vmatprep.subr.bf16.mxu0 %v21096_v10  ;;  %v21148_v57 = vld [vmem:[#allocation3 + $0x29c8] ss:$16 sps:$4 sm:$0xff]   ;;  %v21156_v10 = vld [vmem:[#allocation3 + $0x29ac] ss:$16 sps:$4 sm:$0xff]  }
 0x6d9   : > { %15311 = vmatprep.subr.bf16.mxu1 %v21099_v31  ;;  %v21159_v31 = vld [vmem:[#allocation3 + $0x2a8c] ss:$16 sps:$4 sm:$0xff]  }
 0x6db   : > { %15258 = vmatmul.mubr.bf16.vlgmr.msra.gmra.mxu1 %v22326_v34  ;;  %15287 = vmatpush2.bf16.msra.mxu0 %v21094_v56  ;;  %v21112_v34 = vld [vmem:[#allocation3 + $0x2768] ss:$16 sps:$4 sm:$0xff]  }
 0x6dc   : > { %15312 = vmatpush1.bf16.msra.mxu1 %v21097_v55  ;;  %15288 = vmatprep.subr.bf16.mxu0 %v21102_v44  ;;  %v21154_v56 = vld [vmem:[#allocation3 + $0x29a8] ss:$16 sps:$4 sm:$0xff]   ;;  %v21162_v44 = vld [vmem:[#allocation3 + $0x298c] ss:$16 sps:$4 sm:$0xff]  }
 0x6dd   : > { %15313 = vmatprep.subr.bf16.mxu1 %v21105_v2  ;;  %15343 = vmatprep.mubr.bf16.mxu1 %v23220_v16  ;;  %v21157_v55 = vld [vmem:[#allocation3 + $0x2a88] ss:$16 sps:$4 sm:$0xff]   ;;  %v21165_v2 = vld [vmem:[#allocation3 + $0x2a6c] ss:$16 sps:$4 sm:$0xff]  }
 0x6de   : > { %v21166_v16 = vld [vmem:[#allocation3 + $0x2968] ss:$16 sps:$4 sm:$0xff]  }
 0x6df   : > { %15289 = vmatpush2.bf16.msra.mxu0 %v21100_v41  ;;  %v21160_v41 = vld [vmem:[#allocation3 + $0x2988] ss:$16 sps:$4 sm:$0xff]  }
 0x6e0   : > { %15314 = vmatpush1.bf16.msra.mxu1 %v21103_v38  ;;  %15290 = vmatprep.subr.bf16.mxu0 %v21108_v9  ;;  %v21163_v38 = vld [vmem:[#allocation3 + $0x2a68] ss:$16 sps:$4 sm:$0xff]   ;;  %v21168_v9 = vld [vmem:[#allocation3 + $0x296c] ss:$16 sps:$4 sm:$0xff]  }
 0x6e1   : > { %15315 = vmatprep.subr.bf16.mxu1 %v21111_v15  ;;  %v21171_v15 = vld [vmem:[#allocation3 + $0x2a4c] ss:$16 sps:$4 sm:$0xff]  }
 0x6e3   : > { %15291 = vmatpush2.bf16.msra.mxu0 %v21106_v26  ;;  %v21169_v26 = vld [vmem:[#allocation3 + $0x2a48] ss:$16 sps:$4 sm:$0xff]  }
 0x6e4   : > { %15316 = vmatpush1.bf16.msra.mxu1 %v21109_v43  ;;  %15292 = vmatprep.subr.bf16.mxu0 %v21114_v12  ;;  %v21174_v43 = vld [vmem:[#allocation3 + $0x294c] ss:$16 sps:$4 sm:$0xff]  }
 0x6e5   : > { %15317 = vmatprep.subr.bf16.mxu1 %v21117_v60  ;;  %v21177_v12 = vld [vmem:[#allocation3 + $0x2a2c] ss:$16 sps:$4 sm:$0xff]   ;;  %v21172_v60 = vld [vmem:[#allocation3 + $0x2948] ss:$16 sps:$4 sm:$0xff]  }
 0x6e7   : > { %15293 = vmatpush2.bf16.msra.mxu0 %v21112_v34  ;;  %v21175_v34 = vld [vmem:[#allocation3 + $0x2a28] ss:$16 sps:$4 sm:$0xff]  }
 0x6e8   : > { %15318 = vmatpush1.bf16.msra.mxu1 %v21115_v7  ;;  %15294 = vmatprep.subr.bf16.mxu0 %v21120_v54  ;;  %v21180_v7 = vld [vmem:[#allocation3 + $0x292c] ss:$16 sps:$4 sm:$0xff]  }
 0x6e9   : > { %15319 = vmatprep.subr.bf16.mxu1 %v21123_v11  ;;  %v21183_v54 = vld [vmem:[#allocation3 + $0x2a0c] ss:$16 sps:$4 sm:$0xff]   ;;  %v21178_v11 = vld [vmem:[#allocation3 + $0x2928] ss:$16 sps:$4 sm:$0xff]  }
 0x6eb   : > { %15295 = vmatpush2.bf16.msra.mxu0 %v21118_v27  ;;  %v21181_v27 = vld [vmem:[#allocation3 + $0x2a08] ss:$16 sps:$4 sm:$0xff]  }
 0x6ec   : > { %15320 = vmatpush1.bf16.msra.mxu1 %v21121_v28  ;;  %15296 = vmatprep.subr.bf16.mxu0 %v21126_v51  ;;  %v21186_v28 = vld [vmem:[#allocation3 + $0x290c] ss:$16 sps:$4 sm:$0xff]  }
 0x6ed   : > { %15321 = vmatprep.subr.bf16.mxu1 %v21129_v24  ;;  %v21189_v51 = vld [vmem:[#allocation3 + $0x2bec] ss:$16 sps:$4 sm:$0xff]   ;;  %v21184_v24 = vld [vmem:[#allocation3 + $0x2908] ss:$16 sps:$4 sm:$0xff]  }
 0x6ef   : > { %15297 = vmatpush2.bf16.msra.mxu0 %v21124_v21  ;;  %v21187_v21 = vld [vmem:[#allocation3 + $0x2be8] ss:$16 sps:$4 sm:$0xff]  }
 0x6f0   : > { %15322 = vmatpush1.bf16.msra.mxu1 %v21127_v5  ;;  %15298 = vmatprep.subr.bf16.mxu0 %v21132_v37  ;;  %v21192_v5 = vld [vmem:[#allocation3 + $0x2bcc] ss:$16 sps:$4 sm:$0xff]  }
 0x6f1   : > { %15323 = vmatprep.subr.bf16.mxu1 %v21135_v14  ;;  %v21195_v37 = vld [vmem:[#allocation3 + $0x2cec] ss:$16 sps:$4 sm:$0xff]   ;;  %v21190_v14 = vld [vmem:[#allocation3 + $0x2bc8] ss:$16 sps:$4 sm:$0xff]  }
 0x6f3   : > { %15299 = vmatpush2.bf16.msra.mxu0 %v21130_v20  ;;  %v21193_v20 = vld [vmem:[#allocation3 + $0x2ce8] ss:$16 sps:$4 sm:$0xff]  }
 0x6f4   : > { %15324 = vmatpush1.bf16.msra.mxu1 %v21133_v47  ;;  %15354 = vmatprep.subr.bf16.mxu0 %v21141_v35  ;;  %v21198_v47 = vld [vmem:[#allocation3 + $0x2bac] ss:$16 sps:$4 sm:$0xff]  }
 0x6f5   : > { %15325 = vmatprep.subr.bf16.mxu1 %v21138_v6  ;;  %v21201_v6 = vld [vmem:[#allocation3 + $0x2ccc] ss:$16 sps:$4 sm:$0xff]  }
 0x6f6   : > { %15301 = vmatmul.mubr.bf16.vlgmr.msra.gmra.mxu0 %v23221_v22  ;;  %v23223_v35 = vld [vmem:[#allocation40_spill] sm:$0xff] }
 0x6f7   : > { %15355 = vmatpush1.bf16.msra.mxu0 %v21139_v59  ;;  %15386 = vmatprep.mubr.bf16.mxu0 %v23222_v17  ;;  %v21199_v59 = vld [vmem:[#allocation3 + $0x2cc8] ss:$16 sps:$4 sm:$0xff]  }
 0x6f8   : > { %15326 = vmatpush1.bf16.msra.mxu1 %v21136_v25  ;;  %15356 = vmatprep.subr.bf16.mxu0 %v21147_v30  ;;  %v21196_v25 = vld [vmem:[#allocation3 + $0x2ba8] ss:$16 sps:$4 sm:$0xff]   ;;  %v21207_v30 = vld [vmem:[#allocation3 + $0x2cac] ss:$16 sps:$4 sm:$0xff]  }
 0x6f9   : > { %15327 = vmatprep.subr.bf16.mxu1 %v21144_v48  ;;  %v21204_v48 = vld [vmem:[#allocation3 + $0x2b8c] ss:$16 sps:$4 sm:$0xff]   ;;  %v21208_v17 = vld [vmem:[#allocation3 + $0x2b68] ss:$16 sps:$4 sm:$0xff]  }
 0x6fa   : > { %v23224_v22 = vld [vmem:[#allocation44_spill] sm:$0xff] }
 0x6fb   : > { %15357 = vmatpush1.bf16.msra.mxu0 %v21145_v49  ;;  %v21205_v49 = vld [vmem:[#allocation3 + $0x2ca8] ss:$16 sps:$4 sm:$0xff]  }
 0x6fc   : > { %15328 = vmatpush2.bf16.msra.mxu1 %v21142_v46  ;;  %15358 = vmatprep.subr.bf16.mxu0 %v21153_v8  ;;  %v21202_v46 = vld [vmem:[#allocation3 + $0x2b88] ss:$16 sps:$4 sm:$0xff]   ;;  %v21213_v8 = vld [vmem:[#allocation3 + $0x2c8c] ss:$16 sps:$4 sm:$0xff]  }
 0x6fd   : > { %15329 = vmatprep.subr.bf16.mxu1 %v21150_v52  ;;  %v21210_v52 = vld [vmem:[#allocation3 + $0x2b6c] ss:$16 sps:$4 sm:$0xff]  }
 0x6ff   : > { %15359 = vmatpush1.bf16.msra.mxu0 %v21151_v3  ;;  %v21216_v3 = vld [vmem:[#allocation3 + $0x2b4c] ss:$16 sps:$4 sm:$0xff]  }
 0x700   : > { %15330 = vmatpush2.bf16.msra.mxu1 %v21148_v57  ;;  %15360 = vmatprep.subr.bf16.mxu0 %v21159_v31  ;;  %v21211_v57 = vld [vmem:[#allocation3 + $0x2c88] ss:$16 sps:$4 sm:$0xff]  }
 0x701   : > { %15331 = vmatprep.subr.bf16.mxu1 %v21156_v10  ;;  %v21219_v10 = vld [vmem:[#allocation3 + $0x2c6c] ss:$16 sps:$4 sm:$0xff]   ;;  %v21214_v31 = vld [vmem:[#allocation3 + $0x2b48] ss:$16 sps:$4 sm:$0xff]  }
 0x703   : > { %15361 = vmatpush1.bf16.msra.mxu0 %v21157_v55  ;;  %v21222_v55 = vld [vmem:[#allocation3 + $0x2b2c] ss:$16 sps:$4 sm:$0xff]  }
 0x704   : > { %15332 = vmatpush2.bf16.msra.mxu1 %v21154_v56  ;;  %15362 = vmatprep.subr.bf16.mxu0 %v21165_v2  ;;  %v21217_v56 = vld [vmem:[#allocation3 + $0x2c68] ss:$16 sps:$4 sm:$0xff]  }
 0x705   : > { %15333 = vmatprep.subr.bf16.mxu1 %v21162_v44  ;;  %v21225_v44 = vld [vmem:[#allocation3 + $0x2c4c] ss:$16 sps:$4 sm:$0xff]   ;;  %v21220_v2 = vld [vmem:[#allocation3 + $0x2b28] ss:$16 sps:$4 sm:$0xff]  }
 0x707   : > { %15363 = vmatpush1.bf16.msra.mxu0 %v21163_v38  ;;  %v21228_v38 = vld [vmem:[#allocation3 + $0x2b0c] ss:$16 sps:$4 sm:$0xff]  }
 0x708   : > { %15334 = vmatpush2.bf16.msra.mxu1 %v21160_v41  ;;  %15364 = vmatprep.subr.bf16.mxu0 %v21171_v15  ;;  %v21223_v41 = vld [vmem:[#allocation3 + $0x2c48] ss:$16 sps:$4 sm:$0xff]  }
 0x709   : > { %15335 = vmatprep.subr.bf16.mxu1 %v21168_v9  ;;  %v21231_v9 = vld [vmem:[#allocation3 + $0x2c2c] ss:$16 sps:$4 sm:$0xff]   ;;  %v21226_v15 = vld [vmem:[#allocation3 + $0x2b08] ss:$16 sps:$4 sm:$0xff]  }
 0x70b   : > { %15365 = vmatpush1.bf16.msra.mxu0 %v21169_v26  ;;  %v21234_v26 = vld [vmem:[#allocation3 + $0x2c0c] ss:$16 sps:$4 sm:$0xff]  }
 0x70c   : > { %15336 = vmatpush2.bf16.msra.mxu1 %v21166_v16  ;;  %15366 = vmatprep.subr.bf16.mxu0 %v21177_v12  ;;  %v21229_v16 = vld [vmem:[#allocation3 + $0x2c28] ss:$16 sps:$4 sm:$0xff]  }
 0x70d   : > { %15337 = vmatprep.subr.bf16.mxu1 %v21174_v43  ;;  %v21237_v43 = vld [vmem:[#allocation3 + $0x2eec] ss:$16 sps:$4 sm:$0xff]   ;;  %v21232_v12 = vld [vmem:[#allocation3 + $0x2c08] ss:$16 sps:$4 sm:$0xff]  }
 0x70f   : > { %15367 = vmatpush1.bf16.msra.mxu0 %v21175_v34  ;;  %v21240_v34 = vld [vmem:[#allocation3 + $0x2dec] ss:$16 sps:$4 sm:$0xff]  }
 0x710   : > { %15338 = vmatpush2.bf16.msra.mxu1 %v21172_v60  ;;  %15368 = vmatprep.subr.bf16.mxu0 %v21183_v54  ;;  %v21235_v60 = vld [vmem:[#allocation3 + $0x2ee8] ss:$16 sps:$4 sm:$0xff]   ;;  %v23225_v54 = vld [vmem:[#allocation41_spill] sm:$0xff] }
 0x711   : > { %15339 = vmatprep.subr.bf16.mxu1 %v21180_v7  ;;  %v21243_v7 = vld [vmem:[#allocation3 + $0x2ecc] ss:$16 sps:$4 sm:$0xff]  }
 0x713   : > { %15369 = vmatpush1.bf16.msra.mxu0 %v21181_v27  ;;  %v21241_v27 = vld [vmem:[#allocation3 + $0x2ec8] ss:$16 sps:$4 sm:$0xff]  }
 0x714   : > { %15340 = vmatpush2.bf16.msra.mxu1 %v21178_v11  ;;  %15370 = vmatprep.subr.bf16.mxu0 %v21189_v51  ;;  %v21238_v11 = vld [vmem:[#allocation3 + $0x2de8] ss:$16 sps:$4 sm:$0xff]   ;;  %v21249_v51 = vld [vmem:[#allocation3 + $0x2eac] ss:$16 sps:$4 sm:$0xff]  }
 0x715   : > { %15341 = vmatprep.subr.bf16.mxu1 %v21186_v28  ;;  %v21246_v28 = vld [vmem:[#allocation3 + $0x2dcc] ss:$16 sps:$4 sm:$0xff]  }
 0x717   : > { %15371 = vmatpush2.bf16.msra.mxu0 %v21187_v21  ;;  %v21244_v21 = vld [vmem:[#allocation3 + $0x2dc8] ss:$16 sps:$4 sm:$0xff]  }
 0x718   : > { %15342 = vmatpush2.bf16.msra.mxu1 %v21184_v24  ;;  %15372 = vmatprep.subr.bf16.mxu0 %v21192_v5  ;;  %v23226_v24 = vld [vmem:[#allocation45_spill] sm:$0xff]  ;;  %v21247_v5 = vld [vmem:[#allocation3 + $0x2ea8] ss:$16 sps:$4 sm:$0xff]  }
 0x719   : > { %15397 = vmatprep.subr.bf16.mxu1 %v21195_v37  ;;  %v21252_v37 = vld [vmem:[#allocation3 + $0x2dac] ss:$16 sps:$4 sm:$0xff]  }
 0x71b   : > { %15344 = vmatmul.mubr.bf16.vlgmr.msra.gmra.mxu1 %v23223_v35  ;;  %15373 = vmatpush2.bf16.msra.mxu0 %v21190_v14  ;;  %v21255_v14 = vld [vmem:[#allocation3 + $0x2e8c] ss:$16 sps:$4 sm:$0xff]  }
 0x71c   : > { %15398 = vmatpush1.bf16.msra.mxu1 %v21193_v20  ;;  %15374 = vmatprep.subr.bf16.mxu0 %v21198_v47  ;;  %v21250_v20 = vld [vmem:[#allocation3 + $0x2da8] ss:$16 sps:$4 sm:$0xff]   ;;  %v21261_v35 = vld [vmem:[#allocation3 + $0x2e6c] ss:$16 sps:$4 sm:$0xff]  }
 0x71d   : > { %15399 = vmatprep.subr.bf16.mxu1 %v21201_v6  ;;  %15429 = vmatprep.mubr.bf16.mxu1 %v23224_v22  ;;  %v21253_v47 = vld [vmem:[#allocation3 + $0x2e88] ss:$16 sps:$4 sm:$0xff]   ;;  %v21258_v6 = vld [vmem:[#allocation3 + $0x2d8c] ss:$16 sps:$4 sm:$0xff]  }
 0x71e   : > { %v21262_v22 = vld [vmem:[#allocation3 + $0x2d68] ss:$16 sps:$4 sm:$0xff]  }
 0x71f   : > { %15375 = vmatpush2.bf16.msra.mxu0 %v21196_v25  ;;  %v21256_v25 = vld [vmem:[#allocation3 + $0x2d88] ss:$16 sps:$4 sm:$0xff]  }
 0x720   : > { %15400 = vmatpush1.bf16.msra.mxu1 %v21199_v59  ;;  %15376 = vmatprep.subr.bf16.mxu0 %v21204_v48  ;;  %v21259_v59 = vld [vmem:[#allocation3 + $0x2e68] ss:$16 sps:$4 sm:$0xff]   ;;  %v21264_v48 = vld [vmem:[#allocation3 + $0x2d6c] ss:$16 sps:$4 sm:$0xff]  }
 0x721   : > { %15401 = vmatprep.subr.bf16.mxu1 %v21207_v30  ;;  %v21267_v30 = vld [vmem:[#allocation3 + $0x2e4c] ss:$16 sps:$4 sm:$0xff]  }
 0x723   : > { %15377 = vmatpush2.bf16.msra.mxu0 %v21202_v46  ;;  %v21265_v46 = vld [vmem:[#allocation3 + $0x2e48] ss:$16 sps:$4 sm:$0xff]  }
 0x724   : > { %15402 = vmatpush1.bf16.msra.mxu1 %v21205_v49  ;;  %15378 = vmatprep.subr.bf16.mxu0 %v21210_v52  ;;  %v21270_v49 = vld [vmem:[#allocation3 + $0x2d4c] ss:$16 sps:$4 sm:$0xff]  }
 0x725   : > { %15403 = vmatprep.subr.bf16.mxu1 %v21213_v8  ;;  %v21273_v52 = vld [vmem:[#allocation3 + $0x2e2c] ss:$16 sps:$4 sm:$0xff]   ;;  %v21268_v8 = vld [vmem:[#allocation3 + $0x2d48] ss:$16 sps:$4 sm:$0xff]  }
 0x727   : > { %15379 = vmatpush2.bf16.msra.mxu0 %v21208_v17  ;;  %v21271_v17 = vld [vmem:[#allocation3 + $0x2e28] ss:$16 sps:$4 sm:$0xff]  }
 0x728   : > { %15404 = vmatpush1.bf16.msra.mxu1 %v21211_v57  ;;  %15380 = vmatprep.subr.bf16.mxu0 %v21216_v3  ;;  %v21276_v57 = vld [vmem:[#allocation3 + $0x2d2c] ss:$16 sps:$4 sm:$0xff]  }
 0x729   : > { %15405 = vmatprep.subr.bf16.mxu1 %v21219_v10  ;;  %v21279_v3 = vld [vmem:[#allocation3 + $0x2e0c] ss:$16 sps:$4 sm:$0xff]   ;;  %v21274_v10 = vld [vmem:[#allocation3 + $0x2d28] ss:$16 sps:$4 sm:$0xff]  }
 0x72b   : > { %15381 = vmatpush2.bf16.msra.mxu0 %v21214_v31  ;;  %v21277_v31 = vld [vmem:[#allocation3 + $0x2e08] ss:$16 sps:$4 sm:$0xff]  }
 0x72c   : > { %15406 = vmatpush1.bf16.msra.mxu1 %v21217_v56  ;;  %15382 = vmatprep.subr.bf16.mxu0 %v21222_v55  ;;  %v21282_v56 = vld [vmem:[#allocation3 + $0x2d0c] ss:$16 sps:$4 sm:$0xff]  }
 0x72d   : > { %15407 = vmatprep.subr.bf16.mxu1 %v21225_v44  ;;  %v21285_v55 = vld [vmem:[#allocation3 + $0x2fec] ss:$16 sps:$4 sm:$0xff]   ;;  %v21280_v44 = vld [vmem:[#allocation3 + $0x2d08] ss:$16 sps:$4 sm:$0xff]  }
 0x72f   : > { %15383 = vmatpush2.bf16.msra.mxu0 %v21220_v2  ;;  %v21283_v2 = vld [vmem:[#allocation3 + $0x2fe8] ss:$16 sps:$4 sm:$0xff]  }
 0x730   : > { %15408 = vmatpush1.bf16.msra.mxu1 %v21223_v41  ;;  %15384 = vmatprep.subr.bf16.mxu0 %v21228_v38  ;;  %v21288_v41 = vld [vmem:[#allocation3 + $0x2fcc] ss:$16 sps:$4 sm:$0xff]  }
 0x731   : > { %15409 = vmatprep.subr.bf16.mxu1 %v21231_v9  ;;  %v21291_v38 = vld [vmem:[#allocation3 + $0x30ec] ss:$16 sps:$4 sm:$0xff]   ;;  %v21286_v9 = vld [vmem:[#allocation3 + $0x2fc8] ss:$16 sps:$4 sm:$0xff]  }
 0x733   : > { %15385 = vmatpush2.bf16.msra.mxu0 %v21226_v15  ;;  %v21289_v15 = vld [vmem:[#allocation3 + $0x30e8] ss:$16 sps:$4 sm:$0xff]  }
 0x734   : > { %15410 = vmatpush1.bf16.msra.mxu1 %v21229_v16  ;;  %15440 = vmatprep.subr.bf16.mxu0 %v21237_v43  ;;  %v21294_v16 = vld [vmem:[#allocation3 + $0x2fac] ss:$16 sps:$4 sm:$0xff]  }
 0x735   : > { %15411 = vmatprep.subr.bf16.mxu1 %v21234_v26  ;;  %v21297_v26 = vld [vmem:[#allocation3 + $0x30cc] ss:$16 sps:$4 sm:$0xff]  }
 0x736   : > { %15387 = vmatmul.mubr.bf16.vlgmr.msra.gmra.mxu0 %v23225_v54  ;;  %v23227_v43 = vld [vmem:[#allocation48_spill] sm:$0xff]  ;;  %v23228_v54 = vld [vmem:[#allocation51_spill] sm:$0xff] }
 0x737   : > { %15441 = vmatpush1.bf16.msra.mxu0 %v21235_v60  ;;  %15472 = vmatprep.mubr.bf16.mxu0 %v23226_v24  ;;  %v21295_v60 = vld [vmem:[#allocation3 + $0x30c8] ss:$16 sps:$4 sm:$0xff]  }
 0x738   : > { %15412 = vmatpush1.bf16.msra.mxu1 %v21232_v12  ;;  %15442 = vmatprep.subr.bf16.mxu0 %v21243_v7  ;;  %v21292_v12 = vld [vmem:[#allocation3 + $0x2fa8] ss:$16 sps:$4 sm:$0xff]   ;;  %v21303_v7 = vld [vmem:[#allocation3 + $0x30ac] ss:$16 sps:$4 sm:$0xff]  }
 0x739   : > { %15413 = vmatprep.subr.bf16.mxu1 %v21240_v34  ;;  %v21300_v34 = vld [vmem:[#allocation3 + $0x2f8c] ss:$16 sps:$4 sm:$0xff]   ;;  %v21304_v24 = vld [vmem:[#allocation3 + $0x2f68] ss:$16 sps:$4 sm:$0xff]  }
 0x73b   : > { %15443 = vmatpush1.bf16.msra.mxu0 %v21241_v27  ;;  %v21301_v27 = vld [vmem:[#allocation3 + $0x30a8] ss:$16 sps:$4 sm:$0xff]  }
 0x73c   : > { %15414 = vmatpush2.bf16.msra.mxu1 %v21238_v11  ;;  %15444 = vmatprep.subr.bf16.mxu0 %v21249_v51  ;;  %v21298_v11 = vld [vmem:[#allocation3 + $0x2f88] ss:$16 sps:$4 sm:$0xff]   ;;  %v21309_v51 = vld [vmem:[#allocation3 + $0x308c] ss:$16 sps:$4 sm:$0xff]  }
 0x73d   : > { %15415 = vmatprep.subr.bf16.mxu1 %v21246_v28  ;;  %v21306_v28 = vld [vmem:[#allocation3 + $0x2f6c] ss:$16 sps:$4 sm:$0xff]  }
 0x73f   : > { %15445 = vmatpush1.bf16.msra.mxu0 %v21247_v5  ;;  %v21312_v5 = vld [vmem:[#allocation3 + $0x2f4c] ss:$16 sps:$4 sm:$0xff]  }
 0x740   : > { %15416 = vmatpush2.bf16.msra.mxu1 %v21244_v21  ;;  %15446 = vmatprep.subr.bf16.mxu0 %v21255_v14  ;;  %v21307_v21 = vld [vmem:[#allocation3 + $0x3088] ss:$16 sps:$4 sm:$0xff]  }
 0x741   : > { %15417 = vmatprep.subr.bf16.mxu1 %v21252_v37  ;;  %v21315_v37 = vld [vmem:[#allocation3 + $0x306c] ss:$16 sps:$4 sm:$0xff]   ;;  %v21310_v14 = vld [vmem:[#allocation3 + $0x2f48] ss:$16 sps:$4 sm:$0xff]  }
 0x743   : > { %15447 = vmatpush1.bf16.msra.mxu0 %v21253_v47  ;;  %v21318_v47 = vld [vmem:[#allocation3 + $0x2f2c] ss:$16 sps:$4 sm:$0xff]  }
 0x744   : > { %15418 = vmatpush2.bf16.msra.mxu1 %v21250_v20  ;;  %15448 = vmatprep.subr.bf16.mxu0 %v21261_v35  ;;  %v21313_v20 = vld [vmem:[#allocation3 + $0x3068] ss:$16 sps:$4 sm:$0xff]  }
 0x745   : > { %15419 = vmatprep.subr.bf16.mxu1 %v21258_v6  ;;  %v21321_v6 = vld [vmem:[#allocation3 + $0x304c] ss:$16 sps:$4 sm:$0xff]   ;;  %v21316_v35 = vld [vmem:[#allocation3 + $0x2f28] ss:$16 sps:$4 sm:$0xff]  }
 0x747   : > { %15449 = vmatpush1.bf16.msra.mxu0 %v21259_v59  ;;  %v21324_v59 = vld [vmem:[#allocation3 + $0x2f0c] ss:$16 sps:$4 sm:$0xff]  }
 0x748   : > { %15420 = vmatpush2.bf16.msra.mxu1 %v21256_v25  ;;  %15450 = vmatprep.subr.bf16.mxu0 %v21267_v30  ;;  %v21319_v25 = vld [vmem:[#allocation3 + $0x3048] ss:$16 sps:$4 sm:$0xff]  }
 0x749   : > { %15421 = vmatprep.subr.bf16.mxu1 %v21264_v48  ;;  %v21327_v48 = vld [vmem:[#allocation3 + $0x302c] ss:$16 sps:$4 sm:$0xff]   ;;  %v21322_v30 = vld [vmem:[#allocation3 + $0x2f08] ss:$16 sps:$4 sm:$0xff]  }
 0x74b   : > { %15451 = vmatpush1.bf16.msra.mxu0 %v21265_v46  ;;  %v21330_v46 = vld [vmem:[#allocation3 + $0x300c] ss:$16 sps:$4 sm:$0xff]  }
 0x74c   : > { %15422 = vmatpush2.bf16.msra.mxu1 %v21262_v22  ;;  %15452 = vmatprep.subr.bf16.mxu0 %v21273_v52  ;;  %v21325_v22 = vld [vmem:[#allocation3 + $0x3028] ss:$16 sps:$4 sm:$0xff]  }
 0x74d   : > { %15423 = vmatprep.subr.bf16.mxu1 %v21270_v49  ;;  %v21333_v49 = vld [vmem:[#allocation3 + $0x32ec] ss:$16 sps:$4 sm:$0xff]   ;;  %v21328_v52 = vld [vmem:[#allocation3 + $0x3008] ss:$16 sps:$4 sm:$0xff]  }
 0x74f   : > { %15453 = vmatpush1.bf16.msra.mxu0 %v21271_v17  ;;  %v21336_v17 = vld [vmem:[#allocation3 + $0x31ec] ss:$16 sps:$4 sm:$0xff]  }
 0x750   : > { %15424 = vmatpush2.bf16.msra.mxu1 %v21268_v8  ;;  %15454 = vmatprep.subr.bf16.mxu0 %v21279_v3  ;;  %v21331_v8 = vld [vmem:[#allocation3 + $0x32e8] ss:$16 sps:$4 sm:$0xff]   ;;  %v23229_v3 = vld [vmem:[#allocation49_spill] sm:$0xff] }
 0x751   : > { %15425 = vmatprep.subr.bf16.mxu1 %v21276_v57  ;;  %v21339_v57 = vld [vmem:[#allocation3 + $0x32cc] ss:$16 sps:$4 sm:$0xff]  }
 0x753   : > { %15455 = vmatpush1.bf16.msra.mxu0 %v21277_v31  ;;  %v21337_v31 = vld [vmem:[#allocation3 + $0x32c8] ss:$16 sps:$4 sm:$0xff]  }
 0x754   : > { %15426 = vmatpush2.bf16.msra.mxu1 %v21274_v10  ;;  %15456 = vmatprep.subr.bf16.mxu0 %v21285_v55  ;;  %v21334_v10 = vld [vmem:[#allocation3 + $0x31e8] ss:$16 sps:$4 sm:$0xff]   ;;  %v21345_v55 = vld [vmem:[#allocation3 + $0x32ac] ss:$16 sps:$4 sm:$0xff]  }
 0x755   : > { %15427 = vmatprep.subr.bf16.mxu1 %v21282_v56  ;;  %v21342_v56 = vld [vmem:[#allocation3 + $0x31cc] ss:$16 sps:$4 sm:$0xff]  }
 0x757   : > { %15457 = vmatpush2.bf16.msra.mxu0 %v21283_v2  ;;  %v21340_v2 = vld [vmem:[#allocation3 + $0x31c8] ss:$16 sps:$4 sm:$0xff]  }
 0x758   : > { %15428 = vmatpush2.bf16.msra.mxu1 %v21280_v44  ;;  %15458 = vmatprep.subr.bf16.mxu0 %v21288_v41  ;;  %v23230_v44 = vld [vmem:[#allocation52_spill] sm:$0xff] }
 0x759   : > { %15483 = vmatprep.subr.bf16.mxu1 %v21291_v38  ;;  %v21343_v41 = vld [vmem:[#allocation3 + $0x32a8] ss:$16 sps:$4 sm:$0xff]   ;;  %v21348_v38 = vld [vmem:[#allocation3 + $0x31ac] ss:$16 sps:$4 sm:$0xff]  }
 0x75b   : > { %15430 = vmatmul.mubr.bf16.vlgmr.msra.gmra.mxu1 %v23227_v43  ;;  %15459 = vmatpush2.bf16.msra.mxu0 %v21286_v9  ;;  %v21351_v9 = vld [vmem:[#allocation3 + $0x328c] ss:$16 sps:$4 sm:$0xff]  }
 0x75c   : > { %15484 = vmatpush1.bf16.msra.mxu1 %v21289_v15  ;;  %15460 = vmatprep.subr.bf16.mxu0 %v21294_v16  ;;  %v21346_v15 = vld [vmem:[#allocation3 + $0x31a8] ss:$16 sps:$4 sm:$0xff]   ;;  %v21357_v43 = vld [vmem:[#allocation3 + $0x326c] ss:$16 sps:$4 sm:$0xff]  }
 0x75d   : > { %15485 = vmatprep.subr.bf16.mxu1 %v21297_v26  ;;  %15515 = vmatprep.mubr.bf16.mxu1 %v23228_v54  ;;  %v21349_v16 = vld [vmem:[#allocation3 + $0x3288] ss:$16 sps:$4 sm:$0xff]   ;;  %v21354_v26 = vld [vmem:[#allocation3 + $0x318c] ss:$16 sps:$4 sm:$0xff]  }
 0x75e   : > { %v21358_v54 = vld [vmem:[#allocation3 + $0x3168] ss:$16 sps:$4 sm:$0xff]  }
 0x75f   : > { %15461 = vmatpush2.bf16.msra.mxu0 %v21292_v12  ;;  %v21352_v12 = vld [vmem:[#allocation3 + $0x3188] ss:$16 sps:$4 sm:$0xff]  }
 0x760   : > { %15486 = vmatpush1.bf16.msra.mxu1 %v21295_v60  ;;  %15462 = vmatprep.subr.bf16.mxu0 %v21300_v34  ;;  %v21355_v60 = vld [vmem:[#allocation3 + $0x3268] ss:$16 sps:$4 sm:$0xff]   ;;  %v21360_v34 = vld [vmem:[#allocation3 + $0x316c] ss:$16 sps:$4 sm:$0xff]  }
 0x761   : > { %15487 = vmatprep.subr.bf16.mxu1 %v21303_v7  ;;  %v21363_v7 = vld [vmem:[#allocation3 + $0x324c] ss:$16 sps:$4 sm:$0xff]  }
 0x763   : > { %15463 = vmatpush2.bf16.msra.mxu0 %v21298_v11  ;;  %v21361_v11 = vld [vmem:[#allocation3 + $0x3248] ss:$16 sps:$4 sm:$0xff]  }
 0x764   : > { %15488 = vmatpush1.bf16.msra.mxu1 %v21301_v27  ;;  %15464 = vmatprep.subr.bf16.mxu0 %v21306_v28  ;;  %v21366_v27 = vld [vmem:[#allocation3 + $0x314c] ss:$16 sps:$4 sm:$0xff]  }
 0x765   : > { %15489 = vmatprep.subr.bf16.mxu1 %v21309_v51  ;;  %v21369_v28 = vld [vmem:[#allocation3 + $0x322c] ss:$16 sps:$4 sm:$0xff]   ;;  %v21364_v51 = vld [vmem:[#allocation3 + $0x3148] ss:$16 sps:$4 sm:$0xff]  }
 0x767   : > { %15465 = vmatpush2.bf16.msra.mxu0 %v21304_v24  ;;  %v21367_v24 = vld [vmem:[#allocation3 + $0x3228] ss:$16 sps:$4 sm:$0xff]  }
 0x768   : > { %15490 = vmatpush1.bf16.msra.mxu1 %v21307_v21  ;;  %15466 = vmatprep.subr.bf16.mxu0 %v21312_v5  ;;  %v21372_v21 = vld [vmem:[#allocation3 + $0x312c] ss:$16 sps:$4 sm:$0xff]  }
 0x769   : > { %15491 = vmatprep.subr.bf16.mxu1 %v21315_v37  ;;  %v21375_v5 = vld [vmem:[#allocation3 + $0x320c] ss:$16 sps:$4 sm:$0xff]   ;;  %v21370_v37 = vld [vmem:[#allocation3 + $0x3128] ss:$16 sps:$4 sm:$0xff]  }
 0x76b   : > { %15467 = vmatpush2.bf16.msra.mxu0 %v21310_v14  ;;  %v21373_v14 = vld [vmem:[#allocation3 + $0x3208] ss:$16 sps:$4 sm:$0xff]  }
 0x76c   : > { %15492 = vmatpush1.bf16.msra.mxu1 %v21313_v20  ;;  %15468 = vmatprep.subr.bf16.mxu0 %v21318_v47  ;;  %v21378_v20 = vld [vmem:[#allocation3 + $0x310c] ss:$16 sps:$4 sm:$0xff]  }
 0x76d   : > { %15493 = vmatprep.subr.bf16.mxu1 %v21321_v6  ;;  %v21381_v47 = vld [vmem:[#allocation3 + $0x33ec] ss:$16 sps:$4 sm:$0xff]   ;;  %v21376_v6 = vld [vmem:[#allocation3 + $0x3108] ss:$16 sps:$4 sm:$0xff]  }
 0x76f   : > { %15469 = vmatpush2.bf16.msra.mxu0 %v21316_v35  ;;  %v21379_v35 = vld [vmem:[#allocation3 + $0x33e8] ss:$16 sps:$4 sm:$0xff]  }
 0x770   : > { %15494 = vmatpush1.bf16.msra.mxu1 %v21319_v25  ;;  %15470 = vmatprep.subr.bf16.mxu0 %v21324_v59  ;;  %v21384_v25 = vld [vmem:[#allocation3 + $0x33cc] ss:$16 sps:$4 sm:$0xff]  }
 0x771   : > { %15495 = vmatprep.subr.bf16.mxu1 %v21327_v48  ;;  %v21387_v59 = vld [vmem:[#allocation3 + $0x34ec] ss:$16 sps:$4 sm:$0xff]   ;;  %v21382_v48 = vld [vmem:[#allocation3 + $0x33c8] ss:$16 sps:$4 sm:$0xff]  }
 0x773   : > { %15471 = vmatpush2.bf16.msra.mxu0 %v21322_v30  ;;  %v21385_v30 = vld [vmem:[#allocation3 + $0x34e8] ss:$16 sps:$4 sm:$0xff]  }
 0x774   : > { %15496 = vmatpush1.bf16.msra.mxu1 %v21325_v22  ;;  %15526 = vmatprep.subr.bf16.mxu0 %v21333_v49  ;;  %v21390_v22 = vld [vmem:[#allocation3 + $0x33ac] ss:$16 sps:$4 sm:$0xff]   ;;  %v23231_v49 = vld [vmem:[#allocation55_spill] sm:$0xff] }
 0x775   : > { %15497 = vmatprep.subr.bf16.mxu1 %v21330_v46  ;;  %v21393_v46 = vld [vmem:[#allocation3 + $0x34cc] ss:$16 sps:$4 sm:$0xff]  }
 0x776   : > { %15473 = vmatmul.mubr.bf16.vlgmr.msra.gmra.mxu0 %v23229_v3  ;;  %v23232_v3 = vld [vmem:[#allocation58_spill] sm:$0xff] }
 0x777   : > { %15527 = vmatpush1.bf16.msra.mxu0 %v21331_v8  ;;  %15558 = vmatprep.mubr.bf16.mxu0 %v23230_v44  ;;  %v21391_v8 = vld [vmem:[#allocation3 + $0x34c8] ss:$16 sps:$4 sm:$0xff]  }
 0x778   : > { %15498 = vmatpush1.bf16.msra.mxu1 %v21328_v52  ;;  %15528 = vmatprep.subr.bf16.mxu0 %v21339_v57  ;;  %v21388_v52 = vld [vmem:[#allocation3 + $0x33a8] ss:$16 sps:$4 sm:$0xff]   ;;  %v21399_v57 = vld [vmem:[#allocation3 + $0x34ac] ss:$16 sps:$4 sm:$0xff]  }
 0x779   : > { %15499 = vmatprep.subr.bf16.mxu1 %v21336_v17  ;;  %v21396_v17 = vld [vmem:[#allocation3 + $0x338c] ss:$16 sps:$4 sm:$0xff]   ;;  %v21400_v44 = vld [vmem:[#allocation3 + $0x3368] ss:$16 sps:$4 sm:$0xff]  }
 0x77b   : > { %15529 = vmatpush1.bf16.msra.mxu0 %v21337_v31  ;;  %v21397_v31 = vld [vmem:[#allocation3 + $0x34a8] ss:$16 sps:$4 sm:$0xff]  }
 0x77c   : > { %15500 = vmatpush2.bf16.msra.mxu1 %v21334_v10  ;;  %15530 = vmatprep.subr.bf16.mxu0 %v21345_v55  ;;  %v21394_v10 = vld [vmem:[#allocation3 + $0x3388] ss:$16 sps:$4 sm:$0xff]   ;;  %v21405_v55 = vld [vmem:[#allocation3 + $0x348c] ss:$16 sps:$4 sm:$0xff]  }
 0x77d   : > { %15501 = vmatprep.subr.bf16.mxu1 %v21342_v56  ;;  %v21402_v56 = vld [vmem:[#allocation3 + $0x336c] ss:$16 sps:$4 sm:$0xff]  }
 0x77f   : > { %15531 = vmatpush1.bf16.msra.mxu0 %v21343_v41  ;;  %v21408_v41 = vld [vmem:[#allocation3 + $0x334c] ss:$16 sps:$4 sm:$0xff]  }
 0x780   : > { %15502 = vmatpush2.bf16.msra.mxu1 %v21340_v2  ;;  %15532 = vmatprep.subr.bf16.mxu0 %v21351_v9  ;;  %v21403_v2 = vld [vmem:[#allocation3 + $0x3488] ss:$16 sps:$4 sm:$0xff]  }
 0x781   : > { %15503 = vmatprep.subr.bf16.mxu1 %v21348_v38  ;;  %v21411_v38 = vld [vmem:[#allocation3 + $0x346c] ss:$16 sps:$4 sm:$0xff]   ;;  %v21406_v9 = vld [vmem:[#allocation3 + $0x3348] ss:$16 sps:$4 sm:$0xff]  }
 0x783   : > { %15533 = vmatpush1.bf16.msra.mxu0 %v21349_v16  ;;  %v21414_v16 = vld [vmem:[#allocation3 + $0x332c] ss:$16 sps:$4 sm:$0xff]  }
 0x784   : > { %15504 = vmatpush2.bf16.msra.mxu1 %v21346_v15  ;;  %15534 = vmatprep.subr.bf16.mxu0 %v21357_v43  ;;  %v21409_v15 = vld [vmem:[#allocation3 + $0x3468] ss:$16 sps:$4 sm:$0xff]  }
 0x785   : > { %15505 = vmatprep.subr.bf16.mxu1 %v21354_v26  ;;  %v21417_v26 = vld [vmem:[#allocation3 + $0x344c] ss:$16 sps:$4 sm:$0xff]   ;;  %v21412_v43 = vld [vmem:[#allocation3 + $0x3328] ss:$16 sps:$4 sm:$0xff]  }
 0x787   : > { %15535 = vmatpush1.bf16.msra.mxu0 %v21355_v60  ;;  %v21420_v60 = vld [vmem:[#allocation3 + $0x330c] ss:$16 sps:$4 sm:$0xff]  }
 0x788   : > { %15506 = vmatpush2.bf16.msra.mxu1 %v21352_v12  ;;  %15536 = vmatprep.subr.bf16.mxu0 %v21363_v7  ;;  %v21415_v12 = vld [vmem:[#allocation3 + $0x3448] ss:$16 sps:$4 sm:$0xff]  }
 0x789   : > { %15507 = vmatprep.subr.bf16.mxu1 %v21360_v34  ;;  %v21423_v34 = vld [vmem:[#allocation3 + $0x342c] ss:$16 sps:$4 sm:$0xff]   ;;  %v21418_v7 = vld [vmem:[#allocation3 + $0x3308] ss:$16 sps:$4 sm:$0xff]  }
 0x78b   : > { %15537 = vmatpush1.bf16.msra.mxu0 %v21361_v11  ;;  %v21426_v11 = vld [vmem:[#allocation3 + $0x340c] ss:$16 sps:$4 sm:$0xff]  }
 0x78c   : > { %15508 = vmatpush2.bf16.msra.mxu1 %v21358_v54  ;;  %15538 = vmatprep.subr.bf16.mxu0 %v21369_v28  ;;  %v21421_v54 = vld [vmem:[#allocation3 + $0x3428] ss:$16 sps:$4 sm:$0xff]  }
 0x78d   : > { %15509 = vmatprep.subr.bf16.mxu1 %v21366_v27  ;;  %v21429_v27 = vld [vmem:[#allocation3 + $0x36ec] ss:$16 sps:$4 sm:$0xff]   ;;  %v21424_v28 = vld [vmem:[#allocation3 + $0x3408] ss:$16 sps:$4 sm:$0xff]  }
 0x78f   : > { %15539 = vmatpush1.bf16.msra.mxu0 %v21367_v24  ;;  %v21432_v24 = vld [vmem:[#allocation3 + $0x35ec] ss:$16 sps:$4 sm:$0xff]  }
 0x790   : > { %15510 = vmatpush2.bf16.msra.mxu1 %v21364_v51  ;;  %15540 = vmatprep.subr.bf16.mxu0 %v21375_v5  ;;  %v21427_v51 = vld [vmem:[#allocation3 + $0x36e8] ss:$16 sps:$4 sm:$0xff]  }
 0x791   : > { %15511 = vmatprep.subr.bf16.mxu1 %v21372_v21  ;;  %v21435_v21 = vld [vmem:[#allocation3 + $0x36cc] ss:$16 sps:$4 sm:$0xff]  }
 0x792   : > { %v23233_v5 = vld [vmem:[#allocation56_spill] sm:$0xff] }
 0x793   : > { %15541 = vmatpush1.bf16.msra.mxu0 %v21373_v14  ;;  %v21433_v14 = vld [vmem:[#allocation3 + $0x36c8] ss:$16 sps:$4 sm:$0xff]  }
 0x794   : > { %15512 = vmatpush2.bf16.msra.mxu1 %v21370_v37  ;;  %15542 = vmatprep.subr.bf16.mxu0 %v21381_v47  ;;  %v21430_v37 = vld [vmem:[#allocation3 + $0x35e8] ss:$16 sps:$4 sm:$0xff]   ;;  %v21441_v47 = vld [vmem:[#allocation3 + $0x36ac] ss:$16 sps:$4 sm:$0xff]  }
 0x795   : > { %15513 = vmatprep.subr.bf16.mxu1 %v21378_v20  ;;  %v21438_v20 = vld [vmem:[#allocation3 + $0x35cc] ss:$16 sps:$4 sm:$0xff]  }
 0x797   : > { %15543 = vmatpush2.bf16.msra.mxu0 %v21379_v35  ;;  %v21436_v35 = vld [vmem:[#allocation3 + $0x35c8] ss:$16 sps:$4 sm:$0xff]  }
 0x798   : > { %15514 = vmatpush2.bf16.msra.mxu1 %v21376_v6  ;;  %15544 = vmatprep.subr.bf16.mxu0 %v21384_v25  ;;  %v23234_v6 = vld [vmem:[#allocation59_spill] sm:$0xff]  ;;  %v21439_v25 = vld [vmem:[#allocation3 + $0x36a8] ss:$16 sps:$4 sm:$0xff]  }
 0x799   : > { %15569 = vmatprep.subr.bf16.mxu1 %v21387_v59  ;;  %v21444_v59 = vld [vmem:[#allocation3 + $0x35ac] ss:$16 sps:$4 sm:$0xff]  }
 0x79b   : > { %15516 = vmatmul.mubr.bf16.vlgmr.msra.gmra.mxu1 %v23231_v49  ;;  %15545 = vmatpush2.bf16.msra.mxu0 %v21382_v48  ;;  %v21447_v48 = vld [vmem:[#allocation3 + $0x368c] ss:$16 sps:$4 sm:$0xff]  }
 0x79c   : > { %15570 = vmatpush1.bf16.msra.mxu1 %v21385_v30  ;;  %15546 = vmatprep.subr.bf16.mxu0 %v21390_v22  ;;  %v21442_v30 = vld [vmem:[#allocation3 + $0x35a8] ss:$16 sps:$4 sm:$0xff]   ;;  %v21453_v49 = vld [vmem:[#allocation3 + $0x366c] ss:$16 sps:$4 sm:$0xff]  }
 0x79d   : > { %15571 = vmatprep.subr.bf16.mxu1 %v21393_v46  ;;  %15601 = vmatprep.mubr.bf16.mxu1 %v23232_v3  ;;  %v21445_v22 = vld [vmem:[#allocation3 + $0x3688] ss:$16 sps:$4 sm:$0xff]   ;;  %v21450_v46 = vld [vmem:[#allocation3 + $0x358c] ss:$16 sps:$4 sm:$0xff]  }
 0x79e   : > { %v21454_v3 = vld [vmem:[#allocation3 + $0x3568] ss:$16 sps:$4 sm:$0xff]  }
 0x79f   : > { %15547 = vmatpush2.bf16.msra.mxu0 %v21388_v52  ;;  %v21448_v52 = vld [vmem:[#allocation3 + $0x3588] ss:$16 sps:$4 sm:$0xff]  }
 0x7a0   : > { %15572 = vmatpush1.bf16.msra.mxu1 %v21391_v8  ;;  %15548 = vmatprep.subr.bf16.mxu0 %v21396_v17  ;;  %v21451_v8 = vld [vmem:[#allocation3 + $0x3668] ss:$16 sps:$4 sm:$0xff]   ;;  %v21456_v17 = vld [vmem:[#allocation3 + $0x356c] ss:$16 sps:$4 sm:$0xff]  }
 0x7a1   : > { %15573 = vmatprep.subr.bf16.mxu1 %v21399_v57  ;;  %v21459_v57 = vld [vmem:[#allocation3 + $0x364c] ss:$16 sps:$4 sm:$0xff]  }
 0x7a3   : > { %15549 = vmatpush2.bf16.msra.mxu0 %v21394_v10  ;;  %v21457_v10 = vld [vmem:[#allocation3 + $0x3648] ss:$16 sps:$4 sm:$0xff]  }
 0x7a4   : > { %15574 = vmatpush1.bf16.msra.mxu1 %v21397_v31  ;;  %15550 = vmatprep.subr.bf16.mxu0 %v21402_v56  ;;  %v21462_v31 = vld [vmem:[#allocation3 + $0x354c] ss:$16 sps:$4 sm:$0xff]  }
 0x7a5   : > { %15575 = vmatprep.subr.bf16.mxu1 %v21405_v55  ;;  %v21465_v56 = vld [vmem:[#allocation3 + $0x362c] ss:$16 sps:$4 sm:$0xff]   ;;  %v21460_v55 = vld [vmem:[#allocation3 + $0x3548] ss:$16 sps:$4 sm:$0xff]  }
 0x7a7   : > { %15551 = vmatpush2.bf16.msra.mxu0 %v21400_v44  ;;  %v21463_v44 = vld [vmem:[#allocation3 + $0x3628] ss:$16 sps:$4 sm:$0xff]  }
 0x7a8   : > { %15576 = vmatpush1.bf16.msra.mxu1 %v21403_v2  ;;  %15552 = vmatprep.subr.bf16.mxu0 %v21408_v41  ;;  %v21468_v2 = vld [vmem:[#allocation3 + $0x352c] ss:$16 sps:$4 sm:$0xff]  }
 0x7a9   : > { %15577 = vmatprep.subr.bf16.mxu1 %v21411_v38  ;;  %v21471_v41 = vld [vmem:[#allocation3 + $0x360c] ss:$16 sps:$4 sm:$0xff]   ;;  %v21466_v38 = vld [vmem:[#allocation3 + $0x3528] ss:$16 sps:$4 sm:$0xff]  }
 0x7ab   : > { %15553 = vmatpush2.bf16.msra.mxu0 %v21406_v9  ;;  %v21469_v9 = vld [vmem:[#allocation3 + $0x3608] ss:$16 sps:$4 sm:$0xff]  }
 0x7ac   : > { %15578 = vmatpush1.bf16.msra.mxu1 %v21409_v15  ;;  %15554 = vmatprep.subr.bf16.mxu0 %v21414_v16  ;;  %v21474_v15 = vld [vmem:[#allocation3 + $0x350c] ss:$16 sps:$4 sm:$0xff]  }
 0x7ad   : > { %15579 = vmatprep.subr.bf16.mxu1 %v21417_v26  ;;  %v21477_v16 = vld [vmem:[#allocation3 + $0x37ec] ss:$16 sps:$4 sm:$0xff]   ;;  %v21472_v26 = vld [vmem:[#allocation3 + $0x3508] ss:$16 sps:$4 sm:$0xff]  }
 0x7af   : > { %15555 = vmatpush2.bf16.msra.mxu0 %v21412_v43  ;;  %v21475_v43 = vld [vmem:[#allocation3 + $0x37e8] ss:$16 sps:$4 sm:$0xff]  }
 0x7b0   : > { %15580 = vmatpush1.bf16.msra.mxu1 %v21415_v12  ;;  %15556 = vmatprep.subr.bf16.mxu0 %v21420_v60  ;;  %v21480_v12 = vld [vmem:[#allocation3 + $0x37cc] ss:$16 sps:$4 sm:$0xff]  }
 0x7b1   : > { %15581 = vmatprep.subr.bf16.mxu1 %v21423_v34  ;;  %v21483_v60 = vld [vmem:[#allocation3 + $0x38ec] ss:$16 sps:$4 sm:$0xff]   ;;  %v21478_v34 = vld [vmem:[#allocation3 + $0x37c8] ss:$16 sps:$4 sm:$0xff]  }
 0x7b3   : > { %15557 = vmatpush2.bf16.msra.mxu0 %v21418_v7  ;;  %v21481_v7 = vld [vmem:[#allocation3 + $0x38e8] ss:$16 sps:$4 sm:$0xff]  }
 0x7b4   : > { %15582 = vmatpush1.bf16.msra.mxu1 %v21421_v54  ;;  %15612 = vmatprep.subr.bf16.mxu0 %v21429_v27  ;;  %v21486_v54 = vld [vmem:[#allocation3 + $0x37ac] ss:$16 sps:$4 sm:$0xff]  }
 0x7b5   : > { %15583 = vmatprep.subr.bf16.mxu1 %v21426_v11  ;;  %v21489_v11 = vld [vmem:[#allocation3 + $0x38cc] ss:$16 sps:$4 sm:$0xff]  }
 0x7b6   : > { %15559 = vmatmul.mubr.bf16.vlgmr.msra.gmra.mxu0 %v23233_v5  ;;  %v23235_v27 = vld [vmem:[#allocation60_spill] sm:$0xff]  ;;  %v23236_v5 = vld [vmem:[#allocation62_spill] sm:$0xff] }
 0x7b7   : > { %15613 = vmatpush1.bf16.msra.mxu0 %v21427_v51  ;;  %15644 = vmatprep.mubr.bf16.mxu0 %v23234_v6  ;;  %v21487_v51 = vld [vmem:[#allocation3 + $0x38c8] ss:$16 sps:$4 sm:$0xff]  }
 0x7b8   : > { %15584 = vmatpush1.bf16.msra.mxu1 %v21424_v28  ;;  %15614 = vmatprep.subr.bf16.mxu0 %v21435_v21  ;;  %v21484_v28 = vld [vmem:[#allocation3 + $0x37a8] ss:$16 sps:$4 sm:$0xff]   ;;  %v21495_v21 = vld [vmem:[#allocation3 + $0x38ac] ss:$16 sps:$4 sm:$0xff]  }
 0x7b9   : > { %15585 = vmatprep.subr.bf16.mxu1 %v21432_v24  ;;  %v21492_v24 = vld [vmem:[#allocation3 + $0x378c] ss:$16 sps:$4 sm:$0xff]   ;;  %v21496_v6 = vld [vmem:[#allocation3 + $0x3768] ss:$16 sps:$4 sm:$0xff]  }
 0x7bb   : > { %15615 = vmatpush1.bf16.msra.mxu0 %v21433_v14  ;;  %v21493_v14 = vld [vmem:[#allocation3 + $0x38a8] ss:$16 sps:$4 sm:$0xff]  }
 0x7bc   : > { %15586 = vmatpush2.bf16.msra.mxu1 %v21430_v37  ;;  %15616 = vmatprep.subr.bf16.mxu0 %v21441_v47  ;;  %v21490_v37 = vld [vmem:[#allocation3 + $0x3788] ss:$16 sps:$4 sm:$0xff]   ;;  %v21501_v47 = vld [vmem:[#allocation3 + $0x388c] ss:$16 sps:$4 sm:$0xff]  }
 0x7bd   : > { %15587 = vmatprep.subr.bf16.mxu1 %v21438_v20  ;;  %v21498_v20 = vld [vmem:[#allocation3 + $0x376c] ss:$16 sps:$4 sm:$0xff]  }
 0x7bf   : > { %15617 = vmatpush1.bf16.msra.mxu0 %v21439_v25  ;;  %v21504_v25 = vld [vmem:[#allocation3 + $0x374c] ss:$16 sps:$4 sm:$0xff]  }
 0x7c0   : > { %15588 = vmatpush2.bf16.msra.mxu1 %v21436_v35  ;;  %15618 = vmatprep.subr.bf16.mxu0 %v21447_v48  ;;  %v21499_v35 = vld [vmem:[#allocation3 + $0x3888] ss:$16 sps:$4 sm:$0xff]  }
 0x7c1   : > { %15589 = vmatprep.subr.bf16.mxu1 %v21444_v59  ;;  %v21507_v59 = vld [vmem:[#allocation3 + $0x386c] ss:$16 sps:$4 sm:$0xff]   ;;  %v21502_v48 = vld [vmem:[#allocation3 + $0x3748] ss:$16 sps:$4 sm:$0xff]  }
 0x7c3   : > { %15619 = vmatpush1.bf16.msra.mxu0 %v21445_v22  ;;  %v21510_v22 = vld [vmem:[#allocation3 + $0x372c] ss:$16 sps:$4 sm:$0xff]  }
 0x7c4   : > { %15590 = vmatpush2.bf16.msra.mxu1 %v21442_v30  ;;  %15620 = vmatprep.subr.bf16.mxu0 %v21453_v49  ;;  %v21505_v30 = vld [vmem:[#allocation3 + $0x3868] ss:$16 sps:$4 sm:$0xff]  }
 0x7c5   : > { %15591 = vmatprep.subr.bf16.mxu1 %v21450_v46  ;;  %v21513_v46 = vld [vmem:[#allocation3 + $0x384c] ss:$16 sps:$4 sm:$0xff]   ;;  %v21508_v49 = vld [vmem:[#allocation3 + $0x3728] ss:$16 sps:$4 sm:$0xff]  }
 0x7c7   : > { %15621 = vmatpush1.bf16.msra.mxu0 %v21451_v8  ;;  %v21516_v8 = vld [vmem:[#allocation3 + $0x370c] ss:$16 sps:$4 sm:$0xff]  }
 0x7c8   : > { %15592 = vmatpush2.bf16.msra.mxu1 %v21448_v52  ;;  %15622 = vmatprep.subr.bf16.mxu0 %v21459_v57  ;;  %v21511_v52 = vld [vmem:[#allocation3 + $0x3848] ss:$16 sps:$4 sm:$0xff]  }
 0x7c9   : > { %15593 = vmatprep.subr.bf16.mxu1 %v21456_v17  ;;  %v21519_v17 = vld [vmem:[#allocation3 + $0x382c] ss:$16 sps:$4 sm:$0xff]   ;;  %v21514_v57 = vld [vmem:[#allocation3 + $0x3708] ss:$16 sps:$4 sm:$0xff]  }
 0x7cb   : > { %15623 = vmatpush1.bf16.msra.mxu0 %v21457_v10  ;;  %v21522_v10 = vld [vmem:[#allocation3 + $0x380c] ss:$16 sps:$4 sm:$0xff]  }
 0x7cc   : > { %15594 = vmatpush2.bf16.msra.mxu1 %v21454_v3  ;;  %15624 = vmatprep.subr.bf16.mxu0 %v21465_v56  ;;  %v21517_v3 = vld [vmem:[#allocation3 + $0x3828] ss:$16 sps:$4 sm:$0xff]  }
 0x7cd   : > { %15595 = vmatprep.subr.bf16.mxu1 %v21462_v31  ;;  %v21525_v31 = vld [vmem:[#allocation3 + $0x3aec] ss:$16 sps:$4 sm:$0xff]   ;;  %v21520_v56 = vld [vmem:[#allocation3 + $0x3808] ss:$16 sps:$4 sm:$0xff]  }
 0x7cf   : > { %15625 = vmatpush1.bf16.msra.mxu0 %v21463_v44  ;;  %v21528_v44 = vld [vmem:[#allocation3 + $0x39ec] ss:$16 sps:$4 sm:$0xff]  }
 0x7d0   : > { %15596 = vmatpush2.bf16.msra.mxu1 %v21460_v55  ;;  %15626 = vmatprep.subr.bf16.mxu0 %v21471_v41  ;;  %v21523_v55 = vld [vmem:[#allocation3 + $0x3ae8] ss:$16 sps:$4 sm:$0xff]   ;;  %v23237_v41 = vld [vmem:[#allocation61_spill] sm:$0xff] }
 0x7d1   : > { %15597 = vmatprep.subr.bf16.mxu1 %v21468_v2  ;;  %v21531_v2 = vld [vmem:[#allocation3 + $0x3acc] ss:$16 sps:$4 sm:$0xff]  }
 0x7d3   : > { %15627 = vmatpush1.bf16.msra.mxu0 %v21469_v9  ;;  %v21529_v9 = vld [vmem:[#allocation3 + $0x3ac8] ss:$16 sps:$4 sm:$0xff]  }
 0x7d4   : > { %15598 = vmatpush2.bf16.msra.mxu1 %v21466_v38  ;;  %15628 = vmatprep.subr.bf16.mxu0 %v21477_v16  ;;  %v21526_v38 = vld [vmem:[#allocation3 + $0x39e8] ss:$16 sps:$4 sm:$0xff]   ;;  %v21537_v16 = vld [vmem:[#allocation3 + $0x3aac] ss:$16 sps:$4 sm:$0xff]  }
 0x7d5   : > { %15599 = vmatprep.subr.bf16.mxu1 %v21474_v15  ;;  %v21534_v15 = vld [vmem:[#allocation3 + $0x39cc] ss:$16 sps:$4 sm:$0xff]  }
 0x7d7   : > { %15629 = vmatpush2.bf16.msra.mxu0 %v21475_v43  ;;  %v21532_v43 = vld [vmem:[#allocation3 + $0x39c8] ss:$16 sps:$4 sm:$0xff]  }
 0x7d8   : > { %15600 = vmatpush2.bf16.msra.mxu1 %v21472_v26  ;;  %15630 = vmatprep.subr.bf16.mxu0 %v21480_v12  ;;  %v23238_v26 = vld [vmem:[#allocation63_spill] sm:$0xff]  ;;  %v21535_v12 = vld [vmem:[#allocation3 + $0x3aa8] ss:$16 sps:$4 sm:$0xff]  }
 0x7d9   : > { %15655 = vmatprep.subr.bf16.mxu1 %v21483_v60  ;;  %v21540_v60 = vld [vmem:[#allocation3 + $0x39ac] ss:$16 sps:$4 sm:$0xff]  }
 0x7db   : > { %15602 = vmatmul.mubr.bf16.vlgmr.msra.gmra.mxu1 %v23235_v27  ;;  %15631 = vmatpush2.bf16.msra.mxu0 %v21478_v34  ;;  %v21543_v34 = vld [vmem:[#allocation3 + $0x3a8c] ss:$16 sps:$4 sm:$0xff]  }
 0x7dc   : > { %15656 = vmatpush1.bf16.msra.mxu1 %v21481_v7  ;;  %15632 = vmatprep.subr.bf16.mxu0 %v21486_v54  ;;  %v21538_v7 = vld [vmem:[#allocation3 + $0x39a8] ss:$16 sps:$4 sm:$0xff]   ;;  %v21549_v27 = vld [vmem:[#allocation3 + $0x3a6c] ss:$16 sps:$4 sm:$0xff]  }
 0x7dd   : > { %15657 = vmatprep.subr.bf16.mxu1 %v21489_v11  ;;  %15687 = vmatprep.mubr.bf16.mxu1 %v23236_v5  ;;  %v21541_v54 = vld [vmem:[#allocation3 + $0x3a88] ss:$16 sps:$4 sm:$0xff]   ;;  %v21546_v11 = vld [vmem:[#allocation3 + $0x398c] ss:$16 sps:$4 sm:$0xff]  }
 0x7de   : > { %v21550_v5 = vld [vmem:[#allocation3 + $0x3968] ss:$16 sps:$4 sm:$0xff]  }
 0x7df   : > { %15633 = vmatpush2.bf16.msra.mxu0 %v21484_v28  ;;  %v21544_v28 = vld [vmem:[#allocation3 + $0x3988] ss:$16 sps:$4 sm:$0xff]  }
 0x7e0   : > { %15658 = vmatpush1.bf16.msra.mxu1 %v21487_v51  ;;  %15634 = vmatprep.subr.bf16.mxu0 %v21492_v24  ;;  %v21547_v51 = vld [vmem:[#allocation3 + $0x3a68] ss:$16 sps:$4 sm:$0xff]   ;;  %v21552_v24 = vld [vmem:[#allocation3 + $0x396c] ss:$16 sps:$4 sm:$0xff]  }
 0x7e1   : > { %15659 = vmatprep.subr.bf16.mxu1 %v21495_v21  ;;  %v21555_v21 = vld [vmem:[#allocation3 + $0x3a4c] ss:$16 sps:$4 sm:$0xff]  }
 0x7e3   : > { %15635 = vmatpush2.bf16.msra.mxu0 %v21490_v37  ;;  %v21553_v37 = vld [vmem:[#allocation3 + $0x3a48] ss:$16 sps:$4 sm:$0xff]  }
 0x7e4   : > { %15660 = vmatpush1.bf16.msra.mxu1 %v21493_v14  ;;  %15636 = vmatprep.subr.bf16.mxu0 %v21498_v20  ;;  %v21558_v14 = vld [vmem:[#allocation3 + $0x394c] ss:$16 sps:$4 sm:$0xff]  }
 0x7e5   : > { %15661 = vmatprep.subr.bf16.mxu1 %v21501_v47  ;;  %v21561_v20 = vld [vmem:[#allocation3 + $0x3a2c] ss:$16 sps:$4 sm:$0xff]   ;;  %v21556_v47 = vld [vmem:[#allocation3 + $0x3948] ss:$16 sps:$4 sm:$0xff]  }
 0x7e7   : > { %15637 = vmatpush2.bf16.msra.mxu0 %v21496_v6  ;;  %v21559_v6 = vld [vmem:[#allocation3 + $0x3a28] ss:$16 sps:$4 sm:$0xff]  }
 0x7e8   : > { %15662 = vmatpush1.bf16.msra.mxu1 %v21499_v35  ;;  %15638 = vmatprep.subr.bf16.mxu0 %v21504_v25  ;;  %v21564_v35 = vld [vmem:[#allocation3 + $0x392c] ss:$16 sps:$4 sm:$0xff]  }
 0x7e9   : > { %15663 = vmatprep.subr.bf16.mxu1 %v21507_v59  ;;  %v21567_v25 = vld [vmem:[#allocation3 + $0x3a0c] ss:$16 sps:$4 sm:$0xff]  }
 0x7ea   : > { %v23239_v59 = vld [vmem:[#allocation14_spill] sm:$0xff] }
 0x7eb   : > { %15639 = vmatpush2.bf16.msra.mxu0 %v21502_v48  ;;  %v23240_v48 = vld [vmem:[#allocation15_spill] sm:$0xff] }
 0x7ec   : > { %15664 = vmatpush1.bf16.msra.mxu1 %v21505_v30  ;;  %15640 = vmatprep.subr.bf16.mxu0 %v21510_v22  ;;  %v13073_v30 = vadd.f32 %v23240_v48, %v23239_v59  ;;  %v21562_v22 = vld [vmem:[#allocation3 + $0x3928] ss:$16 sps:$4 sm:$0xff]   ;;  %v21600_v48 = vld [vmem:[#allocation3 + $0x3b4c] ss:$16 sps:$4 sm:$0xff]  }
 0x7ed   : > { %15665 = vmatprep.subr.bf16.mxu1 %v21513_v46  ;;  %v21565_v46 = vld [vmem:[#allocation3 + $0x3a08] ss:$16 sps:$4 sm:$0xff]  }
 0x7ee   : > { %v21595_v59 = vld [vmem:[#allocation3 + $0x3c88] ss:$16 sps:$4 sm:$0xff]  }
 0x7ef   : > { %15641 = vmatpush2.bf16.msra.mxu0 %v21508_v49  ;;  %v21570_v49 = vld [vmem:[#allocation3 + $0x390c] ss:$16 sps:$4 sm:$0xff]  }
 0x7f0   : > { %15666 = vmatpush1.bf16.msra.mxu1 %v21511_v52  ;;  %15642 = vmatprep.subr.bf16.mxu0 %v21516_v8  ;;  %v21573_v52 = vld [vmem:[#allocation3 + $0x3bec] ss:$16 sps:$4 sm:$0xff]  }
 0x7f1   : > { %15667 = vmatprep.subr.bf16.mxu1 %v21519_v17  ;;  %v23241_v8 = vld [vmem:[#allocation16_spill] sm:$0xff] }
 0x7f2   : > { %v13116_v17 = vadd.f32 %v23241_v8, %v13073_v30  ;;  %v21603_v30 = vld [vmem:[#allocation3 + $0x3c6c] ss:$16 sps:$4 sm:$0xff]   ;;  %v23254_v8 = vld [vmem:[#allocation27_spill] sm:$0xff] }
 0x7f3   : > { %15643 = vmatpush2.bf16.msra.mxu0 %v21514_v57  ;;  %v23242_v57 = vld [vmem:[#allocation17_spill] sm:$0xff] }
 0x7f4   : > { %15668 = vmatpush1.bf16.msra.mxu1 %v21517_v3  ;;  %15698 = vmatprep.subr.bf16.mxu0 %v21525_v31  ;;  %v13159_v3 = vadd.f32 %v23242_v57, %v13116_v17  ;;  %v21571_v31 = vld [vmem:[#allocation3 + $0x3be8] ss:$16 sps:$4 sm:$0xff]  }
 0x7f5   : > { %15669 = vmatprep.subr.bf16.mxu1 %v21522_v10  ;;  %v21568_v10 = vld [vmem:[#allocation3 + $0x3908] ss:$16 sps:$4 sm:$0xff]  }
 0x7f6   : > { %15645 = vmatmul.mubr.bf16.vlgmr.msra.gmra.mxu0 %v23237_v41  ;;  %v21574_v41 = vld [vmem:[#allocation3 + $0x3bc8] ss:$16 sps:$4 sm:$0xff]  }
 0x7f7   : > { %15699 = vmatpush1.bf16.msra.mxu0 %v21523_v55  ;;  %15730 = vmatprep.mubr.bf16.mxu0 %v23238_v26  ;;  %v21579_v55 = vld [vmem:[#allocation3 + $0x3cec] ss:$16 sps:$4 sm:$0xff]   ;;  %v21598_v57 = vld [vmem:[#allocation3 + $0x3b48] ss:$16 sps:$4 sm:$0xff]  }
 0x7f8   : > { %15670 = vmatpush1.bf16.msra.mxu1 %v21520_v56  ;;  %15700 = vmatprep.subr.bf16.mxu0 %v21531_v2  ;;  %v21576_v56 = vld [vmem:[#allocation3 + $0x3bcc] ss:$16 sps:$4 sm:$0xff]  }
 0x7f9   : > { %15671 = vmatprep.subr.bf16.mxu1 %v21528_v44  ;;  %v23243_v44 = vld [vmem:[#allocation18_spill] sm:$0xff] }
 0x7fa   : > { %v13202_v2 = vadd.f32 %v23243_v44, %v13159_v3  ;;  %v21601_v3 = vld [vmem:[#allocation3 + $0x3c68] ss:$16 sps:$4 sm:$0xff]  }
 0x7fb   : > { %15701 = vmatpush1.bf16.msra.mxu0 %v21529_v9  ;;  %v21582_v9 = vld [vmem:[#allocation3 + $0x3bac] ss:$16 sps:$4 sm:$0xff]  }
 0x7fc   : > { %15672 = vmatpush2.bf16.msra.mxu1 %v21526_v38  ;;  %15702 = vmatprep.subr.bf16.mxu0 %v21537_v16  ;;  %v21577_v38 = vld [vmem:[#allocation3 + $0x3ce8] ss:$16 sps:$4 sm:$0xff]   ;;  %v23244_v16 = vld [vmem:[#allocation21_spill] sm:$0xff] }
 0x7fd   : > { %15673 = vmatprep.subr.bf16.mxu1 %v21534_v15  ;;  %v21585_v15 = vld [vmem:[#allocation3 + $0x3ccc] ss:$16 sps:$4 sm:$0xff]   ;;  %v13245_v26 = vadd.f32 %v23244_v16, %v13202_v2 }
 0x7fe   : > { %v23256_v44 = vld [vmem:[#allocation28_spill] sm:$0xff] }
 0x7ff   : > { %15703 = vmatpush1.bf16.msra.mxu0 %v21535_v12  ;;  %v21583_v12 = vld [vmem:[#allocation3 + $0x3cc8] ss:$16 sps:$4 sm:$0xff]   ;;  %v21612_v16 = vld [vmem:[#allocation3 + $0x3b0c] ss:$16 sps:$4 sm:$0xff]  }
 0x800   : > { %15674 = vmatpush2.bf16.msra.mxu1 %v21532_v43  ;;  %15704 = vmatprep.subr.bf16.mxu0 %v21543_v34  ;;  %v21580_v43 = vld [vmem:[#allocation3 + $0x3ba8] ss:$16 sps:$4 sm:$0xff]   ;;  %v21591_v34 = vld [vmem:[#allocation3 + $0x3cac] ss:$16 sps:$4 sm:$0xff]  }
 0x801   : > { %15675 = vmatprep.subr.bf16.mxu1 %v21540_v60  ;;  %v21588_v60 = vld [vmem:[#allocation3 + $0x3b8c] ss:$16 sps:$4 sm:$0xff]  }
 0x803   : > { %15705 = vmatpush1.bf16.msra.mxu0 %v21541_v54 }
 0x804   : > { %15676 = vmatpush2.bf16.msra.mxu1 %v21538_v7  ;;  %15706 = vmatprep.subr.bf16.mxu0 %v21549_v27  ;;  %v23245_v7 = vld [vmem:[#allocation22_spill] sm:$0xff]  ;;  %v23247_v27 = vld [vmem:[#allocation20_spill] sm:$0xff] }
 0x805   : > { %15677 = vmatprep.subr.bf16.mxu1 %v21546_v11  ;;  %v13288_v54 = vadd.f32 %v23245_v7, %v13245_v26  ;;  %v23246_v11 = vld [vmem:[#allocation65_spill] sm:$0xff]  ;;  %v21615_v26 = vld [vmem:[#allocation3 + $0x3c2c] ss:$16 sps:$4 sm:$0xff]   ;;  %v21610_v7 = vld [vmem:[#allocation3 + $0x3b08] ss:$16 sps:$4 sm:$0xff]  }
 0x807   : > { %15707 = vmatpush1.bf16.msra.mxu0 %v21547_v51 }
 0x808   : > { %15678 = vmatpush2.bf16.msra.mxu1 %v21544_v28  ;;  %15708 = vmatprep.subr.bf16.mxu0 %v21555_v21  ;;  %v23248_v28 = vld [vmem:[#allocation19_spill] sm:$0xff] }
 0x809   : > { %15679 = vmatprep.subr.bf16.mxu1 %v21552_v24  ;;  %v13284_v51 = vadd.f32 %v23248_v28, %v23247_v27  ;;  %v23249_v24 = vld [vmem:[#allocation25_spill] sm:$0xff]  ;;  %v21621_v27 = vld [vmem:[#allocation3 + $0x3eec] ss:$16 sps:$4 sm:$0xff]  }
 0x80a   : > { %v13331_v21 = vadd.f32 %v23249_v24, %v13288_v54  ;;  %v21613_v54 = vld [vmem:[#allocation3 + $0x3c28] ss:$16 sps:$4 sm:$0xff]  }
 0x80b   : > { %15709 = vmatpush1.bf16.msra.mxu0 %v21553_v37  ;;  %v21594_v37 = vld [vmem:[#allocation3 + $0x3b6c] ss:$16 sps:$4 sm:$0xff]  }
 0x80c   : > { %15680 = vmatpush2.bf16.msra.mxu1 %v21550_v5  ;;  %15710 = vmatprep.subr.bf16.mxu0 %v21561_v20  ;;  %v21589_v5 = vld [vmem:[#allocation3 + $0x3ca8] ss:$16 sps:$4 sm:$0xff]   ;;  %v23250_v20 = vld [vmem:[#allocation23_spill] sm:$0xff] }
 0x80d   : > { %15681 = vmatprep.subr.bf16.mxu1 %v21558_v14  ;;  %v21597_v14 = vld [vmem:[#allocation3 + $0x3c8c] ss:$16 sps:$4 sm:$0xff]  }
 0x80e   : > { %v23260_v28 = vld [vmem:[#allocation32_spill] sm:$0xff]  ;;  %v23261_v24 = vld [vmem:[#allocation42_spill] sm:$0xff] }
 0x80f   : > { %15711 = vmatpush1.bf16.msra.mxu0 %v21559_v6  ;;  %v23251_v6 = vld [vmem:[#allocation26_spill] sm:$0xff] }
 0x810   : > { %15682 = vmatpush2.bf16.msra.mxu1 %v21556_v47  ;;  %15712 = vmatprep.subr.bf16.mxu0 %v21567_v25  ;;  %v13327_v47 = vadd.f32 %v23250_v20, %v13284_v51  ;;  %v21592_v25 = vld [vmem:[#allocation3 + $0x3b68] ss:$16 sps:$4 sm:$0xff]   ;;  %v21624_v20 = vld [vmem:[#allocation3 + $0x3dec] ss:$16 sps:$4 sm:$0xff]  }
 0x811   : > { %15683 = vmatprep.subr.bf16.mxu1 %v21564_v35  ;;  %v13374_v35 = vadd.f32 %v23251_v6, %v13331_v21  ;;  %v23263_v6 = vld [vmem:[#allocation43_spill] sm:$0xff] }
 0x813   : > { %15713 = vmatpush1.bf16.msra.mxu0 %v21565_v46 }
 0x814   : > { %15684 = vmatpush2.bf16.msra.mxu1 %v21562_v22  ;;  %15714 = vmatprep.subr.bf16.mxu0 %v21573_v52  ;;  %v23252_v22 = vld [vmem:[#allocation24_spill] sm:$0xff] }
 0x815   : > { %15685 = vmatprep.subr.bf16.mxu1 %v21570_v49  ;;  %v13370_v46 = vadd.f32 %v23252_v22, %v13327_v47  ;;  %v23253_v49 = vld [vmem:[#allocation29_spill] sm:$0xff]  ;;  %v21627_v47 = vld [vmem:[#allocation3 + $0x3ecc] ss:$16 sps:$4 sm:$0xff]  }
 0x816   : > { %v13417_v52 = vadd.f32 %v23253_v49, %v13374_v35  ;;  %v21625_v49 = vld [vmem:[#allocation3 + $0x3ec8] ss:$16 sps:$4 sm:$0xff]  }
 0x817   : > { %15715 = vmatpush2.bf16.msra.mxu0 %v21571_v31  ;;  %v13413_v17 = vadd.f32 %v23254_v8, %v13370_v46  ;;  %v21609_v31 = vld [vmem:[#allocation3 + $0x3c4c] ss:$16 sps:$4 sm:$0xff]   ;;  %v21622_v46 = vld [vmem:[#allocation3 + $0x3de8] ss:$16 sps:$4 sm:$0xff]  }
 0x818   : > { %15686 = vmatpush2.bf16.msra.mxu1 %v21568_v10  ;;  %15716 = vmatprep.subr.bf16.mxu0 %v21576_v56  ;;  %v21606_v10 = vld [vmem:[#allocation3 + $0x3b2c] ss:$16 sps:$4 sm:$0xff]  }
 0x819   : > { %15741 = vmatprep.subr.bf16.mxu1 %v21579_v55  ;;  %v23255_v56 = vld [vmem:[#allocation30_spill] sm:$0xff]  ;;  %v13456_v2 = vadd.f32 %v23256_v44, %v13413_v17 }
 0x81a   : > { %v13460_v55 = vadd.f32 %v23255_v56, %v13417_v52  ;;  %v21630_v52 = vld [vmem:[#allocation3 + $0x3dcc] ss:$16 sps:$4 sm:$0xff]   ;;  %v21628_v56 = vld [vmem:[#allocation3 + $0x3dc8] ss:$16 sps:$4 sm:$0xff]  }
 0x81b   : > { %15688 = vmatmul.mubr.bf16.vlgmr.msra.gmra.mxu1 %v22474_v23  ;;  %15717 = vmatpush2.bf16.msra.mxu0 %v21574_v41  ;;  %v21586_v23 = vld [vmem:[#allocation3 + $0x3b88] ss:$16 sps:$4 sm:$0xff]   ;;  %v21633_v8 = vld [vmem:[#allocation3 + $0x3eac] ss:$16 sps:$4 sm:$0xff]  }
 0x81c   : > { %15742 = vmatpush1.bf16.msra.mxu1 %v21577_v38  ;;  %15718 = vmatprep.subr.bf16.mxu0 %v21582_v9  ;;  %v23257_v41 = vld [vmem:[#allocation34_spill] sm:$0xff] }
 0x81d   : > { %15743 = vmatprep.subr.bf16.mxu1 %v21585_v15  ;;  %15773 = vmatprep.mubr.bf16.mxu1 %v23246_v11  ;;  %v13503_v38 = vadd.f32 %v23257_v41, %v13460_v55  ;;  %v21604_v9 = vld [vmem:[#allocation3 + $0x3b28] ss:$16 sps:$4 sm:$0xff]   ;;  %v21618_v11 = vld [vmem:[#allocation3 + $0x3c0c] ss:$16 sps:$4 sm:$0xff]   ;;  %v23270_v41 = vld [vmem:[#allocation47_spill] sm:$0xff] }
 0x81e   : > { %v21607_v15 = vld [vmem:[#allocation3 + $0x3c48] ss:$16 sps:$4 sm:$0xff]   ;;  %v21636_v44 = vld [vmem:[#allocation3 + $0x3dac] ss:$16 sps:$4 sm:$0xff]  }
 0x81f   : > { %15719 = vmatpush2.bf16.msra.mxu0 %v21580_v43  ;;  %v23258_v43 = vld [vmem:[#allocation31_spill] sm:$0xff]  ;;  %v23267_v17 = vld [vmem:[#allocation46_spill] sm:$0xff] }
 0x820   : > { %15744 = vmatpush1.bf16.msra.mxu1 %v21583_v12  ;;  %15720 = vmatprep.subr.bf16.mxu0 %v21588_v60  ;;  %v13499_v12 = vadd.f32 %v23258_v43, %v13456_v2  ;;  %v23259_v60 = vld [vmem:[#allocation35_spill] sm:$0xff]  ;;  %v21631_v55 = vld [vmem:[#allocation3 + $0x3ea8] ss:$16 sps:$4 sm:$0xff]   ;;  %v21639_v2 = vld [vmem:[#allocation3 + $0x3e8c] ss:$16 sps:$4 sm:$0xff]  }
 0x821   : > { %15745 = vmatprep.subr.bf16.mxu1 %v21591_v34  ;;  %v13546_v34 = vadd.f32 %v23259_v60, %v13503_v38  ;;  %v21634_v43 = vld [vmem:[#allocation3 + $0x3da8] ss:$16 sps:$4 sm:$0xff]   ;;  %v21642_v60 = vld [vmem:[#allocation3 + $0x3d8c] ss:$16 sps:$4 sm:$0xff]  }
 0x822   : > { %v13542_v51 = vadd.f32 %v23260_v28, %v13499_v12  ;;  %v21637_v12 = vld [vmem:[#allocation3 + $0x3e88] ss:$16 sps:$4 sm:$0xff]  }
 0x823   : > { %15721 = vmatpush2.bf16.msra.mxu0 %v21586_v23  ;;  %v13589_v21 = vadd.f32 %v23261_v24, %v13546_v34  ;;  %v23262_v23 = vld [vmem:[#allocation38_spill] sm:$0xff] }
 0x824   : > { %15746 = vmatpush1.bf16.msra.mxu1 %v21589_v5  ;;  %15722 = vmatprep.subr.bf16.mxu0 %v21594_v37  ;;  %v13585_v5 = vadd.f32 %v23262_v23, %v13542_v51  ;;  %v21616_v37 = vld [vmem:[#allocation3 + $0x3c08] ss:$16 sps:$4 sm:$0xff]   ;;  %v21645_v34 = vld [vmem:[#allocation3 + $0x3e6c] ss:$16 sps:$4 sm:$0xff]  }
 0x825   : > { %15747 = vmatprep.subr.bf16.mxu1 %v21597_v14  ;;  %v21619_v14 = vld [vmem:[#allocation3 + $0x3ee8] ss:$16 sps:$4 sm:$0xff]   ;;  %v13632_v35 = vadd.f32 %v23263_v6, %v13589_v21  ;;  %v21648_v23 = vld [vmem:[#allocation3 + $0x3d6c] ss:$16 sps:$4 sm:$0xff]  }
 0x826   : > { %v23275_v28 = vld [vmem:[#allocation74_spill] sm:$0xff] }
 0x827   : > { %15723 = vmatpush2.bf16.msra.mxu0 %v21592_v25  ;;  %v23264_v25 = vld [vmem:[#allocation64_spill] sm:$0xff] }
 0x828   : > { %15748 = vmatpush1.bf16.msra.mxu1 %v21595_v59  ;;  %15724 = vmatprep.subr.bf16.mxu0 %v21600_v48  ;;  %v23265_v59 = vld [vmem:[#allocation39_spill] sm:$0xff]  ;;  %v21640_v24 = vld [vmem:[#allocation3 + $0x3d88] ss:$16 sps:$4 sm:$0xff]  }
 0x829   : > { %15749 = vmatprep.subr.bf16.mxu1 %v21603_v30  ;;  %v13628_v48 = vadd.f32 %v23265_v59, %v13585_v5  ;;  %v23266_v30 = vld [vmem:[#allocation50_spill] sm:$0xff] }
 0x82a   : > { %v13675_v22 = vadd.f32 %v23266_v30, %v13632_v35  ;;  %v21643_v21 = vld [vmem:[#allocation3 + $0x3e68] ss:$16 sps:$4 sm:$0xff]   ;;  %v21651_v5 = vld [vmem:[#allocation3 + $0x3e4c] ss:$16 sps:$4 sm:$0xff]  }
 0x82b   : > { %15725 = vmatpush2.bf16.msra.mxu0 %v21598_v57  ;;  %v13671_v57 = vadd.f32 %v23267_v17, %v13628_v48  ;;  %v21646_v6 = vld [vmem:[#allocation3 + $0x3d68] ss:$16 sps:$4 sm:$0xff]   ;;  %v21657_v59 = vld [vmem:[#allocation3 + $0x3e2c] ss:$16 sps:$4 sm:$0xff]   ;;  %v23278_v48 = vld [vmem:[#allocation73_spill] sm:$0xff] }
 0x82c   : > { %15750 = vmatpush1.bf16.msra.mxu1 %v21601_v3  ;;  %15726 = vmatprep.subr.bf16.mxu0 %v21606_v10  ;;  %v23268_v3 = vld [vmem:[#allocation66_spill] sm:$0xff]  ;;  %v23269_v10 = vld [vmem:[#allocation53_spill] sm:$0xff] }
 0x82d   : > { %15751 = vmatprep.subr.bf16.mxu1 %v21609_v31  ;;  %v13718_v31 = vadd.f32 %v23269_v10, %v13675_v22  ;;  %v13714_v38 = vadd.f32 %v23270_v41, %v13671_v57  ;;  %v21649_v35 = vld [vmem:[#allocation3 + $0x3e48] ss:$16 sps:$4 sm:$0xff]   ;;  %v21660_v57 = vld [vmem:[#allocation3 + $0x3d2c] ss:$16 sps:$4 sm:$0xff]  }
 0x82e   : > { %v23279_v22 = vld [vmem:[#allocation78_spill] sm:$0xff]  ;;  %v23281_v10 = vld [vmem:[#allocation80_spill] sm:$0xff] }
 0x82f   : > { %15727 = vmatpush2.bf16.msra.mxu0 %v21604_v9  ;;  %v23271_v9 = vld [vmem:[#allocation57_spill] sm:$0xff]  ;;  %v21655_v17 = vld [vmem:[#allocation3 + $0x3e28] ss:$16 sps:$4 sm:$0xff]  }
 0x830   : > { %15752 = vmatpush1.bf16.msra.mxu1 %v21607_v15  ;;  %15728 = vmatprep.subr.bf16.mxu0 %v21612_v16  ;;  %v13761_v15 = vadd.f32 %v23271_v9, %v13718_v31  ;;  %v23272_v16 = vld [vmem:[#allocation54_spill] sm:$0xff] }
 0x831   : > { %15753 = vmatprep.subr.bf16.mxu1 %v21615_v26  ;;  %v13757_v26 = vadd.f32 %v23272_v16, %v13714_v38  ;;  %v21658_v41 = vld [vmem:[#allocation3 + $0x3d28] ss:$16 sps:$4 sm:$0xff]   ;;  %v21666_v9 = vld [vmem:[#allocation3 + $0x3d0c] ss:$16 sps:$4 sm:$0xff]   ;;  %v23284_v16 = vld [vmem:[#allocation79_spill] sm:$0xff] }
 0x832   : > { %v21661_v38 = vld [vmem:[#allocation3 + $0x3e08] ss:$16 sps:$4 sm:$0xff]  }
 0x833   : > { %15729 = vmatpush2.bf16.msra.mxu0 %v21610_v7  ;;  %v23273_v7 = vld [vmem:[#allocation72_spill] sm:$0xff] }
 0x834   : > { %15754 = vmatpush1.bf16.msra.mxu1 %v21613_v54  ;;  %15784 = vmatprep.subr.bf16.mxu0 %v21621_v27  ;;  %v13804_v54 = vadd.f32 %v23273_v7, %v13761_v15  ;;  %v21669_v15 = vld [vmem:[#allocation3 + $0x3fec] ss:$16 sps:$4 sm:$0xff]   ;;  %v21667_v7 = vld [vmem:[#allocation3 + $0x3fe8] ss:$16 sps:$4 sm:$0xff]  }
 0x835   : > { %15755 = vmatprep.subr.bf16.mxu1 %v21618_v11  ;;  %v23274_v11 = vld [vmem:[#allocation70_spill] sm:$0xff] }
 0x836   : > { %15731 = vmatmul.mubr.bf16.vlgmr.msra.gmra.mxu0 %v23264_v25  ;;  %v13800_v27 = vadd.f32 %v23274_v11, %v13757_v26  ;;  %v13847_v51 = vadd.f32 %v23275_v28, %v13804_v54  ;;  %v21654_v25 = vld [vmem:[#allocation3 + $0x3d4c] ss:$16 sps:$4 sm:$0xff]   ;;  %v23286_v28 = vld [vmem:[#allocation81_spill] sm:$0xff] }
 0x837   : > { %15785 = vmatpush1.bf16.msra.mxu0 %v21619_v14  ;;  %15816 = vmatprep.mubr.bf16.mxu0 %v23268_v3  ;;  %v21663_v3 = vld [vmem:[#allocation3 + $0x3e0c] ss:$16 sps:$4 sm:$0xff]  }
 0x838   : > { %15756 = vmatpush1.bf16.msra.mxu1 %v21616_v37  ;;  %15786 = vmatprep.subr.bf16.mxu0 %v21627_v47  ;;  %v23276_v37 = vld [vmem:[#allocation71_spill] sm:$0xff]  ;;  %v21672_v54 = vld [vmem:[#allocation3 + $0x3fcc] ss:$16 sps:$4 sm:$0xff]  }
 0x839   : > { %15757 = vmatprep.subr.bf16.mxu1 %v21624_v20  ;;  %v13843_v14 = vadd.f32 %v23276_v37, %v13800_v27  ;;  %v23277_v20 = vld [vmem:[#allocation76_spill] sm:$0xff] }
 0x83a   : > { %v13890_v47 = vadd.f32 %v23277_v20, %v13847_v51  ;;  %v21670_v37 = vld [vmem:[#allocation3 + $0x3fc8] ss:$16 sps:$4 sm:$0xff]   ;;  %v21677_v20 = vld [vmem:[#allocation3 + $0x3fac] ss:$16 sps:$4 sm:$0xff]  }
 0x83b   : > { %15787 = vmatpush1.bf16.msra.mxu0 %v21625_v49  ;;  %v13886_v30 = vadd.f32 %v23278_v48, %v13843_v14  ;;  %v23280_v49 = vld [vmem:[#allocation75_spill] sm:$0xff] }
 0x83c   : > { %15758 = vmatpush2.bf16.msra.mxu1 %v21622_v46  ;;  %15788 = vmatprep.subr.bf16.mxu0 %v21633_v8  ;;  %v13933_v46 = vadd.f32 %v23279_v22, %v13890_v47  ;;  %v21652_v8 = vld [vmem:[#allocation3 + $0x3d48] ss:$16 sps:$4 sm:$0xff]   ;;  %v21680_v47 = vld [vmem:[#allocation3 + $0x40ac] ss:$16 sps:$4 sm:$0xff]  }
 0x83d   : > { %15759 = vmatprep.subr.bf16.mxu1 %v21630_v52  ;;  %v13929_v52 = vadd.f32 %v23280_v49, %v13886_v30  ;;  %v21675_v22 = vld [vmem:[#allocation3 + $0x3fa8] ss:$16 sps:$4 sm:$0xff]   ;;  %v21683_v49 = vld [vmem:[#allocation3 + $0x3f8c] ss:$16 sps:$4 sm:$0xff]  }
 0x83e   : > { %v13976_v31 = vadd.f32 %v23281_v10, %v13933_v46  ;;  %v21678_v46 = vld [vmem:[#allocation3 + $0x40a8] ss:$16 sps:$4 sm:$0xff]  }
 0x83f   : > { %15789 = vmatpush1.bf16.msra.mxu0 %v21631_v55  ;;  %v21681_v10 = vld [vmem:[#allocation3 + $0x3f88] ss:$16 sps:$4 sm:$0xff]  }
 0x840   : > { %15760 = vmatpush2.bf16.msra.mxu1 %v21628_v56  ;;  %15790 = vmatprep.subr.bf16.mxu0 %v21639_v2  ;;  %v23282_v56 = vld [vmem:[#allocation77_spill] sm:$0xff] }
 0x841   : > { %15761 = vmatprep.subr.bf16.mxu1 %v21636_v44  ;;  %v13972_v55 = vadd.f32 %v23282_v56, %v13929_v52  ;;  %v23283_v44 = vld [vmem:[#allocation82_spill] sm:$0xff] }
 0x842   : > { %v14019_v2 = vadd.f32 %v23283_v44, %v13976_v31  ;;  %v21686_v52 = vld [vmem:[#allocation3 + $0x408c] ss:$16 sps:$4 sm:$0xff]   ;;  %v21684_v31 = vld [vmem:[#allocation3 + $0x4088] ss:$16 sps:$4 sm:$0xff]  }
 0x843   : > { %15791 = vmatpush1.bf16.msra.mxu0 %v21637_v12  ;;  %v14015_v26 = vadd.f32 %v23284_v16, %v13972_v55  ;;  %v23285_v12 = vld [vmem:[#allocation84_spill] sm:$0xff] }
 0x844   : > { %15762 = vmatpush2.bf16.msra.mxu1 %v21634_v43  ;;  %15792 = vmatprep.subr.bf16.mxu0 %v21645_v34  ;;  %v2622_v43 = vld [vmem:[#allocation3 + $0x40c8] sm:$0x33] }
 0x845   : > { %15763 = vmatprep.subr.bf16.mxu1 %v21642_v60  ;;  %v14062_v60 = vadd.f32 %v23285_v12, %v14019_v2  ;;  %v21664_v34 = vld [vmem:[#allocation3 + $0x3d08] ss:$16 sps:$4 sm:$0xff]   ;;  %v18449_v11 = vcombine.high %v2622_v43, %v2622_v43  ;;  %v18448_v27 = vcombine.low %v2622_v43, %v2622_v43  ;;  %v14058_v51 = vadd.f32 %v23286_v28, %v14015_v26  ;;  %v21692_v56 = vld [vmem:[#allocation3 + $0x406c] ss:$16 sps:$4 sm:$0xff]  }
 0x846   : > { %v21704_v43 = vld [vmem:[#allocation3 + $0x402c] ss:$16 sps:$4 sm:$0xff]   ;;  %v21708_v28 = vld [vmem:[#allocation3 + $0x4008] ss:$16 sps:$4 sm:$0xff]  }
 0x847   : > { %15793 = vmatpush1.bf16.msra.mxu0 %v21643_v21  ;;  %v13027_v14 = vsel %vm13019_vm0, %v18448_v27, 0 }
 0x848   : > { %15764 = vmatpush2.bf16.msra.mxu1 %v21640_v24  ;;  %15794 = vmatprep.subr.bf16.mxu0 %v21651_v5  ;;  %v23287_v24 = vld [vmem:[#allocation86_spill] sm:$0xff] }
 0x849   : > { %15765 = vmatprep.subr.bf16.mxu1 %v21648_v23  ;;  %v14105_v21 = vadd.f32 %v23287_v24, %v14062_v60  ;;  %v23288_v23 = vld [vmem:[#allocation83_spill] sm:$0xff] }
 0x84a   : > { %v14101_v5 = vadd.f32 %v23288_v23, %v14058_v51 }
 0x84b   : > { %15795 = vmatpush1.bf16.msra.mxu0 %v21649_v35 }
 0x84c   : > { %15766 = vmatpush2.bf16.msra.mxu1 %v21646_v6  ;;  %15796 = vmatprep.subr.bf16.mxu0 %v21657_v59  ;;  %v23289_v6 = vld [vmem:[#allocation88_spill] sm:$0xff]  ;;  %v23291_v59 = vld [vmem:[#allocation85_spill] sm:$0xff] }
 0x84d   : > { %15767 = vmatprep.subr.bf16.mxu1 %v21654_v25  ;;  %v14148_v35 = vadd.f32 %v23289_v6, %v14105_v21  ;;  %v23290_v25 = vld [vmem:[#allocation67_spill] sm:$0xff]  ;;  %v14144_v48 = vadd.f32 %v23291_v59, %v14101_v5  ;;  %v21711_v21 = vld [vmem:[#allocation7 + $0x78] sm:$0xff]  }
 0x84e   : > { %v23294_v6 = vld [vmem:[#allocation68_spill] sm:$0xff]  ;;  %v21715_v59 = vld [vmem:[#allocation7 + $0x68] sm:$0xff]  }
 0x84f   : > { %15797 = vmatpush1.bf16.msra.mxu0 %v21655_v17  ;;  %v14191_v30 = vadd.f32 %v22601_v45, %v14148_v35  ;;  %v21689_v45 = vld [vmem:[#allocation3 + $0x3f6c] ss:$16 sps:$4 sm:$0xff]   ;;  %v23295_v35 = vld [vmem:[#allocation69_spill] sm:$0xff] }
 0x850   : > { %15768 = vmatpush2.bf16.msra.mxu1 %v21652_v8  ;;  %15798 = vmatprep.subr.bf16.mxu0 %v21663_v3  ;;  %v23292_v8 = vld [vmem:[#allocation87_spill] sm:$0xff] }
 0x851   : > { %15769 = vmatprep.subr.bf16.mxu1 %v21660_v57  ;;  %v14187_v17 = vadd.f32 %v23292_v8, %v14144_v48  ;;  %v23293_v57 = vmov 0   ;;  %v14234_v3 = vadd.f32 %v22614_v19, %v14191_v30  ;;  %v21695_v19 = vld [vmem:[#allocation3 + $0x3f4c] ss:$16 sps:$4 sm:$0xff]   ;;  %v21718_v8 = vld [vmem:[#allocation7 + $0x20] sm:$0xff]  }
 0x853   : > { %15799 = vmatpush1.bf16.msra.mxu0 %v21661_v38  ;;  %v14230_v55 = vadd.f32 %v22599_v33, %v14187_v17  ;;  %v14277_v44 = vadd.f32 %v22622_v32, %v14234_v3  ;;  %v21690_v38 = vld [vmem:[#allocation3 + $0x4068] ss:$16 sps:$4 sm:$0xff]   ;;  %v21719_v3 = vld [vmem:[#allocation7 + $0x58] sm:$0xff]  }
 0x854   : > { %15770 = vmatpush2.bf16.msra.mxu1 %v21658_v41  ;;  %15800 = vmatprep.subr.bf16.mxu0 %v21669_v15  ;;  %v21687_v41 = vld [vmem:[#allocation3 + $0x3f68] ss:$16 sps:$4 sm:$0xff]  }
 0x855   : > { %15771 = vmatprep.subr.bf16.mxu1 %v21666_v9  ;;  %v14273_v2 = vadd.f32 %v22611_v18, %v14230_v55  ;;  %v21698_v9 = vld [vmem:[#allocation3 + $0x404c] ss:$16 sps:$4 sm:$0xff]   ;;  %v14320_v15 = vadd.f32 %v22631_v36, %v14277_v44  ;;  %v21693_v33 = vld [vmem:[#allocation3 + $0x3f48] ss:$16 sps:$4 sm:$0xff]  }
 0x856   : > { %v21696_v32 = vld [vmem:[#allocation3 + $0x4048] ss:$16 sps:$4 sm:$0xff]   ;;  %v21701_v18 = vld [vmem:[#allocation3 + $0x3f2c] ss:$16 sps:$4 sm:$0xff]  }
 0x857   : > { %15801 = vmatpush2.bf16.msra.mxu0 %v21667_v7  ;;  %v14316_v16 = vadd.f32 %v22620_v42, %v14273_v2  ;;  %v14363_v26 = vadd.f32 %v22635_v0, %v14320_v15  ;;  %v21702_v36 = vld [vmem:[#allocation3 + $0x4028] ss:$16 sps:$4 sm:$0xff]   ;;  %v22781_v7 = vpop.f32.mrf.mxu0  ;;  %v22783_v42 = vpop.f32.mrf.mxu1  ;;  %v21707_v0 = vld [vmem:[#allocation3 + $0x3f0c] ss:$16 sps:$4 sm:$0xff]  }
 0x858   : > { %15772 = vmatpush2.bf16.msra.mxu1 %v21664_v34  ;;  %15802 = vmatprep.subr.bf16.mxu0 %v21672_v54  ;;  %v21699_v34 = vld [vmem:[#allocation3 + $0x3f28] ss:$16 sps:$4 sm:$0xff]   ;;  %v21710_v54 = vld [vmem:[#allocation3 + $0x400c] ss:$16 sps:$4 sm:$0xff]  }
 0x859   : > { %18452 = vmatprep.subr.msk.bf16.mxu1 %vm13019_vm0, %v18449_v11  ;;  %v14359_v12 = vadd.f32 %v22628_v40, %v14316_v16  ;;  %v14406_v60 = vadd.f32 %v22646_v29, %v14363_v26  ;;  %v21705_v29 = vld [vmem:[#allocation3 + $0x3f08] ss:$16 sps:$4 sm:$0xff]   ;;  %v22788_v51 = vpop.f32.mrf.mxu0  ;;  %v22790_v24 = vpop.f32.mrf.mxu1 }
 0x85a   : > { %v21722_v55 = vld [vmem:[#allocation7 + $0x10] sm:$0xff]   ;;  %v21725_v15 = vld [vmem:[#allocation7 + $0x40] sm:$0xff]  }
 0x85b   : > { %15774 = vmatmul.mubr.bf16.vlgmr.msra.gmra.mxu1 %v23290_v25  ;;  %15803 = vmatpush2.bf16.msra.mxu0 %v21670_v37  ;;  %v14402_v11 = vadd.f32 %v22633_v62, %v14359_v12  ;;  %v14449_v27 = vadd.f32 %v22653_v50, %v14406_v60  ;;  %v22792_v5 = vpop.f32.mrf.mxu0  ;;  %v22794_v37 = vpop.f32.mrf.mxu1  ;;  %v21713_v50 = vld [vmem:[#allocation7 + $0x70] sm:$0xff]  }
 0x85c   : > { %15830 = vmatpush1.bf16.msra.mxu1 %v13027_v14  ;;  %15804 = vmatprep.subr.bf16.mxu0 %v21677_v20  ;;  %v21714_v25 = vld [vmem:[#allocation7 + $0x30] sm:$0xff]  }
 0x85d   : > { %15831 = vmatprep.subr.bf16.mxu1 %v21680_v47  ;;  %15859 = vmatprep.mubr.bf16.mxu1 %v23293_v57  ;;  %v14445_v40 = vadd.f32 %v22638_v61, %v14402_v11  ;;  %v15875_v23 = vmax.f32 %v14449_v27, 0.0  ;;  %v21712_v61 = vld [vmem:[#allocation7 + $0x38] sm:$0xff]   ;;  %v22796_v20 = vpop.f32.mrf.mxu0  ;;  %v22798_v47 = vpop.f32.mrf.mxu1 }
 0x85e   : > { %v21727_v27 = vld [vmem:[#allocation7 + $0xf8] sm:$0xff]  }
 0x85f   : > { %15805 = vmatpush2.bf16.msra.mxu0 %v21675_v22  ;;  %v15871_v62 = vmax.f32 %v14445_v40, 0.0  ;;  %v22803_v48 = vpop.f32.mrf.mxu0  ;;  %v22805_v30 = vpop.f32.mrf.mxu1  ;;  %v21716_v22 = vld [vmem:[#allocation7 + $0x28] sm:$0xff]   ;;  %v21728_v40 = vld [vmem:[#allocation7 + $0xb8] sm:$0xff]  }
 0x860   : > { %15832 = vmatpush1.bf16.msra.mxu1 %v21678_v46  ;;  %15806 = vmatprep.subr.bf16.mxu0 %v21683_v49  ;;  %v21717_v46 = vld [vmem:[#allocation7 + $0x60] sm:$0xff]  }
 0x861   : > { %15833 = vmatprep.subr.bf16.mxu1 %v21686_v52  ;;  %v15879_v14 = vpack.c.bf16 %v15875_v23, %v15871_v62  ;;  %v22807_v49 = vpop.f32.mrf.mxu0  ;;  %v22809_v52 = vpop.f32.mrf.mxu1  ;;  %v21731_v23 = vld [vmem:[#allocation7 + $0xe8] sm:$0xff]  }
 0x863   : > { %15807 = vmatpush2.bf16.msra.mxu0 %v21681_v10  ;;  %v22811_v17 = vpop.f32.mrf.mxu0  ;;  %v22813_v57 = vpop.f32.mrf.mxu1  ;;  %v21720_v10 = vld [vmem:[#allocation7 + $0x18] sm:$0xff]  }
 0x864   : > { %15834 = vmatpush1.bf16.msra.mxu1 %v21684_v31  ;;  %15808 = vmatprep.subr.bf16.mxu0 %v21689_v45 }
 0x865   : > { %15835 = vmatprep.subr.bf16.mxu1 %v21692_v56  ;;  %v22815_v31 = vpop.f32.mrf.mxu0  ;;  %v22817_v45 = vpop.f32.mrf.mxu1  ;;  %v21721_v56 = vld [vmem:[#allocation7 + $0x50] sm:$0xff]  }
 0x867   : > { %15809 = vmatpush2.bf16.msra.mxu0 %v21687_v41  ;;  %v22819_v44 = vpop.f32.mrf.mxu0  ;;  %v22821_v2 = vpop.f32.mrf.mxu1  ;;  %v21723_v41 = vld [vmem:[#allocation7 + $0x48] sm:$0xff]  }
 0x868   : > { %15836 = vmatpush1.bf16.msra.mxu1 %v21690_v38  ;;  %15810 = vmatprep.subr.bf16.mxu0 %v21695_v19  ;;  %v21724_v38 = vld [vmem:[#allocation7 + $0x8] sm:$0xff]  }
 0x869   : > { %15837 = vmatprep.subr.bf16.mxu1 %v21698_v9  ;;  %v22823_v19 = vpop.f32.mrf.mxu0  ;;  %v22825_v9 = vpop.f32.mrf.mxu1 }
 0x86b   : > { %15811 = vmatpush2.bf16.msra.mxu0 %v21693_v33  ;;  %v22827_v16 = vpop.f32.mrf.mxu0  ;;  %v22829_v26 = vpop.f32.mrf.mxu1  ;;  %v21726_v33 = vld [vmem:[#allocation7] sm:$0xff]  }
 0x86c   : > { %15838 = vmatpush1.bf16.msra.mxu1 %v21696_v32  ;;  %15812 = vmatprep.subr.bf16.mxu0 %v21701_v18 }
 0x86d   : > { %15839 = vmatprep.subr.bf16.mxu1 %v21704_v43  ;;  %v22831_v32 = vpop.f32.mrf.mxu0  ;;  %v22833_v18 = vpop.f32.mrf.mxu1 }
 0x86f   : > { %15813 = vmatpush2.bf16.msra.mxu0 %v21699_v34  ;;  %v22835_v43 = vpop.f32.mrf.mxu0  ;;  %v22837_v12 = vpop.f32.mrf.mxu1 }
 0x870   : > { %15840 = vmatpush1.bf16.msra.mxu1 %v21702_v36  ;;  %15814 = vmatprep.subr.bf16.mxu0 %v21707_v0 }
 0x871   : > { %15841 = vmatprep.subr.bf16.mxu1 %v21710_v54  ;;  %v22840_v60 = vpop.f32.mrf.mxu0  ;;  %v22842_v34 = vpop.f32.mrf.mxu1 }
 0x873   : > { %15815 = vmatpush2.bf16.msra.mxu0 %v21705_v29  ;;  %v22844_v36 = vpop.f32.mrf.mxu0  ;;  %v22846_v0 = vpop.f32.mrf.mxu1  ;;  %v21729_v29 = vld [vmem:[#allocation7 + $0xf0] sm:$0xff]  }
 0x874   : > { %15842 = vmatpush1.bf16.msra.mxu1 %v21708_v28  ;;  %18490 = vmatprep.subr.bf16.mxu0 %v21711_v21 }
 0x875   : > { %v22848_v54 = vpop.f32.mrf.mxu0  ;;  %v22850_v11 = vpop.f32.mrf.mxu1  ;;  %18512 = vmatprep.subr.bf16.mxu1 %v21727_v27 }
 0x876   : > { %15817 = vmatmul.mubr.bf16.vlgmr.msra.gmra.mxu0 %v23294_v6 }
 0x877   : > { %18453 = vmatmul.mubr.msk.bf16.vlgmr.msra.gmra.mxu1 %vm13015_vm1, %v23295_v35  ;;  %18491 = vmatpush3.bf16.msra.mxu0 %v21712_v61  ;;  %v22852_v28 = vpop.f32.mrf.mxu0  ;;  %v22854_v21 = vpop.f32.mrf.mxu1 }
 0x878   : > { %16177 = vmatprep.mubr.bf16.mxu0 %v15879_v14  ;;  %18492 = vmatprep.subr.bf16.mxu0 %v21713_v50  ;;  %v21732_v50 = vld [vmem:[#allocation7 + $0xa8] sm:$0xff]   ;;  %v21733_v14 = vld [vmem:[#allocation7 + $0xe0] sm:$0xff]  }
 0x879   : > { %18513 = vmatpush3.bf16.msra.mxu1 %v21728_v40  ;;  %v22856_v62 = vpop.f32.mrf.mxu0  ;;  %v22858_v61 = vpop.f32.mrf.mxu1 }
 0x87a   : > { %18514 = vmatprep.subr.bf16.mxu1 %v21729_v29  ;;  %v21739_v29 = vld [vmem:[#allocation7 + $0xc8] sm:$0xff]  }
 0x87b   : > { %18493 = vmatpush3.bf16.msra.mxu0 %v21714_v25  ;;  %v22860_v6 = vpop.f32.mrf.mxu0  ;;  %v22862_v35 = vpop.f32.mrf.mxu1  ;;  %v21734_v25 = vld [vmem:[#allocation7 + $0xa0] sm:$0xff]  }
 0x87c   : > { %18494 = vmatprep.subr.bf16.mxu0 %v21715_v59 }
 0x87d   : > { %v22864_v59 = vpop.f32.mrf.mxu0 }
 0x87f   : > { %18495 = vmatpush3.bf16.msra.mxu0 %v21716_v22  ;;  %v22866_v22 = vpop.f32.mrf.mxu1 }
 0x880   : > { %18496 = vmatprep.subr.bf16.mxu0 %v21717_v46  ;;  %v22868_v46 = vpop.f32.mrf.mxu0 }
 0x883   : > { %18497 = vmatpush3.bf16.msra.mxu0 %v21718_v8  ;;  %v22870_v8 = vpop.f32.mrf.mxu1 }
 0x884   : > { %18498 = vmatprep.subr.bf16.mxu0 %v21719_v3  ;;  %v21735_v3 = vld [vmem:[#allocation7 + $0xd8] sm:$0xff]  }
 0x887   : > { %18499 = vmatpush3.bf16.msra.mxu0 %v21720_v10  ;;  %v21736_v10 = vld [vmem:[#allocation7 + $0x98] sm:$0xff]  }
 0x888   : > { %18500 = vmatprep.subr.bf16.mxu0 %v21721_v56  ;;  %v22872_v56 = vpop.f32.mrf.mxu0 }
 0x88b   : > { %18501 = vmatpush3.bf16.msra.mxu0 %v21722_v55  ;;  %v22874_v55 = vpop.f32.mrf.mxu1 }
 0x88c   : > { %18502 = vmatprep.subr.bf16.mxu0 %v21723_v41  ;;  %v22876_v41 = vpop.f32.mrf.mxu0 }
 0x88e   : > { %v22880_v27 = vpop.f32.mrf.mxu0 }
 0x88f   : > { %18503 = vmatpush3.bf16.msra.mxu0 %v21724_v38  ;;  %v22878_v38 = vpop.f32.mrf.mxu1 }
 0x890   : > { %18504 = vmatprep.subr.bf16.mxu0 %v21725_v15  ;;  %v21737_v15 = vld [vmem:[#allocation7 + $0xd0] sm:$0xff]  }
 0x891   : > { %v22882_v40 = vpop.f32.mrf.mxu1 }
 0x892   : > { %23296 = vst [vmem:[#allocation36_spill] sm:$0xff] %v22882_v40 }
 0x893   : > { %18505 = vmatpush3.bf16.msra.mxu0 %v21726_v33  ;;  %v21738_v33 = vld [vmem:[#allocation7 + $0x90] sm:$0xff]  }
 0x896   : > { %16178 = vmatmul.mubr.bf16.vlgmr.msra.gmra.mxu0 %v22641_v13  ;;  %v21730_v13 = vld [vmem:[#allocation7 + $0xb0] sm:$0xff]  }
 0x897   : > { %18515 = vmatpush3.bf16.msra.mxu1 %v21730_v13  ;;  %v21740_v13 = vld [vmem:[#allocation7 + $0x88] sm:$0xff]  }
 0x898   : > { %18516 = vmatprep.subr.bf16.mxu1 %v21731_v23  ;;  %v22884_v23 = vpop.f32.mrf.mxu0 }
 0x899   : > { %23297 = vst [vmem:[#allocation33_spill] sm:$0xff] %v22884_v23 }
 0x89b   : > { %18517 = vmatpush3.bf16.msra.mxu1 %v21732_v50  ;;  %v22886_v50 = vpop.f32.mrf.mxu1 }
 0x89c   : > { %18518 = vmatprep.subr.bf16.mxu1 %v21733_v14  ;;  %23298 = vst [vmem:[#allocation37_spill] sm:$0xff] %v22886_v50  ;;  %v21741_v14 = vld [vmem:[#allocation7 + $0xc0] sm:$0xff]  }
 0x89f   : > { %18519 = vmatpush3.bf16.msra.mxu1 %v21734_v25  ;;  %v21742_v25 = vld [vmem:[#allocation7 + $0x80] sm:$0xff]  }
 0x8a0   : > { %18520 = vmatprep.subr.bf16.mxu1 %v21735_v3  ;;  %v22888_v3 = vpop.f32.mrf.mxu0 }
 0x8a1   : > { %23299 = vst [vmem:[#allocation40_spill] sm:$0xff] %v22888_v3 }
 0x8a3   : > { %18521 = vmatpush3.bf16.msra.mxu1 %v21736_v10  ;;  %v22890_v10 = vpop.f32.mrf.mxu1 }
 0x8a4   : > { %18522 = vmatprep.subr.bf16.mxu1 %v21737_v15  ;;  %23300 = vst [vmem:[#allocation44_spill] sm:$0xff] %v22890_v10  ;;  %v22892_v15 = vpop.f32.mrf.mxu0 }
 0x8a5   : > { %23301 = vst [vmem:[#allocation41_spill] sm:$0xff] %v22892_v15 }
 0x8a6   : > { %v22896_v40 = vpop.f32.mrf.mxu0 }
 0x8a7   : > { %18523 = vmatpush3.bf16.msra.mxu1 %v21738_v33  ;;  %v22894_v33 = vpop.f32.mrf.mxu1  ;;  %23303 = vst [vmem:[#allocation48_spill] sm:$0xff] %v22896_v40 }
 0x8a8   : > { %18524 = vmatprep.subr.bf16.mxu1 %v21739_v29  ;;  %23302 = vst [vmem:[#allocation45_spill] sm:$0xff] %v22894_v33 }
 0x8a9   : > { %v22898_v29 = vpop.f32.mrf.mxu1 }
 0x8aa   : > { %23304 = vst [vmem:[#allocation51_spill] sm:$0xff] %v22898_v29 }
 0x8ab   : > { %18525 = vmatpush3.bf16.msra.mxu1 %v21740_v13  ;;  %v22900_v13 = vpop.f32.mrf.mxu0  ;;  %v22902_v23 = vpop.f32.mrf.mxu1 }
 0x8ac   : > { %18526 = vmatprep.subr.bf16.mxu1 %v21741_v14  ;;  %23305 = vst [vmem:[#allocation49_spill] sm:$0xff] %v22900_v13  ;;  %23306 = vst [vmem:[#allocation52_spill] sm:$0xff] %v22902_v23 }
 0x8ad   : > { %v22904_v50 = vpop.f32.mrf.mxu0  ;;  %v22906_v14 = vpop.f32.mrf.mxu1 }
 0x8ae   : > { %23307 = vst [vmem:[#allocation55_spill] sm:$0xff] %v22904_v50  ;;  %23308 = vst [vmem:[#allocation58_spill] sm:$0xff] %v22906_v14 }
 0x8af   : > { %18527 = vmatpush3.bf16.msra.mxu1 %v21742_v25  ;;  %v22908_v25 = vpop.f32.mrf.mxu0  ;;  %v22910_v3 = vpop.f32.mrf.mxu1 }
 0x8b0   : > { %23309 = vst [vmem:[#allocation56_spill] sm:$0xff] %v22908_v25  ;;  %23310 = vst [vmem:[#allocation59_spill] sm:$0xff] %v22910_v3 }
 0x8b1   : > { %v22912_v10 = vpop.f32.mrf.mxu0  ;;  %v22914_v15 = vpop.f32.mrf.mxu1 }
 0x8b2   : > { %23311 = vst [vmem:[#allocation60_spill] sm:$0xff] %v22912_v10  ;;  %23312 = vst [vmem:[#allocation62_spill] sm:$0xff] %v22914_v15 }
 0x8b3   : > { %v22916_v33 = vpop.f32.mrf.mxu0  ;;  %v22918_v40 = vpop.f32.mrf.mxu1 }
 0x8b4   : > { %23313 = vst [vmem:[#allocation61_spill] sm:$0xff] %v22916_v33  ;;  %23314 = vst [vmem:[#allocation63_spill] sm:$0xff] %v22918_v40 }
 0x8b5   : > { %v22920_v29 = vpop.f32.mrf.mxu0  ;;  %v22922_v13 = vpop.f32.mrf.mxu1 }
 0x8b6   : > { %23315 = vst [vmem:[#allocation14_spill] sm:$0xff] %v22920_v29  ;;  %23316 = vst [vmem:[#allocation15_spill] sm:$0xff] %v22922_v13 }
 0x8b7   : > { %v22924_v23 = vpop.f32.mrf.mxu0  ;;  %v22926_v50 = vpop.f32.mrf.mxu1 }
 0x8b8   : > { %23317 = vst [vmem:[#allocation16_spill] sm:$0xff] %v22924_v23  ;;  %23318 = vst [vmem:[#allocation17_spill] sm:$0xff] %v22926_v50 }
 0x8b9   : > { %v22928_v14 = vpop.f32.mrf.mxu0  ;;  %v22930_v25 = vpop.f32.mrf.mxu1 }
 0x8ba   : > { %23319 = vst [vmem:[#allocation18_spill] sm:$0xff] %v22928_v14  ;;  %23320 = vst [vmem:[#allocation21_spill] sm:$0xff] %v22930_v25 }
 0x8bb   : > { %v22932_v3 = vpop.f32.mrf.mxu0  ;;  %v22934_v10 = vpop.f32.mrf.mxu1 }
 0x8bc   : > { %23321 = vst [vmem:[#allocation22_spill] sm:$0xff] %v22932_v3  ;;  %23322 = vst [vmem:[#allocation65_spill] sm:$0xff] %v22934_v10  ;;  %v14490_v10 = vadd.f32 %v22663_v53, %v22649_v39 }
 0x8bd   : > { %v22936_v15 = vpop.f32.mrf.mxu0  ;;  %v22938_v33 = vpop.f32.mrf.mxu1 }
 0x8be   : > { %23323 = vst [vmem:[#allocation20_spill] sm:$0xff] %v22936_v15  ;;  %23324 = vst [vmem:[#allocation19_spill] sm:$0xff] %v22938_v33 }
 0x8bf   : > { %v22940_v40 = vpop.f32.mrf.mxu0  ;;  %v22942_v29 = vpop.f32.mrf.mxu1 }
 0x8c0   : > { %23325 = vst [vmem:[#allocation25_spill] sm:$0xff] %v22942_v29  ;;  %v14492_v29 = vadd.f32 %v22665_v1, %v22651_v63 }
 0x8c1   : > { %v22944_v13 = vpop.f32.mrf.mxu0  ;;  %v22946_v23 = vpop.f32.mrf.mxu1 }
 0x8c2   : > { %23326 = vst [vmem:[#allocation23_spill] sm:$0xff] %v22946_v23  ;;  %v14533_v23 = vadd.f32 %v22781_v7, %v14490_v10 }
 0x8c3   : > { %v22948_v50 = vpop.f32.mrf.mxu0  ;;  %v22950_v14 = vpop.f32.mrf.mxu1 }
 0x8c4   : > { %23327 = vst [vmem:[#allocation26_spill] sm:$0xff] %v22948_v50  ;;  %23328 = vst [vmem:[#allocation24_spill] sm:$0xff] %v22950_v14  ;;  %v14615_v50 = vadd.f32 %v22792_v5, %v22669_v58  ;;  %v14535_v14 = vadd.f32 %v22788_v51, %v14492_v29 }
 0x8c5   : > { %v22952_v25 = vpop.f32.mrf.mxu0  ;;  %v22954_v3 = vpop.f32.mrf.mxu1 }
 0x8c6   : > { %23329 = vst [vmem:[#allocation29_spill] sm:$0xff] %v22952_v25  ;;  %23330 = vst [vmem:[#allocation27_spill] sm:$0xff] %v22954_v3  ;;  %v14576_v25 = vadd.f32 %v22783_v42, %v14533_v23  ;;  %v14617_v3 = vadd.f32 %v22796_v20, %v22672_v4  ;;  %v14658_v39 = vadd.f32 %v22794_v37, %v14615_v50 }
 0x8c7   : > { %v22958_v33 = vpop.f32.mrf.mxu0  ;;  %v22960_v15 = vpop.f32.mrf.mxu1  ;;  %v14578_v63 = vadd.f32 %v22790_v24, %v14535_v14 }
 0x8c8   : > { %23331 = vst [vmem:[#allocation30_spill] sm:$0xff] %v22960_v15  ;;  %v14619_v1 = vadd.f32 %v22803_v48, %v14576_v25  ;;  %v14660_v7 = vadd.f32 %v22798_v47, %v14617_v3  ;;  %v14701_v58 = vadd.f32 %v22811_v17, %v14658_v39 }
 0x8c9   : > { %v22972_v53 = vpop.f32.mrf.mxu0  ;;  %v22974_v15 = vpop.f32.mrf.mxu1  ;;  %v14621_v51 = vadd.f32 %v22807_v49, %v14578_v63  ;;  %v23332_v63 = vld [vmem:[#allocation33_spill] sm:$0xff] }
 0x8ca   : > { %v14662_v42 = vadd.f32 %v22805_v30, %v14619_v1  ;;  %v14703_v4 = vadd.f32 %v22815_v31, %v14660_v7  ;;  %v14744_v5 = vadd.f32 %v22813_v57, %v14701_v58  ;;  %v23333_v1 = vld [vmem:[#allocation36_spill] sm:$0xff]  ;;  %v23334_v7 = vld [vmem:[#allocation41_spill] sm:$0xff] }
 0x8cb   : > { %v22984_v37 = vpop.f32.mrf.mxu0  ;;  %v22986_v20 = vpop.f32.mrf.mxu1  ;;  %v14664_v24 = vadd.f32 %v22809_v52, %v14621_v51 }
 0x8cc   : > { %v14705_v48 = vadd.f32 %v22819_v44, %v14662_v42  ;;  %v14746_v47 = vadd.f32 %v22817_v45, %v14703_v4  ;;  %v14787_v17 = vadd.f32 %v22827_v16, %v14744_v5  ;;  %v23335_v42 = vld [vmem:[#allocation40_spill] sm:$0xff]  ;;  %v23336_v4 = vld [vmem:[#allocation37_spill] sm:$0xff] }
 0x8cd   : > { %v14707_v49 = vadd.f32 %v22823_v19, %v14664_v24  ;;  %v22996_v23 = vpop.f32.mrf.mxu0  ;;  %v22998_v50 = vpop.f32.mrf.mxu1  ;;  %v23337_v5 = vld [vmem:[#allocation48_spill] sm:$0xff]  ;;  %v23338_v24 = vld [vmem:[#allocation45_spill] sm:$0xff] }
 0x8ce   : > { %v14748_v30 = vadd.f32 %v22821_v2, %v14705_v48  ;;  %v14789_v31 = vadd.f32 %v22831_v32, %v14746_v47  ;;  %v14830_v57 = vadd.f32 %v22829_v26, %v14787_v17  ;;  %v23339_v47 = vld [vmem:[#allocation44_spill] sm:$0xff] }
 0x8cf   : > { %v14750_v52 = vadd.f32 %v22825_v9, %v14707_v49  ;;  %v23004_v3 = vpop.f32.mrf.mxu0  ;;  %v23006_v19 = vpop.f32.mrf.mxu1  ;;  %v23340_v49 = vld [vmem:[#allocation49_spill] sm:$0xff] }
 0x8d0   : > { %v14791_v44 = vadd.f32 %v22835_v43, %v14748_v30  ;;  %v14832_v45 = vadd.f32 %v22833_v18, %v14789_v31  ;;  %v14873_v16 = vadd.f32 %v22844_v36, %v14830_v57  ;;  %v23341_v31 = vld [vmem:[#allocation51_spill] sm:$0xff] }
 0x8d1   : > { %v14793_v2 = vadd.f32 %v22840_v60, %v14750_v52  ;;  %v23016_v29 = vpop.f32.mrf.mxu0  ;;  %v23018_v14 = vpop.f32.mrf.mxu1  ;;  %v23342_v52 = vld [vmem:[#allocation56_spill] sm:$0xff] }
 0x8d2   : > { %v14834_v26 = vadd.f32 %v22837_v12, %v14791_v44  ;;  %v14875_v32 = vadd.f32 %v22848_v54, %v14832_v45  ;;  %v14916_v10 = vadd.f32 %v22846_v0, %v14873_v16  ;;  %v23343_v45 = vld [vmem:[#allocation55_spill] sm:$0xff] }
 0x8d3   : > { %v14836_v9 = vadd.f32 %v22842_v34, %v14793_v2  ;;  %v23028_v25 = vpop.f32.mrf.mxu0  ;;  %v23030_v39 = vpop.f32.mrf.mxu1  ;;  %v23344_v2 = vld [vmem:[#allocation52_spill] sm:$0xff] }
 0x8d4   : > { %v14877_v43 = vadd.f32 %v22852_v28, %v14834_v26  ;;  %v14918_v18 = vadd.f32 %v22850_v11, %v14875_v32  ;;  %v14959_v36 = vadd.f32 %v22860_v6, %v14916_v10  ;;  %v23345_v32 = vld [vmem:[#allocation60_spill] sm:$0xff] }
 0x8d5   : > { %v14879_v60 = vadd.f32 %v22856_v62, %v14836_v9  ;;  %v23040_v58 = vpop.f32.mrf.mxu0  ;;  %v23042_v51 = vpop.f32.mrf.mxu1  ;;  %v23346_v9 = vld [vmem:[#allocation59_spill] sm:$0xff] }
 0x8d6   : > { %v14920_v12 = vadd.f32 %v22854_v21, %v14877_v43  ;;  %v14961_v54 = vadd.f32 %v22864_v59, %v14918_v18  ;;  %v15002_v0 = vadd.f32 %v22862_v35, %v14959_v36 }
 0x8d7   : > { %v14922_v34 = vadd.f32 %v22858_v61, %v14879_v60  ;;  %v15646_v48 = vpop.f32.mrf.mxu0  ;;  %v23347_v60 = vld [vmem:[#allocation58_spill] sm:$0xff] }
 0x8d8   : > { %v14963_v28 = vadd.f32 %v22868_v46, %v14920_v12  ;;  %v15004_v11 = vadd.f32 %v22866_v22, %v14961_v54  ;;  %v15045_v6 = vadd.f32 %v22876_v41, %v15002_v0  ;;  %v23348_v54 = vld [vmem:[#allocation61_spill] sm:$0xff] }
 0x8d9   : > { %v14965_v62 = vadd.f32 %v22872_v56, %v14922_v34  ;;  %v15648_v18 = vpop.f32.mrf.mxu0  ;;  %v23349_v34 = vld [vmem:[#allocation62_spill] sm:$0xff] }
 0x8da   : > { %v15006_v21 = vadd.f32 %v22870_v8, %v14963_v28  ;;  %v15047_v59 = vadd.f32 %v22880_v27, %v15004_v11  ;;  %v15088_v35 = vadd.f32 %v22878_v38, %v15045_v6  ;;  %v23350_v11 = vld [vmem:[#allocation16_spill] sm:$0xff] }
 0x8db   : > { %v15008_v61 = vadd.f32 %v22874_v55, %v14965_v62  ;;  %v15689_v55 = vpop.f32.mrf.mxu1  ;;  %v23351_v62 = vld [vmem:[#allocation14_spill] sm:$0xff] }
 0x8dc   : > { %v15049_v46 = vadd.f32 %v23332_v63, %v15006_v21  ;;  %v15090_v22 = vadd.f32 %v23333_v1, %v15047_v59  ;;  %v15131_v41 = vadd.f32 %v23334_v7, %v15088_v35  ;;  %v23352_v59 = vld [vmem:[#allocation63_spill] sm:$0xff] }
 0x8dd   : > { %v15051_v56 = vadd.f32 %v23335_v42, %v15008_v61  ;;  %v15691_v36 = vpop.f32.mrf.mxu1  ;;  %v23353_v61 = vld [vmem:[#allocation18_spill] sm:$0xff] }
 0x8de   : > { %v15092_v8 = vadd.f32 %v23336_v4, %v15049_v46  ;;  %v15133_v27 = vadd.f32 %v23337_v5, %v15090_v22  ;;  %v15174_v38 = vadd.f32 %v23338_v24, %v15131_v41  ;;  %v23354_v46 = vld [vmem:[#allocation17_spill] sm:$0xff]  ;;  %v15650_v22 = vpop.f32.mrf.mxu0  ;;  %v23355_v41 = vld [vmem:[#allocation15_spill] sm:$0xff]  ;;  %v23358_v24 = vld [vmem:[#allocation20_spill] sm:$0xff] }
 0x8df   : > { %v15094_v17 = vadd.f32 %v23339_v47, %v15051_v56  ;;  %v15693_v7 = vpop.f32.mrf.mxu1  ;;  %v23356_v56 = vld [vmem:[#allocation22_spill] sm:$0xff]  ;;  %v23359_v47 = vld [vmem:[#allocation65_spill] sm:$0xff] }
 0x8e0   : > { %v15135_v30 = vadd.f32 %v23340_v49, %v15092_v8  ;;  %v15176_v57 = vadd.f32 %v23341_v31, %v15133_v27  ;;  %v15217_v44 = vadd.f32 %v23342_v52, %v15174_v38  ;;  %v23357_v8 = vld [vmem:[#allocation21_spill] sm:$0xff] }
 0x8e1   : > { %v15137_v16 = vadd.f32 %v23343_v45, %v15094_v17  ;;  %v15695_v52 = vpop.f32.mrf.mxu1 }
 0x8e2   : > { %v15178_v26 = vadd.f32 %v23344_v2, %v15135_v30  ;;  %v15219_v10 = vadd.f32 %v23345_v32, %v15176_v57  ;;  %v15260_v43 = vadd.f32 %v23346_v9, %v15217_v44  ;;  %v23360_v30 = vld [vmem:[#allocation25_spill] sm:$0xff]  ;;  %v15652_v57 = vpop.f32.mrf.mxu0  ;;  %v23361_v44 = vld [vmem:[#allocation19_spill] sm:$0xff] }
 0x8e3   : > { %v15180_v12 = vadd.f32 %v23347_v60, %v15137_v16  ;;  %v23362_v16 = vld [vmem:[#allocation26_spill] sm:$0xff] }
 0x8e4   : > { %v15221_v0 = vadd.f32 %v23348_v54, %v15178_v26  ;;  %v15262_v28 = vadd.f32 %v23349_v34, %v15219_v10  ;;  %v15303_v6 = vadd.f32 %v23350_v11, %v15260_v43  ;;  %v23363_v26 = vld [vmem:[#allocation23_spill] sm:$0xff]  ;;  %v23364_v43 = vld [vmem:[#allocation29_spill] sm:$0xff] }
 0x8e5   : > { %v15223_v21 = vadd.f32 %v23351_v62, %v15180_v12  ;;  %v23365_v12 = vld [vmem:[#allocation24_spill] sm:$0xff] }
 0x8e6   : > { %v15264_v35 = vadd.f32 %v23352_v59, %v15221_v0  ;;  %v15305_v63 = vadd.f32 %v23353_v61, %v15262_v28  ;;  %v15346_v1 = vadd.f32 %v23354_v46, %v15303_v6  ;;  %v23366_v0 = vld [vmem:[#allocation30_spill] sm:$0xff]  ;;  %v23367_v28 = vld [vmem:[#allocation27_spill] sm:$0xff] }
 0x8e7   : > { %v15266_v42 = vadd.f32 %v23355_v41, %v15223_v21 }
 0x8e8   : > { %v15307_v4 = vadd.f32 %v23356_v56, %v15264_v35  ;;  %v15348_v5 = vadd.f32 %v23357_v8, %v15305_v63  ;;  %v15389_v27 = vadd.f32 %v22940_v40, %v15346_v1 }
 0x8e9   : > { %v15309_v38 = vadd.f32 %v23358_v24, %v15266_v42 }
 0x8ea   : > { %v15350_v17 = vadd.f32 %v23359_v47, %v15307_v4  ;;  %v15391_v49 = vadd.f32 %v22944_v13, %v15348_v5  ;;  %v15432_v31 = vadd.f32 %v23360_v30, %v15389_v27 }
 0x8eb   : > { %v15352_v45 = vadd.f32 %v23361_v44, %v15309_v38 }
 0x8ec   : > { %v15393_v2 = vadd.f32 %v23362_v16, %v15350_v17  ;;  %v15434_v32 = vadd.f32 %v23363_v26, %v15391_v49  ;;  %v15475_v10 = vadd.f32 %v22958_v33, %v15432_v31 }
 0x8ed   : > { %v15395_v60 = vadd.f32 %v23364_v43, %v15352_v45 }
 0x8ee   : > { %v15436_v54 = vadd.f32 %v23365_v12, %v15393_v2  ;;  %v15477_v13 = vadd.f32 %v22972_v53, %v15434_v32  ;;  %v15518_v34 = vadd.f32 %v23366_v0, %v15475_v10 }
 0x8ef   : > { %v15438_v11 = vadd.f32 %v23367_v28, %v15395_v60 }
 0x8f0   : > { %v15479_v6 = vadd.f32 %v22984_v37, %v15436_v54  ;;  %v15520_v62 = vadd.f32 %v22974_v15, %v15477_v13  ;;  %v15561_v21 = vadd.f32 %v23004_v3, %v15518_v34  ;;  %v18454_v34 = vld [vmem:[#allocation8] ss:$0 sm:$0xff] }
 0x8f1   : > { %v15481_v35 = vadd.f32 %v22996_v23, %v15438_v11 }
 0x8f2   : > { %v15522_v61 = vadd.f32 %v22986_v20, %v15479_v6  ;;  %v15563_v63 = vadd.f32 %v23016_v29, %v15520_v62  ;;  %v15604_v53 = vadd.f32 %v23006_v19, %v15561_v21 }
 0x8f3   : > { %v15524_v46 = vadd.f32 %v22998_v50, %v15481_v35 }
 0x8f4   : > { %v15565_v1 = vadd.f32 %v23028_v25, %v15522_v61  ;;  %v15606_v37 = vadd.f32 %v23018_v14, %v15563_v63  ;;  %v15647_v41 = vadd.f32 %v15646_v48, %v15604_v53  ;;  %v18487_v63 = vld [vmem:[#allocation10] ss:$0 sm:$0xff] }
 0x8f5   : > { %v15567_v3 = vadd.f32 %v23040_v58, %v15524_v46 }
 0x8f6   : > { %v15732_v9 = vpop.f32.mrf.mxu0  ;;  %v15608_v56 = vadd.f32 %v23030_v39, %v15565_v1  ;;  %v15649_v23 = vadd.f32 %v15648_v18, %v15606_v37  ;;  %v15690_v4 = vadd.f32 %v15689_v55, %v15647_v41 }
 0x8f7   : > { %v15610_v20 = vadd.f32 %v23042_v51, %v15567_v3  ;;  %v16243_v3 = vstv %s16242_s15 }
 0x8f8   : > { %v15734_v59 = vpop.f32.mrf.mxu0  ;;  %v15651_v29 = vadd.f32 %v15650_v22, %v15608_v56  ;;  %v15692_v8 = vadd.f32 %v15691_v36, %v15649_v23  ;;  %v15733_v19 = vadd.f32 %v15732_v9, %v15690_v4 }
 0x8f9   : > { %v15653_v27 = vadd.f32 %v15652_v57, %v15610_v20 }
 0x8fa   : > { %v15736_v15 = vpop.f32.mrf.mxu0  ;;  %v15694_v25 = vadd.f32 %v15693_v7, %v15651_v29  ;;  %v15735_v24 = vadd.f32 %v15734_v59, %v15692_v8 }
 0x8fb   : > { %v15696_v47 = vadd.f32 %v15695_v52, %v15653_v27 }
 0x8fc   : > { %v15738_v5 = vpop.f32.mrf.mxu0  ;;  %v15737_v17 = vadd.f32 %v15736_v15, %v15694_v25 }
 0x8fd   : > { %v15739_v55 = vadd.f32 %v15738_v5, %v15696_v47 }
 0x91b   : > { %v15775_v40 = vpop.f32.mrf.mxu1 }
 0x91c   : > { %v15776_v14 = vadd.f32 %v15775_v40, %v15733_v19 }
 0x91d   : > { %v15777_v33 = vpop.f32.mrf.mxu1 }
 0x91e   : > { %v15778_v58 = vadd.f32 %v15777_v33, %v15735_v24 }
 0x91f   : > { %v15779_v42 = vpop.f32.mrf.mxu1 }
 0x920   : > { %v15780_v30 = vadd.f32 %v15779_v42, %v15737_v17 }
 0x921   : > { %v15781_v50 = vpop.f32.mrf.mxu1 }
 0x922   : > { %v15782_v31 = vadd.f32 %v15781_v50, %v15739_v55 }
 0x936   : > { %v15818_v48 = vpop.f32.mrf.mxu0 }
 0x937   : > { %v15861_v38 = vpop.f32.mrf.mxu1  ;;  %v15819_v49 = vadd.f32 %v15818_v48, %v15776_v14 }
 0x938   : > { %v15820_v39 = vpop.f32.mrf.mxu0 }
 0x939   : > { %v15863_v18 = vpop.f32.mrf.mxu1  ;;  %v15821_v51 = vadd.f32 %v15820_v39, %v15778_v58  ;;  %v15862_v44 = vadd.f32 %v15861_v38, %v15819_v49 }
 0x93a   : > { %v15822_v22 = vpop.f32.mrf.mxu0 }
 0x93b   : > { %v15865_v36 = vpop.f32.mrf.mxu1  ;;  %v15823_v45 = vadd.f32 %v15822_v22, %v15780_v30  ;;  %v15864_v7 = vadd.f32 %v15863_v18, %v15821_v51  ;;  %v15872_v32 = vmax.f32 %v15862_v44, 0.0 }
 0x93c   : > { %v15824_v57 = vpop.f32.mrf.mxu0 }
 0x93d   : > { %v15866_v16 = vadd.f32 %v15865_v36, %v15823_v45  ;;  %v15825_v2 = vadd.f32 %v15824_v57, %v15782_v31  ;;  %v15867_v26 = vpop.f32.mrf.mxu1  ;;  %v15873_v9 = vmax.f32 %v15864_v7, 0.0 }
 0x93f   : > { %v15876_v52 = vmax.f32 %v15866_v16, 0.0  ;;  %v15868_v10 = vadd.f32 %v15867_v26, %v15825_v2 }
 0x941   : > { %v15880_v40 = vpack.c.bf16 %v15876_v52, %v15872_v32  ;;  %v15877_v43 = vmax.f32 %v15868_v10, 0.0 }
 0x943   : > { %v15881_v60 = vpack.c.bf16 %v15877_v43, %v15873_v9 }
 0x945   : > { %16218 = vmatprep.mubr.bf16.mxu1 %v15881_v60 }
 0x946   : > { %16219 = vmatmul.mubr.bf16.vlgmr.msra.gmra.mxu1 %v15880_v40 }
 0x956   : > { %v18506_v12 = vpop.f32.mrf.mxu0 }
 0x958   : > { %v18507_v54 = vpop.f32.mrf.mxu0 }
 0x959   : > { %v18508_v0 = vadd.f32 %v18507_v54, %v18506_v12 }
 0x95a   : > { %v18509_v13 = vpop.f32.mrf.mxu0 }
 0x95b   : > { %v16180_v62 = vadd.f32 %v18508_v0, %v18454_v34 }
 0x95c   : > { %v18510_v28 = vpop.f32.mrf.mxu0 }
 0x95d   : > { %v18511_v21 = vadd.f32 %v18510_v28, %v18509_v13 }
 0x95f   : > { %v16183_v53 = vadd.f32 %v18511_v21, %v18454_v34 }
 0xa06   : > { %v18528_v11 = vpop.f32.mrf.mxu1 }
 0xa08   : > { %v18529_v6 = vpop.f32.mrf.mxu1 }
 0xa09   : > { %v18530_v59 = vadd.f32 %v18529_v6, %v18528_v11 }
 0xa0a   : > { %v18531_v33 = vpop.f32.mrf.mxu1 }
 0xa0b   : > { %v16221_v35 = vadd.f32 %v18530_v59, %v16180_v62 }
 0xa0c   : > { %v18532_v61 = vpop.f32.mrf.mxu1 }
 0xa0d   : > { %v18533_v46 = vadd.f32 %v18532_v61, %v18531_v33  ;;  %v16227_v1 = vmax.f32 %v16221_v35, 0.0 }
 0xa0f   : > { %v16224_v37 = vadd.f32 %v18533_v46, %v16183_v53  ;;  %v16236_v41 = vmul.f32 %v18487_v63, %v16227_v1 }
 0xa11   : > { %v16228_v15 = vmax.f32 %v16224_v37, 0.0  ;;  %16238 = vadd.xlane.f32.xlu0 %v16236_v41 }
 0xa13   : > { %v16237_v42 = vmul.f32 %v18487_v63, %v16228_v15 }
 0xa15   : > { %16240 = vadd.xlane.f32.xlu0 %v16237_v42 }
 0xa9a   : > { %v16239_v56 = vpop.xlane.xlu0 %16238 }
 0xa9b   : > { %v16244_v23 = vadd.f32 %v16243_v3, %v16239_v56 }
 0xa9d   : > { %16247 = vst.msk [vmem:[%s351_s25] sm:$0xff] %vm16246_vm2, %v16244_v23 }
 0xa9e   : > { %v16241_v4 = vpop.xlane.xlu0 %16240 }
 0xa9f   : > { %v16245_v20 = vadd.f32 %v16243_v3, %v16241_v4 }
 0xaa1   : > { %16248 = vst.msk [vmem:[%s351_s25 + $0x8] sm:$0xff] %vm16246_vm2, %v16245_v20 }
 0xaa2 PF: > { %s21_s26 = sadd.s32 1, %s21892_s26  }
 0xaa3   : > { %p18_p6 = scmp.ge.s32.totalorder %s21_s26, 4  }
 0xaa5   :  { %20 = sbr.rel (!%p18_p6) target bundleno = 5 (0x5), region = 99 }
 0xaaa   :  { %16271 = vsyncpa [#allocation4], 1 }
 0xaab   :  { %16273 = vsyncpa [#allocation4 + $0x1], 1 }
 0xaac   :  { %16274 = vsyncpa [#allocation6], 1 }
 0xaad   :  { %16275 = vsyncpa [#allocation9], 1 }

</bundles_post_ra>
